<compile_context>
chip_gen: v5e
topology: v5e:2x2
jax: 0.10.0
libtpu: 0.0.40
codegen_flags: <defaults>
</compile_context>

<pallas_src>
import jax
import jax.numpy as jnp
import numpy as np
from jax import lax
from jax.experimental import pallas as pl
from jax.experimental.pallas import tpu as pltpu


# ----------------------------------------------------------------------------
# Pallas kernel 1: conv-as-GEMM, fused  out = relu(x @ w + b)
# ----------------------------------------------------------------------------
def _gemm_bias_relu_kernel(x_ref, w_ref, b_ref, o_ref):
    acc = jnp.dot(x_ref[...], w_ref[...], preferred_element_type=jnp.float32)
    acc = jnp.maximum(acc + b_ref[...], 0.0)      # b is (1, N) f32, broadcast over M
    o_ref[...] = acc.astype(o_ref.dtype)


def pallas_gemm_bias_relu(a, w, b, *, out_dtype=jnp.bfloat16, tm_cap=512):
    """a: (M, K) bf16, w: (K, N) bf16, b: (1, N) f32 -> (M, N) out_dtype."""
    M, K = a.shape
    K2, N = w.shape
    assert K == K2
    if M <= tm_cap:
        tm = M                                    # single full block (exempt from 8|tm rule)
    else:
        n_tiles = pl.cdiv(M, tm_cap)              # even M split -> >=2 "parallel" tiles
        tm = ((pl.cdiv(M, n_tiles) + 7) // 8) * 8
    grid = (pl.cdiv(M, tm),)

    flops = 2 * M * K * N
    bytes_accessed = (a.size * a.dtype.itemsize + w.size * w.dtype.itemsize
                      + b.size * 4 + M * N * jnp.dtype(out_dtype).itemsize)

    return pl.pallas_call(
        _gemm_bias_relu_kernel,
        out_shape=jax.ShapeDtypeStruct((M, N), out_dtype),
        grid=grid,
        in_specs=[
            pl.BlockSpec((tm, K), lambda i: (i, 0)),
            pl.BlockSpec((K, N), lambda i: (0, 0)),
            pl.BlockSpec((1, N), lambda i: (0, 0)),
        ],
        out_specs=pl.BlockSpec((tm, N), lambda i: (i, 0)),
        compiler_params=pltpu.CompilerParams(dimension_semantics=("parallel",)),
        cost_estimate=pl.CostEstimate(flops=flops, transcendentals=0,
                                      bytes_accessed=int(bytes_accessed)),
    )(a, w, b)


# ----------------------------------------------------------------------------
# Pallas kernel 2: fused FC head  out = relu(a @ w4 + b4) @ w5 + b5
#   Single full-K / full-N block (w4 is only ~3.2 MB bf16 -> fits VMEM on all
#   generations, even v7x's 64 MiB).  No K tiling, no padding, no scratch, and
#   b5 is added in-kernel so the kernel emits the final (B, n_actions) output.
# ----------------------------------------------------------------------------
def _fc_head_kernel(a_ref, w4_ref, b4_ref, w5_ref, b5_ref, o_ref):
    h = jnp.dot(a_ref[...], w4_ref[...], preferred_element_type=jnp.float32)
    h = jnp.maximum(h + b4_ref[...], 0.0)                       # fc4 + ReLU (f32)
    out = jnp.dot(h, w5_ref[...], preferred_element_type=jnp.float32)
    o_ref[...] = out + b5_ref[...]                              # fc5 + bias, final f32


def pallas_fc_head(a, w4, b4, w5, b5):
    """a: (B, 3136) bf16, w4: (3136, 512) bf16, b4: (1, 512) f32,
       w5: (512, A) f32, b5: (1, A) f32  ->  (B, A) f32."""
    M, K = a.shape
    K2, N4 = w4.shape
    assert K == K2
    N5 = w5.shape[1]

    flops = 2 * M * K * N4 + 2 * M * N4 * N5
    bytes_accessed = (a.size * a.dtype.itemsize + w4.size * w4.dtype.itemsize
                      + (b4.size + w5.size + b5.size + M * N5) * 4)

    return pl.pallas_call(
        _fc_head_kernel,
        out_shape=jax.ShapeDtypeStruct((M, N5), jnp.float32),
        grid=(1,),
        in_specs=[
            pl.BlockSpec((M, K), lambda i: (0, 0)),
            pl.BlockSpec((K, N4), lambda i: (0, 0)),
            pl.BlockSpec((1, N4), lambda i: (0, 0)),
            pl.BlockSpec((N4, N5), lambda i: (0, 0)),
            pl.BlockSpec((1, N5), lambda i: (0, 0)),
        ],
        out_specs=pl.BlockSpec((M, N5), lambda i: (0, 0)),
        compiler_params=pltpu.CompilerParams(dimension_semantics=("arbitrary",)),
        cost_estimate=pl.CostEstimate(flops=flops, transcendentals=0,
                                      bytes_accessed=int(bytes_accessed)),
    )(a, w4, b4, w5, b5)


# ----------------------------------------------------------------------------
# Parameter preparation (one-time, outside jit): layout + dtype plumbing
# ----------------------------------------------------------------------------
def prepare_params(p):
    f32, bf16 = jnp.float32, jnp.bfloat16

    def conv_w(w):  # (Cout, Cin, kh, kw) OIHW -> (Cin*kh*kw, Cout) bf16
        co = w.shape[0]
        return jnp.asarray(w, f32).reshape(co, -1).T.astype(bf16)

    # fc4: permute columns from NCHW-flatten order (torch) to NHWC-flatten order,
    # then transpose to (K, N).  No K padding (full-block kernel).
    c3 = p["w3"].shape[0]                         # conv3 out channels (64)
    n4, kin = p["w4"].shape                       # (512, 3136)
    side = int(round((kin // c3) ** 0.5))         # 7
    assert side * side * c3 == kin
    w4 = jnp.asarray(p["w4"], f32).reshape(n4, c3, side, side)
    w4 = w4.transpose(0, 2, 3, 1).reshape(n4, kin).T.astype(bf16)   # (3136, 512)

    return {
        "w1": conv_w(p["w1"]), "b1": jnp.asarray(p["b1"], f32).reshape(1, -1),
        "w2": conv_w(p["w2"]), "b2": jnp.asarray(p["b2"], f32).reshape(1, -1),
        "w3": conv_w(p["w3"]), "b3": jnp.asarray(p["b3"], f32).reshape(1, -1),
        "w4": w4,              "b4": jnp.asarray(p["b4"], f32).reshape(1, -1),
        "w5": jnp.asarray(p["w5"], f32).T,        # (512, A) f32 (tiny; keep f32)
        "b5": jnp.asarray(p["b5"], f32).reshape(1, -1),
    }


# ----------------------------------------------------------------------------
# Full forward pass (matches PyTorch NeuralNetwork.forward)
# ----------------------------------------------------------------------------
def forward(x, p):
    bf16 = jnp.bfloat16
    B = x.shape[0]
    x = x.astype(bf16)                            # NCHW input, single cast

    # conv1 (+ReLU): NCHW in -> NHWC patches, feature order (cin, kh, kw)
    a = lax.conv_general_dilated_patches(
        x, (8, 8), (4, 4), "VALID",
        dimension_numbers=("NCHW", "HWIO", "NHWC")).astype(bf16)   # (B,20,20,256)
    h1, v1 = a.shape[1], a.shape[2]
    o = pallas_gemm_bias_relu(a.reshape(B * h1 * v1, -1), p["w1"], p["b1"])
    o = o.reshape(B, h1, v1, -1)                                    # (B,20,20,32)

    # conv2 (+ReLU)
    a = lax.conv_general_dilated_patches(
        o, (4, 4), (2, 2), "VALID",
        dimension_numbers=("NHWC", "HWIO", "NHWC")).astype(bf16)    # (B,9,9,512)
    h2, v2 = a.shape[1], a.shape[2]
    o = pallas_gemm_bias_relu(a.reshape(B * h2 * v2, -1), p["w2"], p["b2"])
    o = o.reshape(B, h2, v2, -1)                                    # (B,9,9,64)

    # conv3 (+ReLU)
    a = lax.conv_general_dilated_patches(
        o, (3, 3), (1, 1), "VALID",
        dimension_numbers=("NHWC", "HWIO", "NHWC")).astype(bf16)    # (B,7,7,576)
    h3, v3 = a.shape[1], a.shape[2]
    o = pallas_gemm_bias_relu(a.reshape(B * h3 * v3, -1), p["w3"], p["b3"])

    # flatten in NHWC order (w4 columns were pre-permuted to keep torch semantics)
    feat = o.reshape(B, -1)                                         # (B, 3136) bf16

    # fused fc4 (+ReLU) + fc5 (+b5), single full-block kernel, final f32 output
    return pallas_fc_head(feat, p["w4"], p["b4"], p["w5"], p["b5"])


# ----------------------------------------------------------------------------
# Pure-JAX f32 reference (for numerical validation of the Pallas path)
# ----------------------------------------------------------------------------
def reference_forward(x, p):
    def conv(x, w, b, s):
        y = lax.conv_general_dilated(
            x, w, (s, s), "VALID", dimension_numbers=("NCHW", "OIHW", "NCHW"))
        return jax.nn.relu(y + b[None, :, None, None])
    out = conv(x,   p["w1"], p["b1"], 4)
    out = conv(out, p["w2"], p["b2"], 2)
    out = conv(out, p["w3"], p["b3"], 1)
    out = out.reshape(out.shape[0], -1)
    out = jax.nn.relu(out @ p["w4"].T + p["b4"])
    out = out @ p["w5"].T + p["b5"]
    return out


def init_params(key):
    ks = jax.random.split(key, 10)
    s = 0.05
    return {
        "w1": s * jax.random.normal(ks[0], (32, 4, 8, 8), jnp.float32),
        "b1": s * jax.random.normal(ks[1], (32,), jnp.float32),
        "w2": s * jax.random.normal(ks[2], (64, 32, 4, 4), jnp.float32),
        "b2": s * jax.random.normal(ks[3], (64,), jnp.float32),
        "w3": s * jax.random.normal(ks[4], (64, 64, 3, 3), jnp.float32),
        "b3": s * jax.random.normal(ks[5], (64,), jnp.float32),
        "w4": s * jax.random.normal(ks[6], (512, 3136), jnp.float32),
        "b4": s * jax.random.normal(ks[7], (512,), jnp.float32),
        "w5": s * jax.random.normal(ks[8], (2, 512), jnp.float32),
        "b5": s * jax.random.normal(ks[9], (2,), jnp.float32),
    }


if __name__ == "__main__":
    key = jax.random.PRNGKey(0)
    pkey, xkey = jax.random.split(key)
    raw_params = init_params(pkey)
    params = prepare_params(raw_params)

    # fc4 expects 64*7*7 = 3136 features, which pins the input spatial size to 84x84.
    B = 2
    x = jax.random.normal(xkey, (B, 4, 84, 84), jnp.float32)

    fwd = jax.jit(forward)
    out = jax.block_until_ready(fwd(x, params))
    assert out.shape == (B, 2) and out.dtype == jnp.float32

    ref = jax.block_until_ready(jax.jit(reference_forward)(x, raw_params))
    # bf16 operands (f32 accumulation) -> relaxed tolerance vs. pure-f32 reference.
    np.testing.assert_allclose(np.asarray(out), np.asarray(ref), rtol=5e-2, atol=5e-2)

    print("KERNEL_OK")
</pallas_src>

<mosaic_0001>
module attributes {stable_mosaic.version = 11 : i64} {
  func.func @_gemm_bias_relu_kernel(%arg0: i32, %arg1: memref<400x256xbf16, #tpu.memory_space<vmem>>, %arg2: memref<256x32xbf16, #tpu.memory_space<vmem>>, %arg3: memref<1x32xf32, #tpu.memory_space<vmem>>, %arg4: memref<400x32xbf16, #tpu.memory_space<vmem>>) attributes {dimension_semantics = [#tpu.dimension_semantics<parallel>], iteration_bounds = array<i64: 2>, scalar_prefetch = 0 : i64, scratch_operands = 0 : i64, tpu.core_type = #tpu.core_type<tc>, window_params = [{transform_indices = @transform_0, window_bounds = array<i64: 400, 256>}, {pipeline_mode = #tpu.pipeline_mode<synchronous>, transform_indices = @transform_1, window_bounds = array<i64: 256, 32>}, {pipeline_mode = #tpu.pipeline_mode<synchronous>, transform_indices = @transform_2, window_bounds = array<i64: 1, 32>}, {transform_indices = @transform_3, window_bounds = array<i64: 400, 32>}]} {
    %c0 = arith.constant 0 : index
    %c0_0 = arith.constant 0 : index
    %0 = vector.load %arg1[%c0, %c0_0] : memref<400x256xbf16, #tpu.memory_space<vmem>>, vector<400x256xbf16>
    %c0_1 = arith.constant 0 : index
    %c0_2 = arith.constant 0 : index
    %1 = vector.load %arg2[%c0_1, %c0_2] : memref<256x32xbf16, #tpu.memory_space<vmem>>, vector<256x32xbf16>
    %cst = arith.constant dense<0.000000e+00> : vector<400x32xf32>
    %2 = tpu.matmul %0, %1, %cst {dimension_numbers = #tpu.dot_dimension_numbers<[1], [0], [0], [1], [0, 0, 1, 1], [], []>} : vector<400x256xbf16>, vector<256x32xbf16>, vector<400x32xf32> -> vector<400x32xf32>
    %c0_3 = arith.constant 0 : index
    %c0_4 = arith.constant 0 : index
    %3 = vector.load %arg3[%c0_3, %c0_4] : memref<1x32xf32, #tpu.memory_space<vmem>>, vector<1x32xf32>
    %4 = vector.broadcast %3 : vector<1x32xf32> to vector<400x32xf32>
    %5 = arith.addf %2, %4 : vector<400x32xf32>
    %cst_5 = arith.constant 0.000000e+00 : f32
    %6 = vector.broadcast %cst_5 : f32 to vector<400x32xf32>
    %7 = arith.maximumf %5, %6 : vector<400x32xf32>
    %8 = arith.truncf %7 : vector<400x32xf32> to vector<400x32xbf16>
    %c0_6 = arith.constant 0 : index
    %c0_7 = arith.constant 0 : index
    %9 = vector.load %arg4[%c0_6, %c0_7] : memref<400x32xbf16, #tpu.memory_space<vmem>>, vector<400x32xbf16>
    tpu.vector_store %arg4[%c0_6, %c0_7], %8 {strides = array<i32>} : memref<400x32xbf16, #tpu.memory_space<vmem>>, vector<400x32xbf16>,
    return
  }
  func.func @transform_0(%arg0: i32) -> (i32, i32) {
    %c0_i32 = arith.constant 0 : i32
    %c0_i32_0 = arith.constant 0 : i32
    return %arg0, %c0_i32 : i32, i32
  }
  func.func @transform_1(%arg0: i32) -> (i32, i32) {
    %c0_i32 = arith.constant 0 : i32
    %c0_i32_0 = arith.constant 0 : i32
    %c0_i32_1 = arith.constant 0 : i32
    return %c0_i32, %c0_i32_0 : i32, i32
  }
  func.func @transform_2(%arg0: i32) -> (i32, i32) {
    %c0_i32 = arith.constant 0 : i32
    %c0_i32_0 = arith.constant 0 : i32
    %c0_i32_1 = arith.constant 0 : i32
    return %c0_i32, %c0_i32_0 : i32, i32
  }
  func.func @transform_3(%arg0: i32) -> (i32, i32) {
    %c0_i32 = arith.constant 0 : i32
    %c0_i32_0 = arith.constant 0 : i32
    return %arg0, %c0_i32 : i32, i32
  }
}

module attributes {stable_mosaic.version = 11 : i64} {
  func.func @_gemm_bias_relu_kernel(%arg0: i32, %arg1: memref<162x512xbf16, #tpu.memory_space<vmem>>, %arg2: memref<512x64xbf16, #tpu.memory_space<vmem>>, %arg3: memref<1x64xf32, #tpu.memory_space<vmem>>, %arg4: memref<162x64xbf16, #tpu.memory_space<vmem>>) attributes {dimension_semantics = [#tpu.dimension_semantics<parallel>], iteration_bounds = array<i64: 1>, scalar_prefetch = 0 : i64, scratch_operands = 0 : i64, tpu.core_type = #tpu.core_type<tc>, window_params = [{transform_indices = @transform_0, window_bounds = array<i64: 162, 512>}, {pipeline_mode = #tpu.pipeline_mode<synchronous>, transform_indices = @transform_1, window_bounds = array<i64: 512, 64>}, {pipeline_mode = #tpu.pipeline_mode<synchronous>, transform_indices = @transform_2, window_bounds = array<i64: 1, 64>}, {transform_indices = @transform_3, window_bounds = array<i64: 162, 64>}]} {
    %c0 = arith.constant 0 : index
    %c0_0 = arith.constant 0 : index
    %0 = vector.load %arg1[%c0, %c0_0] : memref<162x512xbf16, #tpu.memory_space<vmem>>, vector<162x512xbf16>
    %c0_1 = arith.constant 0 : index
    %c0_2 = arith.constant 0 : index
    %1 = vector.load %arg2[%c0_1, %c0_2] : memref<512x64xbf16, #tpu.memory_space<vmem>>, vector<512x64xbf16>
    %cst = arith.constant dense<0.000000e+00> : vector<162x64xf32>
    %2 = tpu.matmul %0, %1, %cst {dimension_numbers = #tpu.dot_dimension_numbers<[1], [0], [0], [1], [0, 0, 1, 1], [], []>} : vector<162x512xbf16>, vector<512x64xbf16>, vector<162x64xf32> -> vector<162x64xf32>
    %c0_3 = arith.constant 0 : index
    %c0_4 = arith.constant 0 : index
    %3 = vector.load %arg3[%c0_3, %c0_4] : memref<1x64xf32, #tpu.memory_space<vmem>>, vector<1x64xf32>
    %4 = vector.broadcast %3 : vector<1x64xf32> to vector<162x64xf32>
    %5 = arith.addf %2, %4 : vector<162x64xf32>
    %cst_5 = arith.constant 0.000000e+00 : f32
    %6 = vector.broadcast %cst_5 : f32 to vector<162x64xf32>
    %7 = arith.maximumf %5, %6 : vector<162x64xf32>
    %8 = arith.truncf %7 : vector<162x64xf32> to vector<162x64xbf16>
    %c0_6 = arith.constant 0 : index
    %c0_7 = arith.constant 0 : index
    %9 = vector.load %arg4[%c0_6, %c0_7] : memref<162x64xbf16, #tpu.memory_space<vmem>>, vector<162x64xbf16>
    tpu.vector_store %arg4[%c0_6, %c0_7], %8 {strides = array<i32>} : memref<162x64xbf16, #tpu.memory_space<vmem>>, vector<162x64xbf16>,
    return
  }
  func.func @transform_0(%arg0: i32) -> (i32, i32) {
    %c0_i32 = arith.constant 0 : i32
    %c0_i32_0 = arith.constant 0 : i32
    return %arg0, %c0_i32 : i32, i32
  }
  func.func @transform_1(%arg0: i32) -> (i32, i32) {
    %c0_i32 = arith.constant 0 : i32
    %c0_i32_0 = arith.constant 0 : i32
    %c0_i32_1 = arith.constant 0 : i32
    return %c0_i32, %c0_i32_0 : i32, i32
  }
  func.func @transform_2(%arg0: i32) -> (i32, i32) {
    %c0_i32 = arith.constant 0 : i32
    %c0_i32_0 = arith.constant 0 : i32
    %c0_i32_1 = arith.constant 0 : i32
    return %c0_i32, %c0_i32_0 : i32, i32
  }
  func.func @transform_3(%arg0: i32) -> (i32, i32) {
    %c0_i32 = arith.constant 0 : i32
    %c0_i32_0 = arith.constant 0 : i32
    return %arg0, %c0_i32 : i32, i32
  }
}

module attributes {stable_mosaic.version = 11 : i64} {
  func.func @_gemm_bias_relu_kernel(%arg0: i32, %arg1: memref<98x576xbf16, #tpu.memory_space<vmem>>, %arg2: memref<576x64xbf16, #tpu.memory_space<vmem>>, %arg3: memref<1x64xf32, #tpu.memory_space<vmem>>, %arg4: memref<98x64xbf16, #tpu.memory_space<vmem>>) attributes {dimension_semantics = [#tpu.dimension_semantics<parallel>], iteration_bounds = array<i64: 1>, scalar_prefetch = 0 : i64, scratch_operands = 0 : i64, tpu.core_type = #tpu.core_type<tc>, window_params = [{transform_indices = @transform_0, window_bounds = array<i64: 98, 576>}, {pipeline_mode = #tpu.pipeline_mode<synchronous>, transform_indices = @transform_1, window_bounds = array<i64: 576, 64>}, {pipeline_mode = #tpu.pipeline_mode<synchronous>, transform_indices = @transform_2, window_bounds = array<i64: 1, 64>}, {transform_indices = @transform_3, window_bounds = array<i64: 98, 64>}]} {
    %c0 = arith.constant 0 : index
    %c0_0 = arith.constant 0 : index
    %0 = vector.load %arg1[%c0, %c0_0] : memref<98x576xbf16, #tpu.memory_space<vmem>>, vector<98x576xbf16>
    %c0_1 = arith.constant 0 : index
    %c0_2 = arith.constant 0 : index
    %1 = vector.load %arg2[%c0_1, %c0_2] : memref<576x64xbf16, #tpu.memory_space<vmem>>, vector<576x64xbf16>
    %cst = arith.constant dense<0.000000e+00> : vector<98x64xf32>
    %2 = tpu.matmul %0, %1, %cst {dimension_numbers = #tpu.dot_dimension_numbers<[1], [0], [0], [1], [0, 0, 1, 1], [], []>} : vector<98x576xbf16>, vector<576x64xbf16>, vector<98x64xf32> -> vector<98x64xf32>
    %c0_3 = arith.constant 0 : index
    %c0_4 = arith.constant 0 : index
    %3 = vector.load %arg3[%c0_3, %c0_4] : memref<1x64xf32, #tpu.memory_space<vmem>>, vector<1x64xf32>
    %4 = vector.broadcast %3 : vector<1x64xf32> to vector<98x64xf32>
    %5 = arith.addf %2, %4 : vector<98x64xf32>
    %cst_5 = arith.constant 0.000000e+00 : f32
    %6 = vector.broadcast %cst_5 : f32 to vector<98x64xf32>
    %7 = arith.maximumf %5, %6 : vector<98x64xf32>
    %8 = arith.truncf %7 : vector<98x64xf32> to vector<98x64xbf16>
    %c0_6 = arith.constant 0 : index
    %c0_7 = arith.constant 0 : index
    %9 = vector.load %arg4[%c0_6, %c0_7] : memref<98x64xbf16, #tpu.memory_space<vmem>>, vector<98x64xbf16>
    tpu.vector_store %arg4[%c0_6, %c0_7], %8 {strides = array<i32>} : memref<98x64xbf16, #tpu.memory_space<vmem>>, vector<98x64xbf16>,
    return
  }
  func.func @transform_0(%arg0: i32) -> (i32, i32) {
    %c0_i32 = arith.constant 0 : i32
    %c0_i32_0 = arith.constant 0 : i32
    return %arg0, %c0_i32 : i32, i32
  }
  func.func @transform_1(%arg0: i32) -> (i32, i32) {
    %c0_i32 = arith.constant 0 : i32
    %c0_i32_0 = arith.constant 0 : i32
    %c0_i32_1 = arith.constant 0 : i32
    return %c0_i32, %c0_i32_0 : i32, i32
  }
  func.func @transform_2(%arg0: i32) -> (i32, i32) {
    %c0_i32 = arith.constant 0 : i32
    %c0_i32_0 = arith.constant 0 : i32
    %c0_i32_1 = arith.constant 0 : i32
    return %c0_i32, %c0_i32_0 : i32, i32
  }
  func.func @transform_3(%arg0: i32) -> (i32, i32) {
    %c0_i32 = arith.constant 0 : i32
    %c0_i32_0 = arith.constant 0 : i32
    return %arg0, %c0_i32 : i32, i32
  }
}

module attributes {stable_mosaic.version = 11 : i64} {
  func.func @_fc_head_kernel(%arg0: i32, %arg1: memref<2x3136xbf16, #tpu.memory_space<vmem>>, %arg2: memref<3136x512xbf16, #tpu.memory_space<vmem>>, %arg3: memref<1x512xf32, #tpu.memory_space<vmem>>, %arg4: memref<512x2xf32, #tpu.memory_space<vmem>>, %arg5: memref<1x2xf32, #tpu.memory_space<vmem>>, %arg6: memref<2x2xf32, #tpu.memory_space<vmem>>) attributes {dimension_semantics = [#tpu.dimension_semantics<arbitrary>], iteration_bounds = array<i64: 1>, scalar_prefetch = 0 : i64, scratch_operands = 0 : i64, tpu.core_type = #tpu.core_type<tc>, window_params = [{pipeline_mode = #tpu.pipeline_mode<synchronous>, transform_indices = @transform_0, window_bounds = array<i64: 2, 3136>}, {pipeline_mode = #tpu.pipeline_mode<synchronous>, transform_indices = @transform_1, window_bounds = array<i64: 3136, 512>}, {pipeline_mode = #tpu.pipeline_mode<synchronous>, transform_indices = @transform_2, window_bounds = array<i64: 1, 512>}, {pipeline_mode = #tpu.pipeline_mode<synchronous>, transform_indices = @transform_3, window_bounds = array<i64: 512, 2>}, {pipeline_mode = #tpu.pipeline_mode<synchronous>, transform_indices = @transform_4, window_bounds = array<i64: 1, 2>}, {pipeline_mode = #tpu.pipeline_mode<synchronous>, transform_indices = @transform_5, window_bounds = array<i64: 2, 2>}]} {
    %c0 = arith.constant 0 : index
    %c0_0 = arith.constant 0 : index
    %0 = vector.load %arg1[%c0, %c0_0] : memref<2x3136xbf16, #tpu.memory_space<vmem>>, vector<2x3136xbf16>
    %c0_1 = arith.constant 0 : index
    %c0_2 = arith.constant 0 : index
    %1 = vector.load %arg2[%c0_1, %c0_2] : memref<3136x512xbf16, #tpu.memory_space<vmem>>, vector<3136x512xbf16>
    %cst = arith.constant dense<0.000000e+00> : vector<2x512xf32>
    %2 = tpu.matmul %0, %1, %cst {dimension_numbers = #tpu.dot_dimension_numbers<[1], [0], [0], [1], [0, 0, 1, 1], [], []>} : vector<2x3136xbf16>, vector<3136x512xbf16>, vector<2x512xf32> -> vector<2x512xf32>
    %c0_3 = arith.constant 0 : index
    %c0_4 = arith.constant 0 : index
    %3 = vector.load %arg3[%c0_3, %c0_4] : memref<1x512xf32, #tpu.memory_space<vmem>>, vector<1x512xf32>
    %4 = vector.broadcast %3 : vector<1x512xf32> to vector<2x512xf32>
    %5 = arith.addf %2, %4 : vector<2x512xf32>
    %cst_5 = arith.constant 0.000000e+00 : f32
    %6 = vector.broadcast %cst_5 : f32 to vector<2x512xf32>
    %7 = arith.maximumf %5, %6 : vector<2x512xf32>
    %c0_6 = arith.constant 0 : index
    %c0_7 = arith.constant 0 : index
    %8 = vector.load %arg4[%c0_6, %c0_7] : memref<512x2xf32, #tpu.memory_space<vmem>>, vector<512x2xf32>
    %cst_8 = arith.constant dense<0.000000e+00> : vector<2x2xf32>
    %9 = tpu.matmul %7, %8, %cst_8 {dimension_numbers = #tpu.dot_dimension_numbers<[1], [0], [0], [1], [0, 0, 1, 1], [], []>} : vector<2x512xf32>, vector<512x2xf32>, vector<2x2xf32> -> vector<2x2xf32>
    %c0_9 = arith.constant 0 : index
    %c0_10 = arith.constant 0 : index
    %10 = vector.load %arg5[%c0_9, %c0_10] : memref<1x2xf32, #tpu.memory_space<vmem>>, vector<1x2xf32>
    %11 = vector.broadcast %10 : vector<1x2xf32> to vector<2x2xf32>
    %12 = arith.addf %9, %11 : vector<2x2xf32>
    %c0_11 = arith.constant 0 : index
    %c0_12 = arith.constant 0 : index
    %13 = vector.load %arg6[%c0_11, %c0_12] : memref<2x2xf32, #tpu.memory_space<vmem>>, vector<2x2xf32>
    tpu.vector_store %arg6[%c0_11, %c0_12], %12 {strides = array<i32>} : memref<2x2xf32, #tpu.memory_space<vmem>>, vector<2x2xf32>,
    return
  }
  func.func @transform_0(%arg0: i32) -> (i32, i32) {
    %c0_i32 = arith.constant 0 : i32
    %c0_i32_0 = arith.constant 0 : i32
    %c0_i32_1 = arith.constant 0 : i32
    return %c0_i32, %c0_i32_0 : i32, i32
  }
  func.func @transform_1(%arg0: i32) -> (i32, i32) {
    %c0_i32 = arith.constant 0 : i32
    %c0_i32_0 = arith.constant 0 : i32
    %c0_i32_1 = arith.constant 0 : i32
    return %c0_i32, %c0_i32_0 : i32, i32
  }
  func.func @transform_2(%arg0: i32) -> (i32, i32) {
    %c0_i32 = arith.constant 0 : i32
    %c0_i32_0 = arith.constant 0 : i32
    %c0_i32_1 = arith.constant 0 : i32
    return %c0_i32, %c0_i32_0 : i32, i32
  }
  func.func @transform_3(%arg0: i32) -> (i32, i32) {
    %c0_i32 = arith.constant 0 : i32
    %c0_i32_0 = arith.constant 0 : i32
    %c0_i32_1 = arith.constant 0 : i32
    return %c0_i32, %c0_i32_0 : i32, i32
  }
  func.func @transform_4(%arg0: i32) -> (i32, i32) {
    %c0_i32 = arith.constant 0 : i32
    %c0_i32_0 = arith.constant 0 : i32
    %c0_i32_1 = arith.constant 0 : i32
    return %c0_i32, %c0_i32_0 : i32, i32
  }
  func.func @transform_5(%arg0: i32) -> (i32, i32) {
    %c0_i32 = arith.constant 0 : i32
    %c0_i32_0 = arith.constant 0 : i32
    %c0_i32_1 = arith.constant 0 : i32
    return %c0_i32, %c0_i32_0 : i32, i32
  }
}

</mosaic_0001>

<bundles_post_ra>
// kernel: forward.4
= control target key start
LH: loop header
LB: loop body
LE: loop exit
PB: predicated region body
PF: predicated region fallthrough
CT: control target
= control target key end

     0   :  { %s1478_s12 = smov 0   ;;  %s1812_s0 = inlined_call_operand.vmem [shape: bf16[800,256], index: 0, kind: input, shape index: {}]   ;;  %s1813_s1 = inlined_call_operand.vmem [shape: bf16[256,32], index: 1, kind: input, shape index: {}]   ;;  %s1814_s2 = inlined_call_operand.vmem [shape: f32[1,32], index: 2, kind: input, shape index: {}]   ;;  %s1815_s3 = inlined_call_operand.vmem [shape: bf16[800,32], index: 3, kind: output, shape index: {}]  }
   0x1 LB: > { %s1084_s13 = sadd.s32 4294967295, %s1456_s12   ;;  %p1088_p0 = scmp.ge.s32.totalorder %s1456_s12, 1  ;;  %s1456_s12 = sphi %s1478_s12, %s13_s12  }
   0x2   : > { %p139_p1 = scmp.lt.s32.totalorder %s1456_s12, 3 }
   0x4   : > { %p140_p2 = pnand %p1088_p0, %p139_p1 }
   0x5   : > { %s164_s26 = smul.u32 (!%p140_p2), 50, %s1084_s13 }
   0x6   : > { %143 = sbr.rel (%p140_p2) target bundleno = 384 (0x180), region = 32 }
   0x7   : > { %p165_p3 = scmp.lt.s32.totalorder (!%p140_p2), %s164_s26, 99 }
   0xb   : > { %v1416_v0 = vld [vmem:[%s1813_s1 + $0x38] sm:$0xff]  ;;  %v1415_v2 = vld [vmem:[%s1813_s1 + $0x30] sm:$0xff]  ;;  %v1414_v4 = vld [vmem:[%s1813_s1 + $0x28] sm:$0xff]  ;;  %s1817_s26 = smov (!%p165_p3, %s164_s26), 99  ;;  %vm977_vm0 = vcmask 257024  }
   0xc   : > { %v1424_v1 = vld [vmem:[%s1813_s1 + $0x78] sm:$0xff]  ;;  %609 = vmatpush.bf16.msra.mxu0 %v1416_v0  ;;  %1425 = vmatpush.bf16.msra.mxu2 %v1416_v0  ;;  %v1423_v3 = vld [vmem:[%s1813_s1 + $0x70] sm:$0xff]  ;;  %v1422_v5 = vld [vmem:[%s1813_s1 + $0x68] sm:$0xff]  ;;  %s1358_s13 = sshll.u32 %s1817_s26, 3  ;;  %s1091_s28 = sshll.u32 %s1817_s26, 2 }
   0xd   : > { %743 = vmatpush.bf16.msra.mxu1 %v1424_v1  ;;  %1433 = vmatpush.bf16.msra.mxu3 %v1424_v1  ;;  %v1413_v6 = vld [vmem:[%s1813_s1 + $0x20] sm:$0xff]  ;;  %v1412_v8 = vld [vmem:[%s1813_s1 + $0x18] sm:$0xff]  ;;  %v1411_v10 = vld [vmem:[%s1813_s1 + $0x10] sm:$0xff]  ;;  %s1531_s18 = scalar_lea.vmem %s1812_s0, %s1358_s13  ;;  %s1624_s4 = scalar_lea.vmem %s1815_s3, %s1091_s28 }
   0xe   : > { %v1421_v7 = vld [vmem:[%s1813_s1 + $0x60] sm:$0xff]  ;;  %v1420_v9 = vld [vmem:[%s1813_s1 + $0x58] sm:$0xff]  ;;  %v1419_v11 = vld [vmem:[%s1813_s1 + $0x50] sm:$0xff] }
   0xf   : > { %v1410_v12 = vld [vmem:[%s1813_s1 + $0x8] sm:$0xff]  ;;  %v1409_v14 = vld [vmem:[%s1813_s1] sm:$0xff]  ;;  %v1385_v22 = vld [vmem:[%s1531_s18 + $0xd4] sm:$0xf] }
  0x10   : > { %610 = vmatpush.bf16.msra.mxu0 %v1415_v2  ;;  %1426 = vmatpush.bf16.msra.mxu2 %v1415_v2  ;;  %v1418_v13 = vld [vmem:[%s1813_s1 + $0x48] sm:$0xff]  ;;  %v1417_v15 = vld [vmem:[%s1813_s1 + $0x40] sm:$0xff]  ;;  %v1200_v23 = vld [vmem:[%s1531_s18 + $0xd8] sm:$0xf0] }
  0x11   : > { %744 = vmatpush.bf16.msra.mxu1 %v1423_v3  ;;  %1434 = vmatpush.bf16.msra.mxu3 %v1423_v3  ;;  %v1094_v16 = vld [vmem:[%s1531_s18] sm:$0xf]  ;;  %v1360_v17 = vld [vmem:[%s1531_s18 + $0x4] sm:$0xf0]  ;;  %v1359_v20 = vld [vmem:[%s1531_s18 + $0x4] sm:$0xf]  ;;  %v1203_v27 = vor.u32 %v1385_v22, %v1200_v23 }
  0x12   : > { %v1190_v18 = vld [vmem:[%s1531_s18 + $0xc0] sm:$0xf]  ;;  %v1384_v19 = vld [vmem:[%s1531_s18 + $0xc4] sm:$0xf0]  ;;  %v1096_v21 = vld [vmem:[%s1531_s18 + $0x8] sm:$0xf0]  ;;  %v1095_v24 = vor.u32 %v1360_v17, %v1094_v16 }
  0x13   : > { %v1191_v25 = vor.u32 %v1384_v19, %v1190_v18  ;;  %v1099_v26 = vor.u32 %v1359_v20, %v1096_v21  ;;  %v1102_v28 = vld [vmem:[%s1531_s18 + $0x10] sm:$0xf]  ;;  %v1362_v29 = vld [vmem:[%s1531_s18 + $0x14] sm:$0xf0]  ;;  %v1361_v32 = vld [vmem:[%s1531_s18 + $0x14] sm:$0xf] }
  0x14   : > { %611 = vmatpush.bf16.msra.mxu0 %v1414_v4  ;;  %1427 = vmatpush.bf16.msra.mxu2 %v1414_v4  ;;  %v1198_v30 = vld [vmem:[%s1531_s18 + $0xd0] sm:$0xf]  ;;  %v1386_v31 = vld [vmem:[%s1531_s18 + $0xd4] sm:$0xf0]  ;;  %v1104_v33 = vld [vmem:[%s1531_s18 + $0x18] sm:$0xf0]  ;;  %v1103_v36 = vor.u32 %v1362_v29, %v1102_v28 }
  0x15   : > { %745 = vmatpush.bf16.msra.mxu1 %v1422_v5  ;;  %1435 = vmatpush.bf16.msra.mxu3 %v1422_v5  ;;  %v1387_v34 = vld [vmem:[%s1531_s18 + $0xe4] sm:$0xf]  ;;  %v1208_v35 = vld [vmem:[%s1531_s18 + $0xe8] sm:$0xf0]  ;;  %v1199_v37 = vor.u32 %v1386_v31, %v1198_v30  ;;  %v1107_v38 = vor.u32 %v1361_v32, %v1104_v33  ;;  %v1110_v40 = vld [vmem:[%s1531_s18 + $0x20] sm:$0xf] }
  0x16   : > { %v1211_v39 = vor.u32 %v1387_v34, %v1208_v35  ;;  %v1364_v41 = vld [vmem:[%s1531_s18 + $0x24] sm:$0xf0]  ;;  %v1206_v42 = vld [vmem:[%s1531_s18 + $0xe0] sm:$0xf]  ;;  %v1363_v44 = vld [vmem:[%s1531_s18 + $0x24] sm:$0xf] }
  0x17   : > { %v1388_v43 = vld [vmem:[%s1531_s18 + $0xe4] sm:$0xf0]  ;;  %v1112_v45 = vld [vmem:[%s1531_s18 + $0x28] sm:$0xf0]  ;;  %v1389_v46 = vld [vmem:[%s1531_s18 + $0xf4] sm:$0xf]  ;;  %v1111_v48 = vor.u32 %v1364_v41, %v1110_v40 }
  0x18   : > { %612 = vmatpush.bf16.msra.mxu0 %v1413_v6  ;;  %1428 = vmatpush.bf16.msra.mxu2 %v1413_v6  ;;  %v1216_v47 = vld [vmem:[%s1531_s18 + $0xf8] sm:$0xf0]  ;;  %v1207_v49 = vor.u32 %v1388_v43, %v1206_v42  ;;  %v1115_v50 = vor.u32 %v1363_v44, %v1112_v45  ;;  %v1118_v52 = vld [vmem:[%s1531_s18 + $0x30] sm:$0xf]  ;;  %v1366_v53 = vld [vmem:[%s1531_s18 + $0x34] sm:$0xf0] }
  0x19   : > { %746 = vmatpush.bf16.msra.mxu1 %v1421_v7  ;;  %1436 = vmatpush.bf16.msra.mxu3 %v1421_v7  ;;  %v1219_v51 = vor.u32 %v1389_v46, %v1216_v47  ;;  %v1214_v54 = vld [vmem:[%s1531_s18 + $0xf0] sm:$0xf]  ;;  %v1390_v55 = vld [vmem:[%s1531_s18 + $0xf4] sm:$0xf0]  ;;  %v1365_v56 = vld [vmem:[%s1531_s18 + $0x34] sm:$0xf]  ;;  %v1119_v60 = vor.u32 %v1366_v53, %v1118_v52 }
  0x1a   : > { %v1120_v57 = vld [vmem:[%s1531_s18 + $0x38] sm:$0xf0]  ;;  %v1391_v58 = vld [vmem:[%s1531_s18 + $0x104] sm:$0xf]  ;;  %v1224_v59 = vld [vmem:[%s1531_s18 + $0x108] sm:$0xf0]  ;;  %v1215_v61 = vor.u32 %v1390_v55, %v1214_v54 }
  0x1b   : > { %v1123_v62 = vor.u32 %v1365_v56, %v1120_v57  ;;  %v1227_v63 = vor.u32 %v1391_v58, %v1224_v59  ;;  %v1126_v0 = vld [vmem:[%s1531_s18 + $0x40] sm:$0xf]  ;;  %v1368_v1 = vld [vmem:[%s1531_s18 + $0x44] sm:$0xf0]  ;;  %v1367_v4 = vld [vmem:[%s1531_s18 + $0x44] sm:$0xf] }
  0x1c   : > { %613 = vmatpush.bf16.msra.mxu0 %v1412_v8  ;;  %1429 = vmatpush.bf16.msra.mxu2 %v1412_v8  ;;  %v1222_v2 = vld [vmem:[%s1531_s18 + $0x100] sm:$0xf]  ;;  %v1392_v3 = vld [vmem:[%s1531_s18 + $0x104] sm:$0xf0]  ;;  %v1128_v5 = vld [vmem:[%s1531_s18 + $0x48] sm:$0xf0]  ;;  %v1127_v8 = vor.u32 %v1368_v1, %v1126_v0 }
  0x1d   : > { %747 = vmatpush.bf16.msra.mxu1 %v1420_v9  ;;  %1437 = vmatpush.bf16.msra.mxu3 %v1420_v9  ;;  %v1393_v6 = vld [vmem:[%s1531_s18 + $0x114] sm:$0xf]  ;;  %v1232_v7 = vld [vmem:[%s1531_s18 + $0x118] sm:$0xf0]  ;;  %v1223_v9 = vor.u32 %v1392_v3, %v1222_v2  ;;  %v1395_v18 = vld [vmem:[%s1531_s18 + $0x124] sm:$0xf] }
  0x1e   : > { %v1369_v16 = vld [vmem:[%s1531_s18 + $0x54] sm:$0xf]  ;;  %v1136_v17 = vld [vmem:[%s1531_s18 + $0x58] sm:$0xf0]  ;;  %v1240_v19 = vld [vmem:[%s1531_s18 + $0x128] sm:$0xf0] }
  0x1f   : > { %v1139_v22 = vor.u32 %v1369_v16, %v1136_v17  ;;  %v1243_v23 = vor.u32 %v1395_v18, %v1240_v19  ;;  %v1371_v28 = vld [vmem:[%s1531_s18 + $0x64] sm:$0xf]  ;;  %v1144_v29 = vld [vmem:[%s1531_s18 + $0x68] sm:$0xf0]  ;;  %v1397_v30 = vld [vmem:[%s1531_s18 + $0x134] sm:$0xf] }
  0x20   : > { %614 = vmatpush.bf16.msra.mxu0 %v1411_v10  ;;  %1430 = vmatpush.bf16.msra.mxu2 %v1411_v10  ;;  %v1131_v10 = vor.u32 %v1367_v4, %v1128_v5  ;;  %v1248_v31 = vld [vmem:[%s1531_s18 + $0x138] sm:$0xf0]  ;;  %v1147_v34 = vor.u32 %v1371_v28, %v1144_v29  ;;  %v1373_v40 = vld [vmem:[%s1531_s18 + $0x74] sm:$0xf]  ;;  %v1399_v42 = vld [vmem:[%s1531_s18 + $0x144] sm:$0xf] }
  0x21   : > { %748 = vmatpush.bf16.msra.mxu1 %v1419_v11  ;;  %1438 = vmatpush.bf16.msra.mxu3 %v1419_v11  ;;  %v1235_v11 = vor.u32 %v1393_v6, %v1232_v7  ;;  %v1251_v35 = vor.u32 %v1397_v30, %v1248_v31  ;;  %v1152_v41 = vld [vmem:[%s1531_s18 + $0x78] sm:$0xf0]  ;;  %v1256_v43 = vld [vmem:[%s1531_s18 + $0x148] sm:$0xf0]  ;;  %v1400_v52 = vld [vmem:[%s1531_s18 + $0x144] sm:$0xf0] }
  0x22   : > { %v1155_v46 = vor.u32 %v1373_v40, %v1152_v41  ;;  %v1259_v47 = vor.u32 %v1399_v42, %v1256_v43  ;;  %v1375_v53 = vld [vmem:[%s1531_s18 + $0x84] sm:$0xf]  ;;  %v1160_v54 = vld [vmem:[%s1531_s18 + $0x88] sm:$0xf0]  ;;  %v1401_v55 = vld [vmem:[%s1531_s18 + $0x154] sm:$0xf] }
  0x23   : > { %v1264_v56 = vld [vmem:[%s1531_s18 + $0x158] sm:$0xf0]  ;;  %v1403_v16 = vld [vmem:[%s1531_s18 + $0x164] sm:$0xf]  ;;  %v1272_v17 = vld [vmem:[%s1531_s18 + $0x168] sm:$0xf0] }
  0x24   : > { %615 = vmatpush.bf16.msra.mxu0 %v1410_v12  ;;  %1431 = vmatpush.bf16.msra.mxu2 %v1410_v12  ;;  %v1134_v12 = vld [vmem:[%s1531_s18 + $0x50] sm:$0xf]  ;;  %v1380_v41 = vld [vmem:[%s1531_s18 + $0xa4] sm:$0xf0]  ;;  %v1270_v42 = vld [vmem:[%s1531_s18 + $0x160] sm:$0xf] }
  0x25   : > { %749 = vmatpush.bf16.msra.mxu1 %v1418_v13  ;;  %1439 = vmatpush.bf16.msra.mxu3 %v1418_v13  ;;  %v1370_v13 = vld [vmem:[%s1531_s18 + $0x54] sm:$0xf0]  ;;  %v1404_v43 = vld [vmem:[%s1531_s18 + $0x164] sm:$0xf0] }
  0x26   : > { %v1135_v20 = vor.u32 %v1370_v13, %v1134_v12  ;;  %v1402_v12 = vld [vmem:[%s1531_s18 + $0x154] sm:$0xf0]  ;;  %v1377_v13 = vld [vmem:[%s1531_s18 + $0x94] sm:$0xf] }
  0x28   : > { %616 = vmatpush.bf16.msra.mxu0 %v1409_v14  ;;  %1432 = vmatpush.bf16.msra.mxu2 %v1409_v14  ;;  %v1230_v14 = vld [vmem:[%s1531_s18 + $0x110] sm:$0xf] }
  0x29   : > { %750 = vmatpush.bf16.msra.mxu1 %v1417_v15  ;;  %1440 = vmatpush.bf16.msra.mxu3 %v1417_v15  ;;  %v1394_v15 = vld [vmem:[%s1531_s18 + $0x114] sm:$0xf0] }
  0x2a   : > { %v1231_v21 = vor.u32 %v1394_v15, %v1230_v14  ;;  %v1168_v14 = vld [vmem:[%s1531_s18 + $0x98] sm:$0xf0] }
  0x2b   : > { %617 = vmatmul.bf16.vlgmr.msra.gmra.mxu0 %v1095_v24  ;;  %677 = vmatmul.bf16.vlgmr.msra.gmra.mxu2 %v1191_v25  ;;  %v1142_v24 = vld [vmem:[%s1531_s18 + $0x60] sm:$0xf]  ;;  %v1372_v25 = vld [vmem:[%s1531_s18 + $0x64] sm:$0xf0] }
  0x2c   : > { %751 = vmatmul.bf16.vlgmr.msra.gmra.mxu1 %v1099_v26  ;;  %816 = vmatmul.bf16.vlgmr.msra.gmra.mxu3 %v1203_v27  ;;  %v1238_v26 = vld [vmem:[%s1531_s18 + $0x120] sm:$0xf]  ;;  %v1396_v27 = vld [vmem:[%s1531_s18 + $0x124] sm:$0xf0]  ;;  %v1143_v32 = vor.u32 %v1372_v25, %v1142_v24  ;;  %v1171_v24 = vor.u32 %v1377_v13, %v1168_v14  ;;  %v1275_v25 = vor.u32 %v1403_v16, %v1272_v17  ;;  %v1278_v16 = vld [vmem:[%s1531_s18 + $0x170] sm:$0xf] }
  0x2d   : > { %v1239_v33 = vor.u32 %v1396_v27, %v1238_v26  ;;  %v1406_v17 = vld [vmem:[%s1531_s18 + $0x174] sm:$0xf0] }
  0x3b   : > { %622 = vmatmul.bf16.gmra.mxu0 %v1103_v36  ;;  %682 = vmatmul.bf16.gmra.mxu2 %v1199_v37  ;;  %v1150_v36 = vld [vmem:[%s1531_s18 + $0x70] sm:$0xf]  ;;  %v1374_v37 = vld [vmem:[%s1531_s18 + $0x74] sm:$0xf0] }
  0x3c   : > { %756 = vmatmul.bf16.gmra.mxu1 %v1107_v38  ;;  %821 = vmatmul.bf16.gmra.mxu3 %v1211_v39  ;;  %v1246_v38 = vld [vmem:[%s1531_s18 + $0x130] sm:$0xf]  ;;  %v1398_v39 = vld [vmem:[%s1531_s18 + $0x134] sm:$0xf0]  ;;  %v1151_v44 = vor.u32 %v1374_v37, %v1150_v36 }
  0x3d   : > { %v1247_v45 = vor.u32 %v1398_v39, %v1246_v38  ;;  %v1174_v38 = vld [vmem:[%s1531_s18 + $0xa0] sm:$0xf] }
  0x4b   : > { %627 = vmatmul.bf16.gmra.mxu0 %v1111_v48  ;;  %687 = vmatmul.bf16.gmra.mxu2 %v1207_v49  ;;  %v1609_v48 = vld [vmem:[%s1814_s2] ss:$0 sm:$0xff] }
  0x4c   : > { %761 = vmatmul.bf16.gmra.mxu1 %v1115_v50  ;;  %826 = vmatmul.bf16.gmra.mxu3 %v1219_v51  ;;  %v1158_v49 = vld [vmem:[%s1531_s18 + $0x80] sm:$0xf]  ;;  %v1376_v50 = vld [vmem:[%s1531_s18 + $0x84] sm:$0xf0] }
  0x4d   : > { %v1254_v51 = vld [vmem:[%s1531_s18 + $0x140] sm:$0xf]  ;;  %v1159_v57 = vor.u32 %v1376_v50, %v1158_v49  ;;  %v1405_v49 = vld [vmem:[%s1531_s18 + $0x174] sm:$0xf]  ;;  %v1280_v50 = vld [vmem:[%s1531_s18 + $0x178] sm:$0xf0] }
  0x4e   : > { %v1255_v58 = vor.u32 %v1400_v52, %v1254_v51 }
  0x5b   : > { %632 = vmatmul.bf16.gmra.mxu0 %v1119_v60  ;;  %692 = vmatmul.bf16.gmra.mxu2 %v1215_v61  ;;  %v1163_v60 = vor.u32 %v1375_v53, %v1160_v54  ;;  %v1267_v61 = vor.u32 %v1401_v55, %v1264_v56  ;;  %v1175_v54 = vor.u32 %v1380_v41, %v1174_v38 }
  0x5c   : > { %766 = vmatmul.bf16.gmra.mxu1 %v1123_v62  ;;  %831 = vmatmul.bf16.gmra.mxu3 %v1227_v63  ;;  %v1271_v55 = vor.u32 %v1404_v43, %v1270_v42 }
  0x6b   : > { %637 = vmatmul.bf16.gmra.mxu0 %v1127_v8  ;;  %697 = vmatmul.bf16.gmra.mxu2 %v1223_v9  ;;  %v1166_v9 = vld [vmem:[%s1531_s18 + $0x90] sm:$0xf] }
  0x6c   : > { %771 = vmatmul.bf16.gmra.mxu1 %v1131_v10  ;;  %836 = vmatmul.bf16.gmra.mxu3 %v1235_v11  ;;  %v1378_v10 = vld [vmem:[%s1531_s18 + $0x94] sm:$0xf0]  ;;  %v1262_v11 = vld [vmem:[%s1531_s18 + $0x150] sm:$0xf] }
  0x7b   : > { %642 = vmatmul.bf16.gmra.mxu0 %v1135_v20  ;;  %702 = vmatmul.bf16.gmra.mxu2 %v1231_v21  ;;  %v1167_v20 = vor.u32 %v1378_v10, %v1166_v9  ;;  %v1263_v21 = vor.u32 %v1402_v12, %v1262_v11  ;;  %v1182_v12 = vld [vmem:[%s1531_s18 + $0xb0] sm:$0xf] }
  0x7c   : > { %776 = vmatmul.bf16.gmra.mxu1 %v1139_v22  ;;  %841 = vmatmul.bf16.gmra.mxu3 %v1243_v23 }
  0x8b   : > { %647 = vmatmul.bf16.gmra.mxu0 %v1143_v32  ;;  %707 = vmatmul.bf16.gmra.mxu2 %v1239_v33 }
  0x8c   : > { %781 = vmatmul.bf16.gmra.mxu1 %v1147_v34  ;;  %846 = vmatmul.bf16.gmra.mxu3 %v1251_v35 }
  0x9b   : > { %652 = vmatmul.bf16.gmra.mxu0 %v1151_v44  ;;  %712 = vmatmul.bf16.gmra.mxu2 %v1247_v45  ;;  %v1379_v44 = vld [vmem:[%s1531_s18 + $0xa4] sm:$0xf]  ;;  %v1176_v45 = vld [vmem:[%s1531_s18 + $0xa8] sm:$0xf0] }
  0x9c   : > { %786 = vmatmul.bf16.gmra.mxu1 %v1155_v46  ;;  %851 = vmatmul.bf16.gmra.mxu3 %v1259_v47 }
  0xa8   : > { %v618_v59 = vpop.f32.mrf.mxu0 }
  0xa9   : > { %v619_v62 = vadd.f32 %v1609_v48, %v618_v59  ;;  %v752_v63 = vpop.f32.mrf.mxu1  ;;  %v1283_v59 = vor.u32 %v1405_v49, %v1280_v50 }
  0xab   : > { %v753_v0 = vadd.f32 %v752_v63, %v619_v62  ;;  %657 = vmatmul.bf16.gmra.mxu0 %v1159_v57  ;;  %717 = vmatmul.bf16.gmra.mxu2 %v1255_v58  ;;  %v1179_v58 = vor.u32 %v1379_v44, %v1176_v45 }
  0xac   : > { %791 = vmatmul.bf16.gmra.mxu1 %v1163_v60  ;;  %856 = vmatmul.bf16.gmra.mxu3 %v1267_v61 }
  0xad   : > { %v877_v1 = vmax.f32 %v753_v0, 0.0 }
  0xae   : > { %v1626_v2 = vpop.f32.mrf.mxu2 }
  0xaf   : > { %v927_v3 = vpack.c.bf16 %v877_v1, %v877_v1  ;;  %v817_v4 = vpop.f32.mrf.mxu3 }
  0xb0   : > { %v620_v5 = vpop.f32.mrf.mxu0 }
  0xb1   : > { %978 = vst.msk [vmem:[%s1624_s4] sm:$0xf] %vm977_vm0, %v927_v3  ;;  %v621_v6 = vadd.f32 %v1609_v48, %v620_v5  ;;  %v754_v7 = vpop.f32.mrf.mxu1 }
  0xb3   : > { %v755_v8 = vadd.f32 %v754_v7, %v621_v6 }
  0xb5   : > { %v878_v15 = vmax.f32 %v755_v8, 0.0 }
  0xb6   : > { %v1639_v18 = vpop.f32.mrf.mxu2 }
  0xb7   : > { %v928_v19 = vpack.c.bf16 %v878_v15, %v878_v15  ;;  %v819_v22 = vpop.f32.mrf.mxu3  ;;  %v1382_v15 = vld [vmem:[%s1531_s18 + $0xb4] sm:$0xf0] }
  0xb8   : > { %v623_v23 = vpop.f32.mrf.mxu0 }
  0xb9   : > { %979 = vst.msk [vmem:[%s1624_s4 + $0x4] sm:$0xf] %vm977_vm0, %v928_v19  ;;  %v624_v26 = vadd.f32 %v1609_v48, %v623_v23  ;;  %v757_v27 = vpop.f32.mrf.mxu1  ;;  %v1381_v19 = vld [vmem:[%s1531_s18 + $0xb4] sm:$0xf]  ;;  %v1407_v23 = vld [vmem:[%s1531_s18 + $0x184] sm:$0xf] }
  0xbb   : > { %v758_v28 = vadd.f32 %v757_v27, %v624_v26  ;;  %662 = vmatmul.bf16.gmra.mxu0 %v1167_v20  ;;  %722 = vmatmul.bf16.gmra.mxu2 %v1263_v21  ;;  %v1184_v20 = vld [vmem:[%s1531_s18 + $0xb8] sm:$0xf0] }
  0xbc   : > { %796 = vmatmul.bf16.gmra.mxu1 %v1171_v24  ;;  %861 = vmatmul.bf16.gmra.mxu3 %v1275_v25  ;;  %v1288_v24 = vld [vmem:[%s1531_s18 + $0x188] sm:$0xf0] }
  0xbd   : > { %v879_v29 = vmax.f32 %v758_v28, 0.0  ;;  %v1183_v28 = vor.u32 %v1382_v15, %v1182_v12 }
  0xbe   : > { %v683_v30 = vpop.f32.mrf.mxu2 }
  0xbf   : > { %v929_v31 = vpack.c.bf16 %v879_v29, %v879_v29  ;;  %v684_v32 = vadd.f32 %v1609_v48, %v683_v30  ;;  %v822_v33 = vpop.f32.mrf.mxu3  ;;  %v1279_v29 = vor.u32 %v1406_v17, %v1278_v16 }
  0xc0   : > { %v625_v34 = vpop.f32.mrf.mxu0 }
  0xc1   : > { %980 = vst.msk [vmem:[%s1624_s4 + $0x8] sm:$0xf] %vm977_vm0, %v929_v31  ;;  %v818_v35 = vadd.f32 %v817_v4, %v684_v32  ;;  %v626_v36 = vadd.f32 %v1609_v48, %v625_v34  ;;  %v759_v37 = vpop.f32.mrf.mxu1  ;;  %v1187_v32 = vor.u32 %v1381_v19, %v1184_v20 }
  0xc3   : > { %v903_v39 = vmax.f32 %v818_v35, 0.0  ;;  %v760_v40 = vadd.f32 %v759_v37, %v626_v36 }
  0xc5   : > { %v953_v46 = vpack.c.bf16 %v903_v39, %v903_v39  ;;  %v880_v47 = vmax.f32 %v760_v40, 0.0 }
  0xc6   : > { %v685_v51 = vpop.f32.mrf.mxu2 }
  0xc7   : > { %1004 = vst.msk [vmem:[%s1624_s4 + $0x68] sm:$0xf] %vm977_vm0, %v953_v46  ;;  %v930_v52 = vpack.c.bf16 %v880_v47, %v880_v47  ;;  %v686_v53 = vadd.f32 %v1609_v48, %v685_v51  ;;  %v824_v56 = vpop.f32.mrf.mxu3 }
  0xc8   : > { %v628_v57 = vpop.f32.mrf.mxu0 }
  0xc9   : > { %981 = vst.msk [vmem:[%s1624_s4 + $0xc] sm:$0xf] %vm977_vm0, %v930_v52  ;;  %v820_v60 = vadd.f32 %v819_v22, %v686_v53  ;;  %v629_v61 = vadd.f32 %v1609_v48, %v628_v57  ;;  %v762_v62 = vpop.f32.mrf.mxu1  ;;  %v1286_v52 = vld [vmem:[%s1531_s18 + $0x180] sm:$0xf]  ;;  %v1408_v53 = vld [vmem:[%s1531_s18 + $0x184] sm:$0xf0] }
  0xca   : > { %v1192_v57 = vld [vmem:[%s1531_s18 + $0xc8] sm:$0xf0] }
  0xcb   : > { %v904_v63 = vmax.f32 %v820_v60, 0.0  ;;  %v763_v0 = vadd.f32 %v762_v62, %v629_v61  ;;  %667 = vmatmul.bf16.gmra.mxu0 %v1175_v54  ;;  %727 = vmatmul.bf16.gmra.mxu2 %v1271_v55  ;;  %v1287_v61 = vor.u32 %v1408_v53, %v1286_v52 }
  0xcc   : > { %801 = vmatmul.bf16.gmra.mxu1 %v1179_v58  ;;  %866 = vmatmul.bf16.gmra.mxu3 %v1283_v59 }
  0xcd   : > { %v954_v1 = vpack.c.bf16 %v904_v63, %v904_v63  ;;  %v881_v3 = vmax.f32 %v763_v0, 0.0 }
  0xce   : > { %v688_v4 = vpop.f32.mrf.mxu2 }
  0xcf   : > { %1005 = vst.msk [vmem:[%s1624_s4 + $0x6c] sm:$0xf] %vm977_vm0, %v954_v1  ;;  %v931_v5 = vpack.c.bf16 %v881_v3, %v881_v3  ;;  %v689_v6 = vadd.f32 %v1609_v48, %v688_v4  ;;  %v827_v7 = vpop.f32.mrf.mxu3 }
  0xd0   : > { %v630_v8 = vpop.f32.mrf.mxu0 }
  0xd1   : > { %982 = vst.msk [vmem:[%s1624_s4 + $0x10] sm:$0xf] %vm977_vm0, %v931_v5  ;;  %v823_v9 = vadd.f32 %v822_v33, %v689_v6  ;;  %v631_v10 = vadd.f32 %v1609_v48, %v630_v8  ;;  %v764_v11 = vpop.f32.mrf.mxu1  ;;  %v1291_v33 = vor.u32 %v1407_v23, %v1288_v24 }
  0xd3   : > { %v905_v13 = vmax.f32 %v823_v9, 0.0  ;;  %v765_v14 = vadd.f32 %v764_v11, %v631_v10 }
  0xd5   : > { %v955_v21 = vpack.c.bf16 %v905_v13, %v905_v13  ;;  %v882_v22 = vmax.f32 %v765_v14, 0.0 }
  0xd6   : > { %v690_v25 = vpop.f32.mrf.mxu2 }
  0xd7   : > { %1006 = vst.msk [vmem:[%s1624_s4 + $0x70] sm:$0xf] %vm977_vm0, %v955_v21  ;;  %v932_v26 = vpack.c.bf16 %v882_v22, %v882_v22  ;;  %v691_v27 = vadd.f32 %v1609_v48, %v690_v25  ;;  %v829_v30 = vpop.f32.mrf.mxu3 }
  0xd8   : > { %v633_v31 = vpop.f32.mrf.mxu0 }
  0xd9   : > { %983 = vst.msk [vmem:[%s1624_s4 + $0x14] sm:$0xf] %vm977_vm0, %v932_v26  ;;  %v825_v34 = vadd.f32 %v824_v56, %v691_v27  ;;  %v634_v35 = vadd.f32 %v1609_v48, %v633_v31  ;;  %v767_v36 = vpop.f32.mrf.mxu1  ;;  %v1383_v56 = vld [vmem:[%s1531_s18 + $0xc4] sm:$0xf] }
  0xda   : > { %v1195_v0 = vor.u32 %v1383_v56, %v1192_v57 }
  0xdb   : > { %v906_v37 = vmax.f32 %v825_v34, 0.0  ;;  %v768_v38 = vadd.f32 %v767_v36, %v634_v35  ;;  %672 = vmatmul.bf16.gmra.mxu0 %v1183_v28  ;;  %732 = vmatmul.bf16.gmra.mxu2 %v1279_v29 }
  0xdc   : > { %806 = vmatmul.bf16.gmra.mxu1 %v1187_v32  ;;  %871 = vmatmul.bf16.gmra.mxu3 %v1291_v33 }
  0xdd   : > { %v956_v39 = vpack.c.bf16 %v906_v37, %v906_v37  ;;  %v883_v40 = vmax.f32 %v768_v38, 0.0 }
  0xde   : > { %v693_v41 = vpop.f32.mrf.mxu2 }
  0xdf   : > { %1007 = vst.msk [vmem:[%s1624_s4 + $0x74] sm:$0xf] %vm977_vm0, %v956_v39  ;;  %v933_v42 = vpack.c.bf16 %v883_v40, %v883_v40  ;;  %v694_v43 = vadd.f32 %v1609_v48, %v693_v41  ;;  %v832_v44 = vpop.f32.mrf.mxu3 }
  0xe0   : > { %v635_v45 = vpop.f32.mrf.mxu0 }
  0xe1   : > { %984 = vst.msk [vmem:[%s1624_s4 + $0x18] sm:$0xf] %vm977_vm0, %v933_v42  ;;  %v828_v46 = vadd.f32 %v827_v7, %v694_v43  ;;  %v636_v47 = vadd.f32 %v1609_v48, %v635_v45  ;;  %v769_v49 = vpop.f32.mrf.mxu1 }
  0xe3   : > { %v907_v50 = vmax.f32 %v828_v46, 0.0  ;;  %v770_v51 = vadd.f32 %v769_v49, %v636_v47 }
  0xe5   : > { %v957_v54 = vpack.c.bf16 %v907_v50, %v907_v50  ;;  %v884_v55 = vmax.f32 %v770_v51, 0.0 }
  0xe6   : > { %v695_v58 = vpop.f32.mrf.mxu2 }
  0xe7   : > { %1008 = vst.msk [vmem:[%s1624_s4 + $0x78] sm:$0xf] %vm977_vm0, %v957_v54  ;;  %v934_v59 = vpack.c.bf16 %v884_v55, %v884_v55  ;;  %v696_v60 = vadd.f32 %v1609_v48, %v695_v58  ;;  %v834_v62 = vpop.f32.mrf.mxu3 }
  0xe8   : > { %v638_v63 = vpop.f32.mrf.mxu0 }
  0xe9   : > { %985 = vst.msk [vmem:[%s1624_s4 + $0x1c] sm:$0xf] %vm977_vm0, %v934_v59  ;;  %v830_v1 = vadd.f32 %v829_v30, %v696_v60  ;;  %v639_v3 = vadd.f32 %v1609_v48, %v638_v63  ;;  %v772_v4 = vpop.f32.mrf.mxu1 }
  0xeb   : > { %v908_v5 = vmax.f32 %v830_v1, 0.0  ;;  %v773_v6 = vadd.f32 %v772_v4, %v639_v3  ;;  %737 = vmatmul.bf16.gmra.mxu2 %v1287_v61 }
  0xec   : > { %811 = vmatmul.bf16.gmra.mxu1 %v1195_v0 }
  0xed   : > { %v958_v7 = vpack.c.bf16 %v908_v5, %v908_v5  ;;  %v885_v8 = vmax.f32 %v773_v6, 0.0 }
  0xee   : > { %v698_v9 = vpop.f32.mrf.mxu2 }
  0xef   : > { %1009 = vst.msk [vmem:[%s1624_s4 + $0x7c] sm:$0xf] %vm977_vm0, %v958_v7  ;;  %v935_v10 = vpack.c.bf16 %v885_v8, %v885_v8  ;;  %v699_v11 = vadd.f32 %v1609_v48, %v698_v9  ;;  %v837_v12 = vpop.f32.mrf.mxu3 }
  0xf0   : > { %v640_v13 = vpop.f32.mrf.mxu0 }
  0xf1   : > { %986 = vst.msk [vmem:[%s1624_s4 + $0x20] sm:$0xf] %vm977_vm0, %v935_v10  ;;  %v833_v14 = vadd.f32 %v832_v44, %v699_v11  ;;  %v641_v15 = vadd.f32 %v1609_v48, %v640_v13  ;;  %v774_v16 = vpop.f32.mrf.mxu1 }
  0xf3   : > { %v909_v17 = vmax.f32 %v833_v14, 0.0  ;;  %v775_v19 = vadd.f32 %v774_v16, %v641_v15 }
  0xf5   : > { %v959_v20 = vpack.c.bf16 %v909_v17, %v909_v17  ;;  %v886_v21 = vmax.f32 %v775_v19, 0.0 }
  0xf6   : > { %v700_v22 = vpop.f32.mrf.mxu2 }
  0xf7   : > { %1010 = vst.msk [vmem:[%s1624_s4 + $0x80] sm:$0xf] %vm977_vm0, %v959_v20  ;;  %v936_v23 = vpack.c.bf16 %v886_v21, %v886_v21  ;;  %v701_v24 = vadd.f32 %v1609_v48, %v700_v22  ;;  %v839_v25 = vpop.f32.mrf.mxu3 }
  0xf8   : > { %v643_v26 = vpop.f32.mrf.mxu0 }
  0xf9   : > { %987 = vst.msk [vmem:[%s1624_s4 + $0x24] sm:$0xf] %vm977_vm0, %v936_v23  ;;  %v835_v27 = vadd.f32 %v834_v62, %v701_v24  ;;  %v644_v28 = vadd.f32 %v1609_v48, %v643_v26  ;;  %v777_v29 = vpop.f32.mrf.mxu1 }
  0xfb   : > { %v910_v30 = vmax.f32 %v835_v27, 0.0  ;;  %v778_v31 = vadd.f32 %v777_v29, %v644_v28 }
  0xfd   : > { %v960_v32 = vpack.c.bf16 %v910_v30, %v910_v30  ;;  %v887_v33 = vmax.f32 %v778_v31, 0.0 }
  0xfe   : > { %v703_v34 = vpop.f32.mrf.mxu2 }
  0xff   : > { %1011 = vst.msk [vmem:[%s1624_s4 + $0x84] sm:$0xf] %vm977_vm0, %v960_v32  ;;  %v937_v35 = vpack.c.bf16 %v887_v33, %v887_v33  ;;  %v704_v36 = vadd.f32 %v1609_v48, %v703_v34  ;;  %v842_v37 = vpop.f32.mrf.mxu3 }
 0x100   : > { %v645_v38 = vpop.f32.mrf.mxu0 }
 0x101   : > { %988 = vst.msk [vmem:[%s1624_s4 + $0x28] sm:$0xf] %vm977_vm0, %v937_v35  ;;  %v838_v39 = vadd.f32 %v837_v12, %v704_v36  ;;  %v646_v40 = vadd.f32 %v1609_v48, %v645_v38  ;;  %v779_v41 = vpop.f32.mrf.mxu1 }
 0x103   : > { %v911_v42 = vmax.f32 %v838_v39, 0.0  ;;  %v780_v43 = vadd.f32 %v779_v41, %v646_v40 }
 0x105   : > { %v961_v44 = vpack.c.bf16 %v911_v42, %v911_v42  ;;  %v888_v45 = vmax.f32 %v780_v43, 0.0 }
 0x106   : > { %v705_v46 = vpop.f32.mrf.mxu2 }
 0x107   : > { %1012 = vst.msk [vmem:[%s1624_s4 + $0x88] sm:$0xf] %vm977_vm0, %v961_v44  ;;  %v938_v47 = vpack.c.bf16 %v888_v45, %v888_v45  ;;  %v706_v49 = vadd.f32 %v1609_v48, %v705_v46  ;;  %v844_v50 = vpop.f32.mrf.mxu3 }
 0x108   : > { %v648_v51 = vpop.f32.mrf.mxu0 }
 0x109   : > { %989 = vst.msk [vmem:[%s1624_s4 + $0x2c] sm:$0xf] %vm977_vm0, %v938_v47  ;;  %v840_v52 = vadd.f32 %v839_v25, %v706_v49  ;;  %v649_v53 = vadd.f32 %v1609_v48, %v648_v51  ;;  %v782_v54 = vpop.f32.mrf.mxu1 }
 0x10b   : > { %v912_v55 = vmax.f32 %v840_v52, 0.0  ;;  %v783_v56 = vadd.f32 %v782_v54, %v649_v53 }
 0x10d   : > { %v962_v57 = vpack.c.bf16 %v912_v55, %v912_v55  ;;  %v889_v58 = vmax.f32 %v783_v56, 0.0 }
 0x10e   : > { %v708_v59 = vpop.f32.mrf.mxu2 }
 0x10f   : > { %1013 = vst.msk [vmem:[%s1624_s4 + $0x8c] sm:$0xf] %vm977_vm0, %v962_v57  ;;  %v939_v60 = vpack.c.bf16 %v889_v58, %v889_v58  ;;  %v709_v61 = vadd.f32 %v1609_v48, %v708_v59  ;;  %v847_v62 = vpop.f32.mrf.mxu3 }
 0x110   : > { %v650_v63 = vpop.f32.mrf.mxu0 }
 0x111   : > { %990 = vst.msk [vmem:[%s1624_s4 + $0x30] sm:$0xf] %vm977_vm0, %v939_v60  ;;  %v843_v0 = vadd.f32 %v842_v37, %v709_v61  ;;  %v651_v1 = vadd.f32 %v1609_v48, %v650_v63  ;;  %v784_v3 = vpop.f32.mrf.mxu1 }
 0x113   : > { %v913_v4 = vmax.f32 %v843_v0, 0.0  ;;  %v785_v5 = vadd.f32 %v784_v3, %v651_v1 }
 0x115   : > { %v963_v6 = vpack.c.bf16 %v913_v4, %v913_v4  ;;  %v890_v7 = vmax.f32 %v785_v5, 0.0 }
 0x116   : > { %v710_v8 = vpop.f32.mrf.mxu2 }
 0x117   : > { %1014 = vst.msk [vmem:[%s1624_s4 + $0x90] sm:$0xf] %vm977_vm0, %v963_v6  ;;  %v940_v9 = vpack.c.bf16 %v890_v7, %v890_v7  ;;  %v711_v10 = vadd.f32 %v1609_v48, %v710_v8  ;;  %v849_v11 = vpop.f32.mrf.mxu3 }
 0x118   : > { %v653_v12 = vpop.f32.mrf.mxu0 }
 0x119   : > { %991 = vst.msk [vmem:[%s1624_s4 + $0x34] sm:$0xf] %vm977_vm0, %v940_v9  ;;  %v845_v13 = vadd.f32 %v844_v50, %v711_v10  ;;  %v654_v14 = vadd.f32 %v1609_v48, %v653_v12  ;;  %v787_v15 = vpop.f32.mrf.mxu1 }
 0x11b   : > { %v914_v16 = vmax.f32 %v845_v13, 0.0  ;;  %v788_v17 = vadd.f32 %v787_v15, %v654_v14 }
 0x11d   : > { %v964_v19 = vpack.c.bf16 %v914_v16, %v914_v16  ;;  %v891_v20 = vmax.f32 %v788_v17, 0.0 }
 0x11e   : > { %v713_v21 = vpop.f32.mrf.mxu2 }
 0x11f   : > { %1015 = vst.msk [vmem:[%s1624_s4 + $0x94] sm:$0xf] %vm977_vm0, %v964_v19  ;;  %v941_v22 = vpack.c.bf16 %v891_v20, %v891_v20  ;;  %v714_v23 = vadd.f32 %v1609_v48, %v713_v21  ;;  %v852_v24 = vpop.f32.mrf.mxu3 }
 0x120   : > { %v655_v25 = vpop.f32.mrf.mxu0 }
 0x121   : > { %992 = vst.msk [vmem:[%s1624_s4 + $0x38] sm:$0xf] %vm977_vm0, %v941_v22  ;;  %v848_v26 = vadd.f32 %v847_v62, %v714_v23  ;;  %v656_v27 = vadd.f32 %v1609_v48, %v655_v25  ;;  %v789_v28 = vpop.f32.mrf.mxu1 }
 0x123   : > { %v915_v29 = vmax.f32 %v848_v26, 0.0  ;;  %v790_v30 = vadd.f32 %v789_v28, %v656_v27 }
 0x125   : > { %v965_v31 = vpack.c.bf16 %v915_v29, %v915_v29  ;;  %v892_v32 = vmax.f32 %v790_v30, 0.0 }
 0x126   : > { %v715_v33 = vpop.f32.mrf.mxu2 }
 0x127   : > { %1016 = vst.msk [vmem:[%s1624_s4 + $0x98] sm:$0xf] %vm977_vm0, %v965_v31  ;;  %v942_v34 = vpack.c.bf16 %v892_v32, %v892_v32  ;;  %v716_v35 = vadd.f32 %v1609_v48, %v715_v33  ;;  %v854_v37 = vpop.f32.mrf.mxu3 }
 0x128   : > { %v658_v36 = vpop.f32.mrf.mxu0 }
 0x129   : > { %993 = vst.msk [vmem:[%s1624_s4 + $0x3c] sm:$0xf] %vm977_vm0, %v942_v34  ;;  %v850_v38 = vadd.f32 %v849_v11, %v716_v35  ;;  %v659_v39 = vadd.f32 %v1609_v48, %v658_v36  ;;  %v792_v40 = vpop.f32.mrf.mxu1 }
 0x12b   : > { %v916_v41 = vmax.f32 %v850_v38, 0.0  ;;  %v793_v42 = vadd.f32 %v792_v40, %v659_v39 }
 0x12d   : > { %v966_v43 = vpack.c.bf16 %v916_v41, %v916_v41  ;;  %v893_v44 = vmax.f32 %v793_v42, 0.0 }
 0x12e   : > { %v718_v45 = vpop.f32.mrf.mxu2 }
 0x12f   : > { %1017 = vst.msk [vmem:[%s1624_s4 + $0x9c] sm:$0xf] %vm977_vm0, %v966_v43  ;;  %v943_v46 = vpack.c.bf16 %v893_v44, %v893_v44  ;;  %v719_v47 = vadd.f32 %v1609_v48, %v718_v45  ;;  %v857_v53 = vpop.f32.mrf.mxu3 }
 0x130   : > { %v660_v49 = vpop.f32.mrf.mxu0 }
 0x131   : > { %994 = vst.msk [vmem:[%s1624_s4 + $0x40] sm:$0xf] %vm977_vm0, %v943_v46  ;;  %v853_v50 = vadd.f32 %v852_v24, %v719_v47  ;;  %v661_v51 = vadd.f32 %v1609_v48, %v660_v49  ;;  %v794_v52 = vpop.f32.mrf.mxu1 }
 0x133   : > { %v917_v54 = vmax.f32 %v853_v50, 0.0  ;;  %v795_v55 = vadd.f32 %v794_v52, %v661_v51 }
 0x135   : > { %v967_v56 = vpack.c.bf16 %v917_v54, %v917_v54  ;;  %v894_v57 = vmax.f32 %v795_v55, 0.0 }
 0x136   : > { %v720_v58 = vpop.f32.mrf.mxu2 }
 0x137   : > { %1018 = vst.msk [vmem:[%s1624_s4 + $0xa0] sm:$0xf] %vm977_vm0, %v967_v56  ;;  %v944_v59 = vpack.c.bf16 %v894_v57, %v894_v57  ;;  %v721_v60 = vadd.f32 %v1609_v48, %v720_v58  ;;  %v859_v4 = vpop.f32.mrf.mxu3 }
 0x138   : > { %v663_v61 = vpop.f32.mrf.mxu0 }
 0x139   : > { %995 = vst.msk [vmem:[%s1624_s4 + $0x44] sm:$0xf] %vm977_vm0, %v944_v59  ;;  %v855_v62 = vadd.f32 %v854_v37, %v721_v60  ;;  %v664_v63 = vadd.f32 %v1609_v48, %v663_v61  ;;  %v797_v0 = vpop.f32.mrf.mxu1 }
 0x13b   : > { %v918_v1 = vmax.f32 %v855_v62, 0.0  ;;  %v798_v3 = vadd.f32 %v797_v0, %v664_v63 }
 0x13d   : > { %v968_v5 = vpack.c.bf16 %v918_v1, %v918_v1  ;;  %v895_v6 = vmax.f32 %v798_v3, 0.0 }
 0x13e   : > { %v723_v7 = vpop.f32.mrf.mxu2 }
 0x13f   : > { %1019 = vst.msk [vmem:[%s1624_s4 + $0xa4] sm:$0xf] %vm977_vm0, %v968_v5  ;;  %v945_v8 = vpack.c.bf16 %v895_v6, %v895_v6  ;;  %v724_v9 = vadd.f32 %v1609_v48, %v723_v7  ;;  %v862_v20 = vpop.f32.mrf.mxu3 }
 0x140   : > { %v665_v10 = vpop.f32.mrf.mxu0 }
 0x141   : > { %996 = vst.msk [vmem:[%s1624_s4 + $0x48] sm:$0xf] %vm977_vm0, %v945_v8  ;;  %v858_v11 = vadd.f32 %v857_v53, %v724_v9  ;;  %v666_v12 = vadd.f32 %v1609_v48, %v665_v10  ;;  %v799_v13 = vpop.f32.mrf.mxu1  ;;  %v679_v8 = vadd.f32 %v1609_v48, %v1626_v2  ;;  %v681_v2 = vadd.f32 %v1609_v48, %v1639_v18 }
 0x143   : > { %v919_v14 = vmax.f32 %v858_v11, 0.0  ;;  %v800_v15 = vadd.f32 %v799_v13, %v666_v12 }
 0x145   : > { %v969_v16 = vpack.c.bf16 %v919_v14, %v919_v14  ;;  %v896_v17 = vmax.f32 %v800_v15, 0.0 }
 0x146   : > { %v725_v19 = vpop.f32.mrf.mxu2 }
 0x147   : > { %1020 = vst.msk [vmem:[%s1624_s4 + $0xa8] sm:$0xf] %vm977_vm0, %v969_v16  ;;  %v946_v21 = vpack.c.bf16 %v896_v17, %v896_v17  ;;  %v726_v22 = vadd.f32 %v1609_v48, %v725_v19  ;;  %v864_v35 = vpop.f32.mrf.mxu3 }
 0x148   : > { %v668_v23 = vpop.f32.mrf.mxu0 }
 0x149   : > { %997 = vst.msk [vmem:[%s1624_s4 + $0x4c] sm:$0xf] %vm977_vm0, %v946_v21  ;;  %v860_v24 = vadd.f32 %v859_v4, %v726_v22  ;;  %v669_v25 = vadd.f32 %v1609_v48, %v668_v23  ;;  %v802_v26 = vpop.f32.mrf.mxu1 }
 0x14b   : > { %v920_v27 = vmax.f32 %v860_v24, 0.0  ;;  %v803_v28 = vadd.f32 %v802_v26, %v669_v25 }
 0x14d   : > { %v970_v29 = vpack.c.bf16 %v920_v27, %v920_v27  ;;  %v897_v30 = vmax.f32 %v803_v28, 0.0 }
 0x14e   : > { %v728_v31 = vpop.f32.mrf.mxu2 }
 0x14f   : > { %1021 = vst.msk [vmem:[%s1624_s4 + $0xac] sm:$0xf] %vm977_vm0, %v970_v29  ;;  %v947_v32 = vpack.c.bf16 %v897_v30, %v897_v30  ;;  %v729_v33 = vadd.f32 %v1609_v48, %v728_v31  ;;  %v867_v51 = vpop.f32.mrf.mxu3 }
 0x150   : > { %v670_v34 = vpop.f32.mrf.mxu0 }
 0x151   : > { %998 = vst.msk [vmem:[%s1624_s4 + $0x50] sm:$0xf] %vm977_vm0, %v947_v32  ;;  %v863_v36 = vadd.f32 %v862_v20, %v729_v33  ;;  %v671_v37 = vadd.f32 %v1609_v48, %v670_v34  ;;  %v804_v38 = vpop.f32.mrf.mxu1 }
 0x153   : > { %v921_v39 = vmax.f32 %v863_v36, 0.0  ;;  %v805_v40 = vadd.f32 %v804_v38, %v671_v37 }
 0x155   : > { %v971_v41 = vpack.c.bf16 %v921_v39, %v921_v39  ;;  %v898_v42 = vmax.f32 %v805_v40, 0.0 }
 0x156   : > { %v730_v43 = vpop.f32.mrf.mxu2 }
 0x157   : > { %1022 = vst.msk [vmem:[%s1624_s4 + $0xb0] sm:$0xf] %vm977_vm0, %v971_v41  ;;  %v948_v44 = vpack.c.bf16 %v898_v42, %v898_v42  ;;  %v731_v45 = vadd.f32 %v1609_v48, %v730_v43  ;;  %v869_v1 = vpop.f32.mrf.mxu3 }
 0x158   : > { %v673_v46 = vpop.f32.mrf.mxu0 }
 0x159   : > { %999 = vst.msk [vmem:[%s1624_s4 + $0x54] sm:$0xf] %vm977_vm0, %v948_v44  ;;  %v865_v47 = vadd.f32 %v864_v35, %v731_v45  ;;  %v674_v49 = vadd.f32 %v1609_v48, %v673_v46  ;;  %v807_v50 = vpop.f32.mrf.mxu1 }
 0x15b   : > { %v922_v52 = vmax.f32 %v865_v47, 0.0  ;;  %v808_v53 = vadd.f32 %v807_v50, %v674_v49 }
 0x15d   : > { %v972_v54 = vpack.c.bf16 %v922_v52, %v922_v52  ;;  %v899_v55 = vmax.f32 %v808_v53, 0.0 }
 0x15e   : > { %v733_v56 = vpop.f32.mrf.mxu2 }
 0x15f   : > { %1023 = vst.msk [vmem:[%s1624_s4 + $0xb4] sm:$0xf] %vm977_vm0, %v972_v54  ;;  %v949_v57 = vpack.c.bf16 %v899_v55, %v899_v55  ;;  %v734_v58 = vadd.f32 %v1609_v48, %v733_v56  ;;  %v872_v16 = vpop.f32.mrf.mxu3 }
 0x160   : > { %v675_v59 = vpop.f32.mrf.mxu0 }
 0x161   : > { %1000 = vst.msk [vmem:[%s1624_s4 + $0x58] sm:$0xf] %vm977_vm0, %v949_v57  ;;  %v868_v60 = vadd.f32 %v867_v51, %v734_v58  ;;  %v676_v61 = vadd.f32 %v1609_v48, %v675_v59  ;;  %v809_v62 = vpop.f32.mrf.mxu1 }
 0x163   : > { %v923_v63 = vmax.f32 %v868_v60, 0.0  ;;  %v810_v0 = vadd.f32 %v809_v62, %v676_v61 }
 0x165   : > { %v973_v3 = vpack.c.bf16 %v923_v63, %v923_v63  ;;  %v900_v4 = vmax.f32 %v810_v0, 0.0 }
 0x166   : > { %v735_v5 = vpop.f32.mrf.mxu2 }
 0x167   : > { %1024 = vst.msk [vmem:[%s1624_s4 + $0xb8] sm:$0xf] %vm977_vm0, %v973_v3  ;;  %v950_v6 = vpack.c.bf16 %v900_v4, %v900_v4  ;;  %v736_v7 = vadd.f32 %v1609_v48, %v735_v5  ;;  %v874_v29 = vpop.f32.mrf.mxu3 }
 0x169   : > { %1001 = vst.msk [vmem:[%s1624_s4 + $0x5c] sm:$0xf] %vm977_vm0, %v950_v6  ;;  %v870_v9 = vadd.f32 %v869_v1, %v736_v7  ;;  %v812_v10 = vpop.f32.mrf.mxu1 }
 0x16a   : > { %v813_v11 = vadd.f32 %v812_v10, %v679_v8 }
 0x16b   : > { %v924_v12 = vmax.f32 %v870_v9, 0.0 }
 0x16c   : > { %v901_v13 = vmax.f32 %v813_v11, 0.0 }
 0x16d   : > { %v974_v14 = vpack.c.bf16 %v924_v12, %v924_v12 }
 0x16e   : > { %v951_v15 = vpack.c.bf16 %v901_v13, %v901_v13  ;;  %v738_v17 = vpop.f32.mrf.mxu2 }
 0x16f   : > { %1025 = vst.msk [vmem:[%s1624_s4 + $0xbc] sm:$0xf] %vm977_vm0, %v974_v14  ;;  %v739_v19 = vadd.f32 %v1609_v48, %v738_v17 }
 0x170   : > { %1002 = vst.msk [vmem:[%s1624_s4 + $0x60] sm:$0xf] %vm977_vm0, %v951_v15 }
 0x171   : > { %v873_v20 = vadd.f32 %v872_v16, %v739_v19  ;;  %v814_v21 = vpop.f32.mrf.mxu1 }
 0x172   : > { %v815_v22 = vadd.f32 %v814_v21, %v681_v2 }
 0x173   : > { %v925_v23 = vmax.f32 %v873_v20, 0.0 }
 0x174   : > { %v902_v24 = vmax.f32 %v815_v22, 0.0 }
 0x175   : > { %v975_v25 = vpack.c.bf16 %v925_v23, %v925_v23 }
 0x176   : > { %v952_v26 = vpack.c.bf16 %v902_v24, %v902_v24  ;;  %v740_v27 = vpop.f32.mrf.mxu2 }
 0x177   : > { %1026 = vst.msk [vmem:[%s1624_s4 + $0xc0] sm:$0xf] %vm977_vm0, %v975_v25  ;;  %v741_v28 = vadd.f32 %v1609_v48, %v740_v27 }
 0x178   : > { %1003 = vst.msk [vmem:[%s1624_s4 + $0x64] sm:$0xf] %vm977_vm0, %v952_v26 }
 0x179   : > { %v875_v30 = vadd.f32 %v874_v29, %v741_v28 }
 0x17b   : > { %v926_v18 = vmax.f32 %v875_v30, 0.0 }
 0x17d   : > { %v976_v31 = vpack.c.bf16 %v926_v18, %v926_v18 }
 0x17f   : > { %1027 = vst.msk [vmem:[%s1624_s4 + $0xc4] sm:$0xf] %vm977_vm0, %v976_v31 }
 0x180 PF: > { %s13_s12 = sadd.s32 1, %s1456_s12  }
 0x181   : > { %p10_p4 = scmp.ge.s32.totalorder %s13_s12, 4  }
 0x183   :  { %12 = sbr.rel (!%p10_p4) target bundleno = 1 (0x1), region = 62 }

// kernel: forward.5
= control target key start
LH: loop header
LB: loop body
LE: loop exit
PB: predicated region body
PF: predicated region fallthrough
CT: control target
= control target key end

     0   :  { %vm824_vm0 = vcmask 519168   ;;  %vm845_vm1 = vcmask 516096   ;;  %s1683_s1 = inlined_call_operand.vmem [shape: bf16[512,64], index: 1, kind: input, shape index: {}]   ;;  %s1684_s2 = inlined_call_operand.vmem [shape: f32[1,64], index: 2, kind: input, shape index: {}]   ;;  %s1685_s0 = inlined_call_operand.vmem [shape: bf16[162,512], index: 0, kind: input, shape index: {}]   ;;  %s1686_s3 = inlined_call_operand.vmem [shape: bf16[162,64], index: 3, kind: output, shape index: {}]  }
   0x1   :  { %v1186_v0 = vld [vmem:[%s1683_s1 + $0x38] sm:$0xff]  ;;  %v1185_v4 = vld [vmem:[%s1683_s1 + $0x30] sm:$0xff]  ;;  %v1184_v8 = vld [vmem:[%s1683_s1 + $0x28] sm:$0xff] }
   0x2   :  { %v1194_v1 = vld [vmem:[%s1683_s1 + $0x78] sm:$0xff]  ;;  %530 = vmatpush.bf16.msra.mxu0 %v1186_v0  ;;  %v1193_v5 = vld [vmem:[%s1683_s1 + $0x70] sm:$0xff]  ;;  %v1192_v9 = vld [vmem:[%s1683_s1 + $0x68] sm:$0xff] }
   0x3   :  { %v1202_v2 = vld [vmem:[%s1683_s1 + $0xb8] sm:$0xff]  ;;  %593 = vmatpush.bf16.msra.mxu1 %v1194_v1  ;;  %v1201_v6 = vld [vmem:[%s1683_s1 + $0xb0] sm:$0xff]  ;;  %v1200_v10 = vld [vmem:[%s1683_s1 + $0xa8] sm:$0xff] }
   0x4   :  { %v1210_v3 = vld [vmem:[%s1683_s1 + $0xf8] sm:$0xff]  ;;  %656 = vmatpush.bf16.msra.mxu2 %v1202_v2  ;;  %v1209_v7 = vld [vmem:[%s1683_s1 + $0xf0] sm:$0xff]  ;;  %v1208_v11 = vld [vmem:[%s1683_s1 + $0xe8] sm:$0xff] }
   0x5   :  { %719 = vmatpush.bf16.msra.mxu3 %v1210_v3  ;;  %v1183_v12 = vld [vmem:[%s1683_s1 + $0x20] sm:$0xff]  ;;  %v1182_v16 = vld [vmem:[%s1683_s1 + $0x18] sm:$0xff]  ;;  %v1181_v20 = vld [vmem:[%s1683_s1 + $0x10] sm:$0xff] }
   0x6   :  { %531 = vmatpush.bf16.msra.mxu0 %v1185_v4  ;;  %v1191_v13 = vld [vmem:[%s1683_s1 + $0x60] sm:$0xff]  ;;  %v1190_v17 = vld [vmem:[%s1683_s1 + $0x58] sm:$0xff]  ;;  %v1189_v21 = vld [vmem:[%s1683_s1 + $0x50] sm:$0xff] }
   0x7   :  { %594 = vmatpush.bf16.msra.mxu1 %v1193_v5  ;;  %v1199_v14 = vld [vmem:[%s1683_s1 + $0xa0] sm:$0xff]  ;;  %v1198_v18 = vld [vmem:[%s1683_s1 + $0x98] sm:$0xff]  ;;  %v1197_v22 = vld [vmem:[%s1683_s1 + $0x90] sm:$0xff] }
   0x8   :  { %657 = vmatpush.bf16.msra.mxu2 %v1201_v6  ;;  %v1207_v15 = vld [vmem:[%s1683_s1 + $0xe0] sm:$0xff]  ;;  %v1206_v19 = vld [vmem:[%s1683_s1 + $0xd8] sm:$0xff]  ;;  %v1205_v23 = vld [vmem:[%s1683_s1 + $0xd0] sm:$0xff] }
   0x9   :  { %720 = vmatpush.bf16.msra.mxu3 %v1209_v7  ;;  %v1180_v24 = vld [vmem:[%s1683_s1 + $0x8] sm:$0xff]  ;;  %v1179_v28 = vld [vmem:[%s1683_s1] sm:$0xff]  ;;  %v1141_v33 = vld [vmem:[%s1685_s0 + $0xc] sm:$0xf0] }
   0xa   :  { %532 = vmatpush.bf16.msra.mxu0 %v1184_v8  ;;  %v1188_v25 = vld [vmem:[%s1683_s1 + $0x48] sm:$0xff]  ;;  %v1187_v29 = vld [vmem:[%s1683_s1 + $0x40] sm:$0xff]  ;;  %v855_v35 = vld [vmem:[%s1685_s0 + $0x10] sm:$0xf0] }
   0xb   :  { %595 = vmatpush.bf16.msra.mxu1 %v1192_v9  ;;  %v1196_v26 = vld [vmem:[%s1683_s1 + $0x88] sm:$0xff]  ;;  %v1195_v30 = vld [vmem:[%s1683_s1 + $0x80] sm:$0xff]  ;;  %v1142_v37 = vld [vmem:[%s1685_s0 + $0x14] sm:$0xf0] }
   0xc   :  { %658 = vmatpush.bf16.msra.mxu2 %v1200_v10  ;;  %v1204_v27 = vld [vmem:[%s1683_s1 + $0xc8] sm:$0xff]  ;;  %v1203_v31 = vld [vmem:[%s1683_s1 + $0xc0] sm:$0xff]  ;;  %v863_v39 = vld [vmem:[%s1685_s0 + $0x18] sm:$0xf0] }
   0xd   :  { %721 = vmatpush.bf16.msra.mxu3 %v1208_v11  ;;  %v853_v32 = vld [vmem:[%s1685_s0] sm:$0xf]  ;;  %v1139_v34 = vld [vmem:[%s1685_s0 + $0x4] sm:$0xf]  ;;  %v861_v36 = vld [vmem:[%s1685_s0 + $0x8] sm:$0xf] }
   0xe   :  { %533 = vmatpush.bf16.msra.mxu0 %v1183_v12  ;;  %v1140_v38 = vld [vmem:[%s1685_s0 + $0xc] sm:$0xf]  ;;  %v854_v40 = vor.u32 %v1141_v33, %v853_v32  ;;  %v858_v41 = vor.u32 %v1139_v34, %v855_v35  ;;  %v862_v42 = vor.u32 %v1142_v37, %v861_v36  ;;  %v869_v44 = vld [vmem:[%s1685_s0 + $0x20] sm:$0xf]  ;;  %v1145_v45 = vld [vmem:[%s1685_s0 + $0x2c] sm:$0xf0] }
   0xf   :  { %596 = vmatpush.bf16.msra.mxu1 %v1191_v13  ;;  %v866_v43 = vor.u32 %v1140_v38, %v863_v39  ;;  %v1143_v46 = vld [vmem:[%s1685_s0 + $0x24] sm:$0xf]  ;;  %v871_v47 = vld [vmem:[%s1685_s0 + $0x30] sm:$0xf0]  ;;  %v877_v48 = vld [vmem:[%s1685_s0 + $0x28] sm:$0xf]  ;;  %v870_v52 = vor.u32 %v1145_v45, %v869_v44 }
  0x10   :  { %659 = vmatpush.bf16.msra.mxu2 %v1199_v14  ;;  %v1146_v49 = vld [vmem:[%s1685_s0 + $0x34] sm:$0xf0]  ;;  %v1144_v50 = vld [vmem:[%s1685_s0 + $0x2c] sm:$0xf]  ;;  %v879_v51 = vld [vmem:[%s1685_s0 + $0x38] sm:$0xf0]  ;;  %v874_v53 = vor.u32 %v1143_v46, %v871_v47 }
  0x11   :  { %722 = vmatpush.bf16.msra.mxu3 %v1207_v15  ;;  %v878_v54 = vor.u32 %v1146_v49, %v877_v48  ;;  %v882_v55 = vor.u32 %v1144_v50, %v879_v51  ;;  %v885_v56 = vld [vmem:[%s1685_s0 + $0x40] sm:$0xf]  ;;  %v1149_v57 = vld [vmem:[%s1685_s0 + $0x4c] sm:$0xf0]  ;;  %v1147_v58 = vld [vmem:[%s1685_s0 + $0x44] sm:$0xf] }
  0x12   :  { %534 = vmatpush.bf16.msra.mxu0 %v1182_v16  ;;  %v887_v59 = vld [vmem:[%s1685_s0 + $0x50] sm:$0xf0]  ;;  %v893_v60 = vld [vmem:[%s1685_s0 + $0x48] sm:$0xf]  ;;  %v1150_v61 = vld [vmem:[%s1685_s0 + $0x54] sm:$0xf0]  ;;  %v886_v0 = vor.u32 %v1149_v57, %v885_v56 }
  0x13   :  { %597 = vmatpush.bf16.msra.mxu1 %v1190_v17  ;;  %v1148_v62 = vld [vmem:[%s1685_s0 + $0x4c] sm:$0xf]  ;;  %v895_v63 = vld [vmem:[%s1685_s0 + $0x58] sm:$0xf0]  ;;  %v890_v1 = vor.u32 %v1147_v58, %v887_v59  ;;  %v894_v2 = vor.u32 %v1150_v61, %v893_v60  ;;  %v901_v4 = vld [vmem:[%s1685_s0 + $0x60] sm:$0xf] }
  0x14   :  { %660 = vmatpush.bf16.msra.mxu2 %v1198_v18  ;;  %v898_v3 = vor.u32 %v1148_v62, %v895_v63  ;;  %v1153_v5 = vld [vmem:[%s1685_s0 + $0x6c] sm:$0xf0]  ;;  %v1151_v6 = vld [vmem:[%s1685_s0 + $0x64] sm:$0xf]  ;;  %v903_v7 = vld [vmem:[%s1685_s0 + $0x70] sm:$0xf0] }
  0x15   :  { %723 = vmatpush.bf16.msra.mxu3 %v1206_v19  ;;  %v909_v8 = vld [vmem:[%s1685_s0 + $0x68] sm:$0xf]  ;;  %v1154_v9 = vld [vmem:[%s1685_s0 + $0x74] sm:$0xf0]  ;;  %v1152_v10 = vld [vmem:[%s1685_s0 + $0x6c] sm:$0xf]  ;;  %v902_v12 = vor.u32 %v1153_v5, %v901_v4  ;;  %v906_v13 = vor.u32 %v1151_v6, %v903_v7 }
  0x16   :  { %535 = vmatpush.bf16.msra.mxu0 %v1181_v20  ;;  %v911_v11 = vld [vmem:[%s1685_s0 + $0x78] sm:$0xf0]  ;;  %v910_v14 = vor.u32 %v1154_v9, %v909_v8  ;;  %v917_v16 = vld [vmem:[%s1685_s0 + $0x80] sm:$0xf]  ;;  %v1157_v17 = vld [vmem:[%s1685_s0 + $0x8c] sm:$0xf0] }
  0x17   :  { %598 = vmatpush.bf16.msra.mxu1 %v1189_v21  ;;  %v914_v15 = vor.u32 %v1152_v10, %v911_v11  ;;  %v1155_v18 = vld [vmem:[%s1685_s0 + $0x84] sm:$0xf]  ;;  %v919_v19 = vld [vmem:[%s1685_s0 + $0x90] sm:$0xf0]  ;;  %v925_v20 = vld [vmem:[%s1685_s0 + $0x88] sm:$0xf] }
  0x18   :  { %661 = vmatpush.bf16.msra.mxu2 %v1197_v22  ;;  %v1158_v21 = vld [vmem:[%s1685_s0 + $0x94] sm:$0xf0]  ;;  %v1156_v22 = vld [vmem:[%s1685_s0 + $0x8c] sm:$0xf]  ;;  %v941_v32 = vld [vmem:[%s1685_s0 + $0xa8] sm:$0xf] }
  0x19   :  { %724 = vmatpush.bf16.msra.mxu3 %v1205_v23  ;;  %v927_v23 = vld [vmem:[%s1685_s0 + $0x98] sm:$0xf0]  ;;  %v1162_v33 = vld [vmem:[%s1685_s0 + $0xb4] sm:$0xf0]  ;;  %v1160_v34 = vld [vmem:[%s1685_s0 + $0xac] sm:$0xf] }
  0x1a   :  { %536 = vmatpush.bf16.msra.mxu0 %v1180_v24  ;;  %v918_v24 = vor.u32 %v1157_v17, %v917_v16  ;;  %v943_v35 = vld [vmem:[%s1685_s0 + $0xb8] sm:$0xf0]  ;;  %v942_v38 = vor.u32 %v1162_v33, %v941_v32  ;;  %v957_v44 = vld [vmem:[%s1685_s0 + $0xc8] sm:$0xf]  ;;  %v1166_v45 = vld [vmem:[%s1685_s0 + $0xd4] sm:$0xf0] }
  0x1b   :  { %599 = vmatpush.bf16.msra.mxu1 %v1188_v25  ;;  %v922_v25 = vor.u32 %v1155_v18, %v919_v19  ;;  %v946_v39 = vor.u32 %v1160_v34, %v943_v35  ;;  %v1164_v46 = vld [vmem:[%s1685_s0 + $0xcc] sm:$0xf]  ;;  %v959_v47 = vld [vmem:[%s1685_s0 + $0xd8] sm:$0xf0]  ;;  %v958_v50 = vor.u32 %v1166_v45, %v957_v44  ;;  %v973_v56 = vld [vmem:[%s1685_s0 + $0xe8] sm:$0xf] }
  0x1c   :  { %662 = vmatpush.bf16.msra.mxu2 %v1196_v26  ;;  %v926_v26 = vor.u32 %v1158_v21, %v925_v20  ;;  %v962_v51 = vor.u32 %v1164_v46, %v959_v47  ;;  %v1170_v57 = vld [vmem:[%s1685_s0 + $0xf4] sm:$0xf0]  ;;  %v1168_v58 = vld [vmem:[%s1685_s0 + $0xec] sm:$0xf]  ;;  %v975_v59 = vld [vmem:[%s1685_s0 + $0xf8] sm:$0xf0] }
  0x1d   :  { %725 = vmatpush.bf16.msra.mxu3 %v1204_v27  ;;  %v930_v27 = vor.u32 %v1156_v22, %v927_v23  ;;  %v974_v62 = vor.u32 %v1170_v57, %v973_v56  ;;  %v978_v63 = vor.u32 %v1168_v58, %v975_v59  ;;  %v983_v4 = vld [vmem:[%s1685_s0 + $0x110] sm:$0xf0]  ;;  %v989_v5 = vld [vmem:[%s1685_s0 + $0x108] sm:$0xf]  ;;  %v1174_v6 = vld [vmem:[%s1685_s0 + $0x114] sm:$0xf0] }
  0x1e   :  { %537 = vmatpush.bf16.msra.mxu0 %v1179_v28  ;;  %v933_v28 = vld [vmem:[%s1685_s0 + $0xa0] sm:$0xf]  ;;  %v1172_v7 = vld [vmem:[%s1685_s0 + $0x10c] sm:$0xf]  ;;  %v991_v8 = vld [vmem:[%s1685_s0 + $0x118] sm:$0xf0] }
  0x1f   :  { %600 = vmatpush.bf16.msra.mxu1 %v1187_v29  ;;  %v1161_v29 = vld [vmem:[%s1685_s0 + $0xac] sm:$0xf0]  ;;  %v1007_v32 = vld [vmem:[%s1685_s0 + $0x138] sm:$0xf0] }
  0x20   :  { %663 = vmatpush.bf16.msra.mxu2 %v1195_v30  ;;  %v1159_v30 = vld [vmem:[%s1685_s0 + $0xa4] sm:$0xf]  ;;  %v934_v36 = vor.u32 %v1161_v29, %v933_v28  ;;  %v999_v28 = vld [vmem:[%s1685_s0 + $0x130] sm:$0xf0]  ;;  %v1005_v29 = vld [vmem:[%s1685_s0 + $0x128] sm:$0xf] }
  0x21   :  { %726 = vmatpush.bf16.msra.mxu3 %v1203_v31  ;;  %538 = vmatmul.bf16.vlgmr.msra.gmra.mxu0 %v854_v40  ;;  %v935_v31 = vld [vmem:[%s1685_s0 + $0xb0] sm:$0xf0]  ;;  %v949_v40 = vld [vmem:[%s1685_s0 + $0xc0] sm:$0xf] }
  0x22   :  { %601 = vmatmul.bf16.vlgmr.msra.gmra.mxu1 %v858_v41  ;;  %v938_v37 = vor.u32 %v1159_v30, %v935_v31  ;;  %v1165_v41 = vld [vmem:[%s1685_s0 + $0xcc] sm:$0xf0]  ;;  %v1178_v30 = vld [vmem:[%s1685_s0 + $0x134] sm:$0xf0]  ;;  %v1176_v31 = vld [vmem:[%s1685_s0 + $0x12c] sm:$0xf] }
  0x23   :  { %664 = vmatmul.bf16.vlgmr.msra.gmra.mxu2 %v862_v42  ;;  %v1163_v42 = vld [vmem:[%s1685_s0 + $0xc4] sm:$0xf]  ;;  %v950_v48 = vor.u32 %v1165_v41, %v949_v40 }
  0x24   :  { %727 = vmatmul.bf16.vlgmr.msra.gmra.mxu3 %v866_v43  ;;  %v951_v43 = vld [vmem:[%s1685_s0 + $0xd0] sm:$0xf0] }
  0x25   :  { %v954_v49 = vor.u32 %v1163_v42, %v951_v43  ;;  %v1006_v42 = vor.u32 %v1178_v30, %v1005_v29  ;;  %v1010_v43 = vor.u32 %v1176_v31, %v1007_v32 }
  0x31   :  { %543 = vmatmul.bf16.gmra.mxu0 %v870_v52  ;;  %v965_v52 = vld [vmem:[%s1685_s0 + $0xe0] sm:$0xf] }
  0x32   :  { %606 = vmatmul.bf16.gmra.mxu1 %v874_v53  ;;  %v1169_v53 = vld [vmem:[%s1685_s0 + $0xec] sm:$0xf0] }
  0x33   :  { %669 = vmatmul.bf16.gmra.mxu2 %v878_v54  ;;  %v1167_v54 = vld [vmem:[%s1685_s0 + $0xe4] sm:$0xf]  ;;  %v966_v60 = vor.u32 %v1169_v53, %v965_v52 }
  0x34   :  { %732 = vmatmul.bf16.gmra.mxu3 %v882_v55  ;;  %v967_v55 = vld [vmem:[%s1685_s0 + $0xf0] sm:$0xf0] }
  0x35   :  { %v970_v61 = vor.u32 %v1167_v54, %v967_v55  ;;  %v54_v54 = vld [vmem:[%s1685_s0 + $0x140] sm:$0x11]  ;;  %v55_v55 = vld [vmem:[%s1685_s0 + $0x148] sm:$0x11] }
  0x36   :  { %v246_v58 = vunpack.c.l.b16 %v54_v54  ;;  %v247_v59 = vunpack.c.h.b16 %v54_v54 }
  0x41   :  { %548 = vmatmul.bf16.gmra.mxu0 %v886_v0  ;;  %v1523_v0 = vld [vmem:[%s1684_s2] ss:$0 sm:$0xff] }
  0x42   :  { %611 = vmatmul.bf16.gmra.mxu1 %v890_v1  ;;  %v981_v1 = vld [vmem:[%s1685_s0 + $0x100] sm:$0xf] }
  0x43   :  { %674 = vmatmul.bf16.gmra.mxu2 %v894_v2  ;;  %v1173_v2 = vld [vmem:[%s1685_s0 + $0x10c] sm:$0xf0] }
  0x44   :  { %737 = vmatmul.bf16.gmra.mxu3 %v898_v3  ;;  %v1171_v3 = vld [vmem:[%s1685_s0 + $0x104] sm:$0xf]  ;;  %v982_v9 = vor.u32 %v1173_v2, %v981_v1 }
  0x45   :  { %v986_v10 = vor.u32 %v1171_v3, %v983_v4  ;;  %v290_v4 = vpack.c.b16 %v246_v58, %v246_v58 }
  0x51   :  { %553 = vmatmul.bf16.gmra.mxu0 %v902_v12 }
  0x52   :  { %616 = vmatmul.bf16.gmra.mxu1 %v906_v13  ;;  %v990_v13 = vor.u32 %v1174_v6, %v989_v5  ;;  %v291_v5 = vpack.c.b16 %v247_v59, %v247_v59 }
  0x53   :  { %679 = vmatmul.bf16.gmra.mxu2 %v910_v14  ;;  %v994_v14 = vor.u32 %v1172_v7, %v991_v8 }
  0x54   :  { %742 = vmatmul.bf16.gmra.mxu3 %v914_v15 }
  0x61   :  { %558 = vmatmul.bf16.gmra.mxu0 %v918_v24  ;;  %v997_v24 = vld [vmem:[%s1685_s0 + $0x120] sm:$0xf] }
  0x62   :  { %621 = vmatmul.bf16.gmra.mxu1 %v922_v25  ;;  %v1177_v25 = vld [vmem:[%s1685_s0 + $0x12c] sm:$0xf0] }
  0x63   :  { %684 = vmatmul.bf16.gmra.mxu2 %v926_v26  ;;  %v1175_v26 = vld [vmem:[%s1685_s0 + $0x124] sm:$0xf] }
  0x64   :  { %747 = vmatmul.bf16.gmra.mxu3 %v930_v27 }
  0x71   :  { %563 = vmatmul.bf16.gmra.mxu0 %v934_v36 }
  0x72   :  { %626 = vmatmul.bf16.gmra.mxu1 %v938_v37  ;;  %v998_v37 = vor.u32 %v1177_v25, %v997_v24 }
  0x73   :  { %689 = vmatmul.bf16.gmra.mxu2 %v942_v38  ;;  %v1002_v38 = vor.u32 %v1175_v26, %v999_v28 }
  0x74   :  { %752 = vmatmul.bf16.gmra.mxu3 %v946_v39 }
  0x81   :  { %568 = vmatmul.bf16.gmra.mxu0 %v950_v48 }
  0x82   :  { %631 = vmatmul.bf16.gmra.mxu1 %v954_v49 }
  0x83   :  { %694 = vmatmul.bf16.gmra.mxu2 %v958_v50 }
  0x84   :  { %757 = vmatmul.bf16.gmra.mxu3 %v962_v51 }
  0x91   :  { %573 = vmatmul.bf16.gmra.mxu0 %v966_v60 }
  0x92   :  { %636 = vmatmul.bf16.gmra.mxu1 %v970_v61  ;;  %v248_v61 = vunpack.c.l.b16 %v55_v55 }
  0x93   :  { %699 = vmatmul.bf16.gmra.mxu2 %v974_v62  ;;  %v249_v62 = vunpack.c.h.b16 %v55_v55 }
  0x94   :  { %762 = vmatmul.bf16.gmra.mxu3 %v978_v63 }
  0x9e   :  { %v539_v11 = vpop.f32.mrf.mxu0 }
  0x9f   :  { %v602_v12 = vpop.f32.mrf.mxu1  ;;  %v540_v15 = vadd.f32 %v1523_v0, %v539_v11 }
  0xa1   :  { %578 = vmatmul.bf16.gmra.mxu0 %v982_v9  ;;  %v603_v16 = vadd.f32 %v602_v12, %v540_v15  ;;  %v292_v9 = vpack.c.b16 %v248_v61, %v248_v61 }
  0xa2   :  { %641 = vmatmul.bf16.gmra.mxu1 %v986_v10  ;;  %v293_v10 = vpack.c.b16 %v249_v62, %v249_v62 }
  0xa3   :  { %704 = vmatmul.bf16.gmra.mxu2 %v990_v13 }
  0xa4   :  { %767 = vmatmul.bf16.gmra.mxu3 %v994_v14 }
  0xa6   :  { %v665_v17 = vpop.f32.mrf.mxu2  ;;  %v541_v20 = vpop.f32.mrf.mxu0 }
  0xa7   :  { %v728_v18 = vpop.f32.mrf.mxu3  ;;  %v666_v19 = vadd.f32 %v665_v17, %v603_v16  ;;  %v604_v21 = vpop.f32.mrf.mxu1  ;;  %v542_v23 = vadd.f32 %v1523_v0, %v541_v20 }
  0xa9   :  { %v729_v22 = vadd.f32 %v728_v18, %v666_v19  ;;  %v605_v34 = vadd.f32 %v604_v21, %v542_v23 }
  0xab   :  { %v782_v27 = vmax.f32 %v729_v22, 0.0 }
  0xad   :  { %v803_v33 = vpack.c.bf16 %v782_v27, %v782_v27 }
  0xae   :  { %v667_v35 = vpop.f32.mrf.mxu2  ;;  %v544_v40 = vpop.f32.mrf.mxu0 }
  0xaf   :  { %v730_v36 = vpop.f32.mrf.mxu3  ;;  %825 = vst.msk [vmem:[%s1686_s3] sm:$0xf] %vm824_vm0, %v803_v33  ;;  %v668_v39 = vadd.f32 %v667_v35, %v605_v34  ;;  %v607_v41 = vpop.f32.mrf.mxu1  ;;  %v545_v44 = vadd.f32 %v1523_v0, %v544_v40 }
  0xb1   :  { %v731_v45 = vadd.f32 %v730_v36, %v668_v39  ;;  %583 = vmatmul.bf16.gmra.mxu0 %v998_v37  ;;  %v608_v47 = vadd.f32 %v607_v41, %v545_v44 }
  0xb2   :  { %646 = vmatmul.bf16.gmra.mxu1 %v1002_v38 }
  0xb3   :  { %v783_v46 = vmax.f32 %v731_v45, 0.0  ;;  %709 = vmatmul.bf16.gmra.mxu2 %v1006_v42 }
  0xb4   :  { %772 = vmatmul.bf16.gmra.mxu3 %v1010_v43 }
  0xb5   :  { %v804_v48 = vpack.c.bf16 %v783_v46, %v783_v46 }
  0xb6   :  { %v670_v49 = vpop.f32.mrf.mxu2  ;;  %v546_v52 = vpop.f32.mrf.mxu0 }
  0xb7   :  { %v733_v50 = vpop.f32.mrf.mxu3  ;;  %826 = vst.msk [vmem:[%s1686_s3 + $0x4] sm:$0xf] %vm824_vm0, %v804_v48  ;;  %v671_v51 = vadd.f32 %v670_v49, %v608_v47  ;;  %v609_v53 = vpop.f32.mrf.mxu1  ;;  %v547_v57 = vadd.f32 %v1523_v0, %v546_v52 }
  0xb9   :  { %v734_v56 = vadd.f32 %v733_v50, %v671_v51  ;;  %v610_v1 = vadd.f32 %v609_v53, %v547_v57 }
  0xbb   :  { %v784_v60 = vmax.f32 %v734_v56, 0.0 }
  0xbd   :  { %v805_v63 = vpack.c.bf16 %v784_v60, %v784_v60 }
  0xbe   :  { %v672_v2 = vpop.f32.mrf.mxu2  ;;  %v549_v7 = vpop.f32.mrf.mxu0 }
  0xbf   :  { %v735_v3 = vpop.f32.mrf.mxu3  ;;  %827 = vst.msk [vmem:[%s1686_s3 + $0x8] sm:$0xf] %vm824_vm0, %v805_v63  ;;  %v673_v6 = vadd.f32 %v672_v2, %v610_v1  ;;  %v612_v8 = vpop.f32.mrf.mxu1  ;;  %v550_v11 = vadd.f32 %v1523_v0, %v549_v7 }
  0xc1   :  { %v736_v12 = vadd.f32 %v735_v3, %v673_v6  ;;  %588 = vmatmul.bf16.gmra.mxu0 %v290_v4  ;;  %v613_v14 = vadd.f32 %v612_v8, %v550_v11 }
  0xc2   :  { %651 = vmatmul.bf16.gmra.mxu1 %v291_v5 }
  0xc3   :  { %v785_v13 = vmax.f32 %v736_v12, 0.0  ;;  %714 = vmatmul.bf16.gmra.mxu2 %v292_v9 }
  0xc4   :  { %777 = vmatmul.bf16.gmra.mxu3 %v293_v10 }
  0xc5   :  { %v806_v15 = vpack.c.bf16 %v785_v13, %v785_v13 }
  0xc6   :  { %v675_v16 = vpop.f32.mrf.mxu2  ;;  %v551_v19 = vpop.f32.mrf.mxu0 }
  0xc7   :  { %v738_v17 = vpop.f32.mrf.mxu3  ;;  %828 = vst.msk [vmem:[%s1686_s3 + $0xc] sm:$0xf] %vm824_vm0, %v806_v15  ;;  %v676_v18 = vadd.f32 %v675_v16, %v613_v14  ;;  %v614_v20 = vpop.f32.mrf.mxu1  ;;  %v552_v22 = vadd.f32 %v1523_v0, %v551_v19 }
  0xc9   :  { %v739_v21 = vadd.f32 %v738_v17, %v676_v18  ;;  %v615_v25 = vadd.f32 %v614_v20, %v552_v22 }
  0xcb   :  { %v786_v23 = vmax.f32 %v739_v21, 0.0 }
  0xcd   :  { %v807_v24 = vpack.c.bf16 %v786_v23, %v786_v23 }
  0xce   :  { %v677_v26 = vpop.f32.mrf.mxu2  ;;  %v554_v29 = vpop.f32.mrf.mxu0 }
  0xcf   :  { %v740_v27 = vpop.f32.mrf.mxu3  ;;  %829 = vst.msk [vmem:[%s1686_s3 + $0x10] sm:$0xf] %vm824_vm0, %v807_v24  ;;  %v678_v28 = vadd.f32 %v677_v26, %v615_v25  ;;  %v617_v30 = vpop.f32.mrf.mxu1  ;;  %v555_v31 = vadd.f32 %v1523_v0, %v554_v29 }
  0xd1   :  { %v741_v32 = vadd.f32 %v740_v27, %v678_v28  ;;  %v618_v34 = vadd.f32 %v617_v30, %v555_v31 }
  0xd3   :  { %v787_v33 = vmax.f32 %v741_v32, 0.0 }
  0xd5   :  { %v808_v35 = vpack.c.bf16 %v787_v33, %v787_v33 }
  0xd6   :  { %v680_v36 = vpop.f32.mrf.mxu2  ;;  %v556_v39 = vpop.f32.mrf.mxu0 }
  0xd7   :  { %v743_v37 = vpop.f32.mrf.mxu3  ;;  %830 = vst.msk [vmem:[%s1686_s3 + $0x14] sm:$0xf] %vm824_vm0, %v808_v35  ;;  %v681_v38 = vadd.f32 %v680_v36, %v618_v34  ;;  %v619_v40 = vpop.f32.mrf.mxu1  ;;  %v557_v42 = vadd.f32 %v1523_v0, %v556_v39 }
  0xd9   :  { %v744_v41 = vadd.f32 %v743_v37, %v681_v38  ;;  %v620_v45 = vadd.f32 %v619_v40, %v557_v42 }
  0xdb   :  { %v788_v43 = vmax.f32 %v744_v41, 0.0 }
  0xdd   :  { %v809_v44 = vpack.c.bf16 %v788_v43, %v788_v43 }
  0xde   :  { %v682_v46 = vpop.f32.mrf.mxu2  ;;  %v559_v49 = vpop.f32.mrf.mxu0 }
  0xdf   :  { %v745_v47 = vpop.f32.mrf.mxu3  ;;  %831 = vst.msk [vmem:[%s1686_s3 + $0x18] sm:$0xf] %vm824_vm0, %v809_v44  ;;  %v683_v48 = vadd.f32 %v682_v46, %v620_v45  ;;  %v622_v50 = vpop.f32.mrf.mxu1  ;;  %v560_v51 = vadd.f32 %v1523_v0, %v559_v49 }
  0xe1   :  { %v746_v52 = vadd.f32 %v745_v47, %v683_v48  ;;  %v623_v54 = vadd.f32 %v622_v50, %v560_v51 }
  0xe3   :  { %v789_v53 = vmax.f32 %v746_v52, 0.0 }
  0xe5   :  { %v810_v55 = vpack.c.bf16 %v789_v53, %v789_v53 }
  0xe6   :  { %v685_v56 = vpop.f32.mrf.mxu2  ;;  %v561_v59 = vpop.f32.mrf.mxu0 }
  0xe7   :  { %v748_v57 = vpop.f32.mrf.mxu3  ;;  %832 = vst.msk [vmem:[%s1686_s3 + $0x1c] sm:$0xf] %vm824_vm0, %v810_v55  ;;  %v686_v58 = vadd.f32 %v685_v56, %v623_v54  ;;  %v624_v60 = vpop.f32.mrf.mxu1  ;;  %v562_v62 = vadd.f32 %v1523_v0, %v561_v59 }
  0xe9   :  { %v749_v61 = vadd.f32 %v748_v57, %v686_v58  ;;  %v625_v2 = vadd.f32 %v624_v60, %v562_v62 }
  0xeb   :  { %v790_v63 = vmax.f32 %v749_v61, 0.0 }
  0xed   :  { %v811_v1 = vpack.c.bf16 %v790_v63, %v790_v63 }
  0xee   :  { %v687_v3 = vpop.f32.mrf.mxu2  ;;  %v564_v6 = vpop.f32.mrf.mxu0 }
  0xef   :  { %v750_v4 = vpop.f32.mrf.mxu3  ;;  %833 = vst.msk [vmem:[%s1686_s3 + $0x20] sm:$0xf] %vm824_vm0, %v811_v1  ;;  %v688_v5 = vadd.f32 %v687_v3, %v625_v2  ;;  %v627_v7 = vpop.f32.mrf.mxu1  ;;  %v565_v8 = vadd.f32 %v1523_v0, %v564_v6 }
  0xf1   :  { %v751_v9 = vadd.f32 %v750_v4, %v688_v5  ;;  %v628_v11 = vadd.f32 %v627_v7, %v565_v8 }
  0xf3   :  { %v791_v10 = vmax.f32 %v751_v9, 0.0 }
  0xf5   :  { %v812_v12 = vpack.c.bf16 %v791_v10, %v791_v10 }
  0xf6   :  { %v690_v13 = vpop.f32.mrf.mxu2  ;;  %v566_v16 = vpop.f32.mrf.mxu0 }
  0xf7   :  { %v753_v14 = vpop.f32.mrf.mxu3  ;;  %834 = vst.msk [vmem:[%s1686_s3 + $0x24] sm:$0xf] %vm824_vm0, %v812_v12  ;;  %v691_v15 = vadd.f32 %v690_v13, %v628_v11  ;;  %v629_v17 = vpop.f32.mrf.mxu1  ;;  %v567_v19 = vadd.f32 %v1523_v0, %v566_v16 }
  0xf9   :  { %v754_v18 = vadd.f32 %v753_v14, %v691_v15  ;;  %v630_v22 = vadd.f32 %v629_v17, %v567_v19 }
  0xfb   :  { %v792_v20 = vmax.f32 %v754_v18, 0.0 }
  0xfd   :  { %v813_v21 = vpack.c.bf16 %v792_v20, %v792_v20 }
  0xfe   :  { %v692_v23 = vpop.f32.mrf.mxu2  ;;  %v569_v26 = vpop.f32.mrf.mxu0 }
  0xff   :  { %v755_v24 = vpop.f32.mrf.mxu3  ;;  %835 = vst.msk [vmem:[%s1686_s3 + $0x28] sm:$0xf] %vm824_vm0, %v813_v21  ;;  %v693_v25 = vadd.f32 %v692_v23, %v630_v22  ;;  %v632_v27 = vpop.f32.mrf.mxu1  ;;  %v570_v28 = vadd.f32 %v1523_v0, %v569_v26 }
 0x101   :  { %v756_v29 = vadd.f32 %v755_v24, %v693_v25  ;;  %v633_v31 = vadd.f32 %v632_v27, %v570_v28 }
 0x103   :  { %v793_v30 = vmax.f32 %v756_v29, 0.0 }
 0x105   :  { %v814_v32 = vpack.c.bf16 %v793_v30, %v793_v30 }
 0x106   :  { %v695_v33 = vpop.f32.mrf.mxu2  ;;  %v571_v36 = vpop.f32.mrf.mxu0 }
 0x107   :  { %v758_v34 = vpop.f32.mrf.mxu3  ;;  %836 = vst.msk [vmem:[%s1686_s3 + $0x2c] sm:$0xf] %vm824_vm0, %v814_v32  ;;  %v696_v35 = vadd.f32 %v695_v33, %v633_v31  ;;  %v634_v37 = vpop.f32.mrf.mxu1  ;;  %v572_v39 = vadd.f32 %v1523_v0, %v571_v36 }
 0x109   :  { %v759_v38 = vadd.f32 %v758_v34, %v696_v35  ;;  %v635_v42 = vadd.f32 %v634_v37, %v572_v39 }
 0x10b   :  { %v794_v40 = vmax.f32 %v759_v38, 0.0 }
 0x10d   :  { %v815_v41 = vpack.c.bf16 %v794_v40, %v794_v40 }
 0x10e   :  { %v697_v43 = vpop.f32.mrf.mxu2  ;;  %v574_v46 = vpop.f32.mrf.mxu0 }
 0x10f   :  { %v760_v44 = vpop.f32.mrf.mxu3  ;;  %837 = vst.msk [vmem:[%s1686_s3 + $0x30] sm:$0xf] %vm824_vm0, %v815_v41  ;;  %v698_v45 = vadd.f32 %v697_v43, %v635_v42  ;;  %v637_v47 = vpop.f32.mrf.mxu1  ;;  %v575_v48 = vadd.f32 %v1523_v0, %v574_v46 }
 0x111   :  { %v761_v49 = vadd.f32 %v760_v44, %v698_v45  ;;  %v638_v51 = vadd.f32 %v637_v47, %v575_v48 }
 0x113   :  { %v795_v50 = vmax.f32 %v761_v49, 0.0 }
 0x115   :  { %v816_v52 = vpack.c.bf16 %v795_v50, %v795_v50 }
 0x116   :  { %v700_v53 = vpop.f32.mrf.mxu2  ;;  %v576_v56 = vpop.f32.mrf.mxu0 }
 0x117   :  { %v763_v54 = vpop.f32.mrf.mxu3  ;;  %838 = vst.msk [vmem:[%s1686_s3 + $0x34] sm:$0xf] %vm824_vm0, %v816_v52  ;;  %v701_v55 = vadd.f32 %v700_v53, %v638_v51  ;;  %v639_v57 = vpop.f32.mrf.mxu1  ;;  %v577_v59 = vadd.f32 %v1523_v0, %v576_v56 }
 0x119   :  { %v764_v58 = vadd.f32 %v763_v54, %v701_v55  ;;  %v640_v62 = vadd.f32 %v639_v57, %v577_v59 }
 0x11b   :  { %v796_v60 = vmax.f32 %v764_v58, 0.0 }
 0x11d   :  { %v817_v61 = vpack.c.bf16 %v796_v60, %v796_v60 }
 0x11e   :  { %v702_v63 = vpop.f32.mrf.mxu2  ;;  %v579_v3 = vpop.f32.mrf.mxu0 }
 0x11f   :  { %v765_v1 = vpop.f32.mrf.mxu3  ;;  %839 = vst.msk [vmem:[%s1686_s3 + $0x38] sm:$0xf] %vm824_vm0, %v817_v61  ;;  %v703_v2 = vadd.f32 %v702_v63, %v640_v62  ;;  %v642_v4 = vpop.f32.mrf.mxu1  ;;  %v580_v5 = vadd.f32 %v1523_v0, %v579_v3 }
 0x121   :  { %v766_v6 = vadd.f32 %v765_v1, %v703_v2  ;;  %v643_v8 = vadd.f32 %v642_v4, %v580_v5 }
 0x123   :  { %v797_v7 = vmax.f32 %v766_v6, 0.0 }
 0x125   :  { %v818_v9 = vpack.c.bf16 %v797_v7, %v797_v7 }
 0x126   :  { %v705_v10 = vpop.f32.mrf.mxu2  ;;  %v581_v13 = vpop.f32.mrf.mxu0 }
 0x127   :  { %v768_v11 = vpop.f32.mrf.mxu3  ;;  %840 = vst.msk [vmem:[%s1686_s3 + $0x3c] sm:$0xf] %vm824_vm0, %v818_v9  ;;  %v706_v12 = vadd.f32 %v705_v10, %v643_v8  ;;  %v644_v14 = vpop.f32.mrf.mxu1  ;;  %v582_v16 = vadd.f32 %v1523_v0, %v581_v13 }
 0x129   :  { %v769_v15 = vadd.f32 %v768_v11, %v706_v12  ;;  %v645_v19 = vadd.f32 %v644_v14, %v582_v16 }
 0x12b   :  { %v798_v17 = vmax.f32 %v769_v15, 0.0 }
 0x12d   :  { %v819_v18 = vpack.c.bf16 %v798_v17, %v798_v17 }
 0x12e   :  { %v707_v20 = vpop.f32.mrf.mxu2  ;;  %v584_v23 = vpop.f32.mrf.mxu0 }
 0x12f   :  { %v770_v21 = vpop.f32.mrf.mxu3  ;;  %841 = vst.msk [vmem:[%s1686_s3 + $0x40] sm:$0xf] %vm824_vm0, %v819_v18  ;;  %v708_v22 = vadd.f32 %v707_v20, %v645_v19  ;;  %v647_v24 = vpop.f32.mrf.mxu1  ;;  %v585_v25 = vadd.f32 %v1523_v0, %v584_v23 }
 0x131   :  { %v771_v26 = vadd.f32 %v770_v21, %v708_v22  ;;  %v648_v28 = vadd.f32 %v647_v24, %v585_v25 }
 0x133   :  { %v799_v27 = vmax.f32 %v771_v26, 0.0 }
 0x135   :  { %v820_v29 = vpack.c.bf16 %v799_v27, %v799_v27 }
 0x136   :  { %v710_v30 = vpop.f32.mrf.mxu2  ;;  %v586_v33 = vpop.f32.mrf.mxu0 }
 0x137   :  { %v773_v31 = vpop.f32.mrf.mxu3  ;;  %842 = vst.msk [vmem:[%s1686_s3 + $0x44] sm:$0xf] %vm824_vm0, %v820_v29  ;;  %v711_v32 = vadd.f32 %v710_v30, %v648_v28  ;;  %v649_v34 = vpop.f32.mrf.mxu1  ;;  %v587_v36 = vadd.f32 %v1523_v0, %v586_v33 }
 0x139   :  { %v774_v35 = vadd.f32 %v773_v31, %v711_v32  ;;  %v650_v39 = vadd.f32 %v649_v34, %v587_v36 }
 0x13b   :  { %v800_v37 = vmax.f32 %v774_v35, 0.0 }
 0x13d   :  { %v821_v38 = vpack.c.bf16 %v800_v37, %v800_v37 }
 0x13e   :  { %v712_v40 = vpop.f32.mrf.mxu2  ;;  %v589_v43 = vpop.f32.mrf.mxu0 }
 0x13f   :  { %v775_v41 = vpop.f32.mrf.mxu3  ;;  %843 = vst.msk [vmem:[%s1686_s3 + $0x48] sm:$0xf] %vm824_vm0, %v821_v38  ;;  %v713_v42 = vadd.f32 %v712_v40, %v650_v39  ;;  %v652_v44 = vpop.f32.mrf.mxu1  ;;  %v590_v45 = vadd.f32 %v1523_v0, %v589_v43 }
 0x141   :  { %v776_v46 = vadd.f32 %v775_v41, %v713_v42  ;;  %v653_v48 = vadd.f32 %v652_v44, %v590_v45 }
 0x143   :  { %v801_v47 = vmax.f32 %v776_v46, 0.0 }
 0x145   :  { %v822_v49 = vpack.c.bf16 %v801_v47, %v801_v47 }
 0x146   :  { %v715_v50 = vpop.f32.mrf.mxu2  ;;  %v591_v53 = vpop.f32.mrf.mxu0 }
 0x147   :  { %v778_v51 = vpop.f32.mrf.mxu3  ;;  %844 = vst.msk [vmem:[%s1686_s3 + $0x4c] sm:$0xf] %vm824_vm0, %v822_v49  ;;  %v716_v52 = vadd.f32 %v715_v50, %v653_v48  ;;  %v654_v54 = vpop.f32.mrf.mxu1 }
 0x149   :  { %v779_v55 = vadd.f32 %v778_v51, %v716_v52 }
 0x14b   :  { %v802_v56 = vmax.f32 %v779_v55, 0.0 }
 0x14d   :  { %v823_v57 = vpack.c.bf16 %v802_v56, %v802_v56 }
 0x14e   :  { %v717_v58 = vpop.f32.mrf.mxu2 }
 0x14f   :  { %v780_v0 = vpop.f32.mrf.mxu3  ;;  %846 = vst.msk [vmem:[%s1686_s3 + $0x50] sm:$0x1] %vm845_vm1, %v823_v57 }

// kernel: forward.6
= control target key start
LH: loop header
LB: loop body
LE: loop exit
PB: predicated region body
PF: predicated region fallthrough
CT: control target
= control target key end

     0   :  { %vm513_vm0 = vcmask 523264   ;;  %vm776_vm1 = vcmask 519168   ;;  %vm789_vm2 = vcmask 516096   ;;  %s1581_s1 = inlined_call_operand.vmem [shape: bf16[576,64], index: 1, kind: input, shape index: {}]   ;;  %s1582_s2 = inlined_call_operand.vmem [shape: f32[1,64], index: 2, kind: input, shape index: {}]   ;;  %s1583_s0 = inlined_call_operand.vmem [shape: bf16[98,576], index: 0, kind: input, shape index: {}]   ;;  %s1584_s3 = inlined_call_operand.vmem [shape: bf16[98,64], index: 3, kind: output, shape index: {}]  }
   0x1   :  { %v1103_v0 = vld [vmem:[%s1581_s1 + $0x38] sm:$0xff]  ;;  %v1102_v1 = vld [vmem:[%s1581_s1 + $0x30] sm:$0xff]  ;;  %v1101_v2 = vld [vmem:[%s1581_s1 + $0x28] sm:$0xff] }
   0x2   :  { %1132 = vmatpush.bf16.msra.mxu1 %v1103_v0  ;;  %1133 = vmatpush.bf16.msra.mxu2 %v1103_v0  ;;  %v1100_v3 = vld [vmem:[%s1581_s1 + $0x20] sm:$0xff]  ;;  %v1099_v4 = vld [vmem:[%s1581_s1 + $0x18] sm:$0xff]  ;;  %v1098_v5 = vld [vmem:[%s1581_s1 + $0x10] sm:$0xff] }
   0x3   :  { %1134 = vmatpush.bf16.msra.mxu3 %v1103_v0  ;;  %535 = vmatpush.bf16.msra.mxu0 %v1103_v0  ;;  %v1097_v6 = vld [vmem:[%s1581_s1 + $0x8] sm:$0xff]  ;;  %v1201_v7 = vld [vmem:[%s1583_s0 + $0xf0] sm:$0x11]  ;;  %v1096_v8 = vld [vmem:[%s1581_s1] sm:$0xff] }
   0x4   :  { %v837_v9 = vld [vmem:[%s1583_s0 + $0x50] sm:$0xf]  ;;  %v1078_v10 = vld [vmem:[%s1583_s0 + $0x60] sm:$0xf0]  ;;  %v877_v11 = vld [vmem:[%s1583_s0 + $0xa0] sm:$0xf]  ;;  %v229_v15 = vunpack.c.l.b16 %v1201_v7 }
   0x5   :  { %v1088_v12 = vld [vmem:[%s1583_s0 + $0xb0] sm:$0xf0]  ;;  %v797_v13 = vld [vmem:[%s1583_s0] sm:$0xf]  ;;  %v1127_v16 = vld [vmem:[%s1581_s1 + $0xf8] sm:$0xff]  ;;  %v838_v18 = vor.u32 %v1078_v10, %v837_v9 }
   0x6   :  { %1135 = vmatpush.bf16.msra.mxu1 %v1102_v1  ;;  %1136 = vmatpush.bf16.msra.mxu2 %v1102_v1  ;;  %v1068_v14 = vld [vmem:[%s1583_s0 + $0x10] sm:$0xf0]  ;;  %v1119_v17 = vld [vmem:[%s1581_s1 + $0xb8] sm:$0xff]  ;;  %v878_v19 = vor.u32 %v1088_v12, %v877_v11  ;;  %v264_v23 = vpack.c.b16 %v229_v15, %v229_v15  ;;  %v1125_v28 = vld [vmem:[%s1581_s1 + $0xe8] sm:$0xff] }
   0x7   :  { %1137 = vmatpush.bf16.msra.mxu3 %v1102_v1  ;;  %536 = vmatpush.bf16.msra.mxu0 %v1102_v1  ;;  %v798_v20 = vor.u32 %v1068_v14, %v797_v13  ;;  %v1111_v21 = vld [vmem:[%s1581_s1 + $0x78] sm:$0xff]  ;;  %v1126_v24 = vld [vmem:[%s1581_s1 + $0xf0] sm:$0xff]  ;;  %v1117_v29 = vld [vmem:[%s1581_s1 + $0xa8] sm:$0xff] }
   0x8   :  { %v1131_v22 = vld [vmem:[%s1581_s1 + $0x118] sm:$0xff]  ;;  %v1118_v25 = vld [vmem:[%s1581_s1 + $0xb0] sm:$0xff]  ;;  %v1109_v30 = vld [vmem:[%s1581_s1 + $0x68] sm:$0xff] }
   0x9   :  { %v1110_v26 = vld [vmem:[%s1581_s1 + $0x70] sm:$0xff]  ;;  %v1129_v31 = vld [vmem:[%s1581_s1 + $0x108] sm:$0xff]  ;;  %v1124_v32 = vld [vmem:[%s1581_s1 + $0xe0] sm:$0xff] }
   0xa   :  { %1138 = vmatpush.bf16.msra.mxu1 %v1101_v2  ;;  %1139 = vmatpush.bf16.msra.mxu2 %v1101_v2  ;;  %v1130_v27 = vld [vmem:[%s1581_s1 + $0x110] sm:$0xff]  ;;  %v1116_v33 = vld [vmem:[%s1581_s1 + $0xa0] sm:$0xff]  ;;  %v857_v35 = vld [vmem:[%s1583_s0 + $0x78] sm:$0xf] }
   0xb   :  { %1140 = vmatpush.bf16.msra.mxu3 %v1101_v2  ;;  %537 = vmatpush.bf16.msra.mxu0 %v1101_v2  ;;  %v1108_v34 = vld [vmem:[%s1581_s1 + $0x60] sm:$0xff]  ;;  %v1083_v36 = vld [vmem:[%s1583_s0 + $0x88] sm:$0xf0]  ;;  %v897_v37 = vld [vmem:[%s1583_s0 + $0xc8] sm:$0xf] }
   0xc   :  { %v1093_v38 = vld [vmem:[%s1583_s0 + $0xd8] sm:$0xf0]  ;;  %v817_v39 = vld [vmem:[%s1583_s0 + $0x28] sm:$0xf]  ;;  %v1128_v41 = vld [vmem:[%s1581_s1 + $0x100] sm:$0xff]  ;;  %v858_v44 = vor.u32 %v1083_v36, %v857_v35 }
   0xd   :  { %v1073_v40 = vld [vmem:[%s1583_s0 + $0x38] sm:$0xf0]  ;;  %v898_v45 = vor.u32 %v1093_v38, %v897_v37  ;;  %v1122_v48 = vld [vmem:[%s1581_s1 + $0xd0] sm:$0xff]  ;;  %v1121_v51 = vld [vmem:[%s1581_s1 + $0xc8] sm:$0xff] }
   0xe   :  { %1141 = vmatpush.bf16.msra.mxu1 %v1100_v3  ;;  %1142 = vmatpush.bf16.msra.mxu2 %v1100_v3  ;;  %v1123_v42 = vld [vmem:[%s1581_s1 + $0xd8] sm:$0xff]  ;;  %v818_v46 = vor.u32 %v1073_v40, %v817_v39  ;;  %v1114_v49 = vld [vmem:[%s1581_s1 + $0x90] sm:$0xff]  ;;  %v1113_v52 = vld [vmem:[%s1581_s1 + $0x88] sm:$0xff] }
   0xf   :  { %1143 = vmatpush.bf16.msra.mxu3 %v1100_v3  ;;  %538 = vmatpush.bf16.msra.mxu0 %v1100_v3  ;;  %v1115_v43 = vld [vmem:[%s1581_s1 + $0x98] sm:$0xff]  ;;  %v1106_v50 = vld [vmem:[%s1581_s1 + $0x50] sm:$0xff]  ;;  %v1105_v53 = vld [vmem:[%s1581_s1 + $0x48] sm:$0xff] }
  0x10   :  { %v1107_v47 = vld [vmem:[%s1581_s1 + $0x58] sm:$0xff]  ;;  %v1120_v54 = vld [vmem:[%s1581_s1 + $0xc0] sm:$0xff]  ;;  %v1067_v56 = vld [vmem:[%s1583_s0 + $0xc] sm:$0xf] }
  0x11   :  { %v1112_v55 = vld [vmem:[%s1581_s1 + $0x80] sm:$0xff]  ;;  %v799_v60 = vld [vmem:[%s1583_s0 + $0x14] sm:$0xf0]  ;;  %v805_v61 = vld [vmem:[%s1583_s0 + $0x8] sm:$0xf] }
  0x12   :  { %1144 = vmatpush.bf16.msra.mxu1 %v1099_v4  ;;  %1145 = vmatpush.bf16.msra.mxu2 %v1099_v4  ;;  %v807_v57 = vld [vmem:[%s1583_s0 + $0x1c] sm:$0xf0]  ;;  %v1066_v59 = vld [vmem:[%s1583_s0 + $0x4] sm:$0xf]  ;;  %v1069_v62 = vld [vmem:[%s1583_s0 + $0x18] sm:$0xf0] }
  0x13   :  { %1146 = vmatpush.bf16.msra.mxu3 %v1099_v4  ;;  %539 = vmatpush.bf16.msra.mxu0 %v1099_v4  ;;  %v1104_v58 = vld [vmem:[%s1581_s1 + $0x40] sm:$0xff]  ;;  %v810_v63 = vor.u32 %v1067_v56, %v807_v57  ;;  %v813_v0 = vld [vmem:[%s1583_s0 + $0x10] sm:$0xf]  ;;  %v802_v2 = vor.u32 %v1066_v59, %v799_v60  ;;  %v806_v3 = vor.u32 %v1069_v62, %v805_v61  ;;  %v833_v13 = vld [vmem:[%s1583_s0 + $0x38] sm:$0xf] }
  0x14   :  { %v1070_v1 = vld [vmem:[%s1583_s0 + $0x20] sm:$0xf0]  ;;  %v819_v9 = vld [vmem:[%s1583_s0 + $0x3c] sm:$0xf0]  ;;  %v825_v10 = vld [vmem:[%s1583_s0 + $0x30] sm:$0xf] }
  0x15   :  { %v814_v4 = vor.u32 %v1070_v1, %v813_v0  ;;  %v1074_v11 = vld [vmem:[%s1583_s0 + $0x40] sm:$0xf0]  ;;  %v1075_v14 = vld [vmem:[%s1583_s0 + $0x48] sm:$0xf0]  ;;  %v1084_v35 = vld [vmem:[%s1583_s0 + $0x90] sm:$0xf0] }
  0x16   :  { %1147 = vmatpush.bf16.msra.mxu1 %v1098_v5  ;;  %1148 = vmatpush.bf16.msra.mxu2 %v1098_v5  ;;  %v873_v37 = vld [vmem:[%s1583_s0 + $0x88] sm:$0xf]  ;;  %v1085_v38 = vld [vmem:[%s1583_s0 + $0x98] sm:$0xf0]  ;;  %v1091_v56 = vld [vmem:[%s1583_s0 + $0xcc] sm:$0xf] }
  0x17   :  { %1149 = vmatpush.bf16.msra.mxu3 %v1098_v5  ;;  %540 = vmatpush.bf16.msra.mxu0 %v1098_v5  ;;  %v1072_v5 = vld [vmem:[%s1583_s0 + $0x34] sm:$0xf]  ;;  %v899_v57 = vld [vmem:[%s1583_s0 + $0xdc] sm:$0xf0]  ;;  %v1094_v59 = vld [vmem:[%s1583_s0 + $0xe0] sm:$0xf0] }
  0x18   :  { %v913_v61 = vld [vmem:[%s1583_s0 + $0xd8] sm:$0xf]  ;;  %v1095_v62 = vld [vmem:[%s1583_s0 + $0xe8] sm:$0xf0] }
  0x19   :  { %v914_v1 = vor.u32 %v1095_v62, %v913_v61 }
  0x1a   :  { %1150 = vmatpush.bf16.msra.mxu1 %v1097_v6  ;;  %1151 = vmatpush.bf16.msra.mxu2 %v1097_v6 }
  0x1b   :  { %1152 = vmatpush.bf16.msra.mxu3 %v1097_v6  ;;  %541 = vmatpush.bf16.msra.mxu0 %v1097_v6  ;;  %v827_v6 = vld [vmem:[%s1583_s0 + $0x44] sm:$0xf0] }
  0x1c   :  { %v830_v12 = vor.u32 %v1072_v5, %v827_v6  ;;  %v230_v5 = vunpack.c.h.b16 %v1201_v7 }
  0x1e   :  { %1153 = vmatpush.bf16.msra.mxu1 %v1096_v8  ;;  %1154 = vmatpush.bf16.msra.mxu2 %v1096_v8 }
  0x1f   :  { %1155 = vmatpush.bf16.msra.mxu3 %v1096_v8  ;;  %542 = vmatpush.bf16.msra.mxu0 %v1096_v8  ;;  %v1071_v8 = vld [vmem:[%s1583_s0 + $0x2c] sm:$0xf] }
  0x20   :  { %v822_v15 = vor.u32 %v1071_v8, %v819_v9 }
  0x21   :  { %553 = vmatmul.bf16.vlgmr.msra.gmra.mxu1 %v838_v18  ;;  %563 = vmatmul.bf16.vlgmr.msra.gmra.mxu2 %v878_v19  ;;  %v1077_v18 = vld [vmem:[%s1583_s0 + $0x5c] sm:$0xf]  ;;  %v847_v19 = vld [vmem:[%s1583_s0 + $0x6c] sm:$0xf0] }
  0x22   :  { %621 = vmatpush.bf16.msrb.mxu2 %v1119_v17  ;;  %543 = vmatmul.bf16.vlgmr.msra.gmra.mxu0 %v798_v20  ;;  %v834_v17 = vor.u32 %v1075_v14, %v833_v13  ;;  %v1076_v20 = vld [vmem:[%s1583_s0 + $0x54] sm:$0xf] }
  0x23   :  { %664 = vmatpush.bf16.msrb.mxu3 %v1127_v16  ;;  %578 = vmatpush.bf16.msrb.mxu1 %v1111_v21  ;;  %v826_v16 = vor.u32 %v1074_v11, %v825_v10  ;;  %v839_v21 = vld [vmem:[%s1583_s0 + $0x64] sm:$0xf0]  ;;  %v265_v10 = vpack.c.b16 %v230_v5, %v230_v5 }
  0x24   :  { %711 = vmatpush.bf16.msrb.mxu0 %v1131_v22  ;;  %573 = vmatmul.bf16.vlgmr.msra.gmra.mxu3 %v264_v23  ;;  %v845_v22 = vld [vmem:[%s1583_s0 + $0x58] sm:$0xf]  ;;  %v1079_v23 = vld [vmem:[%s1583_s0 + $0x68] sm:$0xf0] }
  0x26   :  { %622 = vmatpush.bf16.msrb.mxu2 %v1118_v25  ;;  %v853_v25 = vld [vmem:[%s1583_s0 + $0x60] sm:$0xf] }
  0x27   :  { %665 = vmatpush.bf16.msrb.mxu3 %v1126_v24  ;;  %579 = vmatpush.bf16.msrb.mxu1 %v1110_v26  ;;  %v850_v24 = vor.u32 %v1077_v18, %v847_v19  ;;  %v1080_v26 = vld [vmem:[%s1583_s0 + $0x70] sm:$0xf0] }
  0x28   :  { %712 = vmatpush.bf16.msrb.mxu0 %v1130_v27  ;;  %v842_v27 = vor.u32 %v1076_v20, %v839_v21 }
  0x2a   :  { %623 = vmatpush.bf16.msrb.mxu2 %v1117_v29  ;;  %v854_v29 = vor.u32 %v1080_v26, %v853_v25 }
  0x2b   :  { %666 = vmatpush.bf16.msrb.mxu3 %v1125_v28  ;;  %580 = vmatpush.bf16.msrb.mxu1 %v1109_v30  ;;  %v846_v28 = vor.u32 %v1079_v23, %v845_v22  ;;  %v1082_v30 = vld [vmem:[%s1583_s0 + $0x84] sm:$0xf] }
  0x2c   :  { %713 = vmatpush.bf16.msrb.mxu0 %v1129_v31  ;;  %v867_v31 = vld [vmem:[%s1583_s0 + $0x94] sm:$0xf0] }
  0x2d   :  { %v870_v36 = vor.u32 %v1082_v30, %v867_v31 }
  0x2e   :  { %624 = vmatpush.bf16.msrb.mxu2 %v1116_v33  ;;  %v859_v33 = vld [vmem:[%s1583_s0 + $0x8c] sm:$0xf0] }
  0x2f   :  { %667 = vmatpush.bf16.msrb.mxu3 %v1124_v32  ;;  %581 = vmatpush.bf16.msrb.mxu1 %v1108_v34  ;;  %v1081_v32 = vld [vmem:[%s1583_s0 + $0x7c] sm:$0xf]  ;;  %v865_v34 = vld [vmem:[%s1583_s0 + $0x80] sm:$0xf] }
  0x30   :  { %714 = vmatpush.bf16.msrb.mxu0 %v1128_v41  ;;  %v862_v39 = vor.u32 %v1081_v32, %v859_v33  ;;  %v866_v40 = vor.u32 %v1084_v35, %v865_v34  ;;  %v874_v41 = vor.u32 %v1085_v38, %v873_v37 }
  0x31   :  { %558 = vmatmul.bf16.gmra.mxu1 %v858_v44  ;;  %568 = vmatmul.bf16.gmra.mxu2 %v898_v45  ;;  %v1086_v44 = vld [vmem:[%s1583_s0 + $0xa4] sm:$0xf]  ;;  %v879_v45 = vld [vmem:[%s1583_s0 + $0xb4] sm:$0xf0] }
  0x32   :  { %625 = vmatpush.bf16.msrb.mxu2 %v1115_v43  ;;  %548 = vmatmul.bf16.gmra.mxu0 %v818_v46  ;;  %v887_v43 = vld [vmem:[%s1583_s0 + $0xbc] sm:$0xf0]  ;;  %v885_v46 = vld [vmem:[%s1583_s0 + $0xa8] sm:$0xf] }
  0x33   :  { %668 = vmatpush.bf16.msrb.mxu3 %v1123_v42  ;;  %582 = vmatpush.bf16.msrb.mxu1 %v1107_v47  ;;  %v1087_v42 = vld [vmem:[%s1583_s0 + $0xac] sm:$0xf]  ;;  %v1089_v47 = vld [vmem:[%s1583_s0 + $0xb8] sm:$0xf0] }
  0x36   :  { %626 = vmatpush.bf16.msrb.mxu2 %v1114_v49  ;;  %v893_v49 = vld [vmem:[%s1583_s0 + $0xb0] sm:$0xf] }
  0x37   :  { %669 = vmatpush.bf16.msrb.mxu3 %v1122_v48  ;;  %583 = vmatpush.bf16.msrb.mxu1 %v1106_v50  ;;  %v890_v48 = vor.u32 %v1087_v42, %v887_v43  ;;  %v1090_v50 = vld [vmem:[%s1583_s0 + $0xc0] sm:$0xf0] }
  0x3a   :  { %627 = vmatpush.bf16.msrb.mxu2 %v1113_v52  ;;  %v886_v52 = vor.u32 %v1089_v47, %v885_v46 }
  0x3b   :  { %670 = vmatpush.bf16.msrb.mxu3 %v1121_v51  ;;  %584 = vmatpush.bf16.msrb.mxu1 %v1105_v53  ;;  %v882_v51 = vor.u32 %v1086_v44, %v879_v45  ;;  %v894_v53 = vor.u32 %v1090_v50, %v893_v49 }
  0x3e   :  { %628 = vmatpush.bf16.msrb.mxu2 %v1112_v55  ;;  %v907_v55 = vld [vmem:[%s1583_s0 + $0xe4] sm:$0xf0] }
  0x3f   :  { %671 = vmatpush.bf16.msrb.mxu3 %v1120_v54  ;;  %585 = vmatpush.bf16.msrb.mxu1 %v1104_v58  ;;  %v1092_v54 = vld [vmem:[%s1583_s0 + $0xd4] sm:$0xf]  ;;  %v905_v58 = vld [vmem:[%s1583_s0 + $0xd0] sm:$0xf] }
  0x40   :  { %v910_v60 = vor.u32 %v1092_v54, %v907_v55  ;;  %v906_v0 = vor.u32 %v1094_v59, %v905_v58 }
  0x41   :  { %629 = vmatmul.bf16.vlgmr.msrb.gmra.mxu2 %v806_v3 }
  0x42   :  { %672 = vmatmul.bf16.vlgmr.msrb.gmra.mxu3 %v810_v63  ;;  %586 = vmatmul.bf16.vlgmr.msrb.gmra.mxu1 %v802_v2  ;;  %v902_v63 = vor.u32 %v1091_v56, %v899_v57  ;;  %v52_v2 = vld [vmem:[%s1583_s0 + $0xf8] sm:$0x11] }
  0x43   :  { %1059 = vmatmul.msk.bf16.vlgmr.msrb.gmra.mxu0 %vm513_vm0, %v814_v4  ;;  %v232_v3 = vunpack.c.h.b16 %v52_v2  ;;  %v53_v4 = vld [vmem:[%s1583_s0 + $0x100] sm:$0x1]  ;;  %v231_v6 = vunpack.c.l.b16 %v52_v2 }
  0x44   :  { %v233_v8 = vunpack.c.l.b16 %v53_v4 }
  0x45   :  { %v267_v9 = vpack.c.b16 %v232_v3, %v232_v3  ;;  %v266_v11 = vpack.c.b16 %v231_v6, %v231_v6 }
  0x46   :  { %v268_v13 = vpack.c.b16 %v233_v8, %v233_v8 }
  0x51   :  { %634 = vmatmul.bf16.gmra.mxu2 %v826_v16 }
  0x52   :  { %677 = vmatmul.bf16.gmra.mxu3 %v830_v12  ;;  %591 = vmatmul.bf16.gmra.mxu1 %v822_v15  ;;  %v1490_v15 = vld [vmem:[%s1582_s2] ss:$0 sm:$0xff] }
  0x53   :  { %1060 = vmatmul.msk.bf16.gmra.mxu0 %vm513_vm0, %v834_v17 }
  0x61   :  { %639 = vmatmul.bf16.gmra.mxu2 %v846_v28 }
  0x62   :  { %682 = vmatmul.bf16.gmra.mxu3 %v850_v24  ;;  %596 = vmatmul.bf16.gmra.mxu1 %v842_v27 }
  0x63   :  { %1061 = vmatmul.msk.bf16.gmra.mxu0 %vm513_vm0, %v854_v29 }
  0x71   :  { %644 = vmatmul.bf16.gmra.mxu2 %v866_v40 }
  0x72   :  { %687 = vmatmul.bf16.gmra.mxu3 %v870_v36  ;;  %601 = vmatmul.bf16.gmra.mxu1 %v862_v39 }
  0x73   :  { %1062 = vmatmul.msk.bf16.gmra.mxu0 %vm513_vm0, %v874_v41 }
  0x81   :  { %649 = vmatmul.bf16.gmra.mxu2 %v886_v52 }
  0x82   :  { %692 = vmatmul.bf16.gmra.mxu3 %v890_v48  ;;  %606 = vmatmul.bf16.gmra.mxu1 %v882_v51 }
  0x83   :  { %1063 = vmatmul.msk.bf16.gmra.mxu0 %vm513_vm0, %v894_v53 }
  0x91   :  { %654 = vmatmul.bf16.gmra.mxu2 %v906_v0 }
  0x92   :  { %697 = vmatmul.bf16.gmra.mxu3 %v910_v60  ;;  %611 = vmatmul.bf16.gmra.mxu1 %v902_v63 }
  0x93   :  { %1064 = vmatmul.msk.bf16.gmra.mxu0 %vm513_vm0, %v914_v1 }
  0x9e   :  { %v1484_v12 = vpop.f32.mrf.mxu1 }
  0x9f   :  { %v544_v14 = vpop.f32.mrf.mxu0 }
  0xa0   :  { %v545_v34 = vadd.f32 %v1490_v15, %v544_v14 }
  0xa1   :  { %659 = vmatmul.bf16.gmra.mxu2 %v266_v11 }
  0xa2   :  { %702 = vmatmul.bf16.gmra.mxu3 %v267_v9  ;;  %616 = vmatmul.bf16.gmra.mxu1 %v265_v10 }
  0xa3   :  { %1065 = vmatmul.msk.bf16.gmra.mxu0 %vm513_vm0, %v268_v13  ;;  %v555_v13 = vadd.f32 %v1490_v15, %v1484_v12 }
  0xa4   :  { %v564_v7 = vpop.f32.mrf.mxu2 }
  0xa5   :  { %v1493_v16 = vadd.f32 %v1490_v15, %v564_v7 }
  0xa6   :  { %v1495_v17 = vpop.f32.mrf.mxu1 }
  0xa7   :  { %v574_v18 = vpop.f32.mrf.mxu3  ;;  %v546_v19 = vpop.f32.mrf.mxu0 }
  0xa8   :  { %v1498_v20 = vadd.f32 %v1490_v15, %v574_v18  ;;  %v547_v42 = vadd.f32 %v1490_v15, %v546_v19 }
  0xac   :  { %v566_v21 = vpop.f32.mrf.mxu2 }
  0xad   :  { %v1501_v22 = vadd.f32 %v1490_v15, %v566_v21 }
  0xae   :  { %v1503_v23 = vpop.f32.mrf.mxu1 }
  0xaf   :  { %v576_v24 = vpop.f32.mrf.mxu3  ;;  %v549_v25 = vpop.f32.mrf.mxu0 }
  0xb0   :  { %v550_v53 = vadd.f32 %v1490_v15, %v549_v25 }
  0xb4   :  { %v569_v26 = vpop.f32.mrf.mxu2 }
  0xb5   :  { %v1506_v27 = vadd.f32 %v1490_v15, %v569_v26 }
  0xb6   :  { %v1508_v28 = vpop.f32.mrf.mxu1 }
  0xb7   :  { %v551_v29 = vpop.f32.mrf.mxu0 }
  0xb8   :  { %v552_v0 = vadd.f32 %v1490_v15, %v551_v29 }
  0xbc   :  { %v571_v30 = vpop.f32.mrf.mxu2 }
  0xbd   :  { %v1511_v31 = vadd.f32 %v1490_v15, %v571_v30 }
  0xbf   :  { %v587_v32 = vpop.f32.mrf.mxu1 }
  0xc0   :  { %v716_v33 = vpop.f32.mrf.mxu0  ;;  %v588_v36 = vadd.f32 %v587_v32, %v545_v34  ;;  %v557_v32 = vadd.f32 %v1490_v15, %v1495_v17 }
  0xc4   :  { %v630_v37 = vpop.f32.mrf.mxu2 }
  0xc5   :  { %v673_v35 = vpop.f32.mrf.mxu3  ;;  %v631_v38 = vadd.f32 %v630_v37, %v588_v36 }
  0xc7   :  { %v589_v39 = vpop.f32.mrf.mxu1  ;;  %v674_v40 = vadd.f32 %v673_v35, %v631_v38 }
  0xc8   :  { %v718_v41 = vpop.f32.mrf.mxu0  ;;  %v590_v46 = vadd.f32 %v589_v39, %v547_v42  ;;  %v560_v42 = vadd.f32 %v1490_v15, %v1503_v23 }
  0xc9   :  { %v717_v43 = vadd.f32 %v716_v33, %v674_v40 }
  0xcb   :  { %v750_v45 = vmax.f32 %v717_v43, 0.0 }
  0xcc   :  { %v632_v47 = vpop.f32.mrf.mxu2 }
  0xcd   :  { %v675_v44 = vpop.f32.mrf.mxu3  ;;  %v763_v48 = vpack.c.bf16 %v750_v45, %v750_v45  ;;  %v633_v49 = vadd.f32 %v632_v47, %v590_v46 }
  0xcf   :  { %v592_v50 = vpop.f32.mrf.mxu1  ;;  %777 = vst.msk [vmem:[%s1584_s3] sm:$0xf] %vm776_vm1, %v763_v48  ;;  %v676_v51 = vadd.f32 %v675_v44, %v633_v49 }
  0xd0   :  { %v721_v52 = vpop.f32.mrf.mxu0  ;;  %v593_v57 = vadd.f32 %v592_v50, %v550_v53 }
  0xd1   :  { %v719_v54 = vadd.f32 %v718_v41, %v676_v51 }
  0xd3   :  { %v751_v56 = vmax.f32 %v719_v54, 0.0 }
  0xd4   :  { %v635_v58 = vpop.f32.mrf.mxu2 }
  0xd5   :  { %v678_v55 = vpop.f32.mrf.mxu3  ;;  %v764_v59 = vpack.c.bf16 %v751_v56, %v751_v56  ;;  %v636_v60 = vadd.f32 %v635_v58, %v593_v57 }
  0xd7   :  { %v594_v61 = vpop.f32.mrf.mxu1  ;;  %778 = vst.msk [vmem:[%s1584_s3 + $0x4] sm:$0xf] %vm776_vm1, %v764_v59  ;;  %v679_v62 = vadd.f32 %v678_v55, %v636_v60 }
  0xd8   :  { %v723_v63 = vpop.f32.mrf.mxu0  ;;  %v595_v4 = vadd.f32 %v594_v61, %v552_v0 }
  0xd9   :  { %v722_v1 = vadd.f32 %v721_v52, %v679_v62  ;;  %v562_v52 = vadd.f32 %v1490_v15, %v1508_v28 }
  0xdb   :  { %v752_v3 = vmax.f32 %v722_v1, 0.0 }
  0xdc   :  { %v637_v5 = vpop.f32.mrf.mxu2 }
  0xdd   :  { %v680_v2 = vpop.f32.mrf.mxu3  ;;  %v765_v6 = vpack.c.bf16 %v752_v3, %v752_v3  ;;  %v638_v8 = vadd.f32 %v637_v5, %v595_v4 }
  0xdf   :  { %v597_v9 = vpop.f32.mrf.mxu1  ;;  %779 = vst.msk [vmem:[%s1584_s3 + $0x8] sm:$0xf] %vm776_vm1, %v765_v6  ;;  %v681_v10 = vadd.f32 %v680_v2, %v638_v8 }
  0xe0   :  { %v726_v11 = vpop.f32.mrf.mxu0  ;;  %v598_v19 = vadd.f32 %v597_v9, %v555_v13 }
  0xe1   :  { %v724_v14 = vadd.f32 %v723_v63, %v681_v10 }
  0xe3   :  { %v753_v18 = vmax.f32 %v724_v14, 0.0 }
  0xe4   :  { %v640_v21 = vpop.f32.mrf.mxu2 }
  0xe5   :  { %v683_v7 = vpop.f32.mrf.mxu3  ;;  %v766_v24 = vpack.c.bf16 %v753_v18, %v753_v18  ;;  %v641_v25 = vadd.f32 %v640_v21, %v598_v19 }
  0xe7   :  { %v599_v26 = vpop.f32.mrf.mxu1  ;;  %780 = vst.msk [vmem:[%s1584_s3 + $0xc] sm:$0xf] %vm776_vm1, %v766_v24  ;;  %v684_v29 = vadd.f32 %v683_v7, %v641_v25 }
  0xe8   :  { %v728_v30 = vpop.f32.mrf.mxu0  ;;  %v600_v35 = vadd.f32 %v599_v26, %v557_v32 }
  0xe9   :  { %v727_v33 = vadd.f32 %v726_v11, %v684_v29 }
  0xeb   :  { %v754_v34 = vmax.f32 %v727_v33, 0.0 }
  0xec   :  { %v642_v36 = vpop.f32.mrf.mxu2 }
  0xed   :  { %v685_v12 = vpop.f32.mrf.mxu3  ;;  %v767_v37 = vpack.c.bf16 %v754_v34, %v754_v34  ;;  %v643_v38 = vadd.f32 %v642_v36, %v600_v35 }
  0xef   :  { %v602_v39 = vpop.f32.mrf.mxu1  ;;  %781 = vst.msk [vmem:[%s1584_s3 + $0x10] sm:$0xf] %vm776_vm1, %v767_v37  ;;  %v686_v40 = vadd.f32 %v685_v12, %v643_v38 }
  0xf0   :  { %v731_v41 = vpop.f32.mrf.mxu0  ;;  %v603_v45 = vadd.f32 %v602_v39, %v560_v42 }
  0xf1   :  { %v729_v43 = vadd.f32 %v728_v30, %v686_v40 }
  0xf3   :  { %v755_v44 = vmax.f32 %v729_v43, 0.0 }
  0xf4   :  { %v645_v46 = vpop.f32.mrf.mxu2 }
  0xf5   :  { %v688_v17 = vpop.f32.mrf.mxu3  ;;  %v768_v47 = vpack.c.bf16 %v755_v44, %v755_v44  ;;  %v646_v48 = vadd.f32 %v645_v46, %v603_v45 }
  0xf7   :  { %v604_v49 = vpop.f32.mrf.mxu1  ;;  %782 = vst.msk [vmem:[%s1584_s3 + $0x14] sm:$0xf] %vm776_vm1, %v768_v47  ;;  %v689_v50 = vadd.f32 %v688_v17, %v646_v48 }
  0xf8   :  { %v733_v51 = vpop.f32.mrf.mxu0  ;;  %v605_v55 = vadd.f32 %v604_v49, %v562_v52 }
  0xf9   :  { %v732_v53 = vadd.f32 %v731_v41, %v689_v50 }
  0xfb   :  { %v756_v54 = vmax.f32 %v732_v53, 0.0 }
  0xfc   :  { %v647_v56 = vpop.f32.mrf.mxu2 }
  0xfd   :  { %v690_v23 = vpop.f32.mrf.mxu3  ;;  %v769_v57 = vpack.c.bf16 %v756_v54, %v756_v54  ;;  %v648_v58 = vadd.f32 %v647_v56, %v605_v55 }
  0xff   :  { %v607_v59 = vpop.f32.mrf.mxu1  ;;  %783 = vst.msk [vmem:[%s1584_s3 + $0x18] sm:$0xf] %vm776_vm1, %v769_v57  ;;  %v691_v60 = vadd.f32 %v690_v23, %v648_v58 }
 0x100   :  { %v736_v61 = vpop.f32.mrf.mxu0  ;;  %v608_v15 = vadd.f32 %v607_v59, %v1493_v16 }
 0x101   :  { %v734_v62 = vadd.f32 %v733_v51, %v691_v60 }
 0x103   :  { %v757_v0 = vmax.f32 %v734_v62, 0.0 }
 0x104   :  { %v650_v28 = vpop.f32.mrf.mxu2 }
 0x105   :  { %v693_v63 = vpop.f32.mrf.mxu3  ;;  %v770_v1 = vpack.c.bf16 %v757_v0, %v757_v0  ;;  %v651_v2 = vadd.f32 %v650_v28, %v608_v15 }
 0x107   :  { %v609_v3 = vpop.f32.mrf.mxu1  ;;  %784 = vst.msk [vmem:[%s1584_s3 + $0x1c] sm:$0xf] %vm776_vm1, %v770_v1  ;;  %v694_v4 = vadd.f32 %v693_v63, %v651_v2 }
 0x108   :  { %v738_v5 = vpop.f32.mrf.mxu0  ;;  %v610_v10 = vadd.f32 %v609_v3, %v1501_v22 }
 0x109   :  { %v737_v6 = vadd.f32 %v736_v61, %v694_v4 }
 0x10b   :  { %v758_v9 = vmax.f32 %v737_v6, 0.0 }
 0x10c   :  { %v652_v11 = vpop.f32.mrf.mxu2 }
 0x10d   :  { %v695_v8 = vpop.f32.mrf.mxu3  ;;  %v771_v13 = vpack.c.bf16 %v758_v9, %v758_v9  ;;  %v653_v14 = vadd.f32 %v652_v11, %v610_v10 }
 0x10f   :  { %v612_v16 = vpop.f32.mrf.mxu1  ;;  %785 = vst.msk [vmem:[%s1584_s3 + $0x20] sm:$0xf] %vm776_vm1, %v771_v13  ;;  %v696_v7 = vadd.f32 %v695_v8, %v653_v14 }
 0x110   :  { %v741_v18 = vpop.f32.mrf.mxu0  ;;  %v613_v25 = vadd.f32 %v612_v16, %v1506_v27 }
 0x111   :  { %v739_v19 = vadd.f32 %v738_v5, %v696_v7 }
 0x113   :  { %v759_v24 = vmax.f32 %v739_v19, 0.0 }
 0x114   :  { %v655_v26 = vpop.f32.mrf.mxu2 }
 0x115   :  { %v698_v21 = vpop.f32.mrf.mxu3  ;;  %v772_v29 = vpack.c.bf16 %v759_v24, %v759_v24  ;;  %v656_v30 = vadd.f32 %v655_v26, %v613_v25 }
 0x117   :  { %v614_v22 = vpop.f32.mrf.mxu1  ;;  %786 = vst.msk [vmem:[%s1584_s3 + $0x24] sm:$0xf] %vm776_vm1, %v772_v29  ;;  %v699_v32 = vadd.f32 %v698_v21, %v656_v30 }
 0x118   :  { %v743_v33 = vpop.f32.mrf.mxu0  ;;  %v615_v36 = vadd.f32 %v614_v22, %v1511_v31 }
 0x119   :  { %v742_v12 = vadd.f32 %v741_v18, %v699_v32 }
 0x11b   :  { %v760_v35 = vmax.f32 %v742_v12, 0.0 }
 0x11c   :  { %v657_v37 = vpop.f32.mrf.mxu2 }
 0x11d   :  { %v700_v34 = vpop.f32.mrf.mxu3  ;;  %v773_v38 = vpack.c.bf16 %v760_v35, %v760_v35  ;;  %v658_v39 = vadd.f32 %v657_v37, %v615_v36 }
 0x11f   :  { %v617_v27 = vpop.f32.mrf.mxu1  ;;  %787 = vst.msk [vmem:[%s1584_s3 + $0x28] sm:$0xf] %vm776_vm1, %v773_v38  ;;  %v701_v40 = vadd.f32 %v700_v34, %v658_v39 }
 0x120   :  { %v746_v41 = vpop.f32.mrf.mxu0  ;;  %v618_v44 = vadd.f32 %v617_v27, %v1498_v20 }
 0x121   :  { %v744_v42 = vadd.f32 %v743_v33, %v701_v40 }
 0x123   :  { %v761_v17 = vmax.f32 %v744_v42, 0.0 }
 0x124   :  { %v660_v45 = vpop.f32.mrf.mxu2 }
 0x125   :  { %v703_v43 = vpop.f32.mrf.mxu3  ;;  %v774_v46 = vpack.c.bf16 %v761_v17, %v761_v17  ;;  %v661_v47 = vadd.f32 %v660_v45, %v618_v44 }
 0x127   :  { %v619_v31 = vpop.f32.mrf.mxu1  ;;  %788 = vst.msk [vmem:[%s1584_s3 + $0x2c] sm:$0xf] %vm776_vm1, %v774_v46  ;;  %v704_v48 = vadd.f32 %v703_v43, %v661_v47 }
 0x128   :  { %v748_v49 = vpop.f32.mrf.mxu0 }
 0x129   :  { %v747_v50 = vadd.f32 %v746_v41, %v704_v48 }
 0x12b   :  { %v762_v52 = vmax.f32 %v747_v50, 0.0 }
 0x12c   :  { %v662_v53 = vpop.f32.mrf.mxu2 }
 0x12d   :  { %v705_v51 = vpop.f32.mrf.mxu3  ;;  %v775_v23 = vpack.c.bf16 %v762_v52, %v762_v52 }
 0x12f   :  { %790 = vst.msk [vmem:[%s1584_s3 + $0x30] sm:$0x1] %vm789_vm2, %v775_v23 }

// kernel: forward.7
= control target key start
LH: loop header
LB: loop body
LE: loop exit
PB: predicated region body
PF: predicated region fallthrough
CT: control target
= control target key end

     0   :  { %s15393_s0 = inlined_call_operand.vmem [shape: bf16[2,3136], index: 0, kind: input, shape index: {}]   ;;  %s15394_s1 = inlined_call_operand.vmem [shape: bf16[3136,512], index: 1, kind: input, shape index: {}]   ;;  %s15395_s2 = inlined_call_operand.vmem [shape: f32[1,512], index: 2, kind: input, shape index: {}]   ;;  %s15396_s3 = inlined_call_operand.vmem [shape: f32[512,2], index: 3, kind: input, shape index: {}]   ;;  %s15397_s4 = inlined_call_operand.vmem [shape: f32[1,2], index: 4, kind: input, shape index: {}]   ;;  %s15398_s5 = inlined_call_operand.hbm [shape: f32[2,2], index: 5, kind: output, shape index: {}]  }
   0x1   :  { %v6384_v0 = vld [vmem:[%s15394_s1 + $0xe0] sm:$0xf]  ;;  %v9440_v1 = vld [vmem:[%s15394_s1 + $0xec] sm:$0xf0] }
   0x2   :  { %v6512_v2 = vld [vmem:[%s15394_s1 + $0x1e0] sm:$0xf]  ;;  %v6385_v3 = vor.u32 %v9440_v1, %v6384_v0  ;;  %v9472_v4 = vld [vmem:[%s15394_s1 + $0x1ec] sm:$0xf0] }
   0x3   :  { %v6640_v5 = vld [vmem:[%s15394_s1 + $0x2e0] sm:$0xf]  ;;  %v9504_v6 = vld [vmem:[%s15394_s1 + $0x2ec] sm:$0xf0]  ;;  %v6513_v7 = vor.u32 %v9472_v4, %v6512_v2 }
   0x4   :  { %v6641_v8 = vor.u32 %v9504_v6, %v6640_v5  ;;  %v6768_v9 = vld [vmem:[%s15394_s1 + $0x3e0] sm:$0xf]  ;;  %v9536_v10 = vld [vmem:[%s15394_s1 + $0x3ec] sm:$0xf0]  ;;  %4800 = vmatpush.bf16.msra.mxu0 %v6385_v3 }
   0x5   :  { %v6368_v11 = vld [vmem:[%s15394_s1 + $0xc0] sm:$0xf]  ;;  %v6769_v12 = vor.u32 %v9536_v10, %v6768_v9  ;;  %v9436_v13 = vld [vmem:[%s15394_s1 + $0xcc] sm:$0xf0]  ;;  %4813 = vmatpush.bf16.msra.mxu1 %v6513_v7 }
   0x6   :  { %v6496_v14 = vld [vmem:[%s15394_s1 + $0x1c0] sm:$0xf]  ;;  %v9468_v15 = vld [vmem:[%s15394_s1 + $0x1cc] sm:$0xf0]  ;;  %4826 = vmatpush.bf16.msra.mxu2 %v6641_v8  ;;  %v6369_v16 = vor.u32 %v9436_v13, %v6368_v11 }
   0x7   :  { %v6497_v17 = vor.u32 %v9468_v15, %v6496_v14  ;;  %v6624_v18 = vld [vmem:[%s15394_s1 + $0x2c0] sm:$0xf]  ;;  %v9500_v19 = vld [vmem:[%s15394_s1 + $0x2cc] sm:$0xf0]  ;;  %4839 = vmatpush.bf16.msra.mxu3 %v6769_v12 }
   0x8   :  { %v6752_v20 = vld [vmem:[%s15394_s1 + $0x3c0] sm:$0xf]  ;;  %v6625_v21 = vor.u32 %v9500_v19, %v6624_v18  ;;  %v9532_v22 = vld [vmem:[%s15394_s1 + $0x3cc] sm:$0xf0]  ;;  %4801 = vmatpush.bf16.msra.mxu0 %v6369_v16 }
   0x9   :  { %v6352_v23 = vld [vmem:[%s15394_s1 + $0xa0] sm:$0xf]  ;;  %v9432_v24 = vld [vmem:[%s15394_s1 + $0xac] sm:$0xf0]  ;;  %v6753_v25 = vor.u32 %v9532_v22, %v6752_v20  ;;  %4814 = vmatpush.bf16.msra.mxu1 %v6497_v17 }
   0xa   :  { %v6480_v26 = vld [vmem:[%s15394_s1 + $0x1a0] sm:$0xf]  ;;  %v9464_v27 = vld [vmem:[%s15394_s1 + $0x1ac] sm:$0xf0]  ;;  %v6353_v29 = vor.u32 %v9432_v24, %v6352_v23  ;;  %4827 = vmatpush.bf16.msra.mxu2 %v6625_v21 }
   0xb   :  { %v6608_v28 = vld [vmem:[%s15394_s1 + $0x2a0] sm:$0xf]  ;;  %v9496_v30 = vld [vmem:[%s15394_s1 + $0x2ac] sm:$0xf0]  ;;  %v6481_v33 = vor.u32 %v9464_v27, %v6480_v26  ;;  %4840 = vmatpush.bf16.msra.mxu3 %v6753_v25 }
   0xc   :  { %v6736_v31 = vld [vmem:[%s15394_s1 + $0x3a0] sm:$0xf]  ;;  %v9528_v32 = vld [vmem:[%s15394_s1 + $0x3ac] sm:$0xf0]  ;;  %v6609_v34 = vor.u32 %v9496_v30, %v6608_v28  ;;  %4802 = vmatpush.bf16.msra.mxu0 %v6353_v29 }
   0xd   :  { %v6336_v35 = vld [vmem:[%s15394_s1 + $0x80] sm:$0xf]  ;;  %v9428_v36 = vld [vmem:[%s15394_s1 + $0x8c] sm:$0xf0]  ;;  %v6737_v38 = vor.u32 %v9528_v32, %v6736_v31  ;;  %4815 = vmatpush.bf16.msra.mxu1 %v6481_v33 }
   0xe   :  { %v6464_v37 = vld [vmem:[%s15394_s1 + $0x180] sm:$0xf]  ;;  %v9460_v39 = vld [vmem:[%s15394_s1 + $0x18c] sm:$0xf0]  ;;  %v6337_v44 = vor.u32 %v9428_v36, %v6336_v35  ;;  %4828 = vmatpush.bf16.msra.mxu2 %v6609_v34 }
   0xf   :  { %v6592_v40 = vld [vmem:[%s15394_s1 + $0x280] sm:$0xf]  ;;  %v9492_v41 = vld [vmem:[%s15394_s1 + $0x28c] sm:$0xf0]  ;;  %v6465_v45 = vor.u32 %v9460_v39, %v6464_v37  ;;  %4841 = vmatpush.bf16.msra.mxu3 %v6737_v38 }
  0x10   :  { %v6720_v42 = vld [vmem:[%s15394_s1 + $0x380] sm:$0xf]  ;;  %v9524_v43 = vld [vmem:[%s15394_s1 + $0x38c] sm:$0xf0]  ;;  %v6593_v46 = vor.u32 %v9492_v41, %v6592_v40  ;;  %4803 = vmatpush.bf16.msra.mxu0 %v6337_v44 }
  0x11   :  { %v6320_v47 = vld [vmem:[%s15394_s1 + $0x60] sm:$0xf]  ;;  %v9424_v48 = vld [vmem:[%s15394_s1 + $0x6c] sm:$0xf0]  ;;  %v6721_v50 = vor.u32 %v9524_v43, %v6720_v42  ;;  %4816 = vmatpush.bf16.msra.mxu1 %v6465_v45 }
  0x12   :  { %v6448_v49 = vld [vmem:[%s15394_s1 + $0x160] sm:$0xf]  ;;  %v9456_v51 = vld [vmem:[%s15394_s1 + $0x16c] sm:$0xf0]  ;;  %v6321_v56 = vor.u32 %v9424_v48, %v6320_v47  ;;  %4829 = vmatpush.bf16.msra.mxu2 %v6593_v46 }
  0x13   :  { %v6576_v52 = vld [vmem:[%s15394_s1 + $0x260] sm:$0xf]  ;;  %v9488_v53 = vld [vmem:[%s15394_s1 + $0x26c] sm:$0xf0]  ;;  %v6449_v57 = vor.u32 %v9456_v51, %v6448_v49  ;;  %4842 = vmatpush.bf16.msra.mxu3 %v6721_v50 }
  0x14   :  { %v6704_v54 = vld [vmem:[%s15394_s1 + $0x360] sm:$0xf]  ;;  %v9520_v55 = vld [vmem:[%s15394_s1 + $0x36c] sm:$0xf0]  ;;  %v6577_v58 = vor.u32 %v9488_v53, %v6576_v52  ;;  %4804 = vmatpush.bf16.msra.mxu0 %v6321_v56 }
  0x15   :  { %v6304_v59 = vld [vmem:[%s15394_s1 + $0x40] sm:$0xf]  ;;  %v9420_v60 = vld [vmem:[%s15394_s1 + $0x4c] sm:$0xf0]  ;;  %v6705_v62 = vor.u32 %v9520_v55, %v6704_v54  ;;  %4817 = vmatpush.bf16.msra.mxu1 %v6449_v57 }
  0x16   :  { %v6432_v61 = vld [vmem:[%s15394_s1 + $0x140] sm:$0xf]  ;;  %v9452_v63 = vld [vmem:[%s15394_s1 + $0x14c] sm:$0xf0]  ;;  %v6305_v4 = vor.u32 %v9420_v60, %v6304_v59  ;;  %4830 = vmatpush.bf16.msra.mxu2 %v6577_v58 }
  0x17   :  { %v6560_v0 = vld [vmem:[%s15394_s1 + $0x240] sm:$0xf]  ;;  %v9484_v1 = vld [vmem:[%s15394_s1 + $0x24c] sm:$0xf0]  ;;  %v6433_v5 = vor.u32 %v9452_v63, %v6432_v61  ;;  %4843 = vmatpush.bf16.msra.mxu3 %v6705_v62 }
  0x18   :  { %v6688_v2 = vld [vmem:[%s15394_s1 + $0x340] sm:$0xf]  ;;  %v9516_v3 = vld [vmem:[%s15394_s1 + $0x34c] sm:$0xf0]  ;;  %v6561_v6 = vor.u32 %v9484_v1, %v6560_v0  ;;  %4805 = vmatpush.bf16.msra.mxu0 %v6305_v4 }
  0x19   :  { %v6288_v7 = vld [vmem:[%s15394_s1 + $0x20] sm:$0xf]  ;;  %v9416_v8 = vld [vmem:[%s15394_s1 + $0x2c] sm:$0xf0]  ;;  %v6689_v10 = vor.u32 %v9516_v3, %v6688_v2  ;;  %4818 = vmatpush.bf16.msra.mxu1 %v6433_v5 }
  0x1a   :  { %v6416_v9 = vld [vmem:[%s15394_s1 + $0x120] sm:$0xf]  ;;  %v9448_v11 = vld [vmem:[%s15394_s1 + $0x12c] sm:$0xf0]  ;;  %v6289_v16 = vor.u32 %v9416_v8, %v6288_v7  ;;  %4831 = vmatpush.bf16.msra.mxu2 %v6561_v6 }
  0x1b   :  { %v6544_v12 = vld [vmem:[%s15394_s1 + $0x220] sm:$0xf]  ;;  %v9480_v13 = vld [vmem:[%s15394_s1 + $0x22c] sm:$0xf0]  ;;  %v6417_v19 = vor.u32 %v9448_v11, %v6416_v9  ;;  %4844 = vmatpush.bf16.msra.mxu3 %v6689_v10 }
  0x1c   :  { %v6672_v14 = vld [vmem:[%s15394_s1 + $0x320] sm:$0xf]  ;;  %v9512_v15 = vld [vmem:[%s15394_s1 + $0x32c] sm:$0xf0]  ;;  %v6545_v20 = vor.u32 %v9480_v13, %v6544_v12  ;;  %4806 = vmatpush.bf16.msra.mxu0 %v6289_v16 }
  0x1d   :  { %v6272_v17 = vld [vmem:[%s15394_s1] sm:$0xf]  ;;  %v9412_v18 = vld [vmem:[%s15394_s1 + $0xc] sm:$0xf0]  ;;  %v6673_v24 = vor.u32 %v9512_v15, %v6672_v14  ;;  %4819 = vmatpush.bf16.msra.mxu1 %v6417_v19 }
  0x1e   :  { %v6400_v21 = vld [vmem:[%s15394_s1 + $0x100] sm:$0xf]  ;;  %v9444_v22 = vld [vmem:[%s15394_s1 + $0x10c] sm:$0xf0]  ;;  %v6273_v31 = vor.u32 %v9412_v18, %v6272_v17  ;;  %4832 = vmatpush.bf16.msra.mxu2 %v6545_v20 }
  0x1f   :  { %v6528_v23 = vld [vmem:[%s15394_s1 + $0x200] sm:$0xf]  ;;  %v9476_v25 = vld [vmem:[%s15394_s1 + $0x20c] sm:$0xf0]  ;;  %v6401_v35 = vor.u32 %v9444_v22, %v6400_v21  ;;  %4845 = vmatpush.bf16.msra.mxu3 %v6673_v24 }
  0x20   :  { %v6656_v26 = vld [vmem:[%s15394_s1 + $0x300] sm:$0xf]  ;;  %v9508_v27 = vld [vmem:[%s15394_s1 + $0x30c] sm:$0xf0]  ;;  %v6529_v36 = vor.u32 %v9476_v25, %v6528_v23  ;;  %4807 = vmatpush.bf16.msra.mxu0 %v6273_v31 }
  0x21   :  { %v6896_v28 = vld [vmem:[%s15394_s1 + $0x4e0] sm:$0xf]  ;;  %v9568_v29 = vld [vmem:[%s15394_s1 + $0x4ec] sm:$0xf0]  ;;  %v6657_v39 = vor.u32 %v9508_v27, %v6656_v26  ;;  %4820 = vmatpush.bf16.msra.mxu1 %v6401_v35 }
  0x22   :  { %v7024_v30 = vld [vmem:[%s15394_s1 + $0x5e0] sm:$0xf]  ;;  %v9600_v32 = vld [vmem:[%s15394_s1 + $0x5ec] sm:$0xf0]  ;;  %v6897_v40 = vor.u32 %v9568_v29, %v6896_v28  ;;  %4833 = vmatpush.bf16.msra.mxu2 %v6529_v36 }
  0x23   :  { %v7152_v33 = vld [vmem:[%s15394_s1 + $0x6e0] sm:$0xf]  ;;  %v9632_v34 = vld [vmem:[%s15394_s1 + $0x6ec] sm:$0xf0]  ;;  %v7025_v41 = vor.u32 %v9600_v32, %v7024_v30  ;;  %4846 = vmatpush.bf16.msra.mxu3 %v6657_v39 }
  0x24   :  { %v7280_v37 = vld [vmem:[%s15394_s1 + $0x7e0] sm:$0xf]  ;;  %v9664_v38 = vld [vmem:[%s15394_s1 + $0x7ec] sm:$0xf0]  ;;  %v7153_v42 = vor.u32 %v9632_v34, %v7152_v33  ;;  %4852 = vmatpush.bf16.msrb.mxu0 %v6897_v40 }
  0x25   :  { %v6880_v43 = vld [vmem:[%s15394_s1 + $0x4c0] sm:$0xf]  ;;  %v9564_v44 = vld [vmem:[%s15394_s1 + $0x4cc] sm:$0xf0]  ;;  %v7281_v46 = vor.u32 %v9664_v38, %v7280_v37  ;;  %4865 = vmatpush.bf16.msrb.mxu1 %v7025_v41 }
  0x26   :  { %v7008_v45 = vld [vmem:[%s15394_s1 + $0x5c0] sm:$0xf]  ;;  %v9596_v47 = vld [vmem:[%s15394_s1 + $0x5cc] sm:$0xf0]  ;;  %v6881_v52 = vor.u32 %v9564_v44, %v6880_v43  ;;  %4878 = vmatpush.bf16.msrb.mxu2 %v7153_v42 }
  0x27   :  { %v7136_v48 = vld [vmem:[%s15394_s1 + $0x6c0] sm:$0xf]  ;;  %v9628_v49 = vld [vmem:[%s15394_s1 + $0x6cc] sm:$0xf0]  ;;  %v7009_v55 = vor.u32 %v9596_v47, %v7008_v45  ;;  %4891 = vmatpush.bf16.msrb.mxu3 %v7281_v46 }
  0x28   :  { %v7264_v50 = vld [vmem:[%s15394_s1 + $0x7c0] sm:$0xf]  ;;  %v9660_v51 = vld [vmem:[%s15394_s1 + $0x7cc] sm:$0xf0]  ;;  %v7137_v56 = vor.u32 %v9628_v49, %v7136_v48  ;;  %4853 = vmatpush.bf16.msrb.mxu0 %v6881_v52 }
  0x29   :  { %v6864_v53 = vld [vmem:[%s15394_s1 + $0x4a0] sm:$0xf]  ;;  %v9560_v54 = vld [vmem:[%s15394_s1 + $0x4ac] sm:$0xf0]  ;;  %v7265_v60 = vor.u32 %v9660_v51, %v7264_v50  ;;  %4866 = vmatpush.bf16.msrb.mxu1 %v7009_v55 }
  0x2a   :  { %v6992_v57 = vld [vmem:[%s15394_s1 + $0x5a0] sm:$0xf]  ;;  %v9592_v58 = vld [vmem:[%s15394_s1 + $0x5ac] sm:$0xf0]  ;;  %v6865_v1 = vor.u32 %v9560_v54, %v6864_v53  ;;  %4879 = vmatpush.bf16.msrb.mxu2 %v7137_v56 }
  0x2b   :  { %v22_v59 = vld [vmem:[%s15393_s0] sm:$0xff]  ;;  %v9624_v62 = vld [vmem:[%s15394_s1 + $0x6ac] sm:$0xf0]  ;;  %v6993_v2 = vor.u32 %v9592_v58, %v6992_v57  ;;  %4892 = vmatpush.bf16.msrb.mxu3 %v7265_v60 }
  0x2c   :  { %v7120_v61 = vld [vmem:[%s15394_s1 + $0x6a0] sm:$0xf]  ;;  %821 = vst [vmem:[#allocation1] ss:$9 sm:$0xff] %v22_v59  ;;  %v9656_v0 = vld [vmem:[%s15394_s1 + $0x7ac] sm:$0xf0]  ;;  %4854 = vmatpush.bf16.msrb.mxu0 %v6865_v1 }
  0x2d   :  { %v7248_v63 = vld [vmem:[%s15394_s1 + $0x7a0] sm:$0xf]  ;;  %v7121_v3 = vor.u32 %v9624_v62, %v7120_v61  ;;  %v9556_v5 = vld [vmem:[%s15394_s1 + $0x48c] sm:$0xf0]  ;;  %4867 = vmatpush.bf16.msrb.mxu1 %v6993_v2  ;;  %v23_v61 = vld [vmem:[%s15393_s0 + $0x8] sm:$0xff] }
  0x2e   :  { %v6848_v4 = vld [vmem:[%s15394_s1 + $0x480] sm:$0xf]  ;;  %v7249_v7 = vor.u32 %v9656_v0, %v7248_v63  ;;  %v9588_v8 = vld [vmem:[%s15394_s1 + $0x58c] sm:$0xf0] }
  0x2f   :  { %v6976_v6 = vld [vmem:[%s15394_s1 + $0x580] sm:$0xf]  ;;  %v9620_v10 = vld [vmem:[%s15394_s1 + $0x68c] sm:$0xf0]  ;;  %v6849_v14 = vor.u32 %v9556_v5, %v6848_v4  ;;  %4880 = vmatpush.bf16.msrb.mxu2 %v7121_v3 }
  0x30   :  { %v7104_v9 = vld [vmem:[%s15394_s1 + $0x680] sm:$0xf]  ;;  %v9652_v12 = vld [vmem:[%s15394_s1 + $0x78c] sm:$0xf0]  ;;  %v6977_v18 = vor.u32 %v9588_v8, %v6976_v6  ;;  %4893 = vmatpush.bf16.msrb.mxu3 %v7249_v7 }
  0x31   :  { %v7232_v11 = vld [vmem:[%s15394_s1 + $0x780] sm:$0xf]  ;;  %v9552_v15 = vld [vmem:[%s15394_s1 + $0x46c] sm:$0xf0]  ;;  %v7105_v19 = vor.u32 %v9620_v10, %v7104_v9  ;;  %4855 = vmatpush.bf16.msrb.mxu0 %v6849_v14 }
  0x32   :  { %v6832_v13 = vld [vmem:[%s15394_s1 + $0x460] sm:$0xf]  ;;  %v9584_v17 = vld [vmem:[%s15394_s1 + $0x56c] sm:$0xf0]  ;;  %v7233_v23 = vor.u32 %v9652_v12, %v7232_v11  ;;  %4868 = vmatpush.bf16.msrb.mxu1 %v6977_v18 }
  0x33   :  { %v6960_v16 = vld [vmem:[%s15394_s1 + $0x560] sm:$0xf]  ;;  %v10562_v20 = vld [vmem:[#allocation1 + $0x12] sm:$0xff]  ;;  %v10575_v26 = vld [vmem:[#allocation1 + $0x9] sm:$0xff]  ;;  %v6833_v29 = vor.u32 %v9552_v15, %v6832_v13  ;;  %4881 = vmatpush.bf16.msrb.mxu2 %v7105_v19 }
  0x34   :  { %v10564_v21 = vld [vmem:[#allocation1] sm:$0xff]  ;;  %v9616_v25 = vld [vmem:[%s15394_s1 + $0x66c] sm:$0xf0]  ;;  %4834 = vmatmul.bf16.vlgmr.msra.gmra.mxu2 %v10562_v20  ;;  %4821 = vmatmul.bf16.vlgmr.msra.gmra.mxu1 %v10575_v26  ;;  %v6961_v30 = vor.u32 %v9584_v17, %v6960_v16  ;;  %v10652_v60 = vld [vmem:[#allocation1 + $0x36] sm:$0xff] }
  0x35   :  { %v10566_v22 = vld [vmem:[#allocation1 + $0x1b] sm:$0xff]  ;;  %v9648_v28 = vld [vmem:[%s15394_s1 + $0x76c] sm:$0xf0]  ;;  %4808 = vmatmul.bf16.vlgmr.msra.gmra.mxu0 %v10564_v21  ;;  %4894 = vmatpush.bf16.msrb.mxu3 %v7233_v23  ;;  %v10657_v0 = vld [vmem:[#allocation1 + $0x24] sm:$0xff] }
  0x36   :  { %v7088_v24 = vld [vmem:[%s15394_s1 + $0x660] sm:$0xf]  ;;  %4847 = vmatmul.bf16.vlgmr.msra.gmra.mxu3 %v10566_v22  ;;  %v9548_v33 = vld [vmem:[%s15394_s1 + $0x44c] sm:$0xf0]  ;;  %4856 = vmatpush.bf16.msrb.mxu0 %v6833_v29 }
  0x37   :  { %v7216_v27 = vld [vmem:[%s15394_s1 + $0x760] sm:$0xf]  ;;  %v7089_v31 = vor.u32 %v9616_v25, %v7088_v24  ;;  %v9580_v36 = vld [vmem:[%s15394_s1 + $0x54c] sm:$0xf0]  ;;  %4869 = vmatpush.bf16.msrb.mxu1 %v6961_v30 }
  0x38   :  { %v6816_v32 = vld [vmem:[%s15394_s1 + $0x440] sm:$0xf]  ;;  %v7217_v35 = vor.u32 %v9648_v28, %v7216_v27  ;;  %v9612_v38 = vld [vmem:[%s15394_s1 + $0x64c] sm:$0xf0] }
  0x39   :  { %v6944_v34 = vld [vmem:[%s15394_s1 + $0x540] sm:$0xf]  ;;  %v9644_v40 = vld [vmem:[%s15394_s1 + $0x74c] sm:$0xf0]  ;;  %v6817_v41 = vor.u32 %v9548_v33, %v6816_v32  ;;  %4882 = vmatpush.bf16.msrb.mxu2 %v7089_v31 }
  0x3a   :  { %v7072_v37 = vld [vmem:[%s15394_s1 + $0x640] sm:$0xf]  ;;  %v6945_v43 = vor.u32 %v9580_v36, %v6944_v34  ;;  %v9544_v45 = vld [vmem:[%s15394_s1 + $0x42c] sm:$0xf0]  ;;  %4895 = vmatpush.bf16.msrb.mxu3 %v7217_v35 }
  0x3b   :  { %v7200_v39 = vld [vmem:[%s15394_s1 + $0x740] sm:$0xf]  ;;  %v7073_v44 = vor.u32 %v9612_v38, %v7072_v37  ;;  %v9576_v47 = vld [vmem:[%s15394_s1 + $0x52c] sm:$0xf0]  ;;  %4857 = vmatpush.bf16.msrb.mxu0 %v6817_v41 }
  0x3c   :  { %v6800_v42 = vld [vmem:[%s15394_s1 + $0x420] sm:$0xf]  ;;  %v7201_v48 = vor.u32 %v9644_v40, %v7200_v39  ;;  %v9608_v50 = vld [vmem:[%s15394_s1 + $0x62c] sm:$0xf0]  ;;  %4870 = vmatpush.bf16.msrb.mxu1 %v6945_v43 }
  0x3d   :  { %v6928_v46 = vld [vmem:[%s15394_s1 + $0x520] sm:$0xf]  ;;  %v9640_v52 = vld [vmem:[%s15394_s1 + $0x72c] sm:$0xf0]  ;;  %v6801_v55 = vor.u32 %v9544_v45, %v6800_v42  ;;  %4883 = vmatpush.bf16.msrb.mxu2 %v7073_v44 }
  0x3e   :  { %v7056_v49 = vld [vmem:[%s15394_s1 + $0x620] sm:$0xf]  ;;  %v9540_v54 = vld [vmem:[%s15394_s1 + $0x40c] sm:$0xf0]  ;;  %v6929_v62 = vor.u32 %v9576_v47, %v6928_v46  ;;  %4896 = vmatpush.bf16.msrb.mxu3 %v7201_v48 }
  0x3f   :  { %v7184_v51 = vld [vmem:[%s15394_s1 + $0x720] sm:$0xf]  ;;  %v9572_v57 = vld [vmem:[%s15394_s1 + $0x50c] sm:$0xf0]  ;;  %v7057_v63 = vor.u32 %v9608_v50, %v7056_v49  ;;  %4858 = vmatpush.bf16.msrb.mxu0 %v6801_v55 }
  0x40   :  { %v6784_v53 = vld [vmem:[%s15394_s1 + $0x400] sm:$0xf]  ;;  %v9604_v59 = vld [vmem:[%s15394_s1 + $0x60c] sm:$0xf0]  ;;  %v7185_v3 = vor.u32 %v9640_v52, %v7184_v51  ;;  %4871 = vmatpush.bf16.msrb.mxu1 %v6929_v62 }
  0x41   :  { %v6912_v56 = vld [vmem:[%s15394_s1 + $0x500] sm:$0xf]  ;;  %v10661_v2 = vld [vmem:[#allocation1 + $0x2d] sm:$0xff]  ;;  %v6785_v9 = vor.u32 %v9540_v54, %v6784_v53  ;;  %4884 = vmatpush.bf16.msrb.mxu2 %v7057_v63 }
  0x42   :  { %v7040_v58 = vld [vmem:[%s15394_s1 + $0x600] sm:$0xf]  ;;  %v9636_v5 = vld [vmem:[%s15394_s1 + $0x70c] sm:$0xf0]  ;;  %v6913_v13 = vor.u32 %v9572_v57, %v6912_v56  ;;  %4897 = vmatpush.bf16.msrb.mxu3 %v7185_v3 }
  0x43   :  { %v10659_v1 = vld [vmem:[#allocation1 + $0x3f] sm:$0xff]  ;;  %v9696_v7 = vld [vmem:[%s15394_s1 + $0x8ec] sm:$0xf0]  ;;  %v7041_v14 = vor.u32 %v9604_v59, %v7040_v58  ;;  %4859 = vmatpush.bf16.msrb.mxu0 %v6785_v9 }
  0x44   :  { %v7168_v4 = vld [vmem:[%s15394_s1 + $0x700] sm:$0xf]  ;;  %831 = vst [vmem:[#allocation1] ss:$9 sm:$0xff] %v23_v61  ;;  %v9728_v10 = vld [vmem:[%s15394_s1 + $0x9ec] sm:$0xf0]  ;;  %4872 = vmatpush.bf16.msrb.mxu1 %v6913_v13 }
  0x45   :  { %v7408_v6 = vld [vmem:[%s15394_s1 + $0x8e0] sm:$0xf]  ;;  %v9760_v12 = vld [vmem:[%s15394_s1 + $0xaec] sm:$0xf0]  ;;  %v7169_v17 = vor.u32 %v9636_v5, %v7168_v4  ;;  %4885 = vmatpush.bf16.msrb.mxu2 %v7041_v14 }
  0x46   :  { %v7536_v8 = vld [vmem:[%s15394_s1 + $0x9e0] sm:$0xf]  ;;  %v9792_v16 = vld [vmem:[%s15394_s1 + $0xbec] sm:$0xf0]  ;;  %v7409_v18 = vor.u32 %v9696_v7, %v7408_v6  ;;  %4860 = vmatmul.bf16.vlgmr.msrb.gmra.mxu0 %v10657_v0 }
  0x47   :  { %v7664_v11 = vld [vmem:[%s15394_s1 + $0xae0] sm:$0xf]  ;;  %v7537_v19 = vor.u32 %v9728_v10, %v7536_v8  ;;  %v9692_v25 = vld [vmem:[%s15394_s1 + $0x8cc] sm:$0xf0]  ;;  %4898 = vmatpush.bf16.msrb.mxu3 %v7169_v17  ;;  %4873 = vmatmul.bf16.vlgmr.msrb.gmra.mxu1 %v10661_v2 }
  0x48   :  { %v7792_v15 = vld [vmem:[%s15394_s1 + $0xbe0] sm:$0xf]  ;;  %v7665_v23 = vor.u32 %v9760_v12, %v7664_v11  ;;  %v9724_v29 = vld [vmem:[%s15394_s1 + $0x9cc] sm:$0xf0]  ;;  %4904 = vmatpush.bf16.msra.mxu0 %v7409_v18  ;;  %4886 = vmatmul.bf16.vlgmr.msrb.gmra.mxu2 %v10652_v60 }
  0x49   :  { %v7392_v24 = vld [vmem:[%s15394_s1 + $0x8c0] sm:$0xf]  ;;  %v7793_v28 = vor.u32 %v9792_v16, %v7792_v15  ;;  %v9756_v31 = vld [vmem:[%s15394_s1 + $0xacc] sm:$0xf0]  ;;  %4917 = vmatpush.bf16.msra.mxu1 %v7537_v19 }
  0x4a   :  { %v7520_v27 = vld [vmem:[%s15394_s1 + $0x9c0] sm:$0xf]  ;;  %v9788_v33 = vld [vmem:[%s15394_s1 + $0xbcc] sm:$0xf0]  ;;  %v7393_v34 = vor.u32 %v9692_v25, %v7392_v24  ;;  %4930 = vmatpush.bf16.msra.mxu2 %v7665_v23  ;;  %4899 = vmatmul.bf16.vlgmr.msrb.gmra.mxu3 %v10659_v1 }
  0x4b   :  { %v7648_v30 = vld [vmem:[%s15394_s1 + $0xac0] sm:$0xf]  ;;  %v7521_v35 = vor.u32 %v9724_v29, %v7520_v27  ;;  %v9688_v38 = vld [vmem:[%s15394_s1 + $0x8ac] sm:$0xf0]  ;;  %4943 = vmatpush.bf16.msra.mxu3 %v7793_v28 }
  0x4c   :  { %v7776_v32 = vld [vmem:[%s15394_s1 + $0xbc0] sm:$0xf]  ;;  %v7649_v36 = vor.u32 %v9756_v31, %v7648_v30  ;;  %v9720_v41 = vld [vmem:[%s15394_s1 + $0x9ac] sm:$0xf0]  ;;  %4905 = vmatpush.bf16.msra.mxu0 %v7393_v34 }
  0x4d   :  { %v7376_v37 = vld [vmem:[%s15394_s1 + $0x8a0] sm:$0xf]  ;;  %v7777_v40 = vor.u32 %v9788_v33, %v7776_v32  ;;  %v9752_v43 = vld [vmem:[%s15394_s1 + $0xaac] sm:$0xf0]  ;;  %4918 = vmatpush.bf16.msra.mxu1 %v7521_v35 }
  0x4e   :  { %v7504_v39 = vld [vmem:[%s15394_s1 + $0x9a0] sm:$0xf]  ;;  %v9784_v45 = vld [vmem:[%s15394_s1 + $0xbac] sm:$0xf0]  ;;  %v7377_v46 = vor.u32 %v9688_v38, %v7376_v37  ;;  %4931 = vmatpush.bf16.msra.mxu2 %v7649_v36 }
  0x4f   :  { %v7632_v42 = vld [vmem:[%s15394_s1 + $0xaa0] sm:$0xf]  ;;  %v7505_v47 = vor.u32 %v9720_v41, %v7504_v39  ;;  %v9684_v50 = vld [vmem:[%s15394_s1 + $0x88c] sm:$0xf0]  ;;  %4944 = vmatpush.bf16.msra.mxu3 %v7777_v40 }
  0x50   :  { %v7760_v44 = vld [vmem:[%s15394_s1 + $0xba0] sm:$0xf]  ;;  %v7633_v48 = vor.u32 %v9752_v43, %v7632_v42  ;;  %v9716_v53 = vld [vmem:[%s15394_s1 + $0x98c] sm:$0xf0]  ;;  %4906 = vmatpush.bf16.msra.mxu0 %v7377_v46 }
  0x51   :  { %v7360_v49 = vld [vmem:[%s15394_s1 + $0x880] sm:$0xf]  ;;  %v7761_v52 = vor.u32 %v9784_v45, %v7760_v44  ;;  %v9748_v55 = vld [vmem:[%s15394_s1 + $0xa8c] sm:$0xf0]  ;;  %4919 = vmatpush.bf16.msra.mxu1 %v7505_v47 }
  0x52   :  { %v7488_v51 = vld [vmem:[%s15394_s1 + $0x980] sm:$0xf]  ;;  %v9780_v57 = vld [vmem:[%s15394_s1 + $0xb8c] sm:$0xf0]  ;;  %v7361_v58 = vor.u32 %v9684_v50, %v7360_v49  ;;  %4932 = vmatpush.bf16.msra.mxu2 %v7633_v48 }
  0x53   :  { %v7616_v54 = vld [vmem:[%s15394_s1 + $0xa80] sm:$0xf]  ;;  %v7489_v59 = vor.u32 %v9716_v53, %v7488_v51  ;;  %v9680_v63 = vld [vmem:[%s15394_s1 + $0x86c] sm:$0xf0]  ;;  %4945 = vmatpush.bf16.msra.mxu3 %v7761_v52 }
  0x54   :  { %v7744_v56 = vld [vmem:[%s15394_s1 + $0xb80] sm:$0xf]  ;;  %v7617_v61 = vor.u32 %v9748_v55, %v7616_v54  ;;  %v9712_v5 = vld [vmem:[%s15394_s1 + $0x96c] sm:$0xf0]  ;;  %4907 = vmatpush.bf16.msra.mxu0 %v7361_v58 }
  0x55   :  { %v7344_v62 = vld [vmem:[%s15394_s1 + $0x860] sm:$0xf]  ;;  %v7745_v4 = vor.u32 %v9780_v57, %v7744_v56  ;;  %v9744_v7 = vld [vmem:[%s15394_s1 + $0xa6c] sm:$0xf0]  ;;  %4920 = vmatpush.bf16.msra.mxu1 %v7489_v59 }
  0x56   :  { %v7472_v3 = vld [vmem:[%s15394_s1 + $0x960] sm:$0xf]  ;;  %v9776_v9 = vld [vmem:[%s15394_s1 + $0xb6c] sm:$0xf0]  ;;  %v7345_v10 = vor.u32 %v9680_v63, %v7344_v62  ;;  %4933 = vmatpush.bf16.msra.mxu2 %v7617_v61 }
  0x57   :  { %v7600_v6 = vld [vmem:[%s15394_s1 + $0xa60] sm:$0xf]  ;;  %v7473_v11 = vor.u32 %v9712_v5, %v7472_v3  ;;  %v9676_v14 = vld [vmem:[%s15394_s1 + $0x84c] sm:$0xf0]  ;;  %4946 = vmatpush.bf16.msra.mxu3 %v7745_v4 }
  0x58   :  { %v7728_v8 = vld [vmem:[%s15394_s1 + $0xb60] sm:$0xf]  ;;  %v7601_v12 = vor.u32 %v9744_v7, %v7600_v6  ;;  %v9708_v17 = vld [vmem:[%s15394_s1 + $0x94c] sm:$0xf0]  ;;  %4908 = vmatpush.bf16.msra.mxu0 %v7345_v10 }
  0x59   :  { %v7328_v13 = vld [vmem:[%s15394_s1 + $0x840] sm:$0xf]  ;;  %v7729_v16 = vor.u32 %v9776_v9, %v7728_v8  ;;  %v9740_v19 = vld [vmem:[%s15394_s1 + $0xa4c] sm:$0xf0]  ;;  %4921 = vmatpush.bf16.msra.mxu1 %v7473_v11 }
  0x5a   :  { %v7456_v15 = vld [vmem:[%s15394_s1 + $0x940] sm:$0xf]  ;;  %v9772_v24 = vld [vmem:[%s15394_s1 + $0xb4c] sm:$0xf0]  ;;  %v7329_v25 = vor.u32 %v9676_v14, %v7328_v13  ;;  %4934 = vmatpush.bf16.msra.mxu2 %v7601_v12 }
  0x5b   :  { %v7584_v18 = vld [vmem:[%s15394_s1 + $0xa40] sm:$0xf]  ;;  %v7457_v27 = vor.u32 %v9708_v17, %v7456_v15  ;;  %v9672_v30 = vld [vmem:[%s15394_s1 + $0x82c] sm:$0xf0]  ;;  %4947 = vmatpush.bf16.msra.mxu3 %v7729_v16 }
  0x5c   :  { %v7712_v23 = vld [vmem:[%s15394_s1 + $0xb40] sm:$0xf]  ;;  %v7585_v28 = vor.u32 %v9740_v19, %v7584_v18  ;;  %v9704_v33 = vld [vmem:[%s15394_s1 + $0x92c] sm:$0xf0]  ;;  %4909 = vmatpush.bf16.msra.mxu0 %v7329_v25 }
  0x5d   :  { %v7312_v29 = vld [vmem:[%s15394_s1 + $0x820] sm:$0xf]  ;;  %v7713_v32 = vor.u32 %v9772_v24, %v7712_v23  ;;  %v9736_v35 = vld [vmem:[%s15394_s1 + $0xa2c] sm:$0xf0]  ;;  %4922 = vmatpush.bf16.msra.mxu1 %v7457_v27 }
  0x5e   :  { %v7440_v31 = vld [vmem:[%s15394_s1 + $0x920] sm:$0xf]  ;;  %v9768_v37 = vld [vmem:[%s15394_s1 + $0xb2c] sm:$0xf0]  ;;  %v7313_v38 = vor.u32 %v9672_v30, %v7312_v29  ;;  %4935 = vmatpush.bf16.msra.mxu2 %v7585_v28 }
  0x5f   :  { %v7568_v34 = vld [vmem:[%s15394_s1 + $0xa20] sm:$0xf]  ;;  %v9668_v40 = vld [vmem:[%s15394_s1 + $0x80c] sm:$0xf0]  ;;  %v7441_v41 = vor.u32 %v9704_v33, %v7440_v31  ;;  %4948 = vmatpush.bf16.msra.mxu3 %v7713_v32 }
  0x60   :  { %v7696_v36 = vld [vmem:[%s15394_s1 + $0xb20] sm:$0xf]  ;;  %v7569_v42 = vor.u32 %v9736_v35, %v7568_v34  ;;  %v9700_v44 = vld [vmem:[%s15394_s1 + $0x90c] sm:$0xf0]  ;;  %4910 = vmatpush.bf16.msra.mxu0 %v7313_v38 }
  0x61   :  { %v7296_v39 = vld [vmem:[%s15394_s1 + $0x800] sm:$0xf]  ;;  %v7697_v46 = vor.u32 %v9768_v37, %v7696_v36  ;;  %v9732_v47 = vld [vmem:[%s15394_s1 + $0xa0c] sm:$0xf0]  ;;  %4923 = vmatpush.bf16.msra.mxu1 %v7441_v41 }
  0x62   :  { %v7424_v43 = vld [vmem:[%s15394_s1 + $0x900] sm:$0xf]  ;;  %v9764_v49 = vld [vmem:[%s15394_s1 + $0xb0c] sm:$0xf0]  ;;  %v7297_v53 = vor.u32 %v9668_v40, %v7296_v39  ;;  %4936 = vmatpush.bf16.msra.mxu2 %v7569_v42 }
  0x63   :  { %v7552_v45 = vld [vmem:[%s15394_s1 + $0xa00] sm:$0xf]  ;;  %v9824_v51 = vld [vmem:[%s15394_s1 + $0xcec] sm:$0xf0]  ;;  %v7425_v57 = vor.u32 %v9700_v44, %v7424_v43  ;;  %4949 = vmatpush.bf16.msra.mxu3 %v7697_v46 }
  0x64   :  { %v7680_v48 = vld [vmem:[%s15394_s1 + $0xb00] sm:$0xf]  ;;  %v9856_v54 = vld [vmem:[%s15394_s1 + $0xdec] sm:$0xf0]  ;;  %v7553_v58 = vor.u32 %v9732_v47, %v7552_v45  ;;  %4911 = vmatpush.bf16.msra.mxu0 %v7297_v53 }
  0x65   :  { %v7920_v50 = vld [vmem:[%s15394_s1 + $0xce0] sm:$0xf]  ;;  %v9888_v56 = vld [vmem:[%s15394_s1 + $0xeec] sm:$0xf0]  ;;  %v7681_v62 = vor.u32 %v9764_v49, %v7680_v48  ;;  %4924 = vmatpush.bf16.msra.mxu1 %v7425_v57 }
  0x66   :  { %v8048_v52 = vld [vmem:[%s15394_s1 + $0xde0] sm:$0xf]  ;;  %v9920_v61 = vld [vmem:[%s15394_s1 + $0xfec] sm:$0xf0]  ;;  %v7921_v63 = vor.u32 %v9824_v51, %v7920_v50  ;;  %4937 = vmatpush.bf16.msra.mxu2 %v7553_v58 }
  0x67   :  { %v8176_v55 = vld [vmem:[%s15394_s1 + $0xee0] sm:$0xf]  ;;  %v8049_v3 = vor.u32 %v9856_v54, %v8048_v52  ;;  %v9820_v6 = vld [vmem:[%s15394_s1 + $0xccc] sm:$0xf0]  ;;  %4950 = vmatpush.bf16.msra.mxu3 %v7681_v62 }
  0x68   :  { %v8304_v59 = vld [vmem:[%s15394_s1 + $0xfe0] sm:$0xf]  ;;  %v8177_v4 = vor.u32 %v9888_v56, %v8176_v55  ;;  %v9852_v9 = vld [vmem:[%s15394_s1 + $0xdcc] sm:$0xf0]  ;;  %4956 = vmatpush.bf16.msrb.mxu0 %v7921_v63 }
  0x69   :  { %v7904_v5 = vld [vmem:[%s15394_s1 + $0xcc0] sm:$0xf]  ;;  %v8305_v8 = vor.u32 %v9920_v61, %v8304_v59  ;;  %v9884_v11 = vld [vmem:[%s15394_s1 + $0xecc] sm:$0xf0]  ;;  %4969 = vmatpush.bf16.msrb.mxu1 %v8049_v3 }
  0x6a   :  { %v8032_v7 = vld [vmem:[%s15394_s1 + $0xdc0] sm:$0xf]  ;;  %v9916_v14 = vld [vmem:[%s15394_s1 + $0xfcc] sm:$0xf0]  ;;  %v7905_v18 = vor.u32 %v9820_v6, %v7904_v5  ;;  %4982 = vmatpush.bf16.msrb.mxu2 %v8177_v4 }
  0x6b   :  { %v8160_v10 = vld [vmem:[%s15394_s1 + $0xec0] sm:$0xf]  ;;  %v10915_v15 = vld [vmem:[#allocation1 + $0x12] sm:$0xff]  ;;  %v10917_v16 = vld [vmem:[#allocation1 + $0x9] sm:$0xff]  ;;  %v8033_v19 = vor.u32 %v9852_v9, %v8032_v7  ;;  %4995 = vmatpush.bf16.msrb.mxu3 %v8305_v8 }
  0x6c   :  { %v10907_v12 = vld [vmem:[#allocation1] sm:$0xff]  ;;  %v8161_v23 = vor.u32 %v9884_v11, %v8160_v10  ;;  %v9816_v25 = vld [vmem:[%s15394_s1 + $0xcac] sm:$0xf0]  ;;  %4938 = vmatmul.bf16.vlgmr.msra.gmra.mxu2 %v10915_v15  ;;  %4925 = vmatmul.bf16.vlgmr.msra.gmra.mxu1 %v10917_v16 }
  0x6d   :  { %v8288_v13 = vld [vmem:[%s15394_s1 + $0xfc0] sm:$0xf]  ;;  %4912 = vmatmul.bf16.vlgmr.msra.gmra.mxu0 %v10907_v12  ;;  %v9848_v29 = vld [vmem:[%s15394_s1 + $0xdac] sm:$0xf0]  ;;  %4970 = vmatpush.bf16.msrb.mxu1 %v8033_v19 }
  0x6e   :  { %v10919_v17 = vld [vmem:[#allocation1 + $0x1b] sm:$0xff]  ;;  %v8289_v28 = vor.u32 %v9916_v14, %v8288_v13  ;;  %v9880_v31 = vld [vmem:[%s15394_s1 + $0xeac] sm:$0xf0]  ;;  %4957 = vmatpush.bf16.msrb.mxu0 %v7905_v18  ;;  %4983 = vmatpush.bf16.msrb.mxu2 %v8161_v23 }
  0x6f   :  { %v7888_v24 = vld [vmem:[%s15394_s1 + $0xca0] sm:$0xf]  ;;  %v9912_v33 = vld [vmem:[%s15394_s1 + $0xfac] sm:$0xf0]  ;;  %4951 = vmatmul.bf16.vlgmr.msra.gmra.mxu3 %v10919_v17 }
  0x70   :  { %v8016_v27 = vld [vmem:[%s15394_s1 + $0xda0] sm:$0xf]  ;;  %v7889_v34 = vor.u32 %v9816_v25, %v7888_v24  ;;  %v9812_v38 = vld [vmem:[%s15394_s1 + $0xc8c] sm:$0xf0]  ;;  %4996 = vmatpush.bf16.msrb.mxu3 %v8289_v28 }
  0x71   :  { %v8144_v30 = vld [vmem:[%s15394_s1 + $0xea0] sm:$0xf]  ;;  %v8017_v36 = vor.u32 %v9848_v29, %v8016_v27  ;;  %v9844_v40 = vld [vmem:[%s15394_s1 + $0xd8c] sm:$0xf0] }
  0x72   :  { %v8272_v32 = vld [vmem:[%s15394_s1 + $0xfa0] sm:$0xf]  ;;  %v8145_v37 = vor.u32 %v9880_v31, %v8144_v30  ;;  %v9876_v43 = vld [vmem:[%s15394_s1 + $0xe8c] sm:$0xf0] }
  0x73   :  { %v7872_v35 = vld [vmem:[%s15394_s1 + $0xc80] sm:$0xf]  ;;  %v8273_v41 = vor.u32 %v9912_v33, %v8272_v32  ;;  %v9908_v45 = vld [vmem:[%s15394_s1 + $0xf8c] sm:$0xf0] }
  0x74   :  { %v8000_v39 = vld [vmem:[%s15394_s1 + $0xd80] sm:$0xf] }
  0x75   :  { %v8128_v42 = vld [vmem:[%s15394_s1 + $0xe80] sm:$0xf] }
  0x76   :  { %v8256_v44 = vld [vmem:[%s15394_s1 + $0xf80] sm:$0xf] }
  0x77   :  { %10 = vsyncpa [#allocation3], 0  ;;  %4958 = vmatpush.bf16.msrb.mxu0 %v7889_v34  ;;  %v7873_v46 = vor.u32 %v9812_v38, %v7872_v35  ;;  %4971 = vmatpush.bf16.msrb.mxu1 %v8017_v36  ;;  %v8001_v47 = vor.u32 %v9844_v40, %v8000_v39  ;;  %v8129_v48 = vor.u32 %v9876_v43, %v8128_v42  ;;  %v7856_v49 = vld [vmem:[%s15394_s1 + $0xc60] sm:$0xf]  ;;  %v9808_v50 = vld [vmem:[%s15394_s1 + $0xc6c] sm:$0xf0] }
  0x78   :  { %4984 = vmatpush.bf16.msrb.mxu2 %v8145_v37  ;;  %v7984_v51 = vld [vmem:[%s15394_s1 + $0xd60] sm:$0xf]  ;;  %4997 = vmatpush.bf16.msrb.mxu3 %v8273_v41  ;;  %v8257_v52 = vor.u32 %v9908_v45, %v8256_v44  ;;  %v9840_v53 = vld [vmem:[%s15394_s1 + $0xd6c] sm:$0xf0]  ;;  %v7857_v58 = vor.u32 %v9808_v50, %v7856_v49  ;;  %vm4797_vm0 = vcmask 523264   ;;  %s10228_s13 = smov [#allocation2]  }
  0x79   :  { %v8112_v54 = vld [vmem:[%s15394_s1 + $0xe60] sm:$0xf]  ;;  %v9872_v55 = vld [vmem:[%s15394_s1 + $0xe6c] sm:$0xf0]  ;;  %v7985_v59 = vor.u32 %v9840_v53, %v7984_v51  ;;  %s6259_s14 = sshll.u32 %s10228_s13, 4  ;;  %s6261_s16 = sshll.u32 %s15398_s5, 4  ;;  %s6260_s14 = int_to_ptr.vmem [resolvable:$true] %s6259_s14  ;;  %s6262_s16 = int_to_ptr.hbm [resolvable:$true] %s6261_s16 }
  0x7a   :  { %v8240_v56 = vld [vmem:[%s15394_s1 + $0xf60] sm:$0xf]  ;;  %v9904_v57 = vld [vmem:[%s15394_s1 + $0xf6c] sm:$0xf0]  ;;  %v8113_v61 = vor.u32 %v9872_v55, %v8112_v54  ;;  %vm6252_vm1 = vcmask 9216  }
  0x7b   :  { %4959 = vmatpush.bf16.msrb.mxu0 %v7873_v46  ;;  %4972 = vmatpush.bf16.msrb.mxu1 %v8001_v47  ;;  %v7840_v62 = vld [vmem:[%s15394_s1 + $0xc40] sm:$0xf]  ;;  %v9804_v63 = vld [vmem:[%s15394_s1 + $0xc4c] sm:$0xf0]  ;;  %v8241_v4 = vor.u32 %v9904_v57, %v8240_v56  ;;  %v11081_v46 = vld [vmem:[#allocation1 + $0x24] sm:$0xff] }
  0x7c   :  { %4985 = vmatpush.bf16.msrb.mxu2 %v8129_v48  ;;  %v7968_v3 = vld [vmem:[%s15394_s1 + $0xd40] sm:$0xf]  ;;  %4998 = vmatpush.bf16.msrb.mxu3 %v8257_v52  ;;  %v9836_v5 = vld [vmem:[%s15394_s1 + $0xd4c] sm:$0xf0]  ;;  %v7841_v10 = vor.u32 %v9804_v63, %v7840_v62  ;;  %v11083_v47 = vld [vmem:[#allocation1 + $0x36] sm:$0xff] }
  0x7d   :  { %v8096_v6 = vld [vmem:[%s15394_s1 + $0xe40] sm:$0xf]  ;;  %v9868_v7 = vld [vmem:[%s15394_s1 + $0xe4c] sm:$0xf0]  ;;  %v7969_v13 = vor.u32 %v9836_v5, %v7968_v3 }
  0x7e   :  { %v8224_v8 = vld [vmem:[%s15394_s1 + $0xf40] sm:$0xf]  ;;  %v9900_v9 = vld [vmem:[%s15394_s1 + $0xf4c] sm:$0xf0]  ;;  %v8097_v14 = vor.u32 %v9868_v7, %v8096_v6 }
  0x7f   :  { %4960 = vmatpush.bf16.msrb.mxu0 %v7857_v58  ;;  %v7824_v11 = vld [vmem:[%s15394_s1 + $0xc20] sm:$0xf]  ;;  %4973 = vmatpush.bf16.msrb.mxu1 %v7985_v59  ;;  %v9800_v18 = vld [vmem:[%s15394_s1 + $0xc2c] sm:$0xf0]  ;;  %v8225_v24 = vor.u32 %v9900_v9, %v8224_v8 }
  0x80   :  { %4986 = vmatpush.bf16.msrb.mxu2 %v8113_v61  ;;  %v7952_v19 = vld [vmem:[%s15394_s1 + $0xd20] sm:$0xf]  ;;  %v9832_v23 = vld [vmem:[%s15394_s1 + $0xd2c] sm:$0xf0]  ;;  %4999 = vmatpush.bf16.msrb.mxu3 %v8241_v4  ;;  %v7825_v32 = vor.u32 %v9800_v18, %v7824_v11 }
  0x81   :  { %v8080_v25 = vld [vmem:[%s15394_s1 + $0xe20] sm:$0xf]  ;;  %v9864_v27 = vld [vmem:[%s15394_s1 + $0xe2c] sm:$0xf0]  ;;  %v7953_v37 = vor.u32 %v9832_v23, %v7952_v19 }
  0x82   :  { %v8208_v28 = vld [vmem:[%s15394_s1 + $0xf20] sm:$0xf]  ;;  %v9896_v29 = vld [vmem:[%s15394_s1 + $0xf2c] sm:$0xf0]  ;;  %v8081_v38 = vor.u32 %v9864_v27, %v8080_v25 }
  0x83   :  { %v7808_v30 = vld [vmem:[%s15394_s1 + $0xc00] sm:$0xf]  ;;  %v9796_v31 = vld [vmem:[%s15394_s1 + $0xc0c] sm:$0xf0]  ;;  %4961 = vmatpush.bf16.msrb.mxu0 %v7841_v10  ;;  %4974 = vmatpush.bf16.msrb.mxu1 %v7969_v13  ;;  %v8209_v43 = vor.u32 %v9896_v29, %v8208_v28 }
  0x84   :  { %v7936_v33 = vld [vmem:[%s15394_s1 + $0xd00] sm:$0xf]  ;;  %v9828_v34 = vld [vmem:[%s15394_s1 + $0xd0c] sm:$0xf0]  ;;  %4987 = vmatpush.bf16.msrb.mxu2 %v8097_v14  ;;  %5000 = vmatpush.bf16.msrb.mxu3 %v8225_v24  ;;  %v7809_v51 = vor.u32 %v9796_v31, %v7808_v30 }
  0x85   :  { %v8064_v35 = vld [vmem:[%s15394_s1 + $0xe00] sm:$0xf]  ;;  %v9860_v36 = vld [vmem:[%s15394_s1 + $0xe0c] sm:$0xf0]  ;;  %v7937_v54 = vor.u32 %v9828_v34, %v7936_v33 }
  0x86   :  { %v8192_v39 = vld [vmem:[%s15394_s1 + $0xf00] sm:$0xf]  ;;  %v9892_v40 = vld [vmem:[%s15394_s1 + $0xf0c] sm:$0xf0]  ;;  %v8065_v55 = vor.u32 %v9860_v36, %v8064_v35 }
  0x87   :  { %v8432_v41 = vld [vmem:[%s15394_s1 + $0x10e0] sm:$0xf]  ;;  %v9952_v42 = vld [vmem:[%s15394_s1 + $0x10ec] sm:$0xf0]  ;;  %4962 = vmatpush.bf16.msrb.mxu0 %v7825_v32  ;;  %4975 = vmatpush.bf16.msrb.mxu1 %v7953_v37  ;;  %v8193_v58 = vor.u32 %v9892_v40, %v8192_v39 }
  0x88   :  { %v8560_v44 = vld [vmem:[%s15394_s1 + $0x11e0] sm:$0xf]  ;;  %v9984_v45 = vld [vmem:[%s15394_s1 + $0x11ec] sm:$0xf0]  ;;  %4988 = vmatpush.bf16.msrb.mxu2 %v8081_v38  ;;  %5001 = vmatpush.bf16.msrb.mxu3 %v8209_v43  ;;  %v8433_v59 = vor.u32 %v9952_v42, %v8432_v41 }
  0x89   :  { %v11085_v48 = vld [vmem:[#allocation1 + $0x2d] sm:$0xff]  ;;  %v11087_v49 = vld [vmem:[#allocation1 + $0x3f] sm:$0xff]  ;;  %v8561_v61 = vor.u32 %v9984_v45, %v8560_v44 }
  0x8a   :  { %v24_v50 = vld [vmem:[%s15393_s0 + $0x10] sm:$0xff]  ;;  %v8688_v52 = vld [vmem:[%s15394_s1 + $0x12e0] sm:$0xf] }
  0x8b   :  { %v10016_v53 = vld [vmem:[%s15394_s1 + $0x12ec] sm:$0xf0]  ;;  %841 = vst [vmem:[#allocation1] ss:$9 sm:$0xff] %v24_v50  ;;  %v8816_v56 = vld [vmem:[%s15394_s1 + $0x13e0] sm:$0xf]  ;;  %4963 = vmatpush.bf16.msrb.mxu0 %v7809_v51  ;;  %4976 = vmatpush.bf16.msrb.mxu1 %v7937_v54 }
  0x8c   :  { %v10048_v57 = vld [vmem:[%s15394_s1 + $0x13ec] sm:$0xf0]  ;;  %v8689_v62 = vor.u32 %v10016_v53, %v8688_v52  ;;  %v8416_v63 = vld [vmem:[%s15394_s1 + $0x10c0] sm:$0xf]  ;;  %4989 = vmatpush.bf16.msrb.mxu2 %v8065_v55  ;;  %5002 = vmatpush.bf16.msrb.mxu3 %v8193_v58 }
  0x8d   :  { %v9948_v3 = vld [vmem:[%s15394_s1 + $0x10cc] sm:$0xf0]  ;;  %v8544_v4 = vld [vmem:[%s15394_s1 + $0x11c0] sm:$0xf]  ;;  %v8817_v5 = vor.u32 %v10048_v57, %v8816_v56 }
  0x8e   :  { %v9980_v6 = vld [vmem:[%s15394_s1 + $0x11cc] sm:$0xf0]  ;;  %v8672_v7 = vld [vmem:[%s15394_s1 + $0x12c0] sm:$0xf]  ;;  %v8417_v11 = vor.u32 %v9948_v3, %v8416_v63  ;;  %4964 = vmatmul.bf16.vlgmr.msrb.gmra.mxu0 %v11081_v46  ;;  %4977 = vmatmul.bf16.vlgmr.msrb.gmra.mxu1 %v11085_v48 }
  0x8f   :  { %v10012_v8 = vld [vmem:[%s15394_s1 + $0x12cc] sm:$0xf0]  ;;  %v8800_v9 = vld [vmem:[%s15394_s1 + $0x13c0] sm:$0xf]  ;;  %5008 = vmatpush.bf16.msra.mxu0 %v8433_v59  ;;  %5021 = vmatpush.bf16.msra.mxu1 %v8561_v61  ;;  %v8545_v13 = vor.u32 %v9980_v6, %v8544_v4 }
  0x90   :  { %v10044_v10 = vld [vmem:[%s15394_s1 + $0x13cc] sm:$0xf0]  ;;  %5034 = vmatpush.bf16.msra.mxu2 %v8689_v62  ;;  %v8673_v14 = vor.u32 %v10012_v8, %v8672_v7  ;;  %v8400_v18 = vld [vmem:[%s15394_s1 + $0x10a0] sm:$0xf]  ;;  %5047 = vmatpush.bf16.msra.mxu3 %v8817_v5 }
  0x91   :  { %v9944_v19 = vld [vmem:[%s15394_s1 + $0x10ac] sm:$0xf0]  ;;  %v8528_v23 = vld [vmem:[%s15394_s1 + $0x11a0] sm:$0xf]  ;;  %v8801_v24 = vor.u32 %v10044_v10, %v8800_v9  ;;  %4990 = vmatmul.bf16.vlgmr.msrb.gmra.mxu2 %v11083_v47  ;;  %5003 = vmatmul.bf16.vlgmr.msrb.gmra.mxu3 %v11087_v49 }
  0x92   :  { %v9976_v25 = vld [vmem:[%s15394_s1 + $0x11ac] sm:$0xf0]  ;;  %v8656_v27 = vld [vmem:[%s15394_s1 + $0x12a0] sm:$0xf]  ;;  %v8401_v31 = vor.u32 %v9944_v19, %v8400_v18 }
  0x93   :  { %v10008_v28 = vld [vmem:[%s15394_s1 + $0x12ac] sm:$0xf0]  ;;  %v8784_v29 = vld [vmem:[%s15394_s1 + $0x13a0] sm:$0xf]  ;;  %5009 = vmatpush.bf16.msra.mxu0 %v8417_v11  ;;  %5022 = vmatpush.bf16.msra.mxu1 %v8545_v13  ;;  %v8529_v32 = vor.u32 %v9976_v25, %v8528_v23 }
  0x94   :  { %v10040_v30 = vld [vmem:[%s15394_s1 + $0x13ac] sm:$0xf0]  ;;  %5035 = vmatpush.bf16.msra.mxu2 %v8673_v14  ;;  %v8657_v33 = vor.u32 %v10008_v28, %v8656_v27  ;;  %v8384_v34 = vld [vmem:[%s15394_s1 + $0x1080] sm:$0xf]  ;;  %5048 = vmatpush.bf16.msra.mxu3 %v8801_v24 }
  0x95   :  { %v9940_v35 = vld [vmem:[%s15394_s1 + $0x108c] sm:$0xf0]  ;;  %v8512_v36 = vld [vmem:[%s15394_s1 + $0x1180] sm:$0xf]  ;;  %v8785_v37 = vor.u32 %v10040_v30, %v8784_v29 }
  0x96   :  { %v9972_v38 = vld [vmem:[%s15394_s1 + $0x118c] sm:$0xf0]  ;;  %v8640_v39 = vld [vmem:[%s15394_s1 + $0x1280] sm:$0xf]  ;;  %v8385_v43 = vor.u32 %v9940_v35, %v8384_v34 }
  0x97   :  { %v10004_v40 = vld [vmem:[%s15394_s1 + $0x128c] sm:$0xf0]  ;;  %v8768_v41 = vld [vmem:[%s15394_s1 + $0x1380] sm:$0xf]  ;;  %5010 = vmatpush.bf16.msra.mxu0 %v8401_v31  ;;  %5023 = vmatpush.bf16.msra.mxu1 %v8529_v32  ;;  %v8513_v44 = vor.u32 %v9972_v38, %v8512_v36 }
  0x98   :  { %v10036_v42 = vld [vmem:[%s15394_s1 + $0x138c] sm:$0xf0]  ;;  %5036 = vmatpush.bf16.msra.mxu2 %v8657_v33  ;;  %v8641_v45 = vor.u32 %v10004_v40, %v8640_v39  ;;  %v8368_v50 = vld [vmem:[%s15394_s1 + $0x1060] sm:$0xf]  ;;  %5049 = vmatpush.bf16.msra.mxu3 %v8785_v37 }
  0x99   :  { %v9936_v51 = vld [vmem:[%s15394_s1 + $0x106c] sm:$0xf0]  ;;  %v8496_v52 = vld [vmem:[%s15394_s1 + $0x1160] sm:$0xf]  ;;  %v8769_v53 = vor.u32 %v10036_v42, %v8768_v41 }
  0x9a   :  { %v9968_v54 = vld [vmem:[%s15394_s1 + $0x116c] sm:$0xf0]  ;;  %v8624_v55 = vld [vmem:[%s15394_s1 + $0x1260] sm:$0xf]  ;;  %v8369_v59 = vor.u32 %v9936_v51, %v8368_v50 }
  0x9b   :  { %v10000_v56 = vld [vmem:[%s15394_s1 + $0x126c] sm:$0xf0]  ;;  %v8752_v57 = vld [vmem:[%s15394_s1 + $0x1360] sm:$0xf]  ;;  %5011 = vmatpush.bf16.msra.mxu0 %v8385_v43  ;;  %5024 = vmatpush.bf16.msra.mxu1 %v8513_v44  ;;  %v8497_v61 = vor.u32 %v9968_v54, %v8496_v52 }
  0x9c   :  { %v10032_v58 = vld [vmem:[%s15394_s1 + $0x136c] sm:$0xf0]  ;;  %5037 = vmatpush.bf16.msra.mxu2 %v8641_v45  ;;  %v8625_v62 = vor.u32 %v10000_v56, %v8624_v55  ;;  %v8352_v63 = vld [vmem:[%s15394_s1 + $0x1040] sm:$0xf]  ;;  %5050 = vmatpush.bf16.msra.mxu3 %v8769_v53 }
  0x9d   :  { %v9932_v3 = vld [vmem:[%s15394_s1 + $0x104c] sm:$0xf0]  ;;  %v8480_v4 = vld [vmem:[%s15394_s1 + $0x1140] sm:$0xf]  ;;  %v8753_v5 = vor.u32 %v10032_v58, %v8752_v57 }
  0x9e   :  { %v9964_v6 = vld [vmem:[%s15394_s1 + $0x114c] sm:$0xf0]  ;;  %v8608_v7 = vld [vmem:[%s15394_s1 + $0x1240] sm:$0xf]  ;;  %v8353_v11 = vor.u32 %v9932_v3, %v8352_v63 }
  0x9f   :  { %v9996_v8 = vld [vmem:[%s15394_s1 + $0x124c] sm:$0xf0]  ;;  %v8736_v9 = vld [vmem:[%s15394_s1 + $0x1340] sm:$0xf]  ;;  %5012 = vmatpush.bf16.msra.mxu0 %v8369_v59  ;;  %5025 = vmatpush.bf16.msra.mxu1 %v8497_v61  ;;  %v8481_v13 = vor.u32 %v9964_v6, %v8480_v4 }
  0xa0   :  { %v10028_v10 = vld [vmem:[%s15394_s1 + $0x134c] sm:$0xf0]  ;;  %5038 = vmatpush.bf16.msra.mxu2 %v8625_v62  ;;  %v8609_v14 = vor.u32 %v9996_v8, %v8608_v7  ;;  %v8336_v18 = vld [vmem:[%s15394_s1 + $0x1020] sm:$0xf]  ;;  %5051 = vmatpush.bf16.msra.mxu3 %v8753_v5 }
  0xa1   :  { %v9928_v19 = vld [vmem:[%s15394_s1 + $0x102c] sm:$0xf0]  ;;  %v8464_v23 = vld [vmem:[%s15394_s1 + $0x1120] sm:$0xf]  ;;  %v8737_v24 = vor.u32 %v10028_v10, %v8736_v9 }
  0xa2   :  { %v9960_v25 = vld [vmem:[%s15394_s1 + $0x112c] sm:$0xf0]  ;;  %v8592_v27 = vld [vmem:[%s15394_s1 + $0x1220] sm:$0xf]  ;;  %v8337_v31 = vor.u32 %v9928_v19, %v8336_v18 }
  0xa3   :  { %v9992_v28 = vld [vmem:[%s15394_s1 + $0x122c] sm:$0xf0]  ;;  %v8720_v29 = vld [vmem:[%s15394_s1 + $0x1320] sm:$0xf]  ;;  %5013 = vmatpush.bf16.msra.mxu0 %v8353_v11  ;;  %5026 = vmatpush.bf16.msra.mxu1 %v8481_v13  ;;  %v8465_v34 = vor.u32 %v9960_v25, %v8464_v23 }
  0xa4   :  { %v10024_v30 = vld [vmem:[%s15394_s1 + $0x132c] sm:$0xf0]  ;;  %v8320_v32 = vld [vmem:[%s15394_s1 + $0x1000] sm:$0xf]  ;;  %5039 = vmatpush.bf16.msra.mxu2 %v8609_v14  ;;  %v8593_v35 = vor.u32 %v9992_v28, %v8592_v27  ;;  %5052 = vmatpush.bf16.msra.mxu3 %v8737_v24 }
  0xa5   :  { %v9924_v33 = vld [vmem:[%s15394_s1 + $0x100c] sm:$0xf0]  ;;  %v8448_v36 = vld [vmem:[%s15394_s1 + $0x1100] sm:$0xf]  ;;  %v8721_v39 = vor.u32 %v10024_v30, %v8720_v29 }
  0xa6   :  { %v9956_v37 = vld [vmem:[%s15394_s1 + $0x110c] sm:$0xf0]  ;;  %v8576_v38 = vld [vmem:[%s15394_s1 + $0x1200] sm:$0xf]  ;;  %v8321_v50 = vor.u32 %v9924_v33, %v8320_v32 }
  0xa7   :  { %v9988_v40 = vld [vmem:[%s15394_s1 + $0x120c] sm:$0xf0]  ;;  %v8704_v41 = vld [vmem:[%s15394_s1 + $0x1300] sm:$0xf]  ;;  %5014 = vmatpush.bf16.msra.mxu0 %v8337_v31  ;;  %5027 = vmatpush.bf16.msra.mxu1 %v8465_v34  ;;  %v8449_v54 = vor.u32 %v9956_v37, %v8448_v36 }
  0xa8   :  { %v10020_v42 = vld [vmem:[%s15394_s1 + $0x130c] sm:$0xf0]  ;;  %v8944_v43 = vld [vmem:[%s15394_s1 + $0x14e0] sm:$0xf]  ;;  %5040 = vmatpush.bf16.msra.mxu2 %v8593_v35  ;;  %v8577_v55 = vor.u32 %v9988_v40, %v8576_v38  ;;  %5053 = vmatpush.bf16.msra.mxu3 %v8721_v39 }
  0xa9   :  { %v10080_v44 = vld [vmem:[%s15394_s1 + $0x14ec] sm:$0xf0]  ;;  %v9072_v45 = vld [vmem:[%s15394_s1 + $0x15e0] sm:$0xf]  ;;  %v8705_v58 = vor.u32 %v10020_v42, %v8704_v41 }
  0xaa   :  { %v10112_v51 = vld [vmem:[%s15394_s1 + $0x15ec] sm:$0xf0]  ;;  %v9200_v52 = vld [vmem:[%s15394_s1 + $0x16e0] sm:$0xf]  ;;  %v8945_v59 = vor.u32 %v10080_v44, %v8944_v43 }
  0xab   :  { %v10144_v53 = vld [vmem:[%s15394_s1 + $0x16ec] sm:$0xf0]  ;;  %v9328_v56 = vld [vmem:[%s15394_s1 + $0x17e0] sm:$0xf]  ;;  %v9073_v61 = vor.u32 %v10112_v51, %v9072_v45  ;;  %5015 = vmatpush.bf16.msra.mxu0 %v8321_v50  ;;  %5028 = vmatpush.bf16.msra.mxu1 %v8449_v54 }
  0xac   :  { %v10176_v57 = vld [vmem:[%s15394_s1 + $0x17ec] sm:$0xf0]  ;;  %v9201_v62 = vor.u32 %v10144_v53, %v9200_v52  ;;  %v8928_v63 = vld [vmem:[%s15394_s1 + $0x14c0] sm:$0xf]  ;;  %5041 = vmatpush.bf16.msra.mxu2 %v8577_v55  ;;  %5054 = vmatpush.bf16.msra.mxu3 %v8705_v58 }
  0xad   :  { %v10076_v3 = vld [vmem:[%s15394_s1 + $0x14cc] sm:$0xf0]  ;;  %v9056_v4 = vld [vmem:[%s15394_s1 + $0x15c0] sm:$0xf]  ;;  %v9329_v5 = vor.u32 %v10176_v57, %v9328_v56 }
  0xae   :  { %v10108_v6 = vld [vmem:[%s15394_s1 + $0x15cc] sm:$0xf0]  ;;  %v9184_v7 = vld [vmem:[%s15394_s1 + $0x16c0] sm:$0xf]  ;;  %v8929_v19 = vor.u32 %v10076_v3, %v8928_v63 }
  0xaf   :  { %v10140_v8 = vld [vmem:[%s15394_s1 + $0x16cc] sm:$0xf0]  ;;  %v11318_v9 = vld [vmem:[#allocation1] sm:$0xff]  ;;  %5060 = vmatpush.bf16.msrb.mxu0 %v8945_v59  ;;  %5073 = vmatpush.bf16.msrb.mxu1 %v9073_v61  ;;  %v9057_v23 = vor.u32 %v10108_v6, %v9056_v4 }
  0xb0   :  { %v9312_v10 = vld [vmem:[%s15394_s1 + $0x17c0] sm:$0xf]  ;;  %v10172_v11 = vld [vmem:[%s15394_s1 + $0x17cc] sm:$0xf0]  ;;  %5086 = vmatpush.bf16.msrb.mxu2 %v9201_v62  ;;  %v9185_v24 = vor.u32 %v10140_v8, %v9184_v7  ;;  %5099 = vmatpush.bf16.msrb.mxu3 %v9329_v5  ;;  %v11411_v4 = vld [vmem:[#allocation1 + $0x24] sm:$0xff] }
  0xb1   :  { %v11326_v13 = vld [vmem:[#allocation1 + $0x12] sm:$0xff]  ;;  %v11328_v14 = vld [vmem:[#allocation1 + $0x9] sm:$0xff]  ;;  %v11330_v18 = vld [vmem:[#allocation1 + $0x1b] sm:$0xff]  ;;  %5016 = vmatmul.bf16.vlgmr.msra.gmra.mxu0 %v11318_v9  ;;  %v9313_v29 = vor.u32 %v10172_v11, %v9312_v10 }
  0xb2   :  { %v8912_v25 = vld [vmem:[%s15394_s1 + $0x14a0] sm:$0xf]  ;;  %v10072_v27 = vld [vmem:[%s15394_s1 + $0x14ac] sm:$0xf0]  ;;  %5042 = vmatmul.bf16.vlgmr.msra.gmra.mxu2 %v11326_v13  ;;  %5029 = vmatmul.bf16.vlgmr.msra.gmra.mxu1 %v11328_v14  ;;  %v11413_v5 = vld [vmem:[#allocation1 + $0x36] sm:$0xff] }
  0xb3   :  { %v9040_v28 = vld [vmem:[%s15394_s1 + $0x15a0] sm:$0xf]  ;;  %v10104_v30 = vld [vmem:[%s15394_s1 + $0x15ac] sm:$0xf0]  ;;  %5055 = vmatmul.bf16.vlgmr.msra.gmra.mxu3 %v11330_v18  ;;  %5061 = vmatpush.bf16.msrb.mxu0 %v8929_v19  ;;  %v8913_v35 = vor.u32 %v10072_v27, %v8912_v25  ;;  %v25_v8 = vld [vmem:[%s15393_s0 + $0x18] sm:$0x1] }
  0xb4   :  { %v9168_v31 = vld [vmem:[%s15394_s1 + $0x16a0] sm:$0xf]  ;;  %v10136_v32 = vld [vmem:[%s15394_s1 + $0x16ac] sm:$0xf0]  ;;  %5074 = vmatpush.bf16.msrb.mxu1 %v9057_v23  ;;  %5087 = vmatpush.bf16.msrb.mxu2 %v9185_v24  ;;  %v9041_v37 = vor.u32 %v10104_v30, %v9040_v28 }
  0xb5   :  { %v9296_v33 = vld [vmem:[%s15394_s1 + $0x17a0] sm:$0xf]  ;;  %v10168_v34 = vld [vmem:[%s15394_s1 + $0x17ac] sm:$0xf0]  ;;  %v9169_v38 = vor.u32 %v10136_v32, %v9168_v31  ;;  %5100 = vmatpush.bf16.msrb.mxu3 %v9313_v29 }
  0xb6   :  { %v8896_v36 = vld [vmem:[%s15394_s1 + $0x1480] sm:$0xf]  ;;  %v10068_v39 = vld [vmem:[%s15394_s1 + $0x148c] sm:$0xf0]  ;;  %v9297_v42 = vor.u32 %v10168_v34, %v9296_v33 }
  0xb7   :  { %v9024_v40 = vld [vmem:[%s15394_s1 + $0x1580] sm:$0xf]  ;;  %v10100_v41 = vld [vmem:[%s15394_s1 + $0x158c] sm:$0xf0]  ;;  %5062 = vmatpush.bf16.msrb.mxu0 %v8913_v35  ;;  %v8897_v53 = vor.u32 %v10068_v39, %v8896_v36  ;;  %v4809_v35 = vpop.f32.mrf.mxu0 }
  0xb8   :  { %v9152_v43 = vld [vmem:[%s15394_s1 + $0x1680] sm:$0xf]  ;;  %v10132_v44 = vld [vmem:[%s15394_s1 + $0x168c] sm:$0xf0]  ;;  %5075 = vmatpush.bf16.msrb.mxu1 %v9041_v37  ;;  %5088 = vmatpush.bf16.msrb.mxu2 %v9169_v38  ;;  %v9025_v57 = vor.u32 %v10100_v41, %v9024_v40 }
  0xb9   :  { %v9280_v45 = vld [vmem:[%s15394_s1 + $0x1780] sm:$0xf]  ;;  %v10164_v50 = vld [vmem:[%s15394_s1 + $0x178c] sm:$0xf0]  ;;  %v9153_v58 = vor.u32 %v10132_v44, %v9152_v43  ;;  %5101 = vmatpush.bf16.msrb.mxu3 %v9297_v42  ;;  %v4822_v42 = vpop.f32.mrf.mxu1 }
  0xba   :  { %v8880_v51 = vld [vmem:[%s15394_s1 + $0x1460] sm:$0xf]  ;;  %v10064_v52 = vld [vmem:[%s15394_s1 + $0x146c] sm:$0xf0]  ;;  %v9281_v63 = vor.u32 %v10164_v50, %v9280_v45 }
  0xbb   :  { %v9008_v54 = vld [vmem:[%s15394_s1 + $0x1560] sm:$0xf]  ;;  %v10096_v55 = vld [vmem:[%s15394_s1 + $0x156c] sm:$0xf0]  ;;  %5063 = vmatpush.bf16.msrb.mxu0 %v8897_v53  ;;  %v8881_v10 = vor.u32 %v10064_v52, %v8880_v51 }
  0xbc   :  { %v9136_v56 = vld [vmem:[%s15394_s1 + $0x1660] sm:$0xf]  ;;  %v10128_v59 = vld [vmem:[%s15394_s1 + $0x166c] sm:$0xf0]  ;;  %5076 = vmatpush.bf16.msrb.mxu1 %v9025_v57  ;;  %5089 = vmatpush.bf16.msrb.mxu2 %v9153_v58  ;;  %v9009_v19 = vor.u32 %v10096_v55, %v9008_v54 }
  0xbd   :  { %v9264_v61 = vld [vmem:[%s15394_s1 + $0x1760] sm:$0xf]  ;;  %v10160_v62 = vld [vmem:[%s15394_s1 + $0x176c] sm:$0xf0]  ;;  %v9137_v23 = vor.u32 %v10128_v59, %v9136_v56  ;;  %5102 = vmatpush.bf16.msrb.mxu3 %v9281_v63  ;;  %v4835_v63 = vpop.f32.mrf.mxu2 }
  0xbe   :  { %v810_v3 = vld [vmem:[%s15395_s2] sm:$0xf]  ;;  %v11415_v6 = vld [vmem:[#allocation1 + $0x2d] sm:$0xff]  ;;  %v9265_v28 = vor.u32 %v10160_v62, %v9264_v61 }
  0xbf   :  { %v11417_v7 = vld [vmem:[#allocation1 + $0x3f] sm:$0xff]  ;;  %v10060_v24 = vld [vmem:[%s15394_s1 + $0x144c] sm:$0xf0]  ;;  %v812_v27 = vperm.slane %v810_v3, 0  ;;  %5064 = vmatpush.bf16.msrb.mxu0 %v8881_v10 }
  0xc0   :  { %v8864_v11 = vld [vmem:[%s15394_s1 + $0x1440] sm:$0xf]  ;;  %851 = vst [vmem:[#allocation1] ss:$9 sm:$0xff] %v25_v8  ;;  %v10092_v29 = vld [vmem:[%s15394_s1 + $0x154c] sm:$0xf0]  ;;  %5077 = vmatpush.bf16.msrb.mxu1 %v9009_v19  ;;  %5090 = vmatpush.bf16.msrb.mxu2 %v9137_v23  ;;  %v4848_v23 = vpop.f32.mrf.mxu3 }
  0xc1   :  { %v8992_v25 = vld [vmem:[%s15394_s1 + $0x1540] sm:$0xf]  ;;  %v10124_v31 = vld [vmem:[%s15394_s1 + $0x164c] sm:$0xf0]  ;;  %v8865_v34 = vor.u32 %v10060_v24, %v8864_v11  ;;  %v4810_v41 = vadd.f32 %v4809_v35, %v812_v27  ;;  %5103 = vmatpush.bf16.msrb.mxu3 %v9265_v28  ;;  %v9438_v27 = vld [vmem:[%s15394_s1 + $0xe4] sm:$0xf] }
  0xc2   :  { %v9120_v30 = vld [vmem:[%s15394_s1 + $0x1640] sm:$0xf]  ;;  %v10156_v33 = vld [vmem:[%s15394_s1 + $0x174c] sm:$0xf0]  ;;  %v8993_v36 = vor.u32 %v10092_v29, %v8992_v25  ;;  %v6386_v29 = vld [vmem:[%s15394_s1 + $0xf0] sm:$0xf0] }
  0xc3   :  { %v9248_v32 = vld [vmem:[%s15394_s1 + $0x1740] sm:$0xf]  ;;  %v9121_v37 = vor.u32 %v10124_v31, %v9120_v30  ;;  %v10056_v39 = vld [vmem:[%s15394_s1 + $0x142c] sm:$0xf0]  ;;  %v4823_v53 = vadd.f32 %v4822_v42, %v4810_v41  ;;  %5065 = vmatpush.bf16.msrb.mxu0 %v8865_v34  ;;  %v9470_v30 = vld [vmem:[%s15394_s1 + $0x1e4] sm:$0xf]  ;;  %v6389_v41 = vor.u32 %v9438_v27, %v6386_v29 }
  0xc4   :  { %v8848_v38 = vld [vmem:[%s15394_s1 + $0x1420] sm:$0xf]  ;;  %v9249_v43 = vor.u32 %v10156_v33, %v9248_v32  ;;  %v10088_v44 = vld [vmem:[%s15394_s1 + $0x152c] sm:$0xf0]  ;;  %5078 = vmatpush.bf16.msrb.mxu1 %v8993_v36  ;;  %v6514_v31 = vld [vmem:[%s15394_s1 + $0x1f0] sm:$0xf0]  ;;  %v4811_v33 = vpop.f32.mrf.mxu0 }
  0xc5   :  { %v8976_v40 = vld [vmem:[%s15394_s1 + $0x1520] sm:$0xf]  ;;  %v10120_v50 = vld [vmem:[%s15394_s1 + $0x162c] sm:$0xf0]  ;;  %v8849_v54 = vor.u32 %v10056_v39, %v8848_v38  ;;  %5091 = vmatpush.bf16.msrb.mxu2 %v9121_v37  ;;  %v4836_v19 = vadd.f32 %v4835_v63, %v4823_v53  ;;  %v9502_v36 = vld [vmem:[%s15394_s1 + $0x2e4] sm:$0xf]  ;;  %v4824_v38 = vpop.f32.mrf.mxu1  ;;  %v6517_v42 = vor.u32 %v9470_v30, %v6514_v31 }
  0xc6   :  { %v9104_v45 = vld [vmem:[%s15394_s1 + $0x1620] sm:$0xf]  ;;  %v10152_v52 = vld [vmem:[%s15394_s1 + $0x172c] sm:$0xf0]  ;;  %v8977_v57 = vor.u32 %v10088_v44, %v8976_v40  ;;  %5104 = vmatpush.bf16.msrb.mxu3 %v9249_v43  ;;  %v6642_v37 = vld [vmem:[%s15394_s1 + $0x2f0] sm:$0xf0] }
  0xc7   :  { %v9232_v51 = vld [vmem:[%s15394_s1 + $0x1720] sm:$0xf]  ;;  %v10052_v56 = vld [vmem:[%s15394_s1 + $0x140c] sm:$0xf0]  ;;  %v9105_v58 = vor.u32 %v10120_v50, %v9104_v45  ;;  %5066 = vmatpush.bf16.msrb.mxu0 %v8849_v54  ;;  %v11512_v32 = vadd.f32 %v4848_v23, %v4836_v19  ;;  %v9434_v45 = vld [vmem:[%s15394_s1 + $0xc4] sm:$0xf]  ;;  %v6645_v50 = vor.u32 %v9502_v36, %v6642_v37 }
  0xc8   :  { %v8832_v55 = vld [vmem:[%s15394_s1 + $0x1400] sm:$0xf]  ;;  %v10084_v61 = vld [vmem:[%s15394_s1 + $0x150c] sm:$0xf0]  ;;  %v9233_v3 = vor.u32 %v10152_v52, %v9232_v51  ;;  %5079 = vmatpush.bf16.msrb.mxu1 %v8977_v57  ;;  %v6370_v51 = vld [vmem:[%s15394_s1 + $0xd0] sm:$0xf0] }
  0xc9   :  { %v8960_v59 = vld [vmem:[%s15394_s1 + $0x1500] sm:$0xf]  ;;  %v10116_v8 = vld [vmem:[%s15394_s1 + $0x160c] sm:$0xf0]  ;;  %v8833_v28 = vor.u32 %v10052_v56, %v8832_v55  ;;  %5092 = vmatpush.bf16.msrb.mxu2 %v9105_v58  ;;  %v9466_v52 = vld [vmem:[%s15394_s1 + $0x1c4] sm:$0xf]  ;;  %v4837_v56 = vpop.f32.mrf.mxu2  ;;  %v4850_v58 = vpop.f32.mrf.mxu3 }
  0xca   :  { %v9088_v62 = vld [vmem:[%s15394_s1 + $0x1600] sm:$0xf]  ;;  %v10148_v11 = vld [vmem:[%s15394_s1 + $0x170c] sm:$0xf0]  ;;  %v8961_v34 = vor.u32 %v10084_v61, %v8960_v59  ;;  %5105 = vmatpush.bf16.msrb.mxu3 %v9233_v3  ;;  %v6498_v53 = vld [vmem:[%s15394_s1 + $0x1d0] sm:$0xf0]  ;;  %v6373_v59 = vor.u32 %v9434_v45, %v6370_v51 }
  0xcb   :  { %v9216_v10 = vld [vmem:[%s15394_s1 + $0x1700] sm:$0xf]  ;;  %v10192_v25 = vld [vmem:[%s15394_s1 + $0x186c] sm:$0xf0]  ;;  %v9089_v35 = vor.u32 %v10116_v8, %v9088_v62  ;;  %5067 = vmatpush.bf16.msrb.mxu0 %v8833_v28  ;;  %v9498_v54 = vld [vmem:[%s15394_s1 + $0x2c4] sm:$0xf]  ;;  %v6501_v61 = vor.u32 %v9466_v52, %v6498_v53 }
  0xcc   :  { %v9392_v24 = vld [vmem:[%s15394_s1 + $0x1860] sm:$0xf]  ;;  %v9217_v39 = vor.u32 %v10148_v11, %v9216_v10  ;;  %v10188_v44 = vld [vmem:[%s15394_s1 + $0x184c] sm:$0xf0]  ;;  %5080 = vmatpush.bf16.msrb.mxu1 %v8961_v34  ;;  %v6626_v55 = vld [vmem:[%s15394_s1 + $0x2d0] sm:$0xf0] }
  0xcd   :  { %v9393_v40 = vor.u32 %v10192_v25, %v9392_v24  ;;  %v9376_v43 = vld [vmem:[%s15394_s1 + $0x1840] sm:$0xf]  ;;  %5093 = vmatpush.bf16.msrb.mxu2 %v9089_v35  ;;  %v10184_v63 = vld [vmem:[%s15394_s1 + $0x182c] sm:$0xf0]  ;;  %v9430_v3 = vld [vmem:[%s15394_s1 + $0xa4] sm:$0xf]  ;;  %v6629_v8 = vor.u32 %v9498_v54, %v6626_v55  ;;  %v4874_v52 = vpop.f32.mrf.mxu1 }
  0xce   :  { %5106 = vmatpush.bf16.msrb.mxu3 %v9217_v39  ;;  %v9377_v57 = vor.u32 %v10188_v44, %v9376_v43  ;;  %v9360_v62 = vld [vmem:[%s15394_s1 + $0x1820] sm:$0xf]  ;;  %5068 = vmatmul.bf16.vlgmr.msrb.gmra.mxu0 %v11411_v4  ;;  %v6354_v10 = vld [vmem:[%s15394_s1 + $0xb0] sm:$0xf0]  ;;  %v9462_v11 = vld [vmem:[%s15394_s1 + $0x1a4] sm:$0xf] }
  0xcf   :  { %5116 = vmatpush.bf16.msra.mxu0 %v9393_v40  ;;  %v6482_v19 = vld [vmem:[%s15394_s1 + $0x1b0] sm:$0xf0]  ;;  %5081 = vmatmul.bf16.vlgmr.msrb.gmra.mxu1 %v11415_v6  ;;  %v9494_v23 = vld [vmem:[%s15394_s1 + $0x2a4] sm:$0xf]  ;;  %v9361_v25 = vor.u32 %v10184_v63, %v9360_v62  ;;  %v9344_v27 = vld [vmem:[%s15394_s1 + $0x1800] sm:$0xf]  ;;  %v6357_v28 = vor.u32 %v9430_v3, %v6354_v10 }
  0xd0   :  { %5125 = vmatpush.bf16.msra.mxu1 %v6389_v41  ;;  %5094 = vmatmul.bf16.vlgmr.msrb.gmra.mxu2 %v11413_v5  ;;  %v6610_v24 = vld [vmem:[%s15394_s1 + $0x2b0] sm:$0xf0]  ;;  %v6485_v29 = vor.u32 %v9462_v11, %v6482_v19  ;;  %v10180_v30 = vld [vmem:[%s15394_s1 + $0x180c] sm:$0xf0]  ;;  %v9426_v31 = vld [vmem:[%s15394_s1 + $0x84] sm:$0xf] }
  0xd1   :  { %5138 = vmatpush.bf16.msra.mxu2 %v6517_v42  ;;  %5107 = vmatmul.bf16.vlgmr.msrb.gmra.mxu3 %v11417_v7  ;;  %v6338_v33 = vld [vmem:[%s15394_s1 + $0x90] sm:$0xf0]  ;;  %v6613_v34 = vor.u32 %v9494_v23, %v6610_v24  ;;  %v9458_v35 = vld [vmem:[%s15394_s1 + $0x184] sm:$0xf]  ;;  %v9345_v41 = vor.u32 %v10180_v30, %v9344_v27  ;;  %v4861_v42 = vpop.f32.mrf.mxu0  ;;  %v4887_v10 = vpop.f32.mrf.mxu2 }
  0xd2   :  { %5151 = vmatpush.bf16.msra.mxu3 %v6645_v50  ;;  %v6466_v36 = vld [vmem:[%s15394_s1 + $0x190] sm:$0xf0]  ;;  %v9490_v37 = vld [vmem:[%s15394_s1 + $0x284] sm:$0xf]  ;;  %v6341_v43 = vor.u32 %v9426_v31, %v6338_v33  ;;  %v4862_v51 = vadd.f32 %v4861_v42, %v11512_v32 }
  0xd3   :  { %5117 = vmatpush.bf16.msra.mxu0 %v9377_v57  ;;  %v6594_v38 = vld [vmem:[%s15394_s1 + $0x290] sm:$0xf0]  ;;  %v9534_v39 = vld [vmem:[%s15394_s1 + $0x3e4] sm:$0xf]  ;;  %v6469_v44 = vor.u32 %v9458_v35, %v6466_v36 }
  0xd4   :  { %5126 = vmatpush.bf16.msra.mxu1 %v6373_v59  ;;  %v6770_v40 = vld [vmem:[%s15394_s1 + $0x3f0] sm:$0xf0]  ;;  %v9422_v45 = vld [vmem:[%s15394_s1 + $0x64] sm:$0xf]  ;;  %v6597_v53 = vor.u32 %v9490_v37, %v6594_v38 }
  0xd5   :  { %5139 = vmatpush.bf16.msra.mxu2 %v6501_v61  ;;  %v6322_v50 = vld [vmem:[%s15394_s1 + $0x70] sm:$0xf0]  ;;  %v6773_v54 = vor.u32 %v9534_v39, %v6770_v40  ;;  %v9454_v55 = vld [vmem:[%s15394_s1 + $0x164] sm:$0xf]  ;;  %v4875_v61 = vadd.f32 %v4874_v52, %v4862_v51  ;;  %v4876_v40 = vpop.f32.mrf.mxu1 }
  0xd6   :  { %5152 = vmatpush.bf16.msra.mxu3 %v6629_v8  ;;  %v6450_v56 = vld [vmem:[%s15394_s1 + $0x170] sm:$0xf0]  ;;  %v9486_v57 = vld [vmem:[%s15394_s1 + $0x264] sm:$0xf]  ;;  %v6325_v62 = vor.u32 %v9422_v45, %v6322_v50 }
  0xd7   :  { %5118 = vmatpush.bf16.msra.mxu0 %v9361_v25  ;;  %v6578_v32 = vld [vmem:[%s15394_s1 + $0x270] sm:$0xf0]  ;;  %v9530_v58 = vld [vmem:[%s15394_s1 + $0x3c4] sm:$0xf]  ;;  %v6453_v63 = vor.u32 %v9454_v55, %v6450_v56  ;;  %v4888_v27 = vadd.f32 %v4887_v10, %v4875_v61 }
  0xd8   :  { %5127 = vmatpush.bf16.msra.mxu1 %v6357_v28  ;;  %v6754_v59 = vld [vmem:[%s15394_s1 + $0x3d0] sm:$0xf0]  ;;  %v9418_v3 = vld [vmem:[%s15394_s1 + $0x44] sm:$0xf]  ;;  %v6581_v11 = vor.u32 %v9486_v57, %v6578_v32  ;;  %v4900_v28 = vpop.f32.mrf.mxu3 }
  0xd9   :  { %5140 = vmatpush.bf16.msra.mxu2 %v6485_v29  ;;  %v6306_v8 = vld [vmem:[%s15394_s1 + $0x50] sm:$0xf0]  ;;  %v6757_v19 = vor.u32 %v9530_v58, %v6754_v59  ;;  %v9450_v23 = vld [vmem:[%s15394_s1 + $0x144] sm:$0xf]  ;;  %v4863_v35 = vpop.f32.mrf.mxu0  ;;  %v4889_v32 = vpop.f32.mrf.mxu2 }
  0xda   :  { %5153 = vmatpush.bf16.msra.mxu3 %v6613_v34  ;;  %v6434_v24 = vld [vmem:[%s15394_s1 + $0x150] sm:$0xf0]  ;;  %v9482_v25 = vld [vmem:[%s15394_s1 + $0x244] sm:$0xf]  ;;  %v11651_v34 = vadd.f32 %v4900_v28, %v4888_v27  ;;  %v6309_v36 = vor.u32 %v9418_v3, %v6306_v8 }
  0xdb   :  { %5119 = vmatpush.bf16.msra.mxu0 %v9345_v41  ;;  %v6562_v29 = vld [vmem:[%s15394_s1 + $0x250] sm:$0xf0]  ;;  %v9526_v30 = vld [vmem:[%s15394_s1 + $0x3a4] sm:$0xf]  ;;  %v6437_v37 = vor.u32 %v9450_v23, %v6434_v24 }
  0xdc   :  { %5128 = vmatpush.bf16.msra.mxu1 %v6341_v43  ;;  %v6738_v31 = vld [vmem:[%s15394_s1 + $0x3b0] sm:$0xf0]  ;;  %v852_v33 = vld [vmem:[#allocation1] sm:$0xff]  ;;  %v6565_v41 = vor.u32 %v9482_v25, %v6562_v29 }
  0xdd   :  { %5141 = vmatpush.bf16.msra.mxu2 %v6469_v44  ;;  %v9414_v38 = vld [vmem:[%s15394_s1 + $0x24] sm:$0xf]  ;;  %v6290_v39 = vld [vmem:[%s15394_s1 + $0x30] sm:$0xf0]  ;;  %v6741_v42 = vor.u32 %v9526_v30, %v6738_v31 }
  0xde   :  { %5154 = vmatpush.bf16.msra.mxu3 %v6597_v53  ;;  %v9446_v43 = vld [vmem:[%s15394_s1 + $0x124] sm:$0xf]  ;;  %v6418_v44 = vld [vmem:[%s15394_s1 + $0x130] sm:$0xf0]  ;;  %9406 = vmatmul.msk.bf16.vlgmr.msra.gmra.mxu0 %vm4797_vm0, %v852_v33  ;;  %v6293_v53 = vor.u32 %v9414_v38, %v6290_v39 }
  0xdf   :  { %5164 = vmatpush.bf16.msrb.mxu0 %v6773_v54  ;;  %v9478_v45 = vld [vmem:[%s15394_s1 + $0x224] sm:$0xf]  ;;  %v6546_v50 = vld [vmem:[%s15394_s1 + $0x230] sm:$0xf0]  ;;  %v6421_v54 = vor.u32 %v9446_v43, %v6418_v44 }
  0xe0   :  { %5129 = vmatpush.bf16.msra.mxu1 %v6325_v62  ;;  %v9522_v51 = vld [vmem:[%s15394_s1 + $0x384] sm:$0xf]  ;;  %v6722_v52 = vld [vmem:[%s15394_s1 + $0x390] sm:$0xf0]  ;;  %v6549_v58 = vor.u32 %v9478_v45, %v6546_v50  ;;  %v4902_v3 = vpop.f32.mrf.mxu3 }
  0xe1   :  { %5142 = vmatpush.bf16.msra.mxu2 %v6453_v63  ;;  %v9410_v55 = vld [vmem:[%s15394_s1 + $0x4] sm:$0xf]  ;;  %v6274_v56 = vld [vmem:[%s15394_s1 + $0x10] sm:$0xf0]  ;;  %v6725_v59 = vor.u32 %v9522_v51, %v6722_v52 }
  0xe2   :  { %5155 = vmatpush.bf16.msra.mxu3 %v6581_v11  ;;  %v9442_v57 = vld [vmem:[%s15394_s1 + $0x104] sm:$0xf]  ;;  %v6402_v61 = vld [vmem:[%s15394_s1 + $0x110] sm:$0xf0]  ;;  %v6277_v25 = vor.u32 %v9410_v55, %v6274_v56 }
  0xe3   :  { %5165 = vmatpush.bf16.msrb.mxu0 %v6757_v19  ;;  %v9474_v62 = vld [vmem:[%s15394_s1 + $0x204] sm:$0xf]  ;;  %v6530_v63 = vld [vmem:[%s15394_s1 + $0x210] sm:$0xf0]  ;;  %v6405_v27 = vor.u32 %v9442_v57, %v6402_v61 }
  0xe4   :  { %5130 = vmatpush.bf16.msra.mxu1 %v6309_v36  ;;  %v9518_v8 = vld [vmem:[%s15394_s1 + $0x364] sm:$0xf]  ;;  %v6706_v10 = vld [vmem:[%s15394_s1 + $0x370] sm:$0xf0]  ;;  %v6533_v30 = vor.u32 %v9474_v62, %v6530_v63 }
  0xe5   :  { %5143 = vmatpush.bf16.msra.mxu2 %v6437_v37  ;;  %v9566_v11 = vld [vmem:[%s15394_s1 + $0x4e4] sm:$0xf]  ;;  %v6898_v19 = vld [vmem:[%s15394_s1 + $0x4f0] sm:$0xf0]  ;;  %v6709_v31 = vor.u32 %v9518_v8, %v6706_v10 }
  0xe6   :  { %5156 = vmatpush.bf16.msra.mxu3 %v6565_v41  ;;  %v9598_v23 = vld [vmem:[%s15394_s1 + $0x5e4] sm:$0xf]  ;;  %v7026_v24 = vld [vmem:[%s15394_s1 + $0x5f0] sm:$0xf0]  ;;  %v6901_v33 = vor.u32 %v9566_v11, %v6898_v19 }
  0xe7   :  { %5166 = vmatpush.bf16.msrb.mxu0 %v6741_v42  ;;  %v9630_v28 = vld [vmem:[%s15394_s1 + $0x6e4] sm:$0xf]  ;;  %v7154_v29 = vld [vmem:[%s15394_s1 + $0x6f0] sm:$0xf0]  ;;  %v7029_v35 = vor.u32 %v9598_v23, %v7026_v24 }
  0xe8   :  { %5131 = vmatpush.bf16.msra.mxu1 %v6293_v53  ;;  %v9514_v36 = vld [vmem:[%s15394_s1 + $0x344] sm:$0xf]  ;;  %v6690_v37 = vld [vmem:[%s15394_s1 + $0x350] sm:$0xf0]  ;;  %v7157_v39 = vor.u32 %v9630_v28, %v7154_v29 }
  0xe9   :  { %5144 = vmatpush.bf16.msra.mxu2 %v6421_v54  ;;  %v9562_v38 = vld [vmem:[%s15394_s1 + $0x4c4] sm:$0xf]  ;;  %v6882_v40 = vld [vmem:[%s15394_s1 + $0x4d0] sm:$0xf0]  ;;  %v6693_v45 = vor.u32 %v9514_v36, %v6690_v37 }
  0xea   :  { %5157 = vmatpush.bf16.msra.mxu3 %v6549_v58  ;;  %v9594_v41 = vld [vmem:[%s15394_s1 + $0x5c4] sm:$0xf]  ;;  %v7010_v42 = vld [vmem:[%s15394_s1 + $0x5d0] sm:$0xf0]  ;;  %v6885_v50 = vor.u32 %v9562_v38, %v6882_v40 }
  0xeb   :  { %5167 = vmatpush.bf16.msrb.mxu0 %v6725_v59  ;;  %v9626_v43 = vld [vmem:[%s15394_s1 + $0x6c4] sm:$0xf]  ;;  %v7138_v44 = vld [vmem:[%s15394_s1 + $0x6d0] sm:$0xf0]  ;;  %v7013_v51 = vor.u32 %v9594_v41, %v7010_v42 }
  0xec   :  { %5132 = vmatpush.bf16.msra.mxu1 %v6277_v25  ;;  %v9510_v52 = vld [vmem:[%s15394_s1 + $0x324] sm:$0xf]  ;;  %v6674_v53 = vld [vmem:[%s15394_s1 + $0x330] sm:$0xf0]  ;;  %v7141_v55 = vor.u32 %v9626_v43, %v7138_v44 }
  0xed   :  { %5145 = vmatpush.bf16.msra.mxu2 %v6405_v27  ;;  %v9558_v54 = vld [vmem:[%s15394_s1 + $0x4a4] sm:$0xf]  ;;  %v6866_v56 = vld [vmem:[%s15394_s1 + $0x4b0] sm:$0xf0]  ;;  %v6677_v61 = vor.u32 %v9510_v52, %v6674_v53  ;;  %v4913_v27 = vpop.f32.mrf.mxu0 }
  0xee   :  { %5158 = vmatpush.bf16.msra.mxu3 %v6533_v30  ;;  %v9590_v57 = vld [vmem:[%s15394_s1 + $0x5a4] sm:$0xf]  ;;  %v6994_v32 = vld [vmem:[%s15394_s1 + $0x5b0] sm:$0xf0]  ;;  %v6869_v63 = vor.u32 %v9558_v54, %v6866_v56 }
  0xef   :  { %5168 = vmatpush.bf16.msrb.mxu0 %v6709_v31  ;;  %v9622_v58 = vld [vmem:[%s15394_s1 + $0x6a4] sm:$0xf]  ;;  %v7122_v59 = vld [vmem:[%s15394_s1 + $0x6b0] sm:$0xf0]  ;;  %5133 = vmatmul.bf16.vlgmr.msra.gmra.mxu1 %v10564_v21  ;;  %v6997_v3 = vor.u32 %v9590_v57, %v6994_v32  ;;  %v4914_v31 = vadd.f32 %v4913_v27, %v11651_v34  ;;  %v4939_v57 = vpop.f32.mrf.mxu2 }
  0xf0   :  { %5177 = vmatpush.bf16.msrb.mxu1 %v6901_v33  ;;  %5146 = vmatmul.bf16.vlgmr.msra.gmra.mxu2 %v10575_v26  ;;  %v9506_v62 = vld [vmem:[%s15394_s1 + $0x304] sm:$0xf]  ;;  %v6658_v8 = vld [vmem:[%s15394_s1 + $0x310] sm:$0xf0]  ;;  %v7125_v19 = vor.u32 %v9622_v58, %v7122_v59 }
  0xf1   :  { %5190 = vmatpush.bf16.msrb.mxu2 %v7029_v35  ;;  %5159 = vmatmul.bf16.vlgmr.msra.gmra.mxu3 %v10562_v20  ;;  %v9554_v10 = vld [vmem:[%s15394_s1 + $0x484] sm:$0xf]  ;;  %v6850_v11 = vld [vmem:[%s15394_s1 + $0x490] sm:$0xf0]  ;;  %v6661_v33 = vor.u32 %v9506_v62, %v6658_v8  ;;  %v4926_v35 = vpop.f32.mrf.mxu1 }
  0xf2   :  { %5203 = vmatpush.bf16.msrb.mxu3 %v7157_v39  ;;  %v9586_v23 = vld [vmem:[%s15394_s1 + $0x584] sm:$0xf]  ;;  %v6978_v24 = vld [vmem:[%s15394_s1 + $0x590] sm:$0xf0]  ;;  %v6853_v36 = vor.u32 %v9554_v10, %v6850_v11  ;;  %v4927_v41 = vadd.f32 %v4926_v35, %v4914_v31 }
  0xf3   :  { %5169 = vmatpush.bf16.msrb.mxu0 %v6693_v45  ;;  %v9618_v25 = vld [vmem:[%s15394_s1 + $0x684] sm:$0xf]  ;;  %v7106_v28 = vld [vmem:[%s15394_s1 + $0x690] sm:$0xf0]  ;;  %v6981_v37 = vor.u32 %v9586_v23, %v6978_v24 }
  0xf4   :  { %5178 = vmatpush.bf16.msrb.mxu1 %v6885_v50  ;;  %v9662_v29 = vld [vmem:[%s15394_s1 + $0x7e4] sm:$0xf]  ;;  %v7282_v30 = vld [vmem:[%s15394_s1 + $0x7f0] sm:$0xf0]  ;;  %v7109_v40 = vor.u32 %v9618_v25, %v7106_v28  ;;  %v4940_v62 = vadd.f32 %v4939_v57, %v4927_v41 }
  0xf5   :  { %5191 = vmatpush.bf16.msrb.mxu2 %v7013_v51  ;;  %v9550_v38 = vld [vmem:[%s15394_s1 + $0x464] sm:$0xf]  ;;  %v6834_v39 = vld [vmem:[%s15394_s1 + $0x470] sm:$0xf0]  ;;  %v7285_v42 = vor.u32 %v9662_v29, %v7282_v30  ;;  %v4915_v11 = vpop.f32.mrf.mxu0 }
  0xf6   :  { %5204 = vmatpush.bf16.msrb.mxu3 %v7141_v55  ;;  %v9582_v34 = vld [vmem:[%s15394_s1 + $0x564] sm:$0xf]  ;;  %v6962_v43 = vld [vmem:[%s15394_s1 + $0x570] sm:$0xf0]  ;;  %v6837_v52 = vor.u32 %v9550_v38, %v6834_v39 }
  0xf7   :  { %5170 = vmatpush.bf16.msrb.mxu0 %v6677_v61  ;;  %v9614_v44 = vld [vmem:[%s15394_s1 + $0x664] sm:$0xf]  ;;  %v7090_v45 = vld [vmem:[%s15394_s1 + $0x670] sm:$0xf0]  ;;  %v6965_v53 = vor.u32 %v9582_v34, %v6962_v43 }
  0xf8   :  { %5179 = vmatpush.bf16.msrb.mxu1 %v6869_v63  ;;  %v9658_v50 = vld [vmem:[%s15394_s1 + $0x7c4] sm:$0xf]  ;;  %v7266_v51 = vld [vmem:[%s15394_s1 + $0x7d0] sm:$0xf0]  ;;  %v7093_v56 = vor.u32 %v9614_v44, %v7090_v45  ;;  %v4952_v63 = vpop.f32.mrf.mxu3 }
  0xf9   :  { %5192 = vmatpush.bf16.msrb.mxu2 %v6997_v3  ;;  %v9546_v54 = vld [vmem:[%s15394_s1 + $0x444] sm:$0xf]  ;;  %v6818_v55 = vld [vmem:[%s15394_s1 + $0x450] sm:$0xf0]  ;;  %v7269_v32 = vor.u32 %v9658_v50, %v7266_v51  ;;  %v11851_v23 = vadd.f32 %v4952_v63, %v4940_v62 }
  0xfa   :  { %5205 = vmatpush.bf16.msrb.mxu3 %v7125_v19  ;;  %v9578_v58 = vld [vmem:[%s15394_s1 + $0x544] sm:$0xf]  ;;  %v6946_v59 = vld [vmem:[%s15394_s1 + $0x550] sm:$0xf0]  ;;  %v4928_v19 = vpop.f32.mrf.mxu1  ;;  %v6821_v24 = vor.u32 %v9546_v54, %v6818_v55 }
  0xfb   :  { %5171 = vmatpush.bf16.msrb.mxu0 %v6661_v33  ;;  %v9610_v61 = vld [vmem:[%s15394_s1 + $0x644] sm:$0xf]  ;;  %v7074_v3 = vld [vmem:[%s15394_s1 + $0x650] sm:$0xf0]  ;;  %v6949_v25 = vor.u32 %v9578_v58, %v6946_v59 }
  0xfc   :  { %5180 = vmatpush.bf16.msrb.mxu1 %v6853_v36  ;;  %v9654_v8 = vld [vmem:[%s15394_s1 + $0x7a4] sm:$0xf]  ;;  %v7250_v10 = vld [vmem:[%s15394_s1 + $0x7b0] sm:$0xf0]  ;;  %v7077_v29 = vor.u32 %v9610_v61, %v7074_v3 }
  0xfd   :  { %5193 = vmatpush.bf16.msrb.mxu2 %v6981_v37  ;;  %v9542_v27 = vld [vmem:[%s15394_s1 + $0x424] sm:$0xf]  ;;  %v6802_v28 = vld [vmem:[%s15394_s1 + $0x430] sm:$0xf0]  ;;  %v7253_v30 = vor.u32 %v9654_v8, %v7250_v10 }
  0xfe   :  { %5206 = vmatpush.bf16.msrb.mxu3 %v7109_v40  ;;  %5172 = vmatmul.bf16.vlgmr.msrb.gmra.mxu0 %v10566_v22  ;;  %v9574_v31 = vld [vmem:[%s15394_s1 + $0x524] sm:$0xf]  ;;  %v6930_v33 = vld [vmem:[%s15394_s1 + $0x530] sm:$0xf0]  ;;  %v6805_v39 = vor.u32 %v9542_v27, %v6802_v28 }
  0xff   :  { %5216 = vmatpush.bf16.msra.mxu0 %v7285_v42  ;;  %v9606_v35 = vld [vmem:[%s15394_s1 + $0x624] sm:$0xf]  ;;  %v7058_v36 = vld [vmem:[%s15394_s1 + $0x630] sm:$0xf0]  ;;  %v6933_v40 = vor.u32 %v9574_v31, %v6930_v33 }
 0x100   :  { %5181 = vmatpush.bf16.msrb.mxu1 %v6837_v52  ;;  %v9650_v37 = vld [vmem:[%s15394_s1 + $0x784] sm:$0xf]  ;;  %v7234_v38 = vld [vmem:[%s15394_s1 + $0x790] sm:$0xf0]  ;;  %v7061_v43 = vor.u32 %v9606_v35, %v7058_v36  ;;  %v4941_v52 = vpop.f32.mrf.mxu2 }
 0x101   :  { %5194 = vmatpush.bf16.msrb.mxu2 %v6965_v53  ;;  %v9538_v41 = vld [vmem:[%s15394_s1 + $0x404] sm:$0xf]  ;;  %v6786_v42 = vld [vmem:[%s15394_s1 + $0x410] sm:$0xf0]  ;;  %v7237_v44 = vor.u32 %v9650_v37, %v7234_v38 }
 0x102   :  { %5207 = vmatpush.bf16.msrb.mxu3 %v7093_v56  ;;  %v9570_v34 = vld [vmem:[%s15394_s1 + $0x504] sm:$0xf]  ;;  %v6914_v45 = vld [vmem:[%s15394_s1 + $0x510] sm:$0xf0]  ;;  %v4954_v56 = vpop.f32.mrf.mxu3  ;;  %v6789_v59 = vor.u32 %v9538_v41, %v6786_v42 }
 0x103   :  { %5217 = vmatpush.bf16.msra.mxu0 %v7269_v32  ;;  %v9602_v50 = vld [vmem:[%s15394_s1 + $0x604] sm:$0xf]  ;;  %v7042_v51 = vld [vmem:[%s15394_s1 + $0x610] sm:$0xf0]  ;;  %v6917_v61 = vor.u32 %v9570_v34, %v6914_v45 }
 0x104   :  { %5182 = vmatpush.bf16.msrb.mxu1 %v6821_v24  ;;  %v9646_v53 = vld [vmem:[%s15394_s1 + $0x764] sm:$0xf]  ;;  %v7218_v54 = vld [vmem:[%s15394_s1 + $0x770] sm:$0xf0]  ;;  %v7045_v3 = vor.u32 %v9602_v50, %v7042_v51 }
 0x105   :  { %5195 = vmatpush.bf16.msrb.mxu2 %v6949_v25  ;;  %v9694_v55 = vld [vmem:[%s15394_s1 + $0x8e4] sm:$0xf]  ;;  %v7410_v57 = vld [vmem:[%s15394_s1 + $0x8f0] sm:$0xf0]  ;;  %v7221_v8 = vor.u32 %v9646_v53, %v7218_v54 }
 0x106   :  { %5208 = vmatpush.bf16.msrb.mxu3 %v7077_v29  ;;  %v9726_v32 = vld [vmem:[%s15394_s1 + $0x9e4] sm:$0xf]  ;;  %v7538_v58 = vld [vmem:[%s15394_s1 + $0x9f0] sm:$0xf0]  ;;  %v7413_v10 = vor.u32 %v9694_v55, %v7410_v57 }
 0x107   :  { %5218 = vmatpush.bf16.msra.mxu0 %v7253_v30  ;;  %v9758_v62 = vld [vmem:[%s15394_s1 + $0xae4] sm:$0xf]  ;;  %v7666_v63 = vld [vmem:[%s15394_s1 + $0xaf0] sm:$0xf0]  ;;  %v7541_v11 = vor.u32 %v9726_v32, %v7538_v58 }
 0x108   :  { %5183 = vmatpush.bf16.msrb.mxu1 %v6805_v39  ;;  %v9642_v19 = vld [vmem:[%s15394_s1 + $0x744] sm:$0xf]  ;;  %v7202_v24 = vld [vmem:[%s15394_s1 + $0x750] sm:$0xf0]  ;;  %v7669_v27 = vor.u32 %v9758_v62, %v7666_v63 }
 0x109   :  { %5196 = vmatpush.bf16.msrb.mxu2 %v6933_v40  ;;  %v9690_v25 = vld [vmem:[%s15394_s1 + $0x8c4] sm:$0xf]  ;;  %v7394_v28 = vld [vmem:[%s15394_s1 + $0x8d0] sm:$0xf0]  ;;  %v7205_v35 = vor.u32 %v9642_v19, %v7202_v24 }
 0x10a   :  { %5209 = vmatpush.bf16.msrb.mxu3 %v7061_v43  ;;  %v9722_v29 = vld [vmem:[%s15394_s1 + $0x9c4] sm:$0xf]  ;;  %v7522_v30 = vld [vmem:[%s15394_s1 + $0x9d0] sm:$0xf0]  ;;  %v7397_v36 = vor.u32 %v9690_v25, %v7394_v28 }
 0x10b   :  { %5219 = vmatpush.bf16.msra.mxu0 %v7237_v44  ;;  %v9754_v31 = vld [vmem:[%s15394_s1 + $0xac4] sm:$0xf]  ;;  %v7650_v33 = vld [vmem:[%s15394_s1 + $0xad0] sm:$0xf0]  ;;  %v7525_v37 = vor.u32 %v9722_v29, %v7522_v30 }
 0x10c   :  { %5184 = vmatpush.bf16.msrb.mxu1 %v6789_v59  ;;  %v9638_v38 = vld [vmem:[%s15394_s1 + $0x724] sm:$0xf]  ;;  %v7186_v39 = vld [vmem:[%s15394_s1 + $0x730] sm:$0xf0]  ;;  %v7653_v41 = vor.u32 %v9754_v31, %v7650_v33 }
 0x10d   :  { %5197 = vmatpush.bf16.msrb.mxu2 %v6917_v61  ;;  %v9686_v40 = vld [vmem:[%s15394_s1 + $0x8a4] sm:$0xf]  ;;  %v7378_v42 = vld [vmem:[%s15394_s1 + $0x8b0] sm:$0xf0]  ;;  %v7189_v50 = vor.u32 %v9638_v38, %v7186_v39  ;;  %v4965_v61 = vpop.f32.mrf.mxu0 }
 0x10e   :  { %5210 = vmatpush.bf16.msrb.mxu3 %v7045_v3  ;;  %v9718_v34 = vld [vmem:[%s15394_s1 + $0x9a4] sm:$0xf]  ;;  %v7506_v43 = vld [vmem:[%s15394_s1 + $0x9b0] sm:$0xf0]  ;;  %v7381_v52 = vor.u32 %v9686_v40, %v7378_v42 }
 0x10f   :  { %5220 = vmatpush.bf16.msra.mxu0 %v7221_v8  ;;  %v9750_v44 = vld [vmem:[%s15394_s1 + $0xaa4] sm:$0xf]  ;;  %v7634_v45 = vld [vmem:[%s15394_s1 + $0xab0] sm:$0xf0]  ;;  %5185 = vmatmul.bf16.vlgmr.msrb.gmra.mxu1 %v10657_v0  ;;  %v7509_v53 = vor.u32 %v9718_v34, %v7506_v43  ;;  %v4966_v8 = vadd.f32 %v4965_v61, %v11851_v23 }
 0x110   :  { %5229 = vmatpush.bf16.msra.mxu1 %v7413_v10  ;;  %5198 = vmatmul.bf16.vlgmr.msrb.gmra.mxu2 %v10661_v2  ;;  %v9634_v51 = vld [vmem:[%s15394_s1 + $0x704] sm:$0xf]  ;;  %v7170_v54 = vld [vmem:[%s15394_s1 + $0x710] sm:$0xf0]  ;;  %v7637_v57 = vor.u32 %v9750_v44, %v7634_v45 }
 0x111   :  { %5242 = vmatpush.bf16.msra.mxu2 %v7541_v11  ;;  %5211 = vmatmul.bf16.vlgmr.msrb.gmra.mxu3 %v10652_v60  ;;  %v9682_v55 = vld [vmem:[%s15394_s1 + $0x884] sm:$0xf]  ;;  %v7362_v56 = vld [vmem:[%s15394_s1 + $0x890] sm:$0xf0]  ;;  %v7173_v10 = vor.u32 %v9634_v51, %v7170_v54  ;;  %v4978_v11 = vpop.f32.mrf.mxu1 }
 0x112   :  { %5255 = vmatpush.bf16.msra.mxu3 %v7669_v27  ;;  %v9714_v32 = vld [vmem:[%s15394_s1 + $0x984] sm:$0xf]  ;;  %v7490_v58 = vld [vmem:[%s15394_s1 + $0x990] sm:$0xf0]  ;;  %v7365_v19 = vor.u32 %v9682_v55, %v7362_v56  ;;  %v4979_v29 = vadd.f32 %v4978_v11, %v4966_v8 }
 0x113   :  { %5221 = vmatpush.bf16.msra.mxu0 %v7205_v35  ;;  %v9746_v59 = vld [vmem:[%s15394_s1 + $0xa84] sm:$0xf]  ;;  %v7618_v62 = vld [vmem:[%s15394_s1 + $0xa90] sm:$0xf0]  ;;  %v7493_v24 = vor.u32 %v9714_v32, %v7490_v58 }
 0x114   :  { %5230 = vmatpush.bf16.msra.mxu1 %v7397_v36  ;;  %v9790_v63 = vld [vmem:[%s15394_s1 + $0xbe4] sm:$0xf]  ;;  %v7794_v3 = vld [vmem:[%s15394_s1 + $0xbf0] sm:$0xf0]  ;;  %v7621_v28 = vor.u32 %v9746_v59, %v7618_v62  ;;  %v4991_v34 = vpop.f32.mrf.mxu2 }
 0x115   :  { %5243 = vmatpush.bf16.msra.mxu2 %v7525_v37  ;;  %v9678_v25 = vld [vmem:[%s15394_s1 + $0x864] sm:$0xf]  ;;  %v7346_v27 = vld [vmem:[%s15394_s1 + $0x870] sm:$0xf0]  ;;  %v7797_v30 = vor.u32 %v9790_v63, %v7794_v3  ;;  %v4992_v51 = vadd.f32 %v4991_v34, %v4979_v29  ;;  %v4967_v56 = vpop.f32.mrf.mxu0 }
 0x116   :  { %5256 = vmatpush.bf16.msra.mxu3 %v7653_v41  ;;  %v9710_v23 = vld [vmem:[%s15394_s1 + $0x964] sm:$0xf]  ;;  %v7474_v31 = vld [vmem:[%s15394_s1 + $0x970] sm:$0xf0]  ;;  %v7349_v38 = vor.u32 %v9678_v25, %v7346_v27 }
 0x117   :  { %5222 = vmatpush.bf16.msra.mxu0 %v7189_v50  ;;  %v9742_v33 = vld [vmem:[%s15394_s1 + $0xa64] sm:$0xf]  ;;  %v7602_v35 = vld [vmem:[%s15394_s1 + $0xa70] sm:$0xf0]  ;;  %v7477_v39 = vor.u32 %v9710_v23, %v7474_v31 }
 0x118   :  { %5231 = vmatpush.bf16.msra.mxu1 %v7381_v52  ;;  %v9786_v36 = vld [vmem:[%s15394_s1 + $0xbc4] sm:$0xf]  ;;  %v7778_v37 = vld [vmem:[%s15394_s1 + $0xbd0] sm:$0xf0]  ;;  %v7605_v42 = vor.u32 %v9742_v33, %v7602_v35  ;;  %v5004_v52 = vpop.f32.mrf.mxu3 }
 0x119   :  { %5244 = vmatpush.bf16.msra.mxu2 %v7509_v53  ;;  %v9674_v40 = vld [vmem:[%s15394_s1 + $0x844] sm:$0xf]  ;;  %v7330_v41 = vld [vmem:[%s15394_s1 + $0x850] sm:$0xf0]  ;;  %v7781_v43 = vor.u32 %v9786_v36, %v7778_v37  ;;  %v12050_v32 = vadd.f32 %v5004_v52, %v4992_v51 }
 0x11a   :  { %5257 = vmatpush.bf16.msra.mxu3 %v7637_v57  ;;  %v9706_v44 = vld [vmem:[%s15394_s1 + $0x944] sm:$0xf]  ;;  %v7458_v45 = vld [vmem:[%s15394_s1 + $0x950] sm:$0xf0]  ;;  %v4980_v57 = vpop.f32.mrf.mxu1  ;;  %v7333_v58 = vor.u32 %v9674_v40, %v7330_v41 }
 0x11b   :  { %5223 = vmatpush.bf16.msra.mxu0 %v7173_v10  ;;  %v9738_v50 = vld [vmem:[%s15394_s1 + $0xa44] sm:$0xf]  ;;  %v7586_v53 = vld [vmem:[%s15394_s1 + $0xa50] sm:$0xf0]  ;;  %v7461_v59 = vor.u32 %v9706_v44, %v7458_v45 }
 0x11c   :  { %5232 = vmatpush.bf16.msra.mxu1 %v7365_v19  ;;  %v9782_v54 = vld [vmem:[%s15394_s1 + $0xba4] sm:$0xf]  ;;  %v7762_v55 = vld [vmem:[%s15394_s1 + $0xbb0] sm:$0xf0]  ;;  %v7589_v63 = vor.u32 %v9738_v50, %v7586_v53 }
 0x11d   :  { %5245 = vmatpush.bf16.msra.mxu2 %v7493_v24  ;;  %v9670_v61 = vld [vmem:[%s15394_s1 + $0x824] sm:$0xf]  ;;  %v7314_v62 = vld [vmem:[%s15394_s1 + $0x830] sm:$0xf0]  ;;  %v7765_v3 = vor.u32 %v9782_v54, %v7762_v55 }
 0x11e   :  { %5258 = vmatpush.bf16.msra.mxu3 %v7621_v28  ;;  %5224 = vmatmul.bf16.vlgmr.msra.gmra.mxu0 %v10659_v1  ;;  %v9702_v8 = vld [vmem:[%s15394_s1 + $0x924] sm:$0xf]  ;;  %v7442_v10 = vld [vmem:[%s15394_s1 + $0x930] sm:$0xf0]  ;;  %v7317_v27 = vor.u32 %v9670_v61, %v7314_v62 }
 0x11f   :  { %5268 = vmatpush.bf16.msrb.mxu0 %v7797_v30  ;;  %v9734_v11 = vld [vmem:[%s15394_s1 + $0xa24] sm:$0xf]  ;;  %v7570_v19 = vld [vmem:[%s15394_s1 + $0xa30] sm:$0xf0]  ;;  %v7445_v28 = vor.u32 %v9702_v8, %v7442_v10 }
 0x120   :  { %5233 = vmatpush.bf16.msra.mxu1 %v7349_v38  ;;  %v9778_v24 = vld [vmem:[%s15394_s1 + $0xb84] sm:$0xf]  ;;  %v7746_v25 = vld [vmem:[%s15394_s1 + $0xb90] sm:$0xf0]  ;;  %v7573_v31 = vor.u32 %v9734_v11, %v7570_v19  ;;  %v4993_v38 = vpop.f32.mrf.mxu2 }
 0x121   :  { %5246 = vmatpush.bf16.msra.mxu2 %v7477_v39  ;;  %v9666_v29 = vld [vmem:[%s15394_s1 + $0x804] sm:$0xf]  ;;  %v7298_v30 = vld [vmem:[%s15394_s1 + $0x810] sm:$0xf0]  ;;  %v7749_v33 = vor.u32 %v9778_v24, %v7746_v25 }
 0x122   :  { %5259 = vmatpush.bf16.msra.mxu3 %v7605_v42  ;;  %v9698_v23 = vld [vmem:[%s15394_s1 + $0x904] sm:$0xf]  ;;  %v7426_v35 = vld [vmem:[%s15394_s1 + $0x910] sm:$0xf0]  ;;  %v5006_v42 = vpop.f32.mrf.mxu3  ;;  %v7301_v45 = vor.u32 %v9666_v29, %v7298_v30 }
 0x123   :  { %5269 = vmatpush.bf16.msrb.mxu0 %v7781_v43  ;;  %v9730_v36 = vld [vmem:[%s15394_s1 + $0xa04] sm:$0xf]  ;;  %v7554_v37 = vld [vmem:[%s15394_s1 + $0xa10] sm:$0xf0]  ;;  %v7429_v50 = vor.u32 %v9698_v23, %v7426_v35 }
 0x124   :  { %5234 = vmatpush.bf16.msra.mxu1 %v7333_v58  ;;  %v9774_v39 = vld [vmem:[%s15394_s1 + $0xb64] sm:$0xf]  ;;  %v7730_v40 = vld [vmem:[%s15394_s1 + $0xb70] sm:$0xf0]  ;;  %v7557_v53 = vor.u32 %v9730_v36, %v7554_v37 }
 0x125   :  { %5247 = vmatpush.bf16.msra.mxu2 %v7461_v59  ;;  %v9822_v41 = vld [vmem:[%s15394_s1 + $0xce4] sm:$0xf]  ;;  %v7922_v34 = vld [vmem:[%s15394_s1 + $0xcf0] sm:$0xf0]  ;;  %v7733_v54 = vor.u32 %v9774_v39, %v7730_v40 }
 0x126   :  { %5260 = vmatpush.bf16.msra.mxu3 %v7589_v63  ;;  %v9854_v43 = vld [vmem:[%s15394_s1 + $0xde4] sm:$0xf]  ;;  %v8050_v44 = vld [vmem:[%s15394_s1 + $0xdf0] sm:$0xf0]  ;;  %v7925_v55 = vor.u32 %v9822_v41, %v7922_v34 }
 0x127   :  { %5270 = vmatpush.bf16.msrb.mxu0 %v7765_v3  ;;  %v9886_v51 = vld [vmem:[%s15394_s1 + $0xee4] sm:$0xf]  ;;  %v8178_v52 = vld [vmem:[%s15394_s1 + $0xef0] sm:$0xf0]  ;;  %v8053_v56 = vor.u32 %v9854_v43, %v8050_v44 }
 0x128   :  { %5235 = vmatpush.bf16.msra.mxu1 %v7317_v27  ;;  %v9770_v57 = vld [vmem:[%s15394_s1 + $0xb44] sm:$0xf]  ;;  %v7714_v58 = vld [vmem:[%s15394_s1 + $0xb50] sm:$0xf0]  ;;  %v8181_v61 = vor.u32 %v9886_v51, %v8178_v52 }
 0x129   :  { %5248 = vmatpush.bf16.msra.mxu2 %v7445_v28  ;;  %v9818_v59 = vld [vmem:[%s15394_s1 + $0xcc4] sm:$0xf]  ;;  %v7906_v62 = vld [vmem:[%s15394_s1 + $0xcd0] sm:$0xf0]  ;;  %v7717_v11 = vor.u32 %v9770_v57, %v7714_v58 }
 0x12a   :  { %5261 = vmatpush.bf16.msra.mxu3 %v7573_v31  ;;  %v9850_v63 = vld [vmem:[%s15394_s1 + $0xdc4] sm:$0xf]  ;;  %v8034_v3 = vld [vmem:[%s15394_s1 + $0xdd0] sm:$0xf0]  ;;  %v7909_v19 = vor.u32 %v9818_v59, %v7906_v62 }
 0x12b   :  { %5271 = vmatpush.bf16.msrb.mxu0 %v7749_v33  ;;  %v9882_v8 = vld [vmem:[%s15394_s1 + $0xec4] sm:$0xf]  ;;  %v8162_v10 = vld [vmem:[%s15394_s1 + $0xed0] sm:$0xf0]  ;;  %v8037_v24 = vor.u32 %v9850_v63, %v8034_v3 }
 0x12c   :  { %5236 = vmatpush.bf16.msra.mxu1 %v7301_v45  ;;  %v9766_v25 = vld [vmem:[%s15394_s1 + $0xb24] sm:$0xf]  ;;  %v7698_v27 = vld [vmem:[%s15394_s1 + $0xb30] sm:$0xf0]  ;;  %v8165_v29 = vor.u32 %v9882_v8, %v8162_v10 }
 0x12d   :  { %5249 = vmatpush.bf16.msra.mxu2 %v7429_v50  ;;  %v9814_v28 = vld [vmem:[%s15394_s1 + $0xca4] sm:$0xf]  ;;  %v7890_v30 = vld [vmem:[%s15394_s1 + $0xcb0] sm:$0xf0]  ;;  %v7701_v36 = vor.u32 %v9766_v25, %v7698_v27 }
 0x12e   :  { %5262 = vmatpush.bf16.msra.mxu3 %v7557_v53  ;;  %v9846_v23 = vld [vmem:[%s15394_s1 + $0xda4] sm:$0xf]  ;;  %v8018_v31 = vld [vmem:[%s15394_s1 + $0xdb0] sm:$0xf0]  ;;  %v7893_v38 = vor.u32 %v9814_v28, %v7890_v30  ;;  %v5017_v50 = vpop.f32.mrf.mxu0 }
 0x12f   :  { %5272 = vmatpush.bf16.msrb.mxu0 %v7733_v54  ;;  %5237 = vmatmul.bf16.vlgmr.msra.gmra.mxu1 %v10907_v12  ;;  %v9878_v33 = vld [vmem:[%s15394_s1 + $0xea4] sm:$0xf]  ;;  %v8146_v35 = vld [vmem:[%s15394_s1 + $0xeb0] sm:$0xf0]  ;;  %v8021_v39 = vor.u32 %v9846_v23, %v8018_v31  ;;  %v5018_v54 = vadd.f32 %v5017_v50, %v12050_v32 }
 0x130   :  { %5281 = vmatpush.bf16.msrb.mxu1 %v7925_v55  ;;  %5250 = vmatmul.bf16.vlgmr.msra.gmra.mxu2 %v10917_v16  ;;  %v9762_v37 = vld [vmem:[%s15394_s1 + $0xb04] sm:$0xf]  ;;  %v7682_v40 = vld [vmem:[%s15394_s1 + $0xb10] sm:$0xf0]  ;;  %v8149_v34 = vor.u32 %v9878_v33, %v8146_v35 }
 0x131   :  { %5294 = vmatpush.bf16.msrb.mxu2 %v8053_v56  ;;  %5263 = vmatmul.bf16.vlgmr.msra.gmra.mxu3 %v10915_v15  ;;  %v9810_v41 = vld [vmem:[%s15394_s1 + $0xc84] sm:$0xf]  ;;  %v7874_v42 = vld [vmem:[%s15394_s1 + $0xc90] sm:$0xf0]  ;;  %v7685_v55 = vor.u32 %v9762_v37, %v7682_v40  ;;  %v5030_v56 = vpop.f32.mrf.mxu1 }
 0x132   :  { %5307 = vmatpush.bf16.msrb.mxu3 %v8181_v61  ;;  %v9842_v43 = vld [vmem:[%s15394_s1 + $0xd84] sm:$0xf]  ;;  %v8002_v44 = vld [vmem:[%s15394_s1 + $0xd90] sm:$0xf0]  ;;  %v7877_v57 = vor.u32 %v9810_v41, %v7874_v42  ;;  %v5031_v63 = vadd.f32 %v5030_v56, %v5018_v54 }
 0x133   :  { %5273 = vmatpush.bf16.msrb.mxu0 %v7717_v11  ;;  %v9874_v45 = vld [vmem:[%s15394_s1 + $0xe84] sm:$0xf]  ;;  %v8130_v51 = vld [vmem:[%s15394_s1 + $0xe90] sm:$0xf0]  ;;  %v8005_v58 = vor.u32 %v9842_v43, %v8002_v44 }
 0x134   :  { %5282 = vmatpush.bf16.msrb.mxu1 %v7909_v19  ;;  %v9918_v52 = vld [vmem:[%s15394_s1 + $0xfe4] sm:$0xf]  ;;  %v8306_v53 = vld [vmem:[%s15394_s1 + $0xff0] sm:$0xf0]  ;;  %v8133_v62 = vor.u32 %v9874_v45, %v8130_v51 }
 0x135   :  { %5295 = vmatpush.bf16.msrb.mxu2 %v8037_v24  ;;  %v9806_v59 = vld [vmem:[%s15394_s1 + $0xc64] sm:$0xf]  ;;  %v7858_v61 = vld [vmem:[%s15394_s1 + $0xc70] sm:$0xf0]  ;;  %v8309_v3 = vor.u32 %v9918_v52, %v8306_v53  ;;  %v5043_v23 = vpop.f32.mrf.mxu2 }
 0x136   :  { %5308 = vmatpush.bf16.msrb.mxu3 %v8165_v29  ;;  %v9838_v32 = vld [vmem:[%s15394_s1 + $0xd64] sm:$0xf]  ;;  %v7986_v8 = vld [vmem:[%s15394_s1 + $0xd70] sm:$0xf0]  ;;  %v7861_v25 = vor.u32 %v9806_v59, %v7858_v61  ;;  %v5044_v37 = vadd.f32 %v5043_v23, %v5031_v63  ;;  %v5019_v42 = vpop.f32.mrf.mxu0 }
 0x137   :  { %5274 = vmatpush.bf16.msrb.mxu0 %v7701_v36  ;;  %v9870_v10 = vld [vmem:[%s15394_s1 + $0xe64] sm:$0xf]  ;;  %v8114_v11 = vld [vmem:[%s15394_s1 + $0xe70] sm:$0xf0]  ;;  %v7989_v27 = vor.u32 %v9838_v32, %v7986_v8 }
 0x138   :  { %5283 = vmatpush.bf16.msrb.mxu1 %v7893_v38  ;;  %v9914_v19 = vld [vmem:[%s15394_s1 + $0xfc4] sm:$0xf]  ;;  %v8290_v24 = vld [vmem:[%s15394_s1 + $0xfd0] sm:$0xf0]  ;;  %v8117_v30 = vor.u32 %v9870_v10, %v8114_v11  ;;  %v5056_v38 = vpop.f32.mrf.mxu3 }
 0x139   :  { %5296 = vmatpush.bf16.msrb.mxu2 %v8021_v39  ;;  %v9802_v28 = vld [vmem:[%s15394_s1 + $0xc44] sm:$0xf]  ;;  %v7842_v29 = vld [vmem:[%s15394_s1 + $0xc50] sm:$0xf0]  ;;  %v8293_v31 = vor.u32 %v9914_v19, %v8290_v24  ;;  %v12249_v43 = vadd.f32 %v5056_v38, %v5044_v37 }
 0x13a   :  { %5309 = vmatpush.bf16.msrb.mxu3 %v8149_v34  ;;  %v9834_v33 = vld [vmem:[%s15394_s1 + $0xd44] sm:$0xf]  ;;  %v7970_v35 = vld [vmem:[%s15394_s1 + $0xd50] sm:$0xf0]  ;;  %v5032_v34 = vpop.f32.mrf.mxu1  ;;  %v7845_v44 = vor.u32 %v9802_v28, %v7842_v29 }
 0x13b   :  { %5275 = vmatpush.bf16.msrb.mxu0 %v7685_v55  ;;  %v9866_v36 = vld [vmem:[%s15394_s1 + $0xe44] sm:$0xf]  ;;  %v8098_v39 = vld [vmem:[%s15394_s1 + $0xe50] sm:$0xf0]  ;;  %v7973_v45 = vor.u32 %v9834_v33, %v7970_v35 }
 0x13c   :  { %5284 = vmatpush.bf16.msrb.mxu1 %v7877_v57  ;;  %v9910_v40 = vld [vmem:[%s15394_s1 + $0xfa4] sm:$0xf]  ;;  %v8274_v41 = vld [vmem:[%s15394_s1 + $0xfb0] sm:$0xf0]  ;;  %v8101_v52 = vor.u32 %v9866_v36, %v8098_v39 }
 0x13d   :  { %5297 = vmatpush.bf16.msrb.mxu2 %v8005_v58  ;;  %v9798_v50 = vld [vmem:[%s15394_s1 + $0xc24] sm:$0xf]  ;;  %v7826_v51 = vld [vmem:[%s15394_s1 + $0xc30] sm:$0xf0]  ;;  %v8277_v53 = vor.u32 %v9910_v40, %v8274_v41 }
 0x13e   :  { %5310 = vmatpush.bf16.msrb.mxu3 %v8133_v62  ;;  %5276 = vmatmul.bf16.vlgmr.msrb.gmra.mxu0 %v10919_v17  ;;  %v9830_v54 = vld [vmem:[%s15394_s1 + $0xd24] sm:$0xf]  ;;  %v7954_v55 = vld [vmem:[%s15394_s1 + $0xd30] sm:$0xf0]  ;;  %v7829_v61 = vor.u32 %v9798_v50, %v7826_v51 }
 0x13f   :  { %5320 = vmatpush.bf16.msra.mxu0 %v8309_v3  ;;  %v9862_v56 = vld [vmem:[%s15394_s1 + $0xe24] sm:$0xf]  ;;  %v8082_v57 = vld [vmem:[%s15394_s1 + $0xe30] sm:$0xf0]  ;;  %v7957_v62 = vor.u32 %v9830_v54, %v7954_v55 }
 0x140   :  { %5285 = vmatpush.bf16.msrb.mxu1 %v7861_v25  ;;  %v9906_v58 = vld [vmem:[%s15394_s1 + $0xf84] sm:$0xf]  ;;  %v8258_v59 = vld [vmem:[%s15394_s1 + $0xf90] sm:$0xf0]  ;;  %v8085_v8 = vor.u32 %v9862_v56, %v8082_v57  ;;  %v5045_v25 = vpop.f32.mrf.mxu2 }
 0x141   :  { %5298 = vmatpush.bf16.msrb.mxu2 %v7989_v27  ;;  %v9794_v63 = vld [vmem:[%s15394_s1 + $0xc04] sm:$0xf]  ;;  %v7810_v3 = vld [vmem:[%s15394_s1 + $0xc10] sm:$0xf0]  ;;  %v8261_v10 = vor.u32 %v9906_v58, %v8258_v59 }
 0x142   :  { %5311 = vmatpush.bf16.msrb.mxu3 %v8117_v30  ;;  %v9826_v32 = vld [vmem:[%s15394_s1 + $0xd04] sm:$0xf]  ;;  %v7938_v11 = vld [vmem:[%s15394_s1 + $0xd10] sm:$0xf0]  ;;  %v5058_v30 = vpop.f32.mrf.mxu3  ;;  %v7813_v35 = vor.u32 %v9794_v63, %v7810_v3 }
 0x143   :  { %5321 = vmatpush.bf16.msra.mxu0 %v8293_v31  ;;  %v9858_v19 = vld [vmem:[%s15394_s1 + $0xe04] sm:$0xf]  ;;  %v8066_v24 = vld [vmem:[%s15394_s1 + $0xe10] sm:$0xf0]  ;;  %v7941_v36 = vor.u32 %v9826_v32, %v7938_v11 }
 0x144   :  { %5286 = vmatpush.bf16.msrb.mxu1 %v7845_v44  ;;  %v9902_v27 = vld [vmem:[%s15394_s1 + $0xf64] sm:$0xf]  ;;  %v8242_v28 = vld [vmem:[%s15394_s1 + $0xf70] sm:$0xf0]  ;;  %v8069_v39 = vor.u32 %v9858_v19, %v8066_v24 }
 0x145   :  { %5299 = vmatpush.bf16.msrb.mxu2 %v7973_v45  ;;  %v9950_v29 = vld [vmem:[%s15394_s1 + $0x10e4] sm:$0xf]  ;;  %v8434_v23 = vld [vmem:[%s15394_s1 + $0x10f0] sm:$0xf0]  ;;  %v8245_v40 = vor.u32 %v9902_v27, %v8242_v28 }
 0x146   :  { %5312 = vmatpush.bf16.msrb.mxu3 %v8101_v52  ;;  %v9982_v31 = vld [vmem:[%s15394_s1 + $0x11e4] sm:$0xf]  ;;  %v8562_v33 = vld [vmem:[%s15394_s1 + $0x11f0] sm:$0xf0]  ;;  %v8437_v41 = vor.u32 %v9950_v29, %v8434_v23 }
 0x147   :  { %5322 = vmatpush.bf16.msra.mxu0 %v8277_v53  ;;  %v10014_v37 = vld [vmem:[%s15394_s1 + $0x12e4] sm:$0xf]  ;;  %v8690_v38 = vld [vmem:[%s15394_s1 + $0x12f0] sm:$0xf0]  ;;  %v8565_v42 = vor.u32 %v9982_v31, %v8562_v33 }
 0x148   :  { %5287 = vmatpush.bf16.msrb.mxu1 %v7829_v61  ;;  %v9898_v34 = vld [vmem:[%s15394_s1 + $0xf44] sm:$0xf]  ;;  %v8226_v44 = vld [vmem:[%s15394_s1 + $0xf50] sm:$0xf0]  ;;  %v8693_v50 = vor.u32 %v10014_v37, %v8690_v38 }
 0x149   :  { %5300 = vmatpush.bf16.msrb.mxu2 %v7957_v62  ;;  %v9946_v45 = vld [vmem:[%s15394_s1 + $0x10c4] sm:$0xf]  ;;  %v8418_v51 = vld [vmem:[%s15394_s1 + $0x10d0] sm:$0xf0]  ;;  %v8229_v56 = vor.u32 %v9898_v34, %v8226_v44 }
 0x14a   :  { %5313 = vmatpush.bf16.msrb.mxu3 %v8085_v8  ;;  %v9978_v52 = vld [vmem:[%s15394_s1 + $0x11c4] sm:$0xf]  ;;  %v8546_v53 = vld [vmem:[%s15394_s1 + $0x11d0] sm:$0xf0]  ;;  %v8421_v57 = vor.u32 %v9946_v45, %v8418_v51 }
 0x14b   :  { %5323 = vmatpush.bf16.msra.mxu0 %v8261_v10  ;;  %v10010_v54 = vld [vmem:[%s15394_s1 + $0x12c4] sm:$0xf]  ;;  %v8674_v55 = vld [vmem:[%s15394_s1 + $0x12d0] sm:$0xf0]  ;;  %v8549_v58 = vor.u32 %v9978_v52, %v8546_v53 }
 0x14c   :  { %5288 = vmatpush.bf16.msrb.mxu1 %v7813_v35  ;;  %v9894_v59 = vld [vmem:[%s15394_s1 + $0xf24] sm:$0xf]  ;;  %v8210_v61 = vld [vmem:[%s15394_s1 + $0xf30] sm:$0xf0]  ;;  %v8677_v63 = vor.u32 %v10010_v54, %v8674_v55 }
 0x14d   :  { %5301 = vmatpush.bf16.msrb.mxu2 %v7941_v36  ;;  %v9942_v62 = vld [vmem:[%s15394_s1 + $0x10a4] sm:$0xf]  ;;  %v8402_v3 = vld [vmem:[%s15394_s1 + $0x10b0] sm:$0xf0]  ;;  %v8213_v19 = vor.u32 %v9894_v59, %v8210_v61  ;;  %v5069_v36 = vpop.f32.mrf.mxu0 }
 0x14e   :  { %5314 = vmatpush.bf16.msrb.mxu3 %v8069_v39  ;;  %v9974_v32 = vld [vmem:[%s15394_s1 + $0x11a4] sm:$0xf]  ;;  %v8530_v8 = vld [vmem:[%s15394_s1 + $0x11b0] sm:$0xf0]  ;;  %v8405_v25 = vor.u32 %v9942_v62, %v8402_v3 }
 0x14f   :  { %5324 = vmatpush.bf16.msra.mxu0 %v8245_v40  ;;  %5289 = vmatmul.bf16.vlgmr.msrb.gmra.mxu1 %v11081_v46  ;;  %v10006_v10 = vld [vmem:[%s15394_s1 + $0x12a4] sm:$0xf]  ;;  %v8658_v11 = vld [vmem:[%s15394_s1 + $0x12b0] sm:$0xf0]  ;;  %v8533_v27 = vor.u32 %v9974_v32, %v8530_v8  ;;  %v5070_v40 = vadd.f32 %v5069_v36, %v12249_v43 }
 0x150   :  { %5333 = vmatpush.bf16.msra.mxu1 %v8437_v41  ;;  %5302 = vmatmul.bf16.vlgmr.msrb.gmra.mxu2 %v11085_v48  ;;  %v9890_v24 = vld [vmem:[%s15394_s1 + $0xf04] sm:$0xf]  ;;  %v8194_v28 = vld [vmem:[%s15394_s1 + $0xf10] sm:$0xf0]  ;;  %v8661_v23 = vor.u32 %v10006_v10, %v8658_v11 }
 0x151   :  { %5346 = vmatpush.bf16.msra.mxu2 %v8565_v42  ;;  %5315 = vmatmul.bf16.vlgmr.msrb.gmra.mxu3 %v11083_v47  ;;  %v9938_v29 = vld [vmem:[%s15394_s1 + $0x1084] sm:$0xf]  ;;  %v8386_v30 = vld [vmem:[%s15394_s1 + $0x1090] sm:$0xf0]  ;;  %v8197_v41 = vor.u32 %v9890_v24, %v8194_v28  ;;  %v5082_v42 = vpop.f32.mrf.mxu1 }
 0x152   :  { %5359 = vmatpush.bf16.msra.mxu3 %v8693_v50  ;;  %v9970_v31 = vld [vmem:[%s15394_s1 + $0x1184] sm:$0xf]  ;;  %v8514_v33 = vld [vmem:[%s15394_s1 + $0x1190] sm:$0xf0]  ;;  %v8389_v34 = vor.u32 %v9938_v29, %v8386_v30  ;;  %v5083_v52 = vadd.f32 %v5082_v42, %v5070_v40 }
 0x153   :  { %5325 = vmatpush.bf16.msra.mxu0 %v8229_v56  ;;  %v10002_v35 = vld [vmem:[%s15394_s1 + $0x1284] sm:$0xf]  ;;  %v8642_v37 = vld [vmem:[%s15394_s1 + $0x1290] sm:$0xf0]  ;;  %v8517_v44 = vor.u32 %v9970_v31, %v8514_v33  ;;  %v5095_v32 = vpop.f32.mrf.mxu2 }
 0x154   :  { %5334 = vmatpush.bf16.msra.mxu1 %v8421_v57  ;;  %v10046_v38 = vld [vmem:[%s15394_s1 + $0x13e4] sm:$0xf]  ;;  %v8818_v39 = vld [vmem:[%s15394_s1 + $0x13f0] sm:$0xf0]  ;;  %v8645_v51 = vor.u32 %v10002_v35, %v8642_v37  ;;  %v5096_v24 = vadd.f32 %v5095_v32, %v5083_v52 }
 0x155   :  { %5347 = vmatpush.bf16.msra.mxu2 %v8549_v58  ;;  %v9934_v45 = vld [vmem:[%s15394_s1 + $0x1064] sm:$0xf]  ;;  %v8370_v50 = vld [vmem:[%s15394_s1 + $0x1070] sm:$0xf0]  ;;  %v8821_v53 = vor.u32 %v10046_v38, %v8818_v39 }
 0x156   :  { %5360 = vmatpush.bf16.msra.mxu3 %v8677_v63  ;;  %v9966_v43 = vld [vmem:[%s15394_s1 + $0x1164] sm:$0xf]  ;;  %v8498_v54 = vld [vmem:[%s15394_s1 + $0x1170] sm:$0xf0]  ;;  %v8373_v59 = vor.u32 %v9934_v45, %v8370_v50 }
 0x157   :  { %5326 = vmatpush.bf16.msra.mxu0 %v8213_v19  ;;  %v9998_v55 = vld [vmem:[%s15394_s1 + $0x1264] sm:$0xf]  ;;  %v8626_v56 = vld [vmem:[%s15394_s1 + $0x1270] sm:$0xf0]  ;;  %v8501_v61 = vor.u32 %v9966_v43, %v8498_v54 }
 0x158   :  { %5335 = vmatpush.bf16.msra.mxu1 %v8405_v25  ;;  %v10042_v57 = vld [vmem:[%s15394_s1 + $0x13c4] sm:$0xf]  ;;  %v8802_v58 = vld [vmem:[%s15394_s1 + $0x13d0] sm:$0xf0]  ;;  %v8629_v3 = vor.u32 %v9998_v55, %v8626_v56  ;;  %v5071_v25 = vpop.f32.mrf.mxu0 }
 0x159   :  { %5348 = vmatpush.bf16.msra.mxu2 %v8533_v27  ;;  %v9930_v62 = vld [vmem:[%s15394_s1 + $0x1044] sm:$0xf]  ;;  %v8354_v63 = vld [vmem:[%s15394_s1 + $0x1050] sm:$0xf0]  ;;  %v8805_v8 = vor.u32 %v10042_v57, %v8802_v58  ;;  %v5108_v27 = vpop.f32.mrf.mxu3 }
 0x15a   :  { %5361 = vmatpush.bf16.msra.mxu3 %v8661_v23  ;;  %v9962_v10 = vld [vmem:[%s15394_s1 + $0x1144] sm:$0xf]  ;;  %v8482_v11 = vld [vmem:[%s15394_s1 + $0x1150] sm:$0xf0]  ;;  %v5084_v23 = vpop.f32.mrf.mxu1  ;;  %v5109_v31 = vadd.f32 %v5108_v27, %v5096_v24  ;;  %v8357_v33 = vor.u32 %v9930_v62, %v8354_v63 }
 0x15b   :  { %5327 = vmatpush.bf16.msra.mxu0 %v8197_v41  ;;  %v9994_v19 = vld [vmem:[%s15394_s1 + $0x1244] sm:$0xf]  ;;  %v8610_v28 = vld [vmem:[%s15394_s1 + $0x1250] sm:$0xf0]  ;;  %v8485_v35 = vor.u32 %v9962_v10, %v8482_v11 }
 0x15c   :  { %5336 = vmatpush.bf16.msra.mxu1 %v8389_v34  ;;  %v10038_v29 = vld [vmem:[%s15394_s1 + $0x13a4] sm:$0xf]  ;;  %v8786_v30 = vld [vmem:[%s15394_s1 + $0x13b0] sm:$0xf0]  ;;  %v8613_v38 = vor.u32 %v9994_v19, %v8610_v28 }
 0x15d   :  { %5349 = vmatpush.bf16.msra.mxu2 %v8517_v44  ;;  %v9926_v36 = vld [vmem:[%s15394_s1 + $0x1024] sm:$0xf]  ;;  %v8338_v37 = vld [vmem:[%s15394_s1 + $0x1030] sm:$0xf0]  ;;  %v8789_v39 = vor.u32 %v10038_v29, %v8786_v30 }
 0x15e   :  { %5362 = vmatpush.bf16.msra.mxu3 %v8645_v51  ;;  %5328 = vmatmul.bf16.vlgmr.msra.gmra.mxu0 %v11087_v49  ;;  %v9958_v40 = vld [vmem:[%s15394_s1 + $0x1124] sm:$0xf]  ;;  %v8466_v41 = vld [vmem:[%s15394_s1 + $0x1130] sm:$0xf0]  ;;  %v8341_v50 = vor.u32 %v9926_v36, %v8338_v37 }
 0x15f   :  { %5372 = vmatpush.bf16.msrb.mxu0 %v8821_v53  ;;  %v9990_v42 = vld [vmem:[%s15394_s1 + $0x1224] sm:$0xf]  ;;  %v8594_v34 = vld [vmem:[%s15394_s1 + $0x1230] sm:$0xf0]  ;;  %v8469_v51 = vor.u32 %v9958_v40, %v8466_v41 }
 0x160   :  { %5337 = vmatpush.bf16.msra.mxu1 %v8373_v59  ;;  %v10034_v44 = vld [vmem:[%s15394_s1 + $0x1384] sm:$0xf]  ;;  %v8770_v45 = vld [vmem:[%s15394_s1 + $0x1390] sm:$0xf0]  ;;  %v8597_v54 = vor.u32 %v9990_v42, %v8594_v34  ;;  %v5097_v59 = vpop.f32.mrf.mxu2  ;;  %v5121_v32 = vpop.f32.mrf.mxu0 }
 0x161   :  { %5350 = vmatpush.bf16.msra.mxu2 %v8501_v61  ;;  %v9922_v52 = vld [vmem:[%s15394_s1 + $0x1004] sm:$0xf]  ;;  %v8322_v53 = vld [vmem:[%s15394_s1 + $0x1010] sm:$0xf0]  ;;  %v8773_v55 = vor.u32 %v10034_v44, %v8770_v45  ;;  %v12508_v19 = vadd.f32 %v5121_v32, %v5109_v31 }
 0x162   :  { %5363 = vmatpush.bf16.msra.mxu3 %v8629_v3  ;;  %v9954_v43 = vld [vmem:[%s15394_s1 + $0x1104] sm:$0xf]  ;;  %v8450_v56 = vld [vmem:[%s15394_s1 + $0x1110] sm:$0xf0]  ;;  %v5110_v3 = vpop.f32.mrf.mxu3  ;;  %v8325_v24 = vor.u32 %v9922_v52, %v8322_v53 }
 0x163   :  { %5373 = vmatpush.bf16.msrb.mxu0 %v8805_v8  ;;  %v9986_v57 = vld [vmem:[%s15394_s1 + $0x1204] sm:$0xf]  ;;  %v8578_v58 = vld [vmem:[%s15394_s1 + $0x1210] sm:$0xf0]  ;;  %v8453_v25 = vor.u32 %v9954_v43, %v8450_v56 }
 0x164   :  { %5338 = vmatpush.bf16.msra.mxu1 %v8357_v33  ;;  %v10030_v61 = vld [vmem:[%s15394_s1 + $0x1364] sm:$0xf]  ;;  %v8754_v62 = vld [vmem:[%s15394_s1 + $0x1370] sm:$0xf0]  ;;  %v8581_v29 = vor.u32 %v9986_v57, %v8578_v58 }
 0x165   :  { %5351 = vmatpush.bf16.msra.mxu2 %v8485_v35  ;;  %v10078_v63 = vld [vmem:[%s15394_s1 + $0x14e4] sm:$0xf]  ;;  %v8946_v8 = vld [vmem:[%s15394_s1 + $0x14f0] sm:$0xf0]  ;;  %v8757_v30 = vor.u32 %v10030_v61, %v8754_v62 }
 0x166   :  { %5364 = vmatpush.bf16.msra.mxu3 %v8613_v38  ;;  %v10110_v10 = vld [vmem:[%s15394_s1 + $0x15e4] sm:$0xf]  ;;  %v9074_v11 = vld [vmem:[%s15394_s1 + $0x15f0] sm:$0xf0]  ;;  %v8949_v23 = vor.u32 %v10078_v63, %v8946_v8 }
 0x167   :  { %5374 = vmatpush.bf16.msrb.mxu0 %v8789_v39  ;;  %v10142_v27 = vld [vmem:[%s15394_s1 + $0x16e4] sm:$0xf]  ;;  %v9202_v28 = vld [vmem:[%s15394_s1 + $0x16f0] sm:$0xf0]  ;;  %v9077_v33 = vor.u32 %v10110_v10, %v9074_v11 }
 0x168   :  { %5339 = vmatpush.bf16.msra.mxu1 %v8341_v50  ;;  %v10026_v31 = vld [vmem:[%s15394_s1 + $0x1344] sm:$0xf]  ;;  %v8738_v35 = vld [vmem:[%s15394_s1 + $0x1350] sm:$0xf0]  ;;  %v9205_v37 = vor.u32 %v10142_v27, %v9202_v28  ;;  %v5123_v56 = vpop.f32.mrf.mxu0  ;;  %v10196_v27 = vld [vmem:[%s15395_s2] sm:$0xf] }
 0x169   :  { %5352 = vmatpush.bf16.msra.mxu2 %v8469_v51  ;;  %v10074_v36 = vld [vmem:[%s15394_s1 + $0x14c4] sm:$0xf]  ;;  %v8930_v38 = vld [vmem:[%s15394_s1 + $0x14d0] sm:$0xf0]  ;;  %v8741_v34 = vor.u32 %v10026_v31, %v8738_v35  ;;  %v813_v28 = vperm.slane %v10196_v27, 1 }
 0x16a   :  { %5365 = vmatpush.bf16.msra.mxu3 %v8597_v54  ;;  %v10106_v39 = vld [vmem:[%s15394_s1 + $0x15c4] sm:$0xf]  ;;  %v9058_v40 = vld [vmem:[%s15394_s1 + $0x15d0] sm:$0xf0]  ;;  %v8933_v44 = vor.u32 %v10074_v36, %v8930_v38 }
 0x16b   :  { %5375 = vmatpush.bf16.msrb.mxu0 %v8773_v55  ;;  %v10138_v41 = vld [vmem:[%s15394_s1 + $0x16c4] sm:$0xf]  ;;  %v9186_v42 = vld [vmem:[%s15394_s1 + $0x16d0] sm:$0xf0]  ;;  %v9061_v45 = vor.u32 %v10106_v39, %v9058_v40 }
 0x16c   :  { %5340 = vmatpush.bf16.msra.mxu1 %v8325_v24  ;;  %v10022_v50 = vld [vmem:[%s15394_s1 + $0x1324] sm:$0xf]  ;;  %v8722_v51 = vld [vmem:[%s15394_s1 + $0x1330] sm:$0xf0]  ;;  %v9189_v53 = vor.u32 %v10138_v41, %v9186_v42  ;;  %v5134_v31 = vpop.f32.mrf.mxu1 }
 0x16d   :  { %5353 = vmatpush.bf16.msra.mxu2 %v8453_v25  ;;  %v10070_v52 = vld [vmem:[%s15394_s1 + $0x14a4] sm:$0xf]  ;;  %v8914_v43 = vld [vmem:[%s15394_s1 + $0x14b0] sm:$0xf0]  ;;  %v8725_v59 = vor.u32 %v10022_v50, %v8722_v51 }
 0x16e   :  { %5366 = vmatpush.bf16.msra.mxu3 %v8581_v29  ;;  %v10102_v54 = vld [vmem:[%s15394_s1 + $0x15a4] sm:$0xf]  ;;  %v9042_v55 = vld [vmem:[%s15394_s1 + $0x15b0] sm:$0xf0]  ;;  %v8917_v63 = vor.u32 %v10070_v52, %v8914_v43 }
 0x16f   :  { %5376 = vmatpush.bf16.msrb.mxu0 %v8757_v30  ;;  %5341 = vmatmul.bf16.vlgmr.msra.gmra.mxu1 %v11318_v9  ;;  %v10134_v57 = vld [vmem:[%s15394_s1 + $0x16a4] sm:$0xf]  ;;  %v9170_v58 = vld [vmem:[%s15394_s1 + $0x16b0] sm:$0xf0]  ;;  %v9045_v3 = vor.u32 %v10102_v54, %v9042_v55 }
 0x170   :  { %5385 = vmatpush.bf16.msrb.mxu1 %v8949_v23  ;;  %5354 = vmatmul.bf16.vlgmr.msra.gmra.mxu2 %v11328_v14  ;;  %v10018_v61 = vld [vmem:[%s15394_s1 + $0x1304] sm:$0xf]  ;;  %v8706_v62 = vld [vmem:[%s15394_s1 + $0x1310] sm:$0xf0]  ;;  %v9173_v11 = vor.u32 %v10134_v57, %v9170_v58 }
 0x171   :  { %5398 = vmatpush.bf16.msrb.mxu2 %v9077_v33  ;;  %5367 = vmatmul.bf16.vlgmr.msra.gmra.mxu3 %v11326_v13  ;;  %v10066_v32 = vld [vmem:[%s15394_s1 + $0x1484] sm:$0xf]  ;;  %v8898_v8 = vld [vmem:[%s15394_s1 + $0x1490] sm:$0xf0]  ;;  %v8709_v33 = vor.u32 %v10018_v61, %v8706_v62 }
 0x172   :  { %5411 = vmatpush.bf16.msrb.mxu3 %v9205_v37  ;;  %v10098_v10 = vld [vmem:[%s15394_s1 + $0x1584] sm:$0xf]  ;;  %v9026_v24 = vld [vmem:[%s15394_s1 + $0x1590] sm:$0xf0]  ;;  %v8901_v35 = vor.u32 %v10066_v32, %v8898_v8 }
 0x173   :  { %5377 = vmatpush.bf16.msrb.mxu0 %v8741_v34  ;;  %v10130_v25 = vld [vmem:[%s15394_s1 + $0x1684] sm:$0xf]  ;;  %v9154_v29 = vld [vmem:[%s15394_s1 + $0x1690] sm:$0xf0]  ;;  %v9029_v36 = vor.u32 %v10098_v10, %v9026_v24  ;;  %v5147_v55 = vpop.f32.mrf.mxu2 }
 0x174   :  { %5386 = vmatpush.bf16.msrb.mxu1 %v8933_v44  ;;  %v10174_v30 = vld [vmem:[%s15394_s1 + $0x17e4] sm:$0xf]  ;;  %v9330_v23 = vld [vmem:[%s15394_s1 + $0x17f0] sm:$0xf0]  ;;  %v9157_v39 = vor.u32 %v10130_v25, %v9154_v29  ;;  %v5135_v44 = vadd.f32 %v5134_v31, %v813_v28 }
 0x175   :  { %5399 = vmatpush.bf16.msrb.mxu2 %v9061_v45  ;;  %v10062_v37 = vld [vmem:[%s15394_s1 + $0x1464] sm:$0xf]  ;;  %v8882_v38 = vld [vmem:[%s15394_s1 + $0x1470] sm:$0xf0]  ;;  %v9333_v40 = vor.u32 %v10174_v30, %v9330_v23 }
 0x176   :  { %5412 = vmatpush.bf16.msrb.mxu3 %v9189_v53  ;;  %v10094_v41 = vld [vmem:[%s15394_s1 + $0x1564] sm:$0xf]  ;;  %v9010_v42 = vld [vmem:[%s15394_s1 + $0x1570] sm:$0xf0]  ;;  %v8885_v52 = vor.u32 %v10062_v37, %v8882_v38  ;;  %v5148_v62 = vadd.f32 %v5147_v55, %v5135_v44 }
 0x177   :  { %5378 = vmatpush.bf16.msrb.mxu0 %v8725_v59  ;;  %v10126_v34 = vld [vmem:[%s15394_s1 + $0x1664] sm:$0xf]  ;;  %v9138_v45 = vld [vmem:[%s15394_s1 + $0x1670] sm:$0xf0]  ;;  %v9013_v53 = vor.u32 %v10094_v41, %v9010_v42 }
 0x178   :  { %5387 = vmatpush.bf16.msrb.mxu1 %v8917_v63  ;;  %v10170_v50 = vld [vmem:[%s15394_s1 + $0x17c4] sm:$0xf]  ;;  %v9314_v51 = vld [vmem:[%s15394_s1 + $0x17d0] sm:$0xf0]  ;;  %v9141_v56 = vor.u32 %v10126_v34, %v9138_v45  ;;  %v5160_v63 = vpop.f32.mrf.mxu3 }
 0x179   :  { %5400 = vmatpush.bf16.msrb.mxu2 %v9045_v3  ;;  %v10058_v43 = vld [vmem:[%s15394_s1 + $0x1444] sm:$0xf]  ;;  %v8866_v54 = vld [vmem:[%s15394_s1 + $0x1450] sm:$0xf0]  ;;  %v9317_v57 = vor.u32 %v10170_v50, %v9314_v51  ;;  %v5161_v10 = vadd.f32 %v5160_v63, %v5148_v62 }
 0x17a   :  { %5413 = vmatpush.bf16.msrb.mxu3 %v9173_v11  ;;  %v10090_v58 = vld [vmem:[%s15394_s1 + $0x1544] sm:$0xf]  ;;  %v8994_v59 = vld [vmem:[%s15394_s1 + $0x1550] sm:$0xf0]  ;;  %v5136_v11 = vpop.f32.mrf.mxu1  ;;  %v8869_v24 = vor.u32 %v10058_v43, %v8866_v54 }
 0x17b   :  { %5379 = vmatpush.bf16.msrb.mxu0 %v8709_v33  ;;  %v10122_v61 = vld [vmem:[%s15394_s1 + $0x1644] sm:$0xf]  ;;  %v9122_v3 = vld [vmem:[%s15394_s1 + $0x1650] sm:$0xf0]  ;;  %v8997_v25 = vor.u32 %v10090_v58, %v8994_v59  ;;  %v5173_v38 = vpop.f32.mrf.mxu0  ;;  %v5149_v45 = vpop.f32.mrf.mxu2  ;;  %v6392_v59 = vld [vmem:[%s15394_s1 + $0xe8] sm:$0xf] }
 0x17c   :  { %5388 = vmatpush.bf16.msrb.mxu1 %v8901_v35  ;;  %v10166_v32 = vld [vmem:[%s15394_s1 + $0x17a4] sm:$0xf]  ;;  %v9298_v8 = vld [vmem:[%s15394_s1 + $0x17b0] sm:$0xf0]  ;;  %v9125_v29 = vor.u32 %v10122_v61, %v9122_v3  ;;  %v12682_v44 = vadd.f32 %v5173_v38, %v5161_v10  ;;  %v9441_v61 = vld [vmem:[%s15394_s1 + $0xf4] sm:$0xf0] }
 0x17d   :  { %5401 = vmatpush.bf16.msrb.mxu2 %v9029_v36  ;;  %v10054_v27 = vld [vmem:[%s15394_s1 + $0x1424] sm:$0xf]  ;;  %v8850_v28 = vld [vmem:[%s15394_s1 + $0x1430] sm:$0xf0]  ;;  %v9301_v30 = vor.u32 %v10166_v32, %v9298_v8  ;;  %v6520_v3 = vld [vmem:[%s15394_s1 + $0x1e8] sm:$0xf] }
 0x17e   :  { %5414 = vmatpush.bf16.msrb.mxu3 %v9157_v39  ;;  %5380 = vmatmul.bf16.vlgmr.msrb.gmra.mxu0 %v11330_v18  ;;  %v10086_v23 = vld [vmem:[%s15394_s1 + $0x1524] sm:$0xf]  ;;  %v8978_v33 = vld [vmem:[%s15394_s1 + $0x1530] sm:$0xf0]  ;;  %v8853_v39 = vor.u32 %v10054_v27, %v8850_v28  ;;  %v9473_v32 = vld [vmem:[%s15394_s1 + $0x1f4] sm:$0xf0] }
 0x17f   :  { %5424 = vmatpush.bf16.msra.mxu0 %v9333_v40  ;;  %v10118_v31 = vld [vmem:[%s15394_s1 + $0x1624] sm:$0xf]  ;;  %v9106_v35 = vld [vmem:[%s15394_s1 + $0x1630] sm:$0xf0]  ;;  %v8981_v40 = vor.u32 %v10086_v23, %v8978_v33  ;;  %v6376_v23 = vld [vmem:[%s15394_s1 + $0xc8] sm:$0xf] }
 0x180   :  { %5389 = vmatpush.bf16.msrb.mxu1 %v8885_v52  ;;  %v10162_v36 = vld [vmem:[%s15394_s1 + $0x1784] sm:$0xf]  ;;  %v9282_v37 = vld [vmem:[%s15394_s1 + $0x1790] sm:$0xf0]  ;;  %v9109_v50 = vor.u32 %v10118_v31, %v9106_v35  ;;  %v5162_v54 = vpop.f32.mrf.mxu3  ;;  %v9437_v33 = vld [vmem:[%s15394_s1 + $0xd4] sm:$0xf0] }
 0x181   :  { %5402 = vmatpush.bf16.msrb.mxu2 %v9013_v53  ;;  %v10050_v41 = vld [vmem:[%s15394_s1 + $0x1404] sm:$0xf]  ;;  %v8834_v42 = vld [vmem:[%s15394_s1 + $0x1410] sm:$0xf0]  ;;  %v9285_v51 = vor.u32 %v10162_v36, %v9282_v37  ;;  %v6504_v35 = vld [vmem:[%s15394_s1 + $0x1c8] sm:$0xf] }
 0x182   :  { %5415 = vmatpush.bf16.msrb.mxu3 %v9141_v56  ;;  %v10082_v34 = vld [vmem:[%s15394_s1 + $0x1504] sm:$0xf]  ;;  %v8962_v52 = vld [vmem:[%s15394_s1 + $0x1510] sm:$0xf0]  ;;  %v8837_v62 = vor.u32 %v10050_v41, %v8834_v42  ;;  %v9469_v36 = vld [vmem:[%s15394_s1 + $0x1d4] sm:$0xf0] }
 0x183   :  { %5425 = vmatpush.bf16.msra.mxu0 %v9317_v57  ;;  %v10114_v53 = vld [vmem:[%s15394_s1 + $0x1604] sm:$0xf]  ;;  %v9090_v43 = vld [vmem:[%s15394_s1 + $0x1610] sm:$0xf0]  ;;  %v8965_v63 = vor.u32 %v10082_v34, %v8962_v52  ;;  %v5175_v31 = vpop.f32.mrf.mxu0  ;;  %v6505_v34 = vor.u32 %v9469_v36, %v6504_v35  ;;  %v6488_v52 = vld [vmem:[%s15394_s1 + $0x1a8] sm:$0xf] }
 0x184   :  { %5390 = vmatpush.bf16.msrb.mxu1 %v8869_v24  ;;  %v10158_v55 = vld [vmem:[%s15394_s1 + $0x1764] sm:$0xf]  ;;  %v9266_v56 = vld [vmem:[%s15394_s1 + $0x1770] sm:$0xf0]  ;;  %v9093_v8 = vor.u32 %v10114_v53, %v9090_v43  ;;  %v6393_v24 = vor.u32 %v9441_v61, %v6392_v59  ;;  %v9465_v53 = vld [vmem:[%s15394_s1 + $0x1b4] sm:$0xf0] }
 0x185   :  { %5403 = vmatpush.bf16.msrb.mxu2 %v8997_v25  ;;  %v10190_v57 = vld [vmem:[%s15394_s1 + $0x1864] sm:$0xf]  ;;  %v9394_v58 = vld [vmem:[%s15394_s1 + $0x1870] sm:$0xf0]  ;;  %v9269_v10 = vor.u32 %v10158_v55, %v9266_v56  ;;  %v6489_v61 = vor.u32 %v9465_v53, %v6488_v52  ;;  %v6328_v31 = vld [vmem:[%s15394_s1 + $0x68] sm:$0xf] }
 0x186   :  { %5416 = vmatpush.bf16.msrb.mxu3 %v9125_v29  ;;  %v9397_v11 = vor.u32 %v10190_v57, %v9394_v58  ;;  %v10154_v25 = vld [vmem:[%s15394_s1 + $0x1744] sm:$0xf]  ;;  %v9250_v27 = vld [vmem:[%s15394_s1 + $0x1750] sm:$0xf0]  ;;  %v6521_v29 = vor.u32 %v9473_v32, %v6520_v3  ;;  %v6472_v3 = vld [vmem:[%s15394_s1 + $0x188] sm:$0xf] }
 0x187   :  { %5426 = vmatpush.bf16.msra.mxu0 %v9301_v30  ;;  %v10186_v28 = vld [vmem:[%s15394_s1 + $0x1844] sm:$0xf]  ;;  %v9378_v30 = vld [vmem:[%s15394_s1 + $0x1850] sm:$0xf0]  ;;  %v9253_v37 = vor.u32 %v10154_v25, %v9250_v27  ;;  %v9461_v32 = vld [vmem:[%s15394_s1 + $0x194] sm:$0xf0] }
 0x188   :  { %5391 = vmatpush.bf16.msrb.mxu1 %v8853_v39  ;;  %v9381_v38 = vor.u32 %v10186_v28, %v9378_v30  ;;  %v6377_v39 = vor.u32 %v9437_v33, %v6376_v23  ;;  %v9234_v41 = vld [vmem:[%s15394_s1 + $0x1730] sm:$0xf0]  ;;  %v10182_v42 = vld [vmem:[%s15394_s1 + $0x1824] sm:$0xf]  ;;  %v9537_v25 = vld [vmem:[%s15394_s1 + $0x3f4] sm:$0xf0]  ;;  %v6473_v23 = vor.u32 %v9461_v32, %v6472_v3 }
 0x189   :  { %5404 = vmatpush.bf16.msrb.mxu2 %v8981_v40  ;;  %v10150_v40 = vld [vmem:[%s15394_s1 + $0x1724] sm:$0xf]  ;;  %v9362_v45 = vld [vmem:[%s15394_s1 + $0x1830] sm:$0xf0]  ;;  %v9425_v35 = vld [vmem:[%s15394_s1 + $0x74] sm:$0xf0] }
 0x18a   :  { %5417 = vmatpush.bf16.msrb.mxu3 %v9109_v50  ;;  %v6360_v50 = vld [vmem:[%s15394_s1 + $0xa8] sm:$0xf]  ;;  %v9237_v43 = vor.u32 %v10150_v40, %v9234_v41  ;;  %v10146_v54 = vld [vmem:[%s15394_s1 + $0x1704] sm:$0xf]  ;;  %v9365_v55 = vor.u32 %v10182_v42, %v9362_v45  ;;  %v9218_v57 = vld [vmem:[%s15394_s1 + $0x1710] sm:$0xf0]  ;;  %v6329_v42 = vor.u32 %v9425_v35, %v6328_v31 }
 0x18b   :  { %5427 = vmatpush.bf16.msra.mxu0 %v9285_v51  ;;  %v9433_v51 = vld [vmem:[%s15394_s1 + $0xb4] sm:$0xf0]  ;;  %v10178_v58 = vld [vmem:[%s15394_s1 + $0x1804] sm:$0xf]  ;;  %v9346_v59 = vld [vmem:[%s15394_s1 + $0x1810] sm:$0xf0] }
 0x18c   :  { %5392 = vmatpush.bf16.msrb.mxu1 %v8837_v62  ;;  %v6361_v56 = vor.u32 %v9433_v51, %v6360_v50  ;;  %v6344_v62 = vld [vmem:[%s15394_s1 + $0x88] sm:$0xf]  ;;  %v5186_v27 = vpop.f32.mrf.mxu1  ;;  %v9349_v28 = vor.u32 %v10178_v58, %v9346_v59  ;;  %v9533_v41 = vld [vmem:[%s15394_s1 + $0x3d4] sm:$0xf0] }
 0x18d   :  { %5405 = vmatpush.bf16.msrb.mxu2 %v8965_v63  ;;  %v9429_v63 = vld [vmem:[%s15394_s1 + $0x94] sm:$0xf0]  ;;  %v5187_v30 = vadd.f32 %v5186_v27, %v12682_v44  ;;  %v6456_v36 = vld [vmem:[%s15394_s1 + $0x168] sm:$0xf] }
 0x18e   :  { %5418 = vmatpush.bf16.msrb.mxu3 %v9093_v8  ;;  %v6648_v8 = vld [vmem:[%s15394_s1 + $0x2e8] sm:$0xf]  ;;  %v9457_v44 = vld [vmem:[%s15394_s1 + $0x174] sm:$0xf0] }
 0x18f   :  { %5428 = vmatpush.bf16.msra.mxu0 %v9269_v10  ;;  %5393 = vmatmul.bf16.vlgmr.msrb.gmra.mxu1 %v11411_v4  ;;  %v9505_v10 = vld [vmem:[%s15394_s1 + $0x2f4] sm:$0xf0]  ;;  %v6760_v40 = vld [vmem:[%s15394_s1 + $0x3c8] sm:$0xf]  ;;  %v6457_v45 = vor.u32 %v9457_v44, %v6456_v36 }
 0x190   :  { %5441 = vmatpush.bf16.msra.mxu1 %v9397_v11  ;;  %5406 = vmatmul.bf16.vlgmr.msrb.gmra.mxu2 %v11415_v6  ;;  %v9221_v11 = vor.u32 %v10146_v54, %v9218_v57  ;;  %v6649_v33 = vor.u32 %v9505_v10, %v6648_v8  ;;  %v6312_v51 = vld [vmem:[%s15394_s1 + $0x48] sm:$0xf]  ;;  %v9421_v52 = vld [vmem:[%s15394_s1 + $0x54] sm:$0xf0] }
 0x191   :  { %5450 = vmatpush.bf16.msra.mxu2 %v6393_v24  ;;  %5419 = vmatmul.bf16.vlgmr.msrb.gmra.mxu3 %v11413_v5  ;;  %v6776_v24 = vld [vmem:[%s15394_s1 + $0x3e8] sm:$0xf]  ;;  %v9497_v58 = vld [vmem:[%s15394_s1 + $0x2b4] sm:$0xf0]  ;;  %v6313_v3 = vor.u32 %v9421_v52, %v6312_v51 }
 0x192   :  { %5463 = vmatpush.bf16.msra.mxu3 %v6521_v29  ;;  %v6345_v29 = vor.u32 %v9429_v63, %v6344_v62  ;;  %v6440_v53 = vld [vmem:[%s15394_s1 + $0x148] sm:$0xf]  ;;  %v9449_v27 = vld [vmem:[%s15394_s1 + $0x134] sm:$0xf0] }
 0x193   :  { %5429 = vmatpush.bf16.msra.mxu0 %v9253_v37  ;;  %v6777_v37 = vor.u32 %v9537_v25, %v6776_v24  ;;  %v6616_v57 = vld [vmem:[%s15394_s1 + $0x2a8] sm:$0xf]  ;;  %v9525_v31 = vld [vmem:[%s15394_s1 + $0x394] sm:$0xf0] }
 0x194   :  { %5442 = vmatpush.bf16.msra.mxu1 %v9381_v38  ;;  %v6632_v38 = vld [vmem:[%s15394_s1 + $0x2c8] sm:$0xf]  ;;  %v5212_v54 = vpop.f32.mrf.mxu3  ;;  %v5188_v63 = vpop.f32.mrf.mxu1  ;;  %v6617_v8 = vor.u32 %v9497_v58, %v6616_v57  ;;  %v9489_v51 = vld [vmem:[%s15394_s1 + $0x274] sm:$0xf0] }
 0x195   :  { %5451 = vmatpush.bf16.msra.mxu2 %v6377_v39  ;;  %v9501_v39 = vld [vmem:[%s15394_s1 + $0x2d4] sm:$0xf0]  ;;  %v6744_v59 = vld [vmem:[%s15394_s1 + $0x3a8] sm:$0xf] }
 0x196   :  { %5464 = vmatpush.bf16.msra.mxu3 %v6505_v34  ;;  %v5199_v34 = vpop.f32.mrf.mxu2  ;;  %v6633_v50 = vor.u32 %v9501_v39, %v6632_v38  ;;  %v6296_v10 = vld [vmem:[%s15394_s1 + $0x28] sm:$0xf]  ;;  %v9601_v57 = vld [vmem:[%s15394_s1 + $0x5f4] sm:$0xf0] }
 0x197   :  { %5430 = vmatpush.bf16.msra.mxu0 %v9237_v43  ;;  %v5200_v43 = vadd.f32 %v5199_v34, %v5187_v30  ;;  %v6424_v24 = vld [vmem:[%s15394_s1 + $0x128] sm:$0xf]  ;;  %v10197_v30 = vld [vmem:[#allocation1] sm:$0xff] }
 0x198   :  { %5443 = vmatpush.bf16.msra.mxu1 %v9365_v55  ;;  %v6761_v55 = vor.u32 %v9533_v41, %v6760_v40  ;;  %v6425_v38 = vor.u32 %v9449_v27, %v6424_v24  ;;  %v9413_v40 = vld [vmem:[%s15394_s1 + $0x14] sm:$0xf0]  ;;  %v6408_v41 = vld [vmem:[%s15394_s1 + $0x108] sm:$0xf] }
 0x199   :  { %5452 = vmatpush.bf16.msra.mxu2 %v6361_v56  ;;  %v9453_v56 = vld [vmem:[%s15394_s1 + $0x154] sm:$0xf0]  ;;  %v5213_v62 = vadd.f32 %v5212_v54, %v5200_v43  ;;  %v6712_v52 = vld [vmem:[%s15394_s1 + $0x368] sm:$0xf] }
 0x19a   :  { %5465 = vmatpush.bf16.msra.mxu3 %v6489_v61  ;;  %v9529_v61 = vld [vmem:[%s15394_s1 + $0x3b4] sm:$0xf0]  ;;  %v6441_v32 = vor.u32 %v9453_v56, %v6440_v53  ;;  %v6904_v43 = vld [vmem:[%s15394_s1 + $0x4e8] sm:$0xf] }
 0x19b   :  { %5431 = vmatpush.bf16.msra.mxu0 %v9221_v11  ;;  %v9417_v11 = vld [vmem:[%s15394_s1 + $0x34] sm:$0xf0]  ;;  %v6745_v25 = vor.u32 %v9529_v61, %v6744_v59  ;;  %v7032_v56 = vld [vmem:[%s15394_s1 + $0x5e8] sm:$0xf] }
 0x19c   :  { %5444 = vmatpush.bf16.msra.mxu1 %v9349_v28  ;;  %v6600_v28 = vld [vmem:[%s15394_s1 + $0x288] sm:$0xf]  ;;  %v6297_v35 = vor.u32 %v9417_v11, %v6296_v10  ;;  %v5214_v34 = vpop.f32.mrf.mxu3  ;;  %v9521_v53 = vld [vmem:[%s15394_s1 + $0x374] sm:$0xf0] }
 0x19d   :  { %5453 = vmatpush.bf16.msra.mxu2 %v6345_v29  ;;  %v9493_v29 = vld [vmem:[%s15394_s1 + $0x294] sm:$0xf0]  ;;  %v6713_v61 = vor.u32 %v9521_v53, %v6712_v52  ;;  %v6568_v63 = vld [vmem:[%s15394_s1 + $0x248] sm:$0xf] }
 0x19e   :  { %5466 = vmatpush.bf16.msra.mxu3 %v6473_v23  ;;  %5432 = vmatmul.bf16.vlgmr.msra.gmra.mxu0 %v11417_v7  ;;  %v5225_v23 = vpop.f32.mrf.mxu0  ;;  %v5201_v44 = vpop.f32.mrf.mxu2  ;;  %v6601_v39 = vor.u32 %v9493_v29, %v6600_v28  ;;  %v9569_v54 = vld [vmem:[%s15394_s1 + $0x4f4] sm:$0xf0]  ;;  %v6888_v11 = vld [vmem:[%s15394_s1 + $0x4c8] sm:$0xf] }
 0x19f   :  { %5476 = vmatpush.bf16.msrb.mxu0 %v6649_v33  ;;  %9407 = vmatmul.msk.bf16.vlgmr.msra.gmra.mxu1 %vm4797_vm0, %v10197_v30  ;;  %v6728_v33 = vld [vmem:[%s15394_s1 + $0x388] sm:$0xf]  ;;  %v12879_v36 = vadd.f32 %v5225_v23, %v5213_v62  ;;  %v6905_v62 = vor.u32 %v9569_v54, %v6904_v43  ;;  %v9517_v10 = vld [vmem:[%s15394_s1 + $0x354] sm:$0xf0] }
 0x1a0   :  { %5489 = vmatpush.bf16.msrb.mxu1 %v6777_v37  ;;  %v6280_v37 = vld [vmem:[%s15394_s1 + $0x8] sm:$0xf]  ;;  %v9565_v24 = vld [vmem:[%s15394_s1 + $0x4d4] sm:$0xf0] }
 0x1a1   :  { %5454 = vmatpush.bf16.msra.mxu2 %v6329_v42  ;;  %v9445_v42 = vld [vmem:[%s15394_s1 + $0x114] sm:$0xf0]  ;;  %v7016_v27 = vld [vmem:[%s15394_s1 + $0x5c8] sm:$0xf]  ;;  %v6889_v23 = vor.u32 %v9565_v24, %v6888_v11 }
 0x1a2   :  { %5467 = vmatpush.bf16.msra.mxu3 %v6457_v45  ;;  %v6729_v45 = vor.u32 %v9525_v31, %v6728_v33  ;;  %v6409_v58 = vor.u32 %v9445_v42, %v6408_v41  ;;  %v9597_v28 = vld [vmem:[%s15394_s1 + $0x5d4] sm:$0xf0]  ;;  %v6552_v33 = vld [vmem:[%s15394_s1 + $0x228] sm:$0xf] }
 0x1a3   :  { %5477 = vmatpush.bf16.msrb.mxu0 %v6633_v50  ;;  %v6584_v50 = vld [vmem:[%s15394_s1 + $0x268] sm:$0xf]  ;;  %v9481_v31 = vld [vmem:[%s15394_s1 + $0x234] sm:$0xf0] }
 0x1a4   :  { %5490 = vmatpush.bf16.msrb.mxu1 %v6761_v55  ;;  %v6281_v55 = vor.u32 %v9413_v40, %v6280_v37  ;;  %v6585_v59 = vor.u32 %v9489_v51, %v6584_v50  ;;  %v7017_v37 = vor.u32 %v9597_v28, %v7016_v27  ;;  %v9513_v44 = vld [vmem:[%s15394_s1 + $0x334] sm:$0xf0]  ;;  %v7000_v40 = vld [vmem:[%s15394_s1 + $0x5a8] sm:$0xf]  ;;  %v6553_v42 = vor.u32 %v9481_v31, %v6552_v33 }
 0x1a5   :  { %5455 = vmatpush.bf16.msra.mxu2 %v6313_v3  ;;  %v9485_v3 = vld [vmem:[%s15394_s1 + $0x254] sm:$0xf0]  ;;  %v6536_v34 = vld [vmem:[%s15394_s1 + $0x208] sm:$0xf] }
 0x1a6   :  { %5468 = vmatpush.bf16.msra.mxu3 %v6441_v32  ;;  %v6696_v32 = vld [vmem:[%s15394_s1 + $0x348] sm:$0xf]  ;;  %v6569_v29 = vor.u32 %v9485_v3, %v6568_v63  ;;  %v9593_v41 = vld [vmem:[%s15394_s1 + $0x5b4] sm:$0xf0] }
 0x1a7   :  { %5478 = vmatpush.bf16.msrb.mxu0 %v6617_v8  ;;  %v7033_v8 = vor.u32 %v9601_v57, %v7032_v56  ;;  %v6697_v30 = vor.u32 %v9517_v10, %v6696_v32  ;;  %v9477_v51 = vld [vmem:[%s15394_s1 + $0x214] sm:$0xf0]  ;;  %v6664_v52 = vld [vmem:[%s15394_s1 + $0x308] sm:$0xf]  ;;  %v7001_v43 = vor.u32 %v9593_v41, %v7000_v40 }
 0x1a8   :  { %5491 = vmatpush.bf16.msrb.mxu1 %v6745_v25  ;;  %v5227_v25 = vpop.f32.mrf.mxu0  ;;  %v9509_v53 = vld [vmem:[%s15394_s1 + $0x314] sm:$0xf0]  ;;  %v6856_v54 = vld [vmem:[%s15394_s1 + $0x488] sm:$0xf]  ;;  %v6537_v63 = vor.u32 %v9477_v51, %v6536_v34 }
 0x1a9   :  { %5456 = vmatpush.bf16.msra.mxu2 %v6297_v35  ;;  %v6680_v35 = vld [vmem:[%s15394_s1 + $0x328] sm:$0xf]  ;;  %v9665_v32 = vld [vmem:[%s15394_s1 + $0x7f4] sm:$0xf0] }
 0x1aa   :  { %5469 = vmatpush.bf16.msra.mxu3 %v6425_v38  ;;  %v6872_v38 = vld [vmem:[%s15394_s1 + $0x4a8] sm:$0xf]  ;;  %v9553_v25 = vld [vmem:[%s15394_s1 + $0x474] sm:$0xf0] }
 0x1ab   :  { %5479 = vmatpush.bf16.msrb.mxu0 %v6601_v39  ;;  %v9561_v39 = vld [vmem:[%s15394_s1 + $0x4b4] sm:$0xf0]  ;;  %v6984_v56 = vld [vmem:[%s15394_s1 + $0x588] sm:$0xf] }
 0x1ac   :  { %5492 = vmatpush.bf16.msrb.mxu1 %v6729_v45  ;;  %v6681_v45 = vor.u32 %v9513_v44, %v6680_v35  ;;  %v6873_v50 = vor.u32 %v9561_v39, %v6872_v38  ;;  %v5238_v57 = vpop.f32.mrf.mxu1  ;;  %v7288_v3 = vld [vmem:[%s15394_s1 + $0x7e8] sm:$0xf]  ;;  %v9661_v31 = vld [vmem:[%s15394_s1 + $0x7d4] sm:$0xf0] }
 0x1ad   :  { %5457 = vmatpush.bf16.msra.mxu2 %v6281_v55  ;;  %v9557_v55 = vld [vmem:[%s15394_s1 + $0x494] sm:$0xf0]  ;;  %v6968_v27 = vld [vmem:[%s15394_s1 + $0x568] sm:$0xf]  ;;  %v7289_v28 = vor.u32 %v9665_v32, %v7288_v3 }
 0x1ae   :  { %5470 = vmatpush.bf16.msra.mxu3 %v6409_v58  ;;  %v9589_v58 = vld [vmem:[%s15394_s1 + $0x594] sm:$0xf0]  ;;  %v6857_v10 = vor.u32 %v9557_v55, %v6856_v54  ;;  %v7272_v33 = vld [vmem:[%s15394_s1 + $0x7c8] sm:$0xf] }
 0x1af   :  { %5480 = vmatpush.bf16.msrb.mxu0 %v6585_v59  ;;  %v7160_v59 = vld [vmem:[%s15394_s1 + $0x6e8] sm:$0xf]  ;;  %v6985_v11 = vor.u32 %v9589_v58, %v6984_v56  ;;  %v9549_v41 = vld [vmem:[%s15394_s1 + $0x454] sm:$0xf0] }
 0x1b0   :  { %5493 = vmatpush.bf16.msrb.mxu1 %v6713_v61  ;;  %5458 = vmatmul.bf16.vlgmr.msra.gmra.mxu2 %v10564_v21  ;;  %v9633_v61 = vld [vmem:[%s15394_s1 + $0x6f4] sm:$0xf0]  ;;  %v6824_v40 = vld [vmem:[%s15394_s1 + $0x448] sm:$0xf] }
 0x1b1   :  { %5502 = vmatpush.bf16.msrb.mxu2 %v6905_v62  ;;  %5471 = vmatmul.bf16.vlgmr.msra.gmra.mxu3 %v10575_v26  ;;  %v5239_v62 = vadd.f32 %v5238_v57, %v12879_v36  ;;  %v7161_v24 = vor.u32 %v9633_v61, %v7160_v59  ;;  %v6840_v36 = vld [vmem:[%s15394_s1 + $0x468] sm:$0xf]  ;;  %v9657_v54 = vld [vmem:[%s15394_s1 + $0x7b4] sm:$0xf0]  ;;  %v6825_v56 = vor.u32 %v9549_v41, %v6824_v40 }
 0x1b2   :  { %5515 = vmatpush.bf16.msrb.mxu3 %v7033_v8  ;;  %v6665_v8 = vor.u32 %v9509_v53, %v6664_v52  ;;  %v6841_v35 = vor.u32 %v9553_v25, %v6840_v36  ;;  %v7128_v51 = vld [vmem:[%s15394_s1 + $0x6a8] sm:$0xf]  ;;  %v9625_v52 = vld [vmem:[%s15394_s1 + $0x6b4] sm:$0xf0] }
 0x1b3   :  { %5481 = vmatpush.bf16.msrb.mxu0 %v6569_v29  ;;  %v9585_v29 = vld [vmem:[%s15394_s1 + $0x574] sm:$0xf0]  ;;  %v5251_v44 = vpop.f32.mrf.mxu2  ;;  %v7129_v58 = vor.u32 %v9625_v52, %v7128_v51  ;;  %v6808_v59 = vld [vmem:[%s15394_s1 + $0x428] sm:$0xf] }
 0x1b4   :  { %5494 = vmatpush.bf16.msrb.mxu1 %v6697_v30  ;;  %v7144_v30 = vld [vmem:[%s15394_s1 + $0x6c8] sm:$0xf]  ;;  %v5264_v39 = vpop.f32.mrf.mxu3  ;;  %v5252_v34 = vadd.f32 %v5251_v44, %v5239_v62  ;;  %v5240_v53 = vpop.f32.mrf.mxu1  ;;  %v9545_v61 = vld [vmem:[%s15394_s1 + $0x434] sm:$0xf0] }
 0x1b5   :  { %5503 = vmatpush.bf16.msrb.mxu2 %v6889_v23  ;;  %v9629_v23 = vld [vmem:[%s15394_s1 + $0x6d4] sm:$0xf0]  ;;  %v6936_v62 = vld [vmem:[%s15394_s1 + $0x528] sm:$0xf]  ;;  %v6809_v25 = vor.u32 %v9545_v61, %v6808_v59 }
 0x1b6   :  { %5516 = vmatpush.bf16.msrb.mxu3 %v7017_v37  ;;  %v6969_v37 = vor.u32 %v9585_v29, %v6968_v27  ;;  %v7145_v38 = vor.u32 %v9629_v23, %v7144_v30  ;;  %v5265_v55 = vadd.f32 %v5264_v39, %v5252_v34  ;;  %v9577_v3 = vld [vmem:[%s15394_s1 + $0x534] sm:$0xf0]  ;;  %v7112_v32 = vld [vmem:[%s15394_s1 + $0x688] sm:$0xf] }
 0x1b7   :  { %5482 = vmatpush.bf16.msrb.mxu0 %v6553_v42  ;;  %v6952_v42 = vld [vmem:[%s15394_s1 + $0x548] sm:$0xf]  ;;  %v9541_v30 = vld [vmem:[%s15394_s1 + $0x414] sm:$0xf0] }
 0x1b8   :  { %5495 = vmatpush.bf16.msrb.mxu1 %v6681_v45  ;;  %v7273_v45 = vor.u32 %v9661_v31, %v7272_v33  ;;  %v6792_v27 = vld [vmem:[%s15394_s1 + $0x408] sm:$0xf]  ;;  %v9573_v33 = vld [vmem:[%s15394_s1 + $0x514] sm:$0xf0] }
 0x1b9   :  { %5504 = vmatpush.bf16.msrb.mxu2 %v6873_v50  ;;  %v9581_v50 = vld [vmem:[%s15394_s1 + $0x554] sm:$0xf0]  ;;  %v6920_v23 = vld [vmem:[%s15394_s1 + $0x508] sm:$0xf]  ;;  %v6793_v34 = vor.u32 %v9541_v30, %v6792_v27 }
 0x1ba   :  { %5517 = vmatpush.bf16.msrb.mxu3 %v7001_v43  ;;  %v7256_v43 = vld [vmem:[%s15394_s1 + $0x7a8] sm:$0xf]  ;;  %v6953_v57 = vor.u32 %v9581_v50, %v6952_v42  ;;  %v9649_v40 = vld [vmem:[%s15394_s1 + $0x774] sm:$0xf0]  ;;  %v6921_v51 = vor.u32 %v9573_v33, %v6920_v23 }
 0x1bb   :  { %5483 = vmatpush.bf16.msrb.mxu0 %v6537_v63  ;;  %v7257_v63 = vor.u32 %v9657_v54, %v7256_v43  ;;  %v5253_v31 = vpop.f32.mrf.mxu2  ;;  %v7096_v44 = vld [vmem:[%s15394_s1 + $0x668] sm:$0xf]  ;;  %v9697_v42 = vld [vmem:[%s15394_s1 + $0x8f4] sm:$0xf0] }
 0x1bc   :  { %5496 = vmatpush.bf16.msrb.mxu1 %v6665_v8  ;;  %v9621_v8 = vld [vmem:[%s15394_s1 + $0x694] sm:$0xf0]  ;;  %v7224_v39 = vld [vmem:[%s15394_s1 + $0x768] sm:$0xf] }
 0x1bd   :  { %5505 = vmatpush.bf16.msrb.mxu2 %v6857_v10  ;;  %v5277_v10 = vpop.f32.mrf.mxu0  ;;  %v7113_v29 = vor.u32 %v9621_v8, %v7112_v32  ;;  %v7416_v41 = vld [vmem:[%s15394_s1 + $0x8e8] sm:$0xf]  ;;  %v9729_v50 = vld [vmem:[%s15394_s1 + $0x9f4] sm:$0xf0]  ;;  %v7225_v53 = vor.u32 %v9649_v40, %v7224_v39 }
 0x1be   :  { %5518 = vmatpush.bf16.msrb.mxu3 %v6985_v11  ;;  %5484 = vmatmul.bf16.vlgmr.msrb.gmra.mxu0 %v10562_v20  ;;  %v7240_v11 = vld [vmem:[%s15394_s1 + $0x788] sm:$0xf]  ;;  %v13078_v36 = vadd.f32 %v5277_v10, %v5265_v55  ;;  %v7417_v43 = vor.u32 %v9697_v42, %v7416_v41  ;;  %v9613_v55 = vld [vmem:[%s15394_s1 + $0x654] sm:$0xf0] }
 0x1bf   :  { %5528 = vmatpush.bf16.msra.mxu0 %v7161_v24  ;;  %5497 = vmatmul.bf16.vlgmr.msrb.gmra.mxu1 %v10566_v22  ;;  %v9653_v24 = vld [vmem:[%s15394_s1 + $0x794] sm:$0xf0]  ;;  %v7080_v54 = vld [vmem:[%s15394_s1 + $0x648] sm:$0xf] }
 0x1c0   :  { %5541 = vmatpush.bf16.msra.mxu1 %v7289_v28  ;;  %v6937_v28 = vor.u32 %v9577_v3, %v6936_v62  ;;  %v7400_v59 = vld [vmem:[%s15394_s1 + $0x8c8] sm:$0xf]  ;;  %v9693_v61 = vld [vmem:[%s15394_s1 + $0x8d4] sm:$0xf0]  ;;  %v7081_v32 = vor.u32 %v9613_v55, %v7080_v54 }
 0x1c1   :  { %5506 = vmatpush.bf16.msrb.mxu2 %v6841_v35  ;;  %v5266_v35 = vpop.f32.mrf.mxu3  ;;  %v9725_v3 = vld [vmem:[%s15394_s1 + $0x9d4] sm:$0xf0]  ;;  %v7401_v10 = vor.u32 %v9693_v61, %v7400_v59  ;;  %v7512_v23 = vld [vmem:[%s15394_s1 + $0x9a8] sm:$0xf] }
 0x1c2   :  { %5519 = vmatpush.bf16.msrb.mxu3 %v6969_v37  ;;  %v7241_v37 = vor.u32 %v9653_v24, %v7240_v11  ;;  %v7064_v11 = vld [vmem:[%s15394_s1 + $0x628] sm:$0xf]  ;;  %v9609_v24 = vld [vmem:[%s15394_s1 + $0x634] sm:$0xf0] }
 0x1c3   :  { %5529 = vmatpush.bf16.msra.mxu0 %v7145_v38  ;;  %v9617_v38 = vld [vmem:[%s15394_s1 + $0x674] sm:$0xf0]  ;;  %v7065_v31 = vor.u32 %v9609_v24, %v7064_v11  ;;  %v7048_v35 = vld [vmem:[%s15394_s1 + $0x608] sm:$0xf] }
 0x1c4   :  { %5542 = vmatpush.bf16.msra.mxu1 %v7273_v45  ;;  %v7544_v45 = vld [vmem:[%s15394_s1 + $0x9e8] sm:$0xf]  ;;  %v7097_v52 = vor.u32 %v9617_v38, %v7096_v44  ;;  %v9689_v30 = vld [vmem:[%s15394_s1 + $0x8b4] sm:$0xf0] }
 0x1c5   :  { %5507 = vmatpush.bf16.msrb.mxu2 %v6825_v56  ;;  %v7208_v56 = vld [vmem:[%s15394_s1 + $0x748] sm:$0xf]  ;;  %v5279_v62 = vpop.f32.mrf.mxu0  ;;  %v9721_v33 = vld [vmem:[%s15394_s1 + $0x9b4] sm:$0xf0] }
 0x1c6   :  { %5520 = vmatpush.bf16.msrb.mxu3 %v6953_v57  ;;  %v7545_v57 = vor.u32 %v9729_v50, %v7544_v45  ;;  %v9605_v38 = vld [vmem:[%s15394_s1 + $0x614] sm:$0xf0]  ;;  %v7176_v39 = vld [vmem:[%s15394_s1 + $0x708] sm:$0xf]  ;;  %v7513_v41 = vor.u32 %v9721_v33, %v7512_v23 }
 0x1c7   :  { %5530 = vmatpush.bf16.msra.mxu0 %v7129_v58  ;;  %v9645_v58 = vld [vmem:[%s15394_s1 + $0x754] sm:$0xf0]  ;;  %v7368_v42 = vld [vmem:[%s15394_s1 + $0x888] sm:$0xf]  ;;  %v7049_v54 = vor.u32 %v9605_v38, %v7048_v35 }
 0x1c8   :  { %5543 = vmatpush.bf16.msra.mxu1 %v7257_v63  ;;  %v7528_v63 = vld [vmem:[%s15394_s1 + $0x9c8] sm:$0xf]  ;;  %v7209_v8 = vor.u32 %v9645_v58, %v7208_v56  ;;  %v9637_v40 = vld [vmem:[%s15394_s1 + $0x714] sm:$0xf0] }
 0x1c9   :  { %5508 = vmatpush.bf16.msrb.mxu2 %v6809_v25  ;;  %v7192_v25 = vld [vmem:[%s15394_s1 + $0x728] sm:$0xf]  ;;  %v7529_v27 = vor.u32 %v9725_v3, %v7528_v63  ;;  %v9793_v56 = vld [vmem:[%s15394_s1 + $0xbf4] sm:$0xf0] }
 0x1ca   :  { %5521 = vmatpush.bf16.msrb.mxu3 %v6937_v28  ;;  %v9641_v28 = vld [vmem:[%s15394_s1 + $0x734] sm:$0xf0]  ;;  %v7496_v45 = vld [vmem:[%s15394_s1 + $0x988] sm:$0xf] }
 0x1cb   :  { %5531 = vmatpush.bf16.msra.mxu0 %v7113_v29  ;;  %v7384_v29 = vld [vmem:[%s15394_s1 + $0x8a8] sm:$0xf]  ;;  %v9681_v62 = vld [vmem:[%s15394_s1 + $0x874] sm:$0xf0] }
 0x1cc   :  { %5544 = vmatpush.bf16.msra.mxu1 %v7241_v37  ;;  %v7193_v37 = vor.u32 %v9641_v28, %v7192_v25  ;;  %v7385_v44 = vor.u32 %v9689_v30, %v7384_v29  ;;  %v5290_v50 = vpop.f32.mrf.mxu1  ;;  %v7800_v55 = vld [vmem:[%s15394_s1 + $0xbe8] sm:$0xf]  ;;  %v9789_v24 = vld [vmem:[%s15394_s1 + $0xbd4] sm:$0xf0] }
 0x1cd   :  { %5509 = vmatpush.bf16.msrb.mxu2 %v6793_v34  ;;  %v9685_v34 = vld [vmem:[%s15394_s1 + $0x894] sm:$0xf0]  ;;  %v7480_v63 = vld [vmem:[%s15394_s1 + $0x968] sm:$0xf]  ;;  %v7801_v3 = vor.u32 %v9793_v56, %v7800_v55 }
 0x1ce   :  { %5522 = vmatpush.bf16.msrb.mxu3 %v6921_v51  ;;  %v9717_v51 = vld [vmem:[%s15394_s1 + $0x994] sm:$0xf0]  ;;  %v7369_v58 = vor.u32 %v9685_v34, %v7368_v42  ;;  %v7784_v11 = vld [vmem:[%s15394_s1 + $0xbc8] sm:$0xf] }
 0x1cf   :  { %5532 = vmatpush.bf16.msra.mxu0 %v7097_v52  ;;  %v7672_v52 = vld [vmem:[%s15394_s1 + $0xae8] sm:$0xf]  ;;  %v7497_v59 = vor.u32 %v9717_v51, %v7496_v45  ;;  %v9677_v33 = vld [vmem:[%s15394_s1 + $0x854] sm:$0xf0] }
 0x1d0   :  { %5545 = vmatpush.bf16.msra.mxu1 %v7225_v53  ;;  %5510 = vmatmul.bf16.vlgmr.msrb.gmra.mxu2 %v10657_v0  ;;  %v9761_v53 = vld [vmem:[%s15394_s1 + $0xaf4] sm:$0xf0]  ;;  %v7336_v23 = vld [vmem:[%s15394_s1 + $0x848] sm:$0xf] }
 0x1d1   :  { %5554 = vmatpush.bf16.msra.mxu2 %v7417_v43  ;;  %5523 = vmatmul.bf16.vlgmr.msrb.gmra.mxu3 %v10661_v2  ;;  %v5291_v43 = vadd.f32 %v5290_v50, %v13078_v36  ;;  %v7673_v61 = vor.u32 %v9761_v53, %v7672_v52  ;;  %v7352_v36 = vld [vmem:[%s15394_s1 + $0x868] sm:$0xf]  ;;  %v9785_v42 = vld [vmem:[%s15394_s1 + $0xbb4] sm:$0xf0]  ;;  %v7337_v45 = vor.u32 %v9677_v33, %v7336_v23 }
 0x1d2   :  { %5567 = vmatpush.bf16.msra.mxu3 %v7545_v57  ;;  %v7177_v57 = vor.u32 %v9637_v40, %v7176_v39  ;;  %v7353_v25 = vor.u32 %v9681_v62, %v7352_v36  ;;  %v7640_v38 = vld [vmem:[%s15394_s1 + $0xaa8] sm:$0xf]  ;;  %v9753_v39 = vld [vmem:[%s15394_s1 + $0xab4] sm:$0xf0] }
 0x1d3   :  { %5533 = vmatpush.bf16.msra.mxu0 %v7081_v32  ;;  %v9713_v32 = vld [vmem:[%s15394_s1 + $0x974] sm:$0xf0]  ;;  %v5303_v28 = vpop.f32.mrf.mxu2  ;;  %v7641_v51 = vor.u32 %v9753_v39, %v7640_v38  ;;  %v7320_v52 = vld [vmem:[%s15394_s1 + $0x828] sm:$0xf] }
 0x1d4   :  { %5546 = vmatpush.bf16.msra.mxu1 %v7209_v8  ;;  %v7656_v8 = vld [vmem:[%s15394_s1 + $0xac8] sm:$0xf]  ;;  %v5316_v30 = vpop.f32.mrf.mxu3  ;;  %v5304_v35 = vadd.f32 %v5303_v28, %v5291_v43  ;;  %v5292_v40 = vpop.f32.mrf.mxu1  ;;  %v9673_v53 = vld [vmem:[%s15394_s1 + $0x834] sm:$0xf0] }
 0x1d5   :  { %5555 = vmatpush.bf16.msra.mxu2 %v7401_v10  ;;  %v9757_v10 = vld [vmem:[%s15394_s1 + $0xad4] sm:$0xf0]  ;;  %v7448_v43 = vld [vmem:[%s15394_s1 + $0x928] sm:$0xf]  ;;  %v7321_v62 = vor.u32 %v9673_v53, %v7320_v52 }
 0x1d6   :  { %5568 = vmatpush.bf16.msra.mxu3 %v7529_v27  ;;  %v7481_v27 = vor.u32 %v9713_v32, %v7480_v63  ;;  %v7657_v29 = vor.u32 %v9757_v10, %v7656_v8  ;;  %v5317_v34 = vadd.f32 %v5316_v30, %v5304_v35  ;;  %v9705_v55 = vld [vmem:[%s15394_s1 + $0x934] sm:$0xf0]  ;;  %v7624_v56 = vld [vmem:[%s15394_s1 + $0xa88] sm:$0xf] }
 0x1d7   :  { %5534 = vmatpush.bf16.msra.mxu0 %v7065_v31  ;;  %v7464_v31 = vld [vmem:[%s15394_s1 + $0x948] sm:$0xf]  ;;  %v9669_v8 = vld [vmem:[%s15394_s1 + $0x814] sm:$0xf0] }
 0x1d8   :  { %5547 = vmatpush.bf16.msra.mxu1 %v7193_v37  ;;  %v7785_v37 = vor.u32 %v9789_v24, %v7784_v11  ;;  %v7304_v63 = vld [vmem:[%s15394_s1 + $0x808] sm:$0xf]  ;;  %v9701_v11 = vld [vmem:[%s15394_s1 + $0x914] sm:$0xf0] }
 0x1d9   :  { %5556 = vmatpush.bf16.msra.mxu2 %v7385_v44  ;;  %v9709_v44 = vld [vmem:[%s15394_s1 + $0x954] sm:$0xf0]  ;;  %v7432_v10 = vld [vmem:[%s15394_s1 + $0x908] sm:$0xf]  ;;  %v7305_v35 = vor.u32 %v9669_v8, %v7304_v63 }
 0x1da   :  { %5569 = vmatpush.bf16.msra.mxu3 %v7513_v41  ;;  %v7768_v41 = vld [vmem:[%s15394_s1 + $0xba8] sm:$0xf]  ;;  %v7465_v50 = vor.u32 %v9709_v44, %v7464_v31  ;;  %v9777_v23 = vld [vmem:[%s15394_s1 + $0xb74] sm:$0xf0]  ;;  %v7433_v38 = vor.u32 %v9701_v11, %v7432_v10 }
 0x1db   :  { %5535 = vmatpush.bf16.msra.mxu0 %v7049_v54  ;;  %v7769_v54 = vor.u32 %v9785_v42, %v7768_v41  ;;  %v5305_v24 = vpop.f32.mrf.mxu2  ;;  %v7608_v28 = vld [vmem:[%s15394_s1 + $0xa68] sm:$0xf]  ;;  %v9825_v31 = vld [vmem:[%s15394_s1 + $0xcf4] sm:$0xf0] }
 0x1dc   :  { %5548 = vmatpush.bf16.msra.mxu1 %v7177_v57  ;;  %v9749_v57 = vld [vmem:[%s15394_s1 + $0xa94] sm:$0xf0]  ;;  %v7736_v30 = vld [vmem:[%s15394_s1 + $0xb68] sm:$0xf] }
 0x1dd   :  { %5557 = vmatpush.bf16.msra.mxu2 %v7369_v58  ;;  %v5329_v58 = vpop.f32.mrf.mxu0  ;;  %v7625_v32 = vor.u32 %v9749_v57, %v7624_v56  ;;  %v7928_v33 = vld [vmem:[%s15394_s1 + $0xce8] sm:$0xf]  ;;  %v9857_v44 = vld [vmem:[%s15394_s1 + $0xdf4] sm:$0xf0]  ;;  %v7737_v40 = vor.u32 %v9777_v23, %v7736_v30 }
 0x1de   :  { %5570 = vmatpush.bf16.msra.mxu3 %v7497_v59  ;;  %5536 = vmatmul.bf16.vlgmr.msra.gmra.mxu0 %v10652_v60  ;;  %v7752_v59 = vld [vmem:[%s15394_s1 + $0xb88] sm:$0xf]  ;;  %v13277_v36 = vadd.f32 %v5329_v58, %v5317_v34  ;;  %v7929_v41 = vor.u32 %v9825_v31, %v7928_v33  ;;  %v9741_v34 = vld [vmem:[%s15394_s1 + $0xa54] sm:$0xf0] }
 0x1df   :  { %5580 = vmatpush.bf16.msrb.mxu0 %v7673_v61  ;;  %5549 = vmatmul.bf16.vlgmr.msra.gmra.mxu1 %v10659_v1  ;;  %v9781_v61 = vld [vmem:[%s15394_s1 + $0xb94] sm:$0xf0]  ;;  %v7592_v42 = vld [vmem:[%s15394_s1 + $0xa48] sm:$0xf] }
 0x1e0   :  { %5593 = vmatpush.bf16.msrb.mxu1 %v7801_v3  ;;  %v7449_v3 = vor.u32 %v9705_v55, %v7448_v43  ;;  %v7912_v52 = vld [vmem:[%s15394_s1 + $0xcc8] sm:$0xf]  ;;  %v9821_v53 = vld [vmem:[%s15394_s1 + $0xcd4] sm:$0xf0]  ;;  %v7593_v56 = vor.u32 %v9741_v34, %v7592_v42 }
 0x1e1   :  { %5558 = vmatpush.bf16.msra.mxu2 %v7353_v25  ;;  %v5318_v25 = vpop.f32.mrf.mxu3  ;;  %v9853_v55 = vld [vmem:[%s15394_s1 + $0xdd4] sm:$0xf0]  ;;  %v7913_v58 = vor.u32 %v9821_v53, %v7912_v52  ;;  %v8024_v10 = vld [vmem:[%s15394_s1 + $0xda8] sm:$0xf] }
 0x1e2   :  { %5571 = vmatpush.bf16.msra.mxu3 %v7481_v27  ;;  %v7753_v27 = vor.u32 %v9781_v61, %v7752_v59  ;;  %v7576_v59 = vld [vmem:[%s15394_s1 + $0xa28] sm:$0xf]  ;;  %v9737_v61 = vld [vmem:[%s15394_s1 + $0xa34] sm:$0xf0] }
 0x1e3   :  { %5581 = vmatpush.bf16.msrb.mxu0 %v7657_v29  ;;  %v9745_v29 = vld [vmem:[%s15394_s1 + $0xa74] sm:$0xf0]  ;;  %v7577_v24 = vor.u32 %v9737_v61, %v7576_v59  ;;  %v7560_v25 = vld [vmem:[%s15394_s1 + $0xa08] sm:$0xf] }
 0x1e4   :  { %5594 = vmatpush.bf16.msrb.mxu1 %v7785_v37  ;;  %v8056_v37 = vld [vmem:[%s15394_s1 + $0xde8] sm:$0xf]  ;;  %v7609_v39 = vor.u32 %v9745_v29, %v7608_v28  ;;  %v9817_v8 = vld [vmem:[%s15394_s1 + $0xcb4] sm:$0xf0] }
 0x1e5   :  { %5559 = vmatpush.bf16.msra.mxu2 %v7337_v45  ;;  %v7720_v45 = vld [vmem:[%s15394_s1 + $0xb48] sm:$0xf]  ;;  %v5331_v43 = vpop.f32.mrf.mxu0  ;;  %v9849_v11 = vld [vmem:[%s15394_s1 + $0xdb4] sm:$0xf0] }
 0x1e6   :  { %5572 = vmatpush.bf16.msra.mxu3 %v7465_v50  ;;  %v8057_v50 = vor.u32 %v9857_v44, %v8056_v37  ;;  %v9733_v29 = vld [vmem:[%s15394_s1 + $0xa14] sm:$0xf0]  ;;  %v7688_v30 = vld [vmem:[%s15394_s1 + $0xb08] sm:$0xf]  ;;  %v8025_v33 = vor.u32 %v9849_v11, %v8024_v10 }
 0x1e7   :  { %5582 = vmatpush.bf16.msrb.mxu0 %v7641_v51  ;;  %v9773_v51 = vld [vmem:[%s15394_s1 + $0xb54] sm:$0xf0]  ;;  %v7880_v31 = vld [vmem:[%s15394_s1 + $0xc88] sm:$0xf]  ;;  %v7561_v42 = vor.u32 %v9733_v29, %v7560_v25 }
 0x1e8   :  { %5595 = vmatpush.bf16.msrb.mxu1 %v7769_v54  ;;  %v8040_v54 = vld [vmem:[%s15394_s1 + $0xdc8] sm:$0xf]  ;;  %v7721_v57 = vor.u32 %v9773_v51, %v7720_v45  ;;  %v9765_v23 = vld [vmem:[%s15394_s1 + $0xb14] sm:$0xf0] }
 0x1e9   :  { %5560 = vmatpush.bf16.msra.mxu2 %v7321_v62  ;;  %v7704_v62 = vld [vmem:[%s15394_s1 + $0xb28] sm:$0xf]  ;;  %v8041_v63 = vor.u32 %v9853_v55, %v8040_v54  ;;  %v9921_v45 = vld [vmem:[%s15394_s1 + $0xff4] sm:$0xf0] }
 0x1ea   :  { %5573 = vmatpush.bf16.msra.mxu3 %v7449_v3  ;;  %v9769_v3 = vld [vmem:[%s15394_s1 + $0xb34] sm:$0xf0]  ;;  %v8008_v37 = vld [vmem:[%s15394_s1 + $0xd88] sm:$0xf] }
 0x1eb   :  { %5583 = vmatpush.bf16.msrb.mxu0 %v7625_v32  ;;  %v7896_v32 = vld [vmem:[%s15394_s1 + $0xca8] sm:$0xf]  ;;  %v9809_v43 = vld [vmem:[%s15394_s1 + $0xc74] sm:$0xf0] }
 0x1ec   :  { %5596 = vmatpush.bf16.msrb.mxu1 %v7753_v27  ;;  %v7705_v27 = vor.u32 %v9769_v3, %v7704_v62  ;;  %v7897_v28 = vor.u32 %v9817_v8, %v7896_v32  ;;  %v5342_v44 = vpop.f32.mrf.mxu1  ;;  %v8312_v34 = vld [vmem:[%s15394_s1 + $0xfe8] sm:$0xf]  ;;  %v9917_v61 = vld [vmem:[%s15394_s1 + $0xfd4] sm:$0xf0] }
 0x1ed   :  { %5561 = vmatpush.bf16.msra.mxu2 %v7305_v35  ;;  %v9813_v35 = vld [vmem:[%s15394_s1 + $0xc94] sm:$0xf0]  ;;  %v7992_v54 = vld [vmem:[%s15394_s1 + $0xd68] sm:$0xf]  ;;  %v8313_v55 = vor.u32 %v9921_v45, %v8312_v34 }
 0x1ee   :  { %5574 = vmatpush.bf16.msra.mxu3 %v7433_v38  ;;  %v9845_v38 = vld [vmem:[%s15394_s1 + $0xd94] sm:$0xf0]  ;;  %v7881_v51 = vor.u32 %v9813_v35, %v7880_v31  ;;  %v8296_v59 = vld [vmem:[%s15394_s1 + $0xfc8] sm:$0xf] }
 0x1ef   :  { %5584 = vmatpush.bf16.msrb.mxu0 %v7609_v39  ;;  %v8184_v39 = vld [vmem:[%s15394_s1 + $0xee8] sm:$0xf]  ;;  %v8009_v52 = vor.u32 %v9845_v38, %v8008_v37  ;;  %v9805_v11 = vld [vmem:[%s15394_s1 + $0xc54] sm:$0xf0] }
 0x1f0   :  { %5597 = vmatpush.bf16.msrb.mxu1 %v7737_v40  ;;  %5562 = vmatmul.bf16.vlgmr.msra.gmra.mxu2 %v10907_v12  ;;  %v9889_v40 = vld [vmem:[%s15394_s1 + $0xef4] sm:$0xf0]  ;;  %v7848_v10 = vld [vmem:[%s15394_s1 + $0xc48] sm:$0xf] }
 0x1f1   :  { %5606 = vmatpush.bf16.msrb.mxu2 %v7929_v41  ;;  %5575 = vmatmul.bf16.vlgmr.msra.gmra.mxu3 %v10917_v16  ;;  %v5343_v41 = vadd.f32 %v5342_v44, %v13277_v36  ;;  %v8185_v53 = vor.u32 %v9889_v40, %v8184_v39  ;;  %v7864_v36 = vld [vmem:[%s15394_s1 + $0xc68] sm:$0xf]  ;;  %v9913_v31 = vld [vmem:[%s15394_s1 + $0xfb4] sm:$0xf0]  ;;  %v7849_v37 = vor.u32 %v9805_v11, %v7848_v10 }
 0x1f2   :  { %5619 = vmatpush.bf16.msrb.mxu3 %v8057_v50  ;;  %v7689_v50 = vor.u32 %v9765_v23, %v7688_v30  ;;  %v7865_v62 = vor.u32 %v9809_v43, %v7864_v36  ;;  %v8152_v29 = vld [vmem:[%s15394_s1 + $0xea8] sm:$0xf]  ;;  %v9881_v30 = vld [vmem:[%s15394_s1 + $0xeb4] sm:$0xf0] }
 0x1f3   :  { %5585 = vmatpush.bf16.msrb.mxu0 %v7593_v56  ;;  %v9841_v56 = vld [vmem:[%s15394_s1 + $0xd74] sm:$0xf0]  ;;  %v5355_v3 = vpop.f32.mrf.mxu2  ;;  %v8153_v38 = vor.u32 %v9881_v30, %v8152_v29  ;;  %v7832_v39 = vld [vmem:[%s15394_s1 + $0xc28] sm:$0xf] }
 0x1f4   :  { %5598 = vmatpush.bf16.msrb.mxu1 %v7721_v57  ;;  %v8168_v57 = vld [vmem:[%s15394_s1 + $0xec8] sm:$0xf]  ;;  %v5368_v8 = vpop.f32.mrf.mxu3  ;;  %v5356_v25 = vadd.f32 %v5355_v3, %v5343_v41  ;;  %v5344_v23 = vpop.f32.mrf.mxu1  ;;  %v9801_v40 = vld [vmem:[%s15394_s1 + $0xc34] sm:$0xf0] }
 0x1f5   :  { %5607 = vmatpush.bf16.msrb.mxu2 %v7913_v58  ;;  %v9885_v58 = vld [vmem:[%s15394_s1 + $0xed4] sm:$0xf0]  ;;  %v7960_v41 = vld [vmem:[%s15394_s1 + $0xd28] sm:$0xf]  ;;  %v7833_v43 = vor.u32 %v9801_v40, %v7832_v39 }
 0x1f6   :  { %5620 = vmatpush.bf16.msrb.mxu3 %v8041_v63  ;;  %v7993_v63 = vor.u32 %v9841_v56, %v7992_v54  ;;  %v8169_v32 = vor.u32 %v9885_v58, %v8168_v57  ;;  %v5369_v35 = vadd.f32 %v5368_v8, %v5356_v25  ;;  %v9833_v34 = vld [vmem:[%s15394_s1 + $0xd34] sm:$0xf0]  ;;  %v8136_v45 = vld [vmem:[%s15394_s1 + $0xe88] sm:$0xf] }
 0x1f7   :  { %5586 = vmatpush.bf16.msrb.mxu0 %v7577_v24  ;;  %v7976_v24 = vld [vmem:[%s15394_s1 + $0xd48] sm:$0xf]  ;;  %v9797_v57 = vld [vmem:[%s15394_s1 + $0xc14] sm:$0xf0] }
 0x1f8   :  { %5599 = vmatpush.bf16.msrb.mxu1 %v7705_v27  ;;  %v8297_v27 = vor.u32 %v9917_v61, %v8296_v59  ;;  %v7816_v54 = vld [vmem:[%s15394_s1 + $0xc08] sm:$0xf]  ;;  %v9829_v59 = vld [vmem:[%s15394_s1 + $0xd14] sm:$0xf0] }
 0x1f9   :  { %5608 = vmatpush.bf16.msrb.mxu2 %v7897_v28  ;;  %v9837_v28 = vld [vmem:[%s15394_s1 + $0xd54] sm:$0xf0]  ;;  %v7944_v58 = vld [vmem:[%s15394_s1 + $0xd08] sm:$0xf]  ;;  %v7817_v25 = vor.u32 %v9797_v57, %v7816_v54 }
 0x1fa   :  { %5621 = vmatpush.bf16.msrb.mxu3 %v8025_v33  ;;  %v8280_v33 = vld [vmem:[%s15394_s1 + $0xfa8] sm:$0xf]  ;;  %v7977_v44 = vor.u32 %v9837_v28, %v7976_v24  ;;  %v9905_v10 = vld [vmem:[%s15394_s1 + $0xf74] sm:$0xf0]  ;;  %v7945_v29 = vor.u32 %v9829_v59, %v7944_v58 }
 0x1fb   :  { %5587 = vmatpush.bf16.msrb.mxu0 %v7561_v42  ;;  %v8281_v42 = vor.u32 %v9913_v31, %v8280_v33  ;;  %v5357_v61 = vpop.f32.mrf.mxu2  ;;  %v8120_v3 = vld [vmem:[%s15394_s1 + $0xe68] sm:$0xf]  ;;  %v9953_v24 = vld [vmem:[%s15394_s1 + $0x10f4] sm:$0xf0] }
 0x1fc   :  { %5600 = vmatpush.bf16.msrb.mxu1 %v7689_v50  ;;  %v9877_v50 = vld [vmem:[%s15394_s1 + $0xe94] sm:$0xf0]  ;;  %v8248_v8 = vld [vmem:[%s15394_s1 + $0xf68] sm:$0xf] }
 0x1fd   :  { %5609 = vmatpush.bf16.msrb.mxu2 %v7881_v51  ;;  %v5381_v51 = vpop.f32.mrf.mxu0  ;;  %v8137_v56 = vor.u32 %v9877_v50, %v8136_v45  ;;  %v8440_v11 = vld [vmem:[%s15394_s1 + $0x10e8] sm:$0xf]  ;;  %v9985_v28 = vld [vmem:[%s15394_s1 + $0x11f4] sm:$0xf0]  ;;  %v8249_v23 = vor.u32 %v9905_v10, %v8248_v8 }
 0x1fe   :  { %5622 = vmatpush.bf16.msrb.mxu3 %v8009_v52  ;;  %5588 = vmatmul.bf16.vlgmr.msrb.gmra.mxu0 %v10915_v15  ;;  %v8264_v52 = vld [vmem:[%s15394_s1 + $0xf88] sm:$0xf]  ;;  %v13476_v36 = vadd.f32 %v5381_v51, %v5369_v35  ;;  %v8441_v33 = vor.u32 %v9953_v24, %v8440_v11  ;;  %v9869_v35 = vld [vmem:[%s15394_s1 + $0xe54] sm:$0xf0] }
 0x1ff   :  { %5632 = vmatpush.bf16.msra.mxu0 %v8185_v53  ;;  %5601 = vmatmul.bf16.vlgmr.msrb.gmra.mxu1 %v10919_v17  ;;  %v9909_v53 = vld [vmem:[%s15394_s1 + $0xf94] sm:$0xf0]  ;;  %v8104_v31 = vld [vmem:[%s15394_s1 + $0xe48] sm:$0xf] }
 0x200   :  { %5645 = vmatpush.bf16.msra.mxu1 %v8313_v55  ;;  %v7961_v55 = vor.u32 %v9833_v34, %v7960_v41  ;;  %v8424_v39 = vld [vmem:[%s15394_s1 + $0x10c8] sm:$0xf]  ;;  %v9949_v40 = vld [vmem:[%s15394_s1 + $0x10d4] sm:$0xf0]  ;;  %v8105_v45 = vor.u32 %v9869_v35, %v8104_v31 }
 0x201   :  { %5610 = vmatpush.bf16.msrb.mxu2 %v7865_v62  ;;  %v5370_v62 = vpop.f32.mrf.mxu3  ;;  %v9981_v34 = vld [vmem:[%s15394_s1 + $0x11d4] sm:$0xf0]  ;;  %v8425_v51 = vor.u32 %v9949_v40, %v8424_v39  ;;  %v8536_v58 = vld [vmem:[%s15394_s1 + $0x11a8] sm:$0xf] }
 0x202   :  { %5623 = vmatpush.bf16.msrb.mxu3 %v7993_v63  ;;  %v8265_v63 = vor.u32 %v9909_v53, %v8264_v52  ;;  %v8088_v52 = vld [vmem:[%s15394_s1 + $0xe28] sm:$0xf]  ;;  %v9865_v53 = vld [vmem:[%s15394_s1 + $0xe34] sm:$0xf0] }
 0x203   :  { %5633 = vmatpush.bf16.msra.mxu0 %v8169_v32  ;;  %v9873_v32 = vld [vmem:[%s15394_s1 + $0xe74] sm:$0xf0]  ;;  %v8089_v61 = vor.u32 %v9865_v53, %v8088_v52  ;;  %v8072_v62 = vld [vmem:[%s15394_s1 + $0xe08] sm:$0xf] }
 0x204   :  { %5646 = vmatpush.bf16.msra.mxu1 %v8297_v27  ;;  %v8568_v27 = vld [vmem:[%s15394_s1 + $0x11e8] sm:$0xf]  ;;  %v8121_v30 = vor.u32 %v9873_v32, %v8120_v3  ;;  %v9945_v57 = vld [vmem:[%s15394_s1 + $0x10b4] sm:$0xf0] }
 0x205   :  { %5611 = vmatpush.bf16.msrb.mxu2 %v7849_v37  ;;  %v8232_v37 = vld [vmem:[%s15394_s1 + $0xf48] sm:$0xf]  ;;  %v5383_v41 = vpop.f32.mrf.mxu0  ;;  %v9977_v59 = vld [vmem:[%s15394_s1 + $0x11b4] sm:$0xf0] }
 0x206   :  { %5624 = vmatpush.bf16.msrb.mxu3 %v7977_v44  ;;  %v8569_v44 = vor.u32 %v9985_v28, %v8568_v27  ;;  %v9861_v32 = vld [vmem:[%s15394_s1 + $0xe14] sm:$0xf0]  ;;  %v8200_v8 = vld [vmem:[%s15394_s1 + $0xf08] sm:$0xf]  ;;  %v8537_v11 = vor.u32 %v9977_v59, %v8536_v58 }
 0x207   :  { %5634 = vmatpush.bf16.msra.mxu0 %v8153_v38  ;;  %v9901_v38 = vld [vmem:[%s15394_s1 + $0xf54] sm:$0xf0]  ;;  %v8392_v24 = vld [vmem:[%s15394_s1 + $0x1088] sm:$0xf]  ;;  %v8073_v31 = vor.u32 %v9861_v32, %v8072_v62 }
 0x208   :  { %5647 = vmatpush.bf16.msra.mxu1 %v8281_v42  ;;  %v8552_v42 = vld [vmem:[%s15394_s1 + $0x11c8] sm:$0xf]  ;;  %v8233_v50 = vor.u32 %v9901_v38, %v8232_v37  ;;  %v9893_v10 = vld [vmem:[%s15394_s1 + $0xf14] sm:$0xf0] }
 0x209   :  { %5612 = vmatpush.bf16.msrb.mxu2 %v7833_v43  ;;  %v8216_v43 = vld [vmem:[%s15394_s1 + $0xf28] sm:$0xf]  ;;  %v8553_v54 = vor.u32 %v9981_v34, %v8552_v42  ;;  %v10049_v37 = vld [vmem:[%s15394_s1 + $0x13f4] sm:$0xf0] }
 0x20a   :  { %5625 = vmatpush.bf16.msrb.mxu3 %v7961_v55  ;;  %v9897_v55 = vld [vmem:[%s15394_s1 + $0xf34] sm:$0xf0]  ;;  %v8520_v27 = vld [vmem:[%s15394_s1 + $0x1188] sm:$0xf] }
 0x20b   :  { %5635 = vmatpush.bf16.msra.mxu0 %v8137_v56  ;;  %v8408_v56 = vld [vmem:[%s15394_s1 + $0x10a8] sm:$0xf]  ;;  %v9937_v41 = vld [vmem:[%s15394_s1 + $0x1074] sm:$0xf0] }
 0x20c   :  { %5648 = vmatpush.bf16.msra.mxu1 %v8265_v63  ;;  %v8217_v63 = vor.u32 %v9897_v55, %v8216_v43  ;;  %v8409_v3 = vor.u32 %v9945_v57, %v8408_v56  ;;  %v5394_v28 = vpop.f32.mrf.mxu1  ;;  %v8824_v35 = vld [vmem:[%s15394_s1 + $0x13e8] sm:$0xf]  ;;  %v10045_v53 = vld [vmem:[%s15394_s1 + $0x13d4] sm:$0xf0] }
 0x20d   :  { %5613 = vmatpush.bf16.msrb.mxu2 %v7817_v25  ;;  %v9941_v25 = vld [vmem:[%s15394_s1 + $0x1094] sm:$0xf0]  ;;  %v8504_v42 = vld [vmem:[%s15394_s1 + $0x1168] sm:$0xf]  ;;  %v8825_v34 = vor.u32 %v10049_v37, %v8824_v35 }
 0x20e   :  { %5626 = vmatpush.bf16.msrb.mxu3 %v7945_v29  ;;  %v9973_v29 = vld [vmem:[%s15394_s1 + $0x1194] sm:$0xf0]  ;;  %v8393_v38 = vor.u32 %v9941_v25, %v8392_v24  ;;  %v8808_v52 = vld [vmem:[%s15394_s1 + $0x13c8] sm:$0xf] }
 0x20f   :  { %5636 = vmatpush.bf16.msra.mxu0 %v8121_v30  ;;  %v8696_v30 = vld [vmem:[%s15394_s1 + $0x12e8] sm:$0xf]  ;;  %v8521_v39 = vor.u32 %v9973_v29, %v8520_v27  ;;  %v9933_v59 = vld [vmem:[%s15394_s1 + $0x1054] sm:$0xf0] }
 0x210   :  { %5649 = vmatpush.bf16.msra.mxu1 %v8249_v23  ;;  %5614 = vmatmul.bf16.vlgmr.msrb.gmra.mxu2 %v11081_v46  ;;  %v10017_v23 = vld [vmem:[%s15394_s1 + $0x12f4] sm:$0xf0]  ;;  %v8360_v58 = vld [vmem:[%s15394_s1 + $0x1048] sm:$0xf] }
 0x211   :  { %5658 = vmatpush.bf16.msra.mxu2 %v8441_v33  ;;  %5627 = vmatmul.bf16.vlgmr.msrb.gmra.mxu3 %v11085_v48  ;;  %v5395_v33 = vadd.f32 %v5394_v28, %v13476_v36  ;;  %v8697_v40 = vor.u32 %v10017_v23, %v8696_v30  ;;  %v8376_v36 = vld [vmem:[%s15394_s1 + $0x1068] sm:$0xf]  ;;  %v9965_v32 = vld [vmem:[%s15394_s1 + $0x1154] sm:$0xf0]  ;;  %v8361_v27 = vor.u32 %v9933_v59, %v8360_v58 }
 0x212   :  { %5671 = vmatpush.bf16.msra.mxu3 %v8569_v44  ;;  %v8201_v44 = vor.u32 %v9893_v10, %v8200_v8  ;;  %v8377_v43 = vor.u32 %v9937_v41, %v8376_v36  ;;  %v8664_v8 = vld [vmem:[%s15394_s1 + $0x12a8] sm:$0xf]  ;;  %v10009_v10 = vld [vmem:[%s15394_s1 + $0x12b4] sm:$0xf0] }
 0x213   :  { %5637 = vmatpush.bf16.msra.mxu0 %v8105_v45  ;;  %v9969_v45 = vld [vmem:[%s15394_s1 + $0x1174] sm:$0xf0]  ;;  %v5407_v55 = vpop.f32.mrf.mxu2  ;;  %v8665_v29 = vor.u32 %v10009_v10, %v8664_v8  ;;  %v8344_v30 = vld [vmem:[%s15394_s1 + $0x1028] sm:$0xf] }
 0x214   :  { %5650 = vmatpush.bf16.msra.mxu1 %v8233_v50  ;;  %v8680_v50 = vld [vmem:[%s15394_s1 + $0x12c8] sm:$0xf]  ;;  %v5420_v57 = vpop.f32.mrf.mxu3  ;;  %v5408_v62 = vadd.f32 %v5407_v55, %v5395_v33  ;;  %v10041_v24 = vld [vmem:[%s15394_s1 + $0x13b4] sm:$0xf0] }
 0x215   :  { %5659 = vmatpush.bf16.msra.mxu2 %v8425_v51  ;;  %v10013_v51 = vld [vmem:[%s15394_s1 + $0x12d4] sm:$0xf0]  ;;  %v8472_v33 = vld [vmem:[%s15394_s1 + $0x1128] sm:$0xf] }
 0x216   :  { %5672 = vmatpush.bf16.msra.mxu3 %v8553_v54  ;;  %v8505_v54 = vor.u32 %v9969_v45, %v8504_v42  ;;  %v8681_v56 = vor.u32 %v10013_v51, %v8680_v50  ;;  %v5421_v25 = vadd.f32 %v5420_v57, %v5408_v62  ;;  %v9929_v23 = vld [vmem:[%s15394_s1 + $0x1034] sm:$0xf0]  ;;  %v8648_v37 = vld [vmem:[%s15394_s1 + $0x1288] sm:$0xf] }
 0x217   :  { %5638 = vmatpush.bf16.msra.mxu0 %v8089_v61  ;;  %v8488_v61 = vld [vmem:[%s15394_s1 + $0x1148] sm:$0xf]  ;;  %v9961_v35 = vld [vmem:[%s15394_s1 + $0x1134] sm:$0xf0]  ;;  %v8345_v41 = vor.u32 %v9929_v23, %v8344_v30 }
 0x218   :  { %5651 = vmatpush.bf16.msra.mxu1 %v8217_v63  ;;  %v8809_v63 = vor.u32 %v10045_v53, %v8808_v52  ;;  %v8489_v28 = vor.u32 %v9965_v32, %v8488_v61  ;;  %v8328_v42 = vld [vmem:[%s15394_s1 + $0x1008] sm:$0xf]  ;;  %v9925_v50 = vld [vmem:[%s15394_s1 + $0x1014] sm:$0xf0] }
 0x219   :  { %5660 = vmatpush.bf16.msra.mxu2 %v8409_v3  ;;  %v5396_v3 = vpop.f32.mrf.mxu1  ;;  %v8456_v51 = vld [vmem:[%s15394_s1 + $0x1108] sm:$0xf]  ;;  %v9957_v52 = vld [vmem:[%s15394_s1 + $0x1114] sm:$0xf0] }
 0x21a   :  { %5673 = vmatpush.bf16.msra.mxu3 %v8537_v11  ;;  %v8792_v11 = vld [vmem:[%s15394_s1 + $0x13a8] sm:$0xf]  ;;  %v10033_v58 = vld [vmem:[%s15394_s1 + $0x1374] sm:$0xf0]  ;;  %v8457_v10 = vor.u32 %v9957_v52, %v8456_v51 }
 0x21b   :  { %5639 = vmatpush.bf16.msra.mxu0 %v8073_v31  ;;  %v8793_v31 = vor.u32 %v10041_v24, %v8792_v11  ;;  %v8632_v55 = vld [vmem:[%s15394_s1 + $0x1268] sm:$0xf]  ;;  %v10081_v61 = vld [vmem:[%s15394_s1 + $0x14f4] sm:$0xf0] }
 0x21c   :  { %5652 = vmatpush.bf16.msra.mxu1 %v8201_v44  ;;  %v10005_v44 = vld [vmem:[%s15394_s1 + $0x1294] sm:$0xf0]  ;;  %v5422_v53 = vpop.f32.mrf.mxu3  ;;  %v8760_v57 = vld [vmem:[%s15394_s1 + $0x1368] sm:$0xf] }
 0x21d   :  { %5661 = vmatpush.bf16.msra.mxu2 %v8393_v38  ;;  %v5433_v38 = vpop.f32.mrf.mxu0  ;;  %v8649_v45 = vor.u32 %v10005_v44, %v8648_v37  ;;  %v8952_v59 = vld [vmem:[%s15394_s1 + $0x14e8] sm:$0xf]  ;;  %v10113_v32 = vld [vmem:[%s15394_s1 + $0x15f4] sm:$0xf0]  ;;  %v8761_v24 = vor.u32 %v10033_v58, %v8760_v57 }
 0x21e   :  { %5674 = vmatpush.bf16.msra.mxu3 %v8521_v39  ;;  %5640 = vmatmul.bf16.vlgmr.msra.gmra.mxu0 %v11083_v47  ;;  %v8776_v39 = vld [vmem:[%s15394_s1 + $0x1388] sm:$0xf]  ;;  %v5434_v36 = vadd.f32 %v5433_v38, %v5421_v25  ;;  %v8953_v25 = vor.u32 %v10081_v61, %v8952_v59  ;;  %v10029_v23 = vld [vmem:[%s15394_s1 + $0x1354] sm:$0xf0] }
 0x21f   :  { %5684 = vmatpush.bf16.msrb.mxu0 %v8697_v40  ;;  %5653 = vmatmul.bf16.vlgmr.msra.gmra.mxu1 %v11087_v49  ;;  %v10037_v40 = vld [vmem:[%s15394_s1 + $0x1394] sm:$0xf0]  ;;  %v9080_v3 = vld [vmem:[%s15394_s1 + $0x15e8] sm:$0xf] }
 0x220   :  { %5697 = vmatpush.bf16.msrb.mxu1 %v8825_v34  ;;  %v8473_v34 = vor.u32 %v9961_v35, %v8472_v33  ;;  %v9081_v30 = vor.u32 %v10113_v32, %v9080_v3  ;;  %v8936_v33 = vld [vmem:[%s15394_s1 + $0x14c8] sm:$0xf]  ;;  %v10109_v44 = vld [vmem:[%s15394_s1 + $0x15d4] sm:$0xf0] }
 0x221   :  { %5662 = vmatpush.bf16.msra.mxu2 %v8377_v43  ;;  %v5409_v43 = vpop.f32.mrf.mxu2  ;;  %v5446_v62 = vpop.f32.mrf.mxu1  ;;  %v9064_v37 = vld [vmem:[%s15394_s1 + $0x15c8] sm:$0xf]  ;;  %v10073_v51 = vld [vmem:[%s15394_s1 + $0x14b4] sm:$0xf0] }
 0x222   :  { %5675 = vmatpush.bf16.msra.mxu3 %v8505_v54  ;;  %v8777_v54 = vor.u32 %v10037_v40, %v8776_v39  ;;  %v13711_v8 = vadd.f32 %v5446_v62, %v5434_v36  ;;  %v8600_v36 = vld [vmem:[%s15394_s1 + $0x1228] sm:$0xf]  ;;  %v10105_v53 = vld [vmem:[%s15394_s1 + $0x15b4] sm:$0xf0] }
 0x223   :  { %5685 = vmatpush.bf16.msrb.mxu0 %v8681_v56  ;;  %v10001_v56 = vld [vmem:[%s15394_s1 + $0x1274] sm:$0xf0]  ;;  %v9048_v52 = vld [vmem:[%s15394_s1 + $0x15a8] sm:$0xf] }
 0x224   :  { %5698 = vmatpush.bf16.msrb.mxu1 %v8809_v63  ;;  %v8329_v63 = vor.u32 %v9925_v50, %v8328_v42  ;;  %v8633_v11 = vor.u32 %v10001_v56, %v8632_v55  ;;  %v8728_v42 = vld [vmem:[%s15394_s1 + $0x1328] sm:$0xf]  ;;  %v9989_v58 = vld [vmem:[%s15394_s1 + $0x1214] sm:$0xf0]  ;;  %v9049_v62 = vor.u32 %v10105_v53, %v9048_v52 }
 0x225   :  { %5663 = vmatpush.bf16.msra.mxu2 %v8361_v27  ;;  %v8616_v27 = vld [vmem:[%s15394_s1 + $0x1248] sm:$0xf]  ;;  %v5435_v35 = vpop.f32.mrf.mxu0  ;;  %v10021_v61 = vld [vmem:[%s15394_s1 + $0x1314] sm:$0xf0] }
 0x226   :  { %5676 = vmatpush.bf16.msra.mxu3 %v8489_v28  ;;  %v9997_v28 = vld [vmem:[%s15394_s1 + $0x1254] sm:$0xf0]  ;;  %v8920_v50 = vld [vmem:[%s15394_s1 + $0x14a8] sm:$0xf] }
 0x227   :  { %5686 = vmatpush.bf16.msrb.mxu0 %v8665_v29  ;;  %v8744_v29 = vld [vmem:[%s15394_s1 + $0x1348] sm:$0xf]  ;;  %v8617_v38 = vor.u32 %v9997_v28, %v8616_v27  ;;  %v8921_v57 = vor.u32 %v10073_v51, %v8920_v50  ;;  %v10069_v3 = vld [vmem:[%s15394_s1 + $0x1494] sm:$0xf0] }
 0x228   :  { %5699 = vmatpush.bf16.msrb.mxu1 %v8793_v31  ;;  %v10077_v31 = vld [vmem:[%s15394_s1 + $0x14d4] sm:$0xf0]  ;;  %v8745_v39 = vor.u32 %v10029_v23, %v8744_v29  ;;  %v8584_v55 = vld [vmem:[%s15394_s1 + $0x1208] sm:$0xf] }
 0x229   :  { %5664 = vmatpush.bf16.msra.mxu2 %v8345_v41  ;;  %v8937_v40 = vor.u32 %v10077_v31, %v8936_v33  ;;  %v9993_v41 = vld [vmem:[%s15394_s1 + $0x1234] sm:$0xf0]  ;;  %v5448_v43 = vpop.f32.mrf.mxu1  ;;  %v8712_v59 = vld [vmem:[%s15394_s1 + $0x1308] sm:$0xf] }
 0x22a   :  { %5677 = vmatpush.bf16.msra.mxu3 %v8473_v34  ;;  %v9065_v34 = vor.u32 %v10109_v44, %v9064_v37  ;;  %v9032_v32 = vld [vmem:[%s15394_s1 + $0x1588] sm:$0xf]  ;;  %v10177_v28 = vld [vmem:[%s15394_s1 + $0x17f4] sm:$0xf0]  ;;  %v8713_v29 = vor.u32 %v10021_v61, %v8712_v59  ;;  %v10198_v44 = vld [vmem:[%s15395_s2] sm:$0xf] }
 0x22b   :  { %5687 = vmatpush.bf16.msrb.mxu0 %v8649_v45  ;;  %v10025_v45 = vld [vmem:[%s15394_s1 + $0x1334] sm:$0xf0]  ;;  %v9336_v27 = vld [vmem:[%s15394_s1 + $0x17e8] sm:$0xf] }
 0x22c   :  { %5700 = vmatpush.bf16.msrb.mxu1 %v8777_v54  ;;  %v8601_v54 = vor.u32 %v9993_v41, %v8600_v36  ;;  %v8729_v56 = vor.u32 %v10025_v45, %v8728_v42  ;;  %v8888_v23 = vld [vmem:[%s15394_s1 + $0x1468] sm:$0xf]  ;;  %v10065_v35 = vld [vmem:[%s15394_s1 + $0x1474] sm:$0xf0] }
 0x22d   :  { %5665 = vmatpush.bf16.msra.mxu2 %v8329_v63  ;;  %v8904_v63 = vld [vmem:[%s15394_s1 + $0x1488] sm:$0xf]  ;;  %v10141_v41 = vld [vmem:[%s15394_s1 + $0x16d4] sm:$0xf0]  ;;  %v8889_v45 = vor.u32 %v10065_v35, %v8888_v23 }
 0x22e   :  { %5678 = vmatpush.bf16.msra.mxu3 %v8457_v10  ;;  %v10101_v10 = vld [vmem:[%s15394_s1 + $0x1594] sm:$0xf0]  ;;  %v9016_v37 = vld [vmem:[%s15394_s1 + $0x1568] sm:$0xf] }
 0x22f   :  { %5688 = vmatpush.bf16.msrb.mxu0 %v8633_v11  ;;  %v9208_v11 = vld [vmem:[%s15394_s1 + $0x16e8] sm:$0xf]  ;;  %v9033_v33 = vor.u32 %v10101_v10, %v9032_v32  ;;  %v10061_v43 = vld [vmem:[%s15394_s1 + $0x1454] sm:$0xf0] }
 0x230   :  { %5701 = vmatpush.bf16.msrb.mxu1 %v8761_v24  ;;  %5666 = vmatmul.bf16.vlgmr.msra.gmra.mxu2 %v11318_v9  ;;  %v10145_v24 = vld [vmem:[%s15394_s1 + $0x16f4] sm:$0xf0]  ;;  %v9192_v36 = vld [vmem:[%s15394_s1 + $0x16c8] sm:$0xf] }
 0x231   :  { %5710 = vmatpush.bf16.msrb.mxu2 %v8953_v25  ;;  %5679 = vmatmul.bf16.vlgmr.msra.gmra.mxu3 %v11328_v14  ;;  %v8585_v25 = vor.u32 %v9989_v58, %v8584_v55  ;;  %v9209_v31 = vor.u32 %v10145_v24, %v9208_v11  ;;  %v9320_v42 = vld [vmem:[%s15394_s1 + $0x17c8] sm:$0xf]  ;;  %v9193_v52 = vor.u32 %v10141_v41, %v9192_v36  ;;  %v10093_v58 = vld [vmem:[%s15394_s1 + $0x1554] sm:$0xf0] }
 0x232   :  { %5723 = vmatpush.bf16.msrb.mxu3 %v9081_v30  ;;  %v8905_v30 = vor.u32 %v10069_v3, %v8904_v63  ;;  %v8872_v53 = vld [vmem:[%s15394_s1 + $0x1448] sm:$0xf]  ;;  %v10137_v61 = vld [vmem:[%s15394_s1 + $0x16b4] sm:$0xf0] }
 0x233   :  { %5689 = vmatpush.bf16.msrb.mxu0 %v8617_v38  ;;  %v814_v38 = vperm.slane %v10198_v44, 2  ;;  %v5459_v50 = vpop.f32.mrf.mxu2  ;;  %v9176_v59 = vld [vmem:[%s15394_s1 + $0x16a8] sm:$0xf]  ;;  %v10169_v63 = vld [vmem:[%s15394_s1 + $0x17b4] sm:$0xf0]  ;;  %v8873_v32 = vor.u32 %v10061_v43, %v8872_v53 }
 0x234   :  { %5702 = vmatpush.bf16.msrb.mxu1 %v8745_v39  ;;  %v9337_v39 = vor.u32 %v10177_v28, %v9336_v27  ;;  %v9177_v11 = vor.u32 %v10137_v61, %v9176_v59  ;;  %v8856_v24 = vld [vmem:[%s15394_s1 + $0x1428] sm:$0xf]  ;;  %v10133_v23 = vld [vmem:[%s15394_s1 + $0x1694] sm:$0xf0] }
 0x235   :  { %5711 = vmatpush.bf16.msrb.mxu2 %v8937_v40  ;;  %v10097_v40 = vld [vmem:[%s15394_s1 + $0x1574] sm:$0xf0]  ;;  %v5460_v55 = vadd.f32 %v5459_v50, %v814_v38  ;;  %v8984_v27 = vld [vmem:[%s15394_s1 + $0x1528] sm:$0xf] }
 0x236   :  { %5724 = vmatpush.bf16.msrb.mxu3 %v9065_v34  ;;  %v10173_v34 = vld [vmem:[%s15394_s1 + $0x17d4] sm:$0xf0]  ;;  %v9017_v51 = vor.u32 %v10097_v40, %v9016_v37  ;;  %v8840_v44 = vld [vmem:[%s15394_s1 + $0x1408] sm:$0xf] }
 0x237   :  { %5690 = vmatpush.bf16.msrb.mxu0 %v8601_v54  ;;  %v9000_v54 = vld [vmem:[%s15394_s1 + $0x1548] sm:$0xf]  ;;  %v10053_v41 = vld [vmem:[%s15394_s1 + $0x1414] sm:$0xf0] }
 0x238   :  { %5703 = vmatpush.bf16.msrb.mxu1 %v8729_v56  ;;  %v5472_v56 = vpop.f32.mrf.mxu3  ;;  %v9001_v10 = vor.u32 %v10093_v58, %v9000_v54  ;;  %v9272_v53 = vld [vmem:[%s15394_s1 + $0x1768] sm:$0xf]  ;;  %v10161_v43 = vld [vmem:[%s15394_s1 + $0x1774] sm:$0xf0]  ;;  %v6394_v58 = vld [vmem:[%s15394_s1 + $0xf8] sm:$0xf0] }
 0x239   :  { %5712 = vmatpush.bf16.msrb.mxu2 %v8921_v57  ;;  %v9321_v57 = vor.u32 %v10173_v34, %v9320_v42  ;;  %v13852_v3 = vadd.f32 %v5472_v56, %v5460_v55  ;;  %v8968_v42 = vld [vmem:[%s15394_s1 + $0x1508] sm:$0xf]  ;;  %v10085_v34 = vld [vmem:[%s15394_s1 + $0x1514] sm:$0xf0]  ;;  %v8841_v56 = vor.u32 %v10053_v41, %v8840_v44 }
 0x23a   :  { %5725 = vmatpush.bf16.msrb.mxu3 %v9049_v62  ;;  %v9304_v62 = vld [vmem:[%s15394_s1 + $0x17a8] sm:$0xf]  ;;  %v10193_v55 = vld [vmem:[%s15394_s1 + $0x1874] sm:$0xf0]  ;;  %v8969_v59 = vor.u32 %v10085_v34, %v8968_v42 }
 0x23b   :  { %5691 = vmatpush.bf16.msrb.mxu0 %v8585_v25  ;;  %v10057_v25 = vld [vmem:[%s15394_s1 + $0x1434] sm:$0xf0]  ;;  %v9305_v28 = vor.u32 %v10169_v63, %v9304_v62  ;;  %v13878_v35 = vpop.f32.mrf.mxu0  ;;  %v9400_v54 = vld [vmem:[%s15394_s1 + $0x1868] sm:$0xf]  ;;  %v9273_v62 = vor.u32 %v10161_v43, %v9272_v53 }
 0x23c   :  { %5704 = vmatpush.bf16.msrb.mxu1 %v8713_v29  ;;  %v10089_v29 = vld [vmem:[%s15394_s1 + $0x1534] sm:$0xf0]  ;;  %v8857_v37 = vor.u32 %v10057_v25, %v8856_v24  ;;  %v13883_v38 = vpop.f32.mrf.mxu1  ;;  %v9401_v63 = vor.u32 %v10193_v55, %v9400_v54  ;;  %v9368_v34 = vld [vmem:[%s15394_s1 + $0x1828] sm:$0xf] }
 0x23d   :  { %5713 = vmatpush.bf16.msrb.mxu2 %v8905_v30  ;;  %v9160_v30 = vld [vmem:[%s15394_s1 + $0x1688] sm:$0xf]  ;;  %v8985_v40 = vor.u32 %v10089_v29, %v8984_v27  ;;  %v10157_v25 = vld [vmem:[%s15394_s1 + $0x1754] sm:$0xf0] }
 0x23e   :  { %5726 = vmatpush.bf16.msrb.mxu3 %v9033_v33  ;;  %5692 = vmatmul.bf16.vlgmr.msrb.gmra.mxu0 %v11326_v13  ;;  %v9288_v33 = vld [vmem:[%s15394_s1 + $0x1788] sm:$0xf]  ;;  %v9161_v36 = vor.u32 %v10133_v23, %v9160_v30  ;;  %v9435_v30 = vld [vmem:[%s15394_s1 + $0xcc] sm:$0xf]  ;;  %v6378_v23 = vld [vmem:[%s15394_s1 + $0xd8] sm:$0xf0] }
 0x23f   :  { %5736 = vmatpush.bf16.msra.mxu0 %v9209_v31  ;;  %5705 = vmatmul.bf16.vlgmr.msrb.gmra.mxu1 %v11330_v18  ;;  %v10165_v31 = vld [vmem:[%s15394_s1 + $0x1794] sm:$0xf0]  ;;  %v9384_v27 = vld [vmem:[%s15394_s1 + $0x1848] sm:$0xf]  ;;  %v6381_v41 = vor.u32 %v9435_v30, %v6378_v23 }
 0x240   :  { %5749 = vmatpush.bf16.msra.mxu1 %v9337_v39  ;;  %v5461_v39 = vpop.f32.mrf.mxu2  ;;  %v9289_v50 = vor.u32 %v10165_v31, %v9288_v33  ;;  %v10153_v42 = vld [vmem:[%s15394_s1 + $0x1734] sm:$0xf0]  ;;  %v9096_v53 = vld [vmem:[%s15394_s1 + $0x1608] sm:$0xf] }
 0x241   :  { %5714 = vmatpush.bf16.msrb.mxu2 %v8889_v45  ;;  %v5474_v45 = vpop.f32.mrf.mxu3  ;;  %v9112_v39 = vld [vmem:[%s15394_s1 + $0x1628] sm:$0xf]  ;;  %v10117_v43 = vld [vmem:[%s15394_s1 + $0x1614] sm:$0xf0] }
 0x242   :  { %5727 = vmatpush.bf16.msrb.mxu3 %v9017_v51  ;;  %v9144_v51 = vld [vmem:[%s15394_s1 + $0x1668] sm:$0xf]  ;;  %v10185_v45 = vld [vmem:[%s15394_s1 + $0x1834] sm:$0xf0] }
 0x243   :  { %5737 = vmatpush.bf16.msra.mxu0 %v9193_v52  ;;  %v10129_v52 = vld [vmem:[%s15394_s1 + $0x1674] sm:$0xf0]  ;;  %v5487_v29 = vpop.f32.mrf.mxu0  ;;  %v9369_v55 = vor.u32 %v10185_v45, %v9368_v34  ;;  %v6762_v34 = vld [vmem:[%s15394_s1 + $0x3d8] sm:$0xf0] }
 0x244   :  { %5750 = vmatpush.bf16.msra.mxu1 %v9321_v57  ;;  %v9439_v57 = vld [vmem:[%s15394_s1 + $0xec] sm:$0xf]  ;;  %v9145_v61 = vor.u32 %v10129_v52, %v9144_v51  ;;  %v5500_v33 = vpop.f32.mrf.mxu1  ;;  %v6362_v51 = vld [vmem:[%s15394_s1 + $0xb8] sm:$0xf0] }
 0x245   :  { %5715 = vmatpush.bf16.msrb.mxu2 %v8873_v32  ;;  %v9128_v32 = vld [vmem:[%s15394_s1 + $0x1648] sm:$0xf]  ;;  %v6397_v24 = vor.u32 %v9439_v57, %v6394_v58  ;;  %v10149_v57 = vld [vmem:[%s15394_s1 + $0x1714] sm:$0xf0] }
 0x246   :  { %5728 = vmatpush.bf16.msrb.mxu3 %v9001_v10  ;;  %v10125_v10 = vld [vmem:[%s15394_s1 + $0x1654] sm:$0xf0]  ;;  %v9352_v58 = vld [vmem:[%s15394_s1 + $0x1808] sm:$0xf] }
 0x247   :  { %5738 = vmatpush.bf16.msra.mxu0 %v9177_v11  ;;  %v9256_v11 = vld [vmem:[%s15394_s1 + $0x1748] sm:$0xf]  ;;  %v9129_v31 = vor.u32 %v10125_v10, %v9128_v32  ;;  %v6346_v32 = vld [vmem:[%s15394_s1 + $0x98] sm:$0xf0]  ;;  %v9471_v10 = vld [vmem:[%s15394_s1 + $0x1ec] sm:$0xf] }
 0x248   :  { %5751 = vmatpush.bf16.msra.mxu1 %v9305_v28  ;;  %v10189_v28 = vld [vmem:[%s15394_s1 + $0x1854] sm:$0xf0] }
 0x249   :  { %5716 = vmatpush.bf16.msrb.mxu2 %v8857_v37  ;;  %v9257_v37 = vor.u32 %v10157_v25, %v9256_v11  ;;  %v9385_v44 = vor.u32 %v10189_v28, %v9384_v27  ;;  %v9097_v11 = vor.u32 %v10117_v43, %v9096_v53  ;;  %v9535_v25 = vld [vmem:[%s15394_s1 + $0x3ec] sm:$0xf]  ;;  %v6778_v27 = vld [vmem:[%s15394_s1 + $0x3f8] sm:$0xf0] }
 0x24a   :  { %5729 = vmatpush.bf16.msrb.mxu3 %v8985_v40  ;;  %v10121_v40 = vld [vmem:[%s15394_s1 + $0x1634] sm:$0xf0]  ;;  %v6314_v53 = vld [vmem:[%s15394_s1 + $0x58] sm:$0xf0] }
 0x24b   :  { %5739 = vmatpush.bf16.msra.mxu0 %v9161_v36  ;;  %v9240_v36 = vld [vmem:[%s15394_s1 + $0x1728] sm:$0xf]  ;;  %v9113_v52 = vor.u32 %v10121_v40, %v9112_v39  ;;  %v6781_v39 = vor.u32 %v9535_v25, %v6778_v27  ;;  %v9467_v40 = vld [vmem:[%s15394_s1 + $0x1cc] sm:$0xf] }
 0x24c   :  { %5752 = vmatpush.bf16.msra.mxu1 %v9289_v50  ;;  %v9431_v50 = vld [vmem:[%s15394_s1 + $0xac] sm:$0xf]  ;;  %v9241_v54 = vor.u32 %v10153_v42, %v9240_v36 }
 0x24d   :  { %5717 = vmatpush.bf16.msrb.mxu2 %v8841_v56  ;;  %v9224_v56 = vld [vmem:[%s15394_s1 + $0x1708] sm:$0xf]  ;;  %v9499_v36 = vld [vmem:[%s15394_s1 + $0x2cc] sm:$0xf] }
 0x24e   :  { %5730 = vmatpush.bf16.msrb.mxu3 %v8969_v59  ;;  %v6365_v59 = vor.u32 %v9431_v50, %v6362_v51  ;;  %v9225_v28 = vor.u32 %v10149_v57, %v9224_v56  ;;  %v9531_v42 = vld [vmem:[%s15394_s1 + $0x3cc] sm:$0xf] }
 0x24f   :  { %5740 = vmatpush.bf16.msra.mxu0 %v9145_v61  ;;  %v5486_v61 = vadd.f32 %v13878_v35, %v13852_v3  ;;  %v6522_v3 = vld [vmem:[%s15394_s1 + $0x1f8] sm:$0xf0]  ;;  %v9503_v35 = vld [vmem:[%s15394_s1 + $0x2ec] sm:$0xf]  ;;  %v6765_v56 = vor.u32 %v9531_v42, %v6762_v34 }
 0x250   :  { %5753 = vmatpush.bf16.msra.mxu1 %v9273_v62  ;;  %5718 = vmatmul.bf16.vlgmr.msrb.gmra.mxu2 %v11411_v4  ;;  %v10181_v62 = vld [vmem:[%s15394_s1 + $0x1814] sm:$0xf0]  ;;  %v6525_v33 = vor.u32 %v9471_v10, %v6522_v3  ;;  %v9463_v57 = vld [vmem:[%s15394_s1 + $0x1ac] sm:$0xf]  ;;  %v6282_v42 = vld [vmem:[%s15394_s1 + $0x18] sm:$0xf0] }
 0x251   :  { %5766 = vmatpush.bf16.msra.mxu2 %v9401_v63  ;;  %5731 = vmatmul.bf16.vlgmr.msrb.gmra.mxu3 %v11415_v6  ;;  %v9427_v63 = vld [vmem:[%s15394_s1 + $0x8c] sm:$0xf]  ;;  %v9353_v29 = vor.u32 %v10181_v62, %v9352_v58  ;;  %v5499_v30 = vadd.f32 %v13883_v38, %v5486_v61  ;;  %v6506_v38 = vld [vmem:[%s15394_s1 + $0x1d8] sm:$0xf0] }
 0x252   :  { %5775 = vmatpush.bf16.msra.mxu3 %v6397_v24  ;;  %v6650_v24 = vld [vmem:[%s15394_s1 + $0x2f8] sm:$0xf0]  ;;  %v6349_v23 = vor.u32 %v9427_v63, %v6346_v32  ;;  %v6509_v51 = vor.u32 %v9467_v40, %v6506_v38  ;;  %v9527_v62 = vld [vmem:[%s15394_s1 + $0x3ac] sm:$0xf] }
 0x253   :  { %5741 = vmatpush.bf16.msra.mxu0 %v9129_v31  ;;  %v9423_v31 = vld [vmem:[%s15394_s1 + $0x6c] sm:$0xf]  ;;  %v5511_v45 = vpop.f32.mrf.mxu2  ;;  %v6490_v58 = vld [vmem:[%s15394_s1 + $0x1b8] sm:$0xf0] }
 0x254   :  { %5754 = vmatpush.bf16.msra.mxu1 %v9257_v37  ;;  %v6330_v37 = vld [vmem:[%s15394_s1 + $0x78] sm:$0xf0]  ;;  %v5512_v43 = vadd.f32 %v5511_v45, %v5499_v30  ;;  %v6493_v3 = vor.u32 %v9463_v57, %v6490_v58  ;;  %v9459_v27 = vld [vmem:[%s15394_s1 + $0x18c] sm:$0xf]  ;;  %v10199_v30 = vld [vmem:[#allocation1] sm:$0xff] }
 0x255   :  { %5767 = vmatpush.bf16.msra.mxu2 %v9385_v44  ;;  %v6653_v44 = vor.u32 %v9503_v35, %v6650_v24  ;;  %v6333_v50 = vor.u32 %v9423_v31, %v6330_v37  ;;  %v6618_v61 = vld [vmem:[%s15394_s1 + $0x2b8] sm:$0xf0]  ;;  %v9415_v35 = vld [vmem:[%s15394_s1 + $0x2c] sm:$0xf] }
 0x256   :  { %5776 = vmatpush.bf16.msra.mxu3 %v6381_v41  ;;  %v6634_v41 = vld [vmem:[%s15394_s1 + $0x2d8] sm:$0xf0]  ;;  %v9523_v31 = vld [vmem:[%s15394_s1 + $0x38c] sm:$0xf] }
 0x257   :  { %5742 = vmatpush.bf16.msra.mxu0 %v9113_v52  ;;  %v9419_v52 = vld [vmem:[%s15394_s1 + $0x4c] sm:$0xf]  ;;  %v6746_v63 = vld [vmem:[%s15394_s1 + $0x3b8] sm:$0xf0] }
 0x258   :  { %5755 = vmatpush.bf16.msra.mxu1 %v9241_v54  ;;  %v5524_v54 = vpop.f32.mrf.mxu3  ;;  %v6317_v10 = vor.u32 %v9419_v52, %v6314_v53  ;;  %v6749_v25 = vor.u32 %v9527_v62, %v6746_v63  ;;  %v6730_v37 = vld [vmem:[%s15394_s1 + $0x398] sm:$0xf0]  ;;  %v9455_v52 = vld [vmem:[%s15394_s1 + $0x16c] sm:$0xf] }
 0x259   :  { %5768 = vmatpush.bf16.msra.mxu2 %v9369_v55  ;;  %v6637_v55 = vor.u32 %v9499_v36, %v6634_v41  ;;  %v5525_v32 = vadd.f32 %v5524_v54, %v5512_v43  ;;  %v9411_v41 = vld [vmem:[%s15394_s1 + $0xc] sm:$0xf]  ;;  %v6458_v53 = vld [vmem:[%s15394_s1 + $0x178] sm:$0xf0] }
 0x25a   :  { %5777 = vmatpush.bf16.msra.mxu3 %v6365_v59  ;;  %v9495_v59 = vld [vmem:[%s15394_s1 + $0x2ac] sm:$0xf]  ;;  %v6586_v54 = vld [vmem:[%s15394_s1 + $0x278] sm:$0xf0] }
 0x25b   :  { %5743 = vmatpush.bf16.msra.mxu0 %v9097_v11  ;;  %v6298_v11 = vld [vmem:[%s15394_s1 + $0x38] sm:$0xf0]  ;;  %v6621_v24 = vor.u32 %v9495_v59, %v6618_v61  ;;  %v5513_v40 = vpop.f32.mrf.mxu2  ;;  %v9487_v43 = vld [vmem:[%s15394_s1 + $0x26c] sm:$0xf]  ;;  %v6285_v59 = vor.u32 %v9411_v41, %v6282_v42  ;;  %v6461_v61 = vor.u32 %v9455_v52, %v6458_v53 }
 0x25c   :  { %5756 = vmatpush.bf16.msra.mxu1 %v9225_v28  ;;  %v6474_v28 = vld [vmem:[%s15394_s1 + $0x198] sm:$0xf0]  ;;  %v6301_v38 = vor.u32 %v9415_v35, %v6298_v11  ;;  %v9567_v57 = vld [vmem:[%s15394_s1 + $0x4ec] sm:$0xf]  ;;  %v6589_v62 = vor.u32 %v9487_v43, %v6586_v54 }
 0x25d   :  { %5769 = vmatpush.bf16.msra.mxu2 %v9353_v29  ;;  %v9491_v29 = vld [vmem:[%s15394_s1 + $0x28c] sm:$0xf]  ;;  %v6477_v36 = vor.u32 %v9459_v27, %v6474_v28  ;;  %v6906_v58 = vld [vmem:[%s15394_s1 + $0x4f8] sm:$0xf0] }
 0x25e   :  { %5778 = vmatpush.bf16.msra.mxu3 %v6349_v23  ;;  %5744 = vmatmul.bf16.vlgmr.msra.gmra.mxu0 %v11413_v5  ;;  %v5537_v23 = vpop.f32.mrf.mxu0  ;;  %v6909_v35 = vor.u32 %v9567_v57, %v6906_v58  ;;  %v6570_v11 = vld [vmem:[%s15394_s1 + $0x258] sm:$0xf0]  ;;  %v9563_v28 = vld [vmem:[%s15394_s1 + $0x4cc] sm:$0xf] }
 0x25f   :  { %5788 = vmatpush.bf16.msrb.mxu0 %v6525_v33  ;;  %5757 = vmatmul.bf16.vlgmr.msra.gmra.mxu1 %v11417_v7  ;;  %v6602_v33 = vld [vmem:[%s15394_s1 + $0x298] sm:$0xf0]  ;;  %v9559_v42 = vld [vmem:[%s15394_s1 + $0x4ac] sm:$0xf] }
 0x260   :  { %5801 = vmatpush.bf16.msrb.mxu1 %v6653_v44  ;;  %9408 = vmatmul.msk.bf16.vlgmr.msra.gmra.mxu2 %vm4797_vm0, %v10199_v30  ;;  %v5538_v44 = vadd.f32 %v5537_v23, %v5525_v32  ;;  %v5526_v34 = vpop.f32.mrf.mxu3  ;;  %v6605_v45 = vor.u32 %v9491_v29, %v6602_v33  ;;  %v9451_v32 = vld [vmem:[%s15394_s1 + $0x14c] sm:$0xf]  ;;  %v6890_v29 = vld [vmem:[%s15394_s1 + $0x4d8] sm:$0xf0] }
 0x261   :  { %5814 = vmatpush.bf16.msrb.mxu2 %v6781_v39  ;;  %v5550_v39 = vpop.f32.mrf.mxu1  ;;  %v6893_v40 = vor.u32 %v9563_v28, %v6890_v29  ;;  %v6682_v41 = vld [vmem:[%s15394_s1 + $0x338] sm:$0xf0]  ;;  %v9475_v54 = vld [vmem:[%s15394_s1 + $0x20c] sm:$0xf] }
 0x262   :  { %5779 = vmatpush.bf16.msra.mxu3 %v6333_v50  ;;  %v6733_v50 = vor.u32 %v9523_v31, %v6730_v37  ;;  %v9447_v37 = vld [vmem:[%s15394_s1 + $0x12c] sm:$0xf]  ;;  %v6874_v34 = vld [vmem:[%s15394_s1 + $0x4b8] sm:$0xf0] }
 0x263   :  { %5789 = vmatpush.bf16.msrb.mxu0 %v6509_v51  ;;  %v14094_v51 = vadd.f32 %v5550_v39, %v5538_v44  ;;  %v6426_v44 = vld [vmem:[%s15394_s1 + $0x138] sm:$0xf0]  ;;  %v9479_v39 = vld [vmem:[%s15394_s1 + $0x22c] sm:$0xf] }
 0x264   :  { %5802 = vmatpush.bf16.msrb.mxu1 %v6637_v55  ;;  %v9519_v55 = vld [vmem:[%s15394_s1 + $0x36c] sm:$0xf]  ;;  %v6410_v52 = vld [vmem:[%s15394_s1 + $0x118] sm:$0xf0] }
 0x265   :  { %5815 = vmatpush.bf16.msrb.mxu2 %v6765_v56  ;;  %v6714_v56 = vld [vmem:[%s15394_s1 + $0x378] sm:$0xf0]  ;;  %v9555_v58 = vld [vmem:[%s15394_s1 + $0x48c] sm:$0xf] }
 0x266   :  { %5780 = vmatpush.bf16.msra.mxu3 %v6317_v10  ;;  %v6717_v63 = vor.u32 %v9519_v55, %v6714_v56  ;;  %v6442_v10 = vld [vmem:[%s15394_s1 + $0x158] sm:$0xf0]  ;;  %v5539_v27 = vpop.f32.mrf.mxu0  ;;  %v9507_v55 = vld [vmem:[%s15394_s1 + $0x30c] sm:$0xf]  ;;  %v6877_v56 = vor.u32 %v9559_v42, %v6874_v34 }
 0x267   :  { %5790 = vmatpush.bf16.msrb.mxu0 %v6493_v3  ;;  %v9483_v3 = vld [vmem:[%s15394_s1 + $0x24c] sm:$0xf]  ;;  %v6445_v23 = vor.u32 %v9451_v32, %v6442_v10  ;;  %v6666_v57 = vld [vmem:[%s15394_s1 + $0x318] sm:$0xf0] }
 0x268   :  { %5803 = vmatpush.bf16.msrb.mxu1 %v6621_v24  ;;  %v9515_v24 = vld [vmem:[%s15394_s1 + $0x34c] sm:$0xf]  ;;  %v6573_v33 = vor.u32 %v9483_v3, %v6570_v11  ;;  %v7162_v10 = vld [vmem:[%s15394_s1 + $0x6f8] sm:$0xf0] }
 0x269   :  { %5816 = vmatpush.bf16.msrb.mxu2 %v6749_v25  ;;  %v6698_v25 = vld [vmem:[%s15394_s1 + $0x358] sm:$0xf0]  ;;  %v5552_v30 = vpop.f32.mrf.mxu1  ;;  %v9663_v3 = vld [vmem:[%s15394_s1 + $0x7ec] sm:$0xf] }
 0x26a   :  { %5781 = vmatpush.bf16.msra.mxu3 %v6301_v38  ;;  %v6701_v31 = vor.u32 %v9515_v24, %v6698_v25  ;;  %v6554_v38 = vld [vmem:[%s15394_s1 + $0x238] sm:$0xf0]  ;;  %v6669_v24 = vor.u32 %v9507_v55, %v6666_v57  ;;  %v9551_v28 = vld [vmem:[%s15394_s1 + $0x46c] sm:$0xf] }
 0x26b   :  { %5791 = vmatpush.bf16.msrb.mxu0 %v6477_v36  ;;  %v9511_v36 = vld [vmem:[%s15394_s1 + $0x32c] sm:$0xf]  ;;  %v6557_v53 = vor.u32 %v9479_v39, %v6554_v38  ;;  %v6842_v29 = vld [vmem:[%s15394_s1 + $0x478] sm:$0xf0] }
 0x26c   :  { %5804 = vmatpush.bf16.msrb.mxu1 %v6605_v45  ;;  %v6429_v45 = vor.u32 %v9447_v37, %v6426_v44  ;;  %v6685_v43 = vor.u32 %v9511_v36, %v6682_v41  ;;  %v9627_v37 = vld [vmem:[%s15394_s1 + $0x6cc] sm:$0xf]  ;;  %v7146_v44 = vld [vmem:[%s15394_s1 + $0x6d8] sm:$0xf0]  ;;  %v6845_v36 = vor.u32 %v9551_v28, %v6842_v29 }
 0x26d   :  { %5817 = vmatpush.bf16.msrb.mxu2 %v6733_v50  ;;  %v9443_v50 = vld [vmem:[%s15394_s1 + $0x10c] sm:$0xf]  ;;  %v7130_v55 = vld [vmem:[%s15394_s1 + $0x6b8] sm:$0xf0] }
 0x26e   :  { %5782 = vmatpush.bf16.msra.mxu3 %v6285_v59  ;;  %v6858_v59 = vld [vmem:[%s15394_s1 + $0x498] sm:$0xf0]  ;;  %v6413_v32 = vor.u32 %v9443_v50, %v6410_v52  ;;  %v9659_v39 = vld [vmem:[%s15394_s1 + $0x7cc] sm:$0xf]  ;;  %v7149_v52 = vor.u32 %v9627_v37, %v7146_v44 }
 0x26f   :  { %5792 = vmatpush.bf16.msrb.mxu0 %v6461_v61  ;;  %v9599_v61 = vld [vmem:[%s15394_s1 + $0x5ec] sm:$0xf]  ;;  %v6861_v25 = vor.u32 %v9555_v58, %v6858_v59  ;;  %v6826_v50 = vld [vmem:[%s15394_s1 + $0x458] sm:$0xf0] }
 0x270   :  { %5805 = vmatpush.bf16.msrb.mxu1 %v6589_v62  ;;  %v7034_v62 = vld [vmem:[%s15394_s1 + $0x5f8] sm:$0xf0] }
 0x271   :  { %5818 = vmatpush.bf16.msrb.mxu2 %v6717_v63  ;;  %5783 = vmatmul.bf16.vlgmr.msra.gmra.mxu3 %v10564_v21  ;;  %v6538_v21 = vld [vmem:[%s15394_s1 + $0x218] sm:$0xf0]  ;;  %v9631_v63 = vld [vmem:[%s15394_s1 + $0x6ec] sm:$0xf]  ;;  %v7037_v27 = vor.u32 %v9599_v61, %v7034_v62 }
 0x272   :  { %5827 = vmatpush.bf16.msrb.mxu3 %v6909_v35  ;;  %v7290_v35 = vld [vmem:[%s15394_s1 + $0x7f8] sm:$0xf0]  ;;  %v6541_v11 = vor.u32 %v9475_v54, %v6538_v21  ;;  %v7165_v30 = vor.u32 %v9631_v63, %v7162_v10  ;;  %v9623_v54 = vld [vmem:[%s15394_s1 + $0x6ac] sm:$0xf] }
 0x273   :  { %5793 = vmatpush.bf16.msrb.mxu0 %v6445_v23  ;;  %v7293_v23 = vor.u32 %v9663_v3, %v7290_v35  ;;  %v5563_v38 = vpop.f32.mrf.mxu2  ;;  %v7258_v57 = vld [vmem:[%s15394_s1 + $0x7b8] sm:$0xf0]  ;;  %v9543_v61 = vld [vmem:[%s15394_s1 + $0x42c] sm:$0xf]  ;;  %v7133_v63 = vor.u32 %v9623_v54, %v7130_v55 }
 0x274   :  { %5806 = vmatpush.bf16.msrb.mxu1 %v6573_v33  ;;  %v9595_v33 = vld [vmem:[%s15394_s1 + $0x5cc] sm:$0xf]  ;;  %v5564_v41 = vadd.f32 %v5563_v38, %v14094_v51  ;;  %v5576_v34 = vpop.f32.mrf.mxu3  ;;  %v7002_v51 = vld [vmem:[%s15394_s1 + $0x5b8] sm:$0xf0] }
 0x275   :  { %5819 = vmatpush.bf16.msrb.mxu2 %v6701_v31  ;;  %v7018_v31 = vld [vmem:[%s15394_s1 + $0x5d8] sm:$0xf0]  ;;  %v9651_v35 = vld [vmem:[%s15394_s1 + $0x78c] sm:$0xf] }
 0x276   :  { %5828 = vmatpush.bf16.msrb.mxu3 %v6893_v40  ;;  %v7274_v40 = vld [vmem:[%s15394_s1 + $0x7d8] sm:$0xf0]  ;;  %v7021_v42 = vor.u32 %v9595_v33, %v7018_v31  ;;  %v5577_v21 = vadd.f32 %v5576_v34, %v5564_v41  ;;  %v9615_v38 = vld [vmem:[%s15394_s1 + $0x66c] sm:$0xf] }
 0x277   :  { %5794 = vmatpush.bf16.msrb.mxu0 %v6429_v45  ;;  %v9547_v45 = vld [vmem:[%s15394_s1 + $0x44c] sm:$0xf]  ;;  %v6810_v62 = vld [vmem:[%s15394_s1 + $0x438] sm:$0xf0] }
 0x278   :  { %5807 = vmatpush.bf16.msrb.mxu1 %v6557_v53  ;;  %v7277_v53 = vor.u32 %v9659_v39, %v7274_v40  ;;  %v6829_v58 = vor.u32 %v9547_v45, %v6826_v50  ;;  %v7114_v3 = vld [vmem:[%s15394_s1 + $0x698] sm:$0xf0]  ;;  %v6813_v28 = vor.u32 %v9543_v61, %v6810_v62  ;;  %v9583_v39 = vld [vmem:[%s15394_s1 + $0x56c] sm:$0xf] }
 0x279   :  { %5820 = vmatpush.bf16.msrb.mxu2 %v6685_v43  ;;  %v9591_v43 = vld [vmem:[%s15394_s1 + $0x5ac] sm:$0xf]  ;;  %v6970_v40 = vld [vmem:[%s15394_s1 + $0x578] sm:$0xf0] }
 0x27a   :  { %5829 = vmatpush.bf16.msrb.mxu3 %v6877_v56  ;;  %v9655_v56 = vld [vmem:[%s15394_s1 + $0x7ac] sm:$0xf]  ;;  %v7005_v59 = vor.u32 %v9591_v43, %v7002_v51  ;;  %v7418_v45 = vld [vmem:[%s15394_s1 + $0x8f8] sm:$0xf0] }
 0x27b   :  { %5795 = vmatpush.bf16.msrb.mxu0 %v6413_v32  ;;  %v9619_v32 = vld [vmem:[%s15394_s1 + $0x68c] sm:$0xf]  ;;  %v5589_v10 = vpop.f32.mrf.mxu0  ;;  %v6954_v54 = vld [vmem:[%s15394_s1 + $0x558] sm:$0xf0] }
 0x27c   :  { %5808 = vmatpush.bf16.msrb.mxu1 %v6541_v11  ;;  %v7242_v11 = vld [vmem:[%s15394_s1 + $0x798] sm:$0xf0]  ;;  %v5578_v33 = vpop.f32.mrf.mxu3  ;;  %v7117_v31 = vor.u32 %v9619_v32, %v7114_v3  ;;  %v9647_v41 = vld [vmem:[%s15394_s1 + $0x76c] sm:$0xf] }
 0x27d   :  { %5821 = vmatpush.bf16.msrb.mxu2 %v6669_v24  ;;  %v5590_v24 = vadd.f32 %v5589_v10, %v5577_v21  ;;  %v7245_v37 = vor.u32 %v9651_v35, %v7242_v11  ;;  %v9695_v34 = vld [vmem:[%s15394_s1 + $0x8ec] sm:$0xf]  ;;  %v7402_v62 = vld [vmem:[%s15394_s1 + $0x8d8] sm:$0xf0] }
 0x27e   :  { %5830 = vmatpush.bf16.msrb.mxu3 %v6861_v25  ;;  %5796 = vmatmul.bf16.vlgmr.msrb.gmra.mxu0 %v10575_v26  ;;  %v6986_v26 = vld [vmem:[%s15394_s1 + $0x598] sm:$0xf0]  ;;  %v5602_v25 = vpop.f32.mrf.mxu1  ;;  %v9579_v51 = vld [vmem:[%s15394_s1 + $0x54c] sm:$0xf]  ;;  %v7421_v55 = vor.u32 %v9695_v34, %v7418_v45 }
 0x27f   :  { %5840 = vmatpush.bf16.msra.mxu0 %v7037_v27  ;;  %5809 = vmatmul.bf16.vlgmr.msrb.gmra.mxu1 %v10562_v20  ;;  %v9587_v20 = vld [vmem:[%s15394_s1 + $0x58c] sm:$0xf]  ;;  %v5565_v27 = vpop.f32.mrf.mxu2  ;;  %v14293_v44 = vadd.f32 %v5602_v25, %v5590_v24  ;;  %v6938_v10 = vld [vmem:[%s15394_s1 + $0x538] sm:$0xf0] }
 0x280   :  { %5853 = vmatpush.bf16.msra.mxu1 %v7165_v30  ;;  %5822 = vmatmul.bf16.vlgmr.msrb.gmra.mxu2 %v10566_v22  ;;  %v7261_v22 = vor.u32 %v9655_v56, %v7258_v57  ;;  %v6989_v29 = vor.u32 %v9587_v20, %v6986_v26  ;;  %v9539_v30 = vld [vmem:[%s15394_s1 + $0x40c] sm:$0xf]  ;;  %v7082_v56 = vld [vmem:[%s15394_s1 + $0x658] sm:$0xf0] }
 0x281   :  { %5866 = vmatpush.bf16.msra.mxu2 %v7293_v23  ;;  %v6794_v23 = vld [vmem:[%s15394_s1 + $0x418] sm:$0xf0]  ;;  %v9611_v21 = vld [vmem:[%s15394_s1 + $0x64c] sm:$0xf] }
 0x282   :  { %5831 = vmatpush.bf16.msrb.mxu3 %v6845_v36  ;;  %v7098_v36 = vld [vmem:[%s15394_s1 + $0x678] sm:$0xf0]  ;;  %v6797_v50 = vor.u32 %v9539_v30, %v6794_v23  ;;  %v9643_v57 = vld [vmem:[%s15394_s1 + $0x74c] sm:$0xf]  ;;  %v7085_v20 = vor.u32 %v9611_v21, %v7082_v56 }
 0x283   :  { %5841 = vmatpush.bf16.msra.mxu0 %v7021_v42  ;;  %v7226_v42 = vld [vmem:[%s15394_s1 + $0x778] sm:$0xf0]  ;;  %v9691_v61 = vld [vmem:[%s15394_s1 + $0x8cc] sm:$0xf] }
 0x284   :  { %5854 = vmatpush.bf16.msra.mxu1 %v7149_v52  ;;  %v6973_v52 = vor.u32 %v9583_v39, %v6970_v40  ;;  %v7229_v43 = vor.u32 %v9647_v41, %v7226_v42  ;;  %v9575_v32 = vld [vmem:[%s15394_s1 + $0x52c] sm:$0xf]  ;;  %v7405_v35 = vor.u32 %v9691_v61, %v7402_v62  ;;  %v7066_v11 = vld [vmem:[%s15394_s1 + $0x638] sm:$0xf0] }
 0x285   :  { %5867 = vmatpush.bf16.msra.mxu2 %v7277_v53  ;;  %v7101_v53 = vor.u32 %v9615_v38, %v7098_v36  ;;  %v9607_v3 = vld [vmem:[%s15394_s1 + $0x62c] sm:$0xf]  ;;  %v7194_v25 = vld [vmem:[%s15394_s1 + $0x738] sm:$0xf0] }
 0x286   :  { %5832 = vmatpush.bf16.msrb.mxu3 %v6829_v58  ;;  %v7210_v58 = vld [vmem:[%s15394_s1 + $0x758] sm:$0xf0]  ;;  %v9639_v24 = vld [vmem:[%s15394_s1 + $0x72c] sm:$0xf] }
 0x287   :  { %5842 = vmatpush.bf16.msra.mxu0 %v7005_v59  ;;  %v5591_v59 = vpop.f32.mrf.mxu0  ;;  %v7213_v26 = vor.u32 %v9643_v57, %v7210_v58  ;;  %v9687_v27 = vld [vmem:[%s15394_s1 + $0x8ac] sm:$0xf]  ;;  %v6922_v23 = vld [vmem:[%s15394_s1 + $0x518] sm:$0xf0]  ;;  %v7197_v33 = vor.u32 %v9639_v24, %v7194_v25 }
 0x288   :  { %5855 = vmatpush.bf16.msra.mxu1 %v7133_v63  ;;  %v5604_v63 = vpop.f32.mrf.mxu1  ;;  %v9571_v30 = vld [vmem:[%s15394_s1 + $0x50c] sm:$0xf]  ;;  %v7178_v38 = vld [vmem:[%s15394_s1 + $0x718] sm:$0xf0] }
 0x289   :  { %5868 = vmatpush.bf16.msra.mxu2 %v7261_v22  ;;  %v6957_v22 = vor.u32 %v9579_v51, %v6954_v54  ;;  %v9635_v39 = vld [vmem:[%s15394_s1 + $0x70c] sm:$0xf]  ;;  %v7370_v41 = vld [vmem:[%s15394_s1 + $0x898] sm:$0xf0] }
 0x28a   :  { %5833 = vmatpush.bf16.msrb.mxu3 %v6813_v28  ;;  %v7386_v28 = vld [vmem:[%s15394_s1 + $0x8b8] sm:$0xf0]  ;;  %v9683_v36 = vld [vmem:[%s15394_s1 + $0x88c] sm:$0xf]  ;;  %v7181_v54 = vor.u32 %v9635_v39, %v7178_v38 }
 0x28b   :  { %5843 = vmatpush.bf16.msra.mxu0 %v6989_v29  ;;  %v6941_v29 = vor.u32 %v9575_v32, %v6938_v10  ;;  %v7389_v40 = vor.u32 %v9687_v27, %v7386_v28  ;;  %v9727_v42 = vld [vmem:[%s15394_s1 + $0x9ec] sm:$0xf]  ;;  %v7546_v34 = vld [vmem:[%s15394_s1 + $0x9f8] sm:$0xf0]  ;;  %v7373_v21 = vor.u32 %v9683_v36, %v7370_v41 }
 0x28c   :  { %5856 = vmatpush.bf16.msra.mxu1 %v7117_v31  ;;  %v9603_v31 = vld [vmem:[%s15394_s1 + $0x60c] sm:$0xf]  ;;  %v7354_v57 = vld [vmem:[%s15394_s1 + $0x878] sm:$0xf0] }
 0x28d   :  { %5869 = vmatpush.bf16.msra.mxu2 %v7245_v37  ;;  %v7050_v37 = vld [vmem:[%s15394_s1 + $0x618] sm:$0xf0]  ;;  %v9759_v45 = vld [vmem:[%s15394_s1 + $0xaec] sm:$0xf] }
 0x28e   :  { %5834 = vmatpush.bf16.msrb.mxu3 %v6797_v50  ;;  %v6925_v50 = vor.u32 %v9571_v30, %v6922_v23  ;;  %v7053_v51 = vor.u32 %v9603_v31, %v7050_v37  ;;  %v9679_v56 = vld [vmem:[%s15394_s1 + $0x86c] sm:$0xf]  ;;  %v7530_v62 = vld [vmem:[%s15394_s1 + $0x9d8] sm:$0xf0] }
 0x28f   :  { %5844 = vmatpush.bf16.msra.mxu0 %v6973_v52  ;;  %v7674_v52 = vld [vmem:[%s15394_s1 + $0xaf8] sm:$0xf0]  ;;  %v9723_v61 = vld [vmem:[%s15394_s1 + $0x9cc] sm:$0xf]  ;;  %v7357_v10 = vor.u32 %v9679_v56, %v7354_v57 }
 0x290   :  { %5857 = vmatpush.bf16.msra.mxu1 %v7101_v53  ;;  %v9791_v53 = vld [vmem:[%s15394_s1 + $0xbec] sm:$0xf]  ;;  %v7677_v58 = vor.u32 %v9759_v45, %v7674_v52  ;;  %v7338_v25 = vld [vmem:[%s15394_s1 + $0x858] sm:$0xf0] }
 0x291   :  { %5870 = vmatpush.bf16.msra.mxu2 %v7229_v43  ;;  %5835 = vmatmul.bf16.vlgmr.msrb.gmra.mxu3 %v10657_v0  ;;  %v7069_v0 = vor.u32 %v9607_v3, %v7066_v11  ;;  %v7802_v43 = vld [vmem:[%s15394_s1 + $0xbf8] sm:$0xf0]  ;;  %v9755_v63 = vld [vmem:[%s15394_s1 + $0xacc] sm:$0xf] }
 0x292   :  { %5879 = vmatpush.bf16.msra.mxu3 %v7421_v55  ;;  %v7549_v55 = vor.u32 %v9727_v42, %v7546_v34  ;;  %v7805_v59 = vor.u32 %v9791_v53, %v7802_v43  ;;  %v9675_v24 = vld [vmem:[%s15394_s1 + $0x84c] sm:$0xf]  ;;  %v7770_v31 = vld [vmem:[%s15394_s1 + $0xbb8] sm:$0xf0] }
 0x293   :  { %5845 = vmatpush.bf16.msra.mxu0 %v6957_v22  ;;  %v7658_v22 = vld [vmem:[%s15394_s1 + $0xad8] sm:$0xf0]  ;;  %v5615_v32 = vpop.f32.mrf.mxu2  ;;  %v9751_v30 = vld [vmem:[%s15394_s1 + $0xaac] sm:$0xf] }
 0x294   :  { %5858 = vmatpush.bf16.msra.mxu1 %v7085_v20  ;;  %v9787_v20 = vld [vmem:[%s15394_s1 + $0xbcc] sm:$0xf]  ;;  %v5616_v3 = vadd.f32 %v5615_v32, %v14293_v44  ;;  %v5628_v11 = vpop.f32.mrf.mxu3  ;;  %v7661_v27 = vor.u32 %v9755_v63, %v7658_v22  ;;  %v7514_v44 = vld [vmem:[%s15394_s1 + $0x9b8] sm:$0xf0] }
 0x295   :  { %5871 = vmatpush.bf16.msra.mxu2 %v7213_v26  ;;  %v7786_v26 = vld [vmem:[%s15394_s1 + $0xbd8] sm:$0xf0]  ;;  %v9747_v41 = vld [vmem:[%s15394_s1 + $0xa8c] sm:$0xf] }
 0x296   :  { %5880 = vmatpush.bf16.msra.mxu3 %v7405_v35  ;;  %v7533_v35 = vor.u32 %v9723_v61, %v7530_v62  ;;  %v7789_v28 = vor.u32 %v9787_v20, %v7786_v26  ;;  %v5629_v23 = vadd.f32 %v5628_v11, %v5616_v3  ;;  %v7322_v39 = vld [vmem:[%s15394_s1 + $0x838] sm:$0xf0]  ;;  %v9779_v45 = vld [vmem:[%s15394_s1 + $0xb8c] sm:$0xf] }
 0x297   :  { %5846 = vmatpush.bf16.msra.mxu0 %v6941_v29  ;;  %v9719_v29 = vld [vmem:[%s15394_s1 + $0x9ac] sm:$0xf]  ;;  %v7498_v36 = vld [vmem:[%s15394_s1 + $0x998] sm:$0xf0] }
 0x298   :  { %5859 = vmatpush.bf16.msra.mxu1 %v7069_v0  ;;  %v7642_v0 = vld [vmem:[%s15394_s1 + $0xab8] sm:$0xf0]  ;;  %v7517_v37 = vor.u32 %v9719_v29, %v7514_v44  ;;  %v9711_v61 = vld [vmem:[%s15394_s1 + $0x96c] sm:$0xf] }
 0x299   :  { %5872 = vmatpush.bf16.msra.mxu2 %v7197_v33  ;;  %v9783_v33 = vld [vmem:[%s15394_s1 + $0xbac] sm:$0xf]  ;;  %v7626_v34 = vld [vmem:[%s15394_s1 + $0xa98] sm:$0xf0] }
 0x29a   :  { %5881 = vmatpush.bf16.msra.mxu3 %v7389_v40  ;;  %v7645_v40 = vor.u32 %v9751_v30, %v7642_v0  ;;  %v7773_v38 = vor.u32 %v9783_v33, %v7770_v31  ;;  %v7629_v57 = vor.u32 %v9747_v41, %v7626_v34  ;;  %v7482_v62 = vld [vmem:[%s15394_s1 + $0x978] sm:$0xf0]  ;;  %v9743_v63 = vld [vmem:[%s15394_s1 + $0xa6c] sm:$0xf] }
 0x29b   :  { %5847 = vmatpush.bf16.msra.mxu0 %v6925_v50  ;;  %v5641_v42 = vpop.f32.mrf.mxu0  ;;  %v7754_v50 = vld [vmem:[%s15394_s1 + $0xb98] sm:$0xf0]  ;;  %v5617_v43 = vpop.f32.mrf.mxu2  ;;  %v9775_v20 = vld [vmem:[%s15394_s1 + $0xb6c] sm:$0xf] }
 0x29c   :  { %5860 = vmatpush.bf16.msra.mxu1 %v7053_v51  ;;  %v5642_v52 = vadd.f32 %v5641_v42, %v5629_v23  ;;  %v5654_v53 = vpop.f32.mrf.mxu1  ;;  %v5630_v56 = vpop.f32.mrf.mxu3  ;;  %v7610_v22 = vld [vmem:[%s15394_s1 + $0xa78] sm:$0xf0]  ;;  %v9823_v32 = vld [vmem:[%s15394_s1 + $0xcec] sm:$0xf] }
 0x29d   :  { %5873 = vmatpush.bf16.msra.mxu2 %v7181_v54  ;;  %v7738_v26 = vld [vmem:[%s15394_s1 + $0xb78] sm:$0xf0]  ;;  %v7613_v11 = vor.u32 %v9743_v63, %v7610_v22  ;;  %v9771_v30 = vld [vmem:[%s15394_s1 + $0xb4c] sm:$0xf] }
 0x29e   :  { %5882 = vmatpush.bf16.msra.mxu3 %v7373_v21  ;;  %5848 = vmatmul.bf16.vlgmr.msra.gmra.mxu0 %v10661_v2  ;;  %v9671_v2 = vld [vmem:[%s15394_s1 + $0x82c] sm:$0xf]  ;;  %v7594_v44 = vld [vmem:[%s15394_s1 + $0xa58] sm:$0xf0] }
 0x29f   :  { %5892 = vmatpush.bf16.msrb.mxu0 %v7549_v55  ;;  %5861 = vmatmul.bf16.vlgmr.msra.gmra.mxu1 %v10652_v60  ;;  %v9715_v60 = vld [vmem:[%s15394_s1 + $0x98c] sm:$0xf]  ;;  %v7325_v51 = vor.u32 %v9671_v2, %v7322_v39  ;;  %v7306_v55 = vld [vmem:[%s15394_s1 + $0x818] sm:$0xf0] }
 0x2a0   :  { %5905 = vmatpush.bf16.msrb.mxu1 %v7677_v58  ;;  %5874 = vmatmul.bf16.vlgmr.msra.gmra.mxu2 %v10659_v1  ;;  %v7341_v1 = vor.u32 %v9675_v24, %v7338_v25  ;;  %v7501_v54 = vor.u32 %v9715_v60, %v7498_v36  ;;  %v9667_v21 = vld [vmem:[%s15394_s1 + $0x80c] sm:$0xf]  ;;  %v7757_v58 = vor.u32 %v9779_v45, %v7754_v50  ;;  %v7722_v23 = vld [vmem:[%s15394_s1 + $0xb58] sm:$0xf0] }
 0x2a1   :  { %5918 = vmatpush.bf16.msrb.mxu2 %v7805_v59  ;;  %v14492_v59 = vadd.f32 %v5654_v53, %v5642_v52  ;;  %v7309_v3 = vor.u32 %v9667_v21, %v7306_v55  ;;  %v7741_v24 = vor.u32 %v9775_v20, %v7738_v26  ;;  %v9707_v25 = vld [vmem:[%s15394_s1 + $0x94c] sm:$0xf]  ;;  %v7914_v31 = vld [vmem:[%s15394_s1 + $0xcd8] sm:$0xf0]  ;;  %v7725_v39 = vor.u32 %v9771_v30, %v7722_v23 }
 0x2a2   :  { %5883 = vmatpush.bf16.msra.mxu3 %v7357_v10  ;;  %v7930_v10 = vld [vmem:[%s15394_s1 + $0xcf8] sm:$0xf0]  ;;  %v9819_v33 = vld [vmem:[%s15394_s1 + $0xccc] sm:$0xf] }
 0x2a3   :  { %5893 = vmatpush.bf16.msrb.mxu0 %v7533_v35  ;;  %v7485_v35 = vor.u32 %v9711_v61, %v7482_v62  ;;  %v7933_v29 = vor.u32 %v9823_v32, %v7930_v10  ;;  %v5643_v0 = vpop.f32.mrf.mxu0  ;;  %v9735_v60 = vld [vmem:[%s15394_s1 + $0xa2c] sm:$0xf]  ;;  %v7917_v36 = vor.u32 %v9819_v33, %v7914_v31  ;;  %v7578_v41 = vld [vmem:[%s15394_s1 + $0xa38] sm:$0xf0] }
 0x2a4   :  { %5906 = vmatpush.bf16.msrb.mxu1 %v7661_v27  ;;  %v7466_v27 = vld [vmem:[%s15394_s1 + $0x958] sm:$0xf0]  ;;  %v9767_v42 = vld [vmem:[%s15394_s1 + $0xb2c] sm:$0xf] }
 0x2a5   :  { %5919 = vmatpush.bf16.msrb.mxu2 %v7789_v28  ;;  %v9739_v28 = vld [vmem:[%s15394_s1 + $0xa4c] sm:$0xf]  ;;  %v7706_v34 = vld [vmem:[%s15394_s1 + $0xb38] sm:$0xf0] }
 0x2a6   :  { %5884 = vmatpush.bf16.msra.mxu3 %v7341_v1  ;;  %v5656_v1 = vpop.f32.mrf.mxu1  ;;  %v7597_v2 = vor.u32 %v9739_v28, %v7594_v44  ;;  %v9815_v45 = vld [vmem:[%s15394_s1 + $0xcac] sm:$0xf]  ;;  %v7898_v50 = vld [vmem:[%s15394_s1 + $0xcb8] sm:$0xf0] }
 0x2a7   :  { %5894 = vmatpush.bf16.msrb.mxu0 %v7517_v37  ;;  %v7469_v37 = vor.u32 %v9707_v25, %v7466_v27  ;;  %v9699_v53 = vld [vmem:[%s15394_s1 + $0x90c] sm:$0xf]  ;;  %v7434_v43 = vld [vmem:[%s15394_s1 + $0x918] sm:$0xf0]  ;;  %v7901_v56 = vor.u32 %v9815_v45, %v7898_v50 }
 0x2a8   :  { %5907 = vmatpush.bf16.msrb.mxu1 %v7645_v40  ;;  %v9703_v40 = vld [vmem:[%s15394_s1 + $0x92c] sm:$0xf]  ;;  %v7562_v21 = vld [vmem:[%s15394_s1 + $0xa18] sm:$0xf0]  ;;  %v7437_v20 = vor.u32 %v9699_v53, %v7434_v43 }
 0x2a9   :  { %5920 = vmatpush.bf16.msrb.mxu2 %v7773_v38  ;;  %v7450_v38 = vld [vmem:[%s15394_s1 + $0x938] sm:$0xf0]  ;;  %v9763_v55 = vld [vmem:[%s15394_s1 + $0xb0c] sm:$0xf] }
 0x2aa   :  { %5885 = vmatpush.bf16.msra.mxu3 %v7325_v51  ;;  %v7453_v52 = vor.u32 %v9703_v40, %v7450_v38  ;;  %v7709_v51 = vor.u32 %v9767_v42, %v7706_v34  ;;  %v7882_v61 = vld [vmem:[%s15394_s1 + $0xc98] sm:$0xf0]  ;;  %v9855_v62 = vld [vmem:[%s15394_s1 + $0xdec] sm:$0xf] }
 0x2ab   :  { %5895 = vmatpush.bf16.msrb.mxu0 %v7501_v54  ;;  %v9731_v54 = vld [vmem:[%s15394_s1 + $0xa0c] sm:$0xf]  ;;  %v8058_v63 = vld [vmem:[%s15394_s1 + $0xdf8] sm:$0xf0] }
 0x2ac   :  { %5908 = vmatpush.bf16.msrb.mxu1 %v7629_v57  ;;  %v7690_v57 = vld [vmem:[%s15394_s1 + $0xb18] sm:$0xf0]  ;;  %v9887_v22 = vld [vmem:[%s15394_s1 + $0xeec] sm:$0xf] }
 0x2ad   :  { %5921 = vmatpush.bf16.msrb.mxu2 %v7757_v58  ;;  %v9811_v58 = vld [vmem:[%s15394_s1 + $0xc8c] sm:$0xf]  ;;  %v8186_v26 = vld [vmem:[%s15394_s1 + $0xef8] sm:$0xf0] }
 0x2ae   :  { %5886 = vmatpush.bf16.msra.mxu3 %v7309_v3  ;;  %v9919_v32 = vld [vmem:[%s15394_s1 + $0xfec] sm:$0xf]  ;;  %v8314_v10 = vld [vmem:[%s15394_s1 + $0xff8] sm:$0xf0]  ;;  %v7565_v3 = vor.u32 %v9731_v54, %v7562_v21  ;;  %v8189_v28 = vor.u32 %v9887_v22, %v8186_v26 }
 0x2af   :  { %5896 = vmatpush.bf16.msrb.mxu0 %v7485_v35  ;;  %v7693_v35 = vor.u32 %v9763_v55, %v7690_v57  ;;  %v9807_v25 = vld [vmem:[%s15394_s1 + $0xc6c] sm:$0xf]  ;;  %v7866_v27 = vld [vmem:[%s15394_s1 + $0xc78] sm:$0xf0] }
 0x2b0   :  { %5909 = vmatpush.bf16.msrb.mxu1 %v7613_v11  ;;  %v7885_v11 = vor.u32 %v9811_v58, %v7882_v61  ;;  %v9851_v44 = vld [vmem:[%s15394_s1 + $0xdcc] sm:$0xf]  ;;  %v8042_v30 = vld [vmem:[%s15394_s1 + $0xdd8] sm:$0xf0] }
 0x2b1   :  { %5922 = vmatpush.bf16.msrb.mxu2 %v7741_v24  ;;  %5887 = vmatmul.bf16.vlgmr.msra.gmra.mxu3 %v10907_v12  ;;  %v7581_v12 = vor.u32 %v9735_v60, %v7578_v41  ;;  %v8061_v24 = vor.u32 %v9855_v62, %v8058_v63  ;;  %v9883_v23 = vld [vmem:[%s15394_s1 + $0xecc] sm:$0xf]  ;;  %v8170_v0 = vld [vmem:[%s15394_s1 + $0xed8] sm:$0xf0] }
 0x2b2   :  { %5931 = vmatpush.bf16.msrb.mxu3 %v7933_v29  ;;  %v8317_v29 = vor.u32 %v9919_v32, %v8314_v10  ;;  %v9915_v33 = vld [vmem:[%s15394_s1 + $0xfcc] sm:$0xf]  ;;  %v8298_v31 = vld [vmem:[%s15394_s1 + $0xfd8] sm:$0xf0] }
 0x2b3   :  { %5897 = vmatpush.bf16.msrb.mxu0 %v7469_v37  ;;  %v5667_v1 = vpop.f32.mrf.mxu2  ;;  %v7869_v37 = vor.u32 %v9807_v25, %v7866_v27  ;;  %v9803_v38 = vld [vmem:[%s15394_s1 + $0xc4c] sm:$0xf]  ;;  %v7850_v60 = vld [vmem:[%s15394_s1 + $0xc58] sm:$0xf0]  ;;  %v8301_v41 = vor.u32 %v9915_v33, %v8298_v31 }
 0x2b4   :  { %5910 = vmatpush.bf16.msrb.mxu1 %v7597_v2  ;;  %v5668_v2 = vadd.f32 %v5667_v1, %v14492_v59  ;;  %v5680_v40 = vpop.f32.mrf.mxu3  ;;  %v9847_v42 = vld [vmem:[%s15394_s1 + $0xdac] sm:$0xf]  ;;  %v8026_v59 = vld [vmem:[%s15394_s1 + $0xdb8] sm:$0xf0] }
 0x2b5   :  { %5923 = vmatpush.bf16.msrb.mxu2 %v7725_v39  ;;  %v8045_v39 = vor.u32 %v9851_v44, %v8042_v30  ;;  %v9879_v34 = vld [vmem:[%s15394_s1 + $0xeac] sm:$0xf]  ;;  %v8154_v50 = vld [vmem:[%s15394_s1 + $0xeb8] sm:$0xf0]  ;;  %v8029_v43 = vor.u32 %v9847_v42, %v8026_v59 }
 0x2b6   :  { %5932 = vmatpush.bf16.msrb.mxu3 %v7917_v36  ;;  %v8173_v36 = vor.u32 %v9883_v23, %v8170_v0  ;;  %v5681_v45 = vadd.f32 %v5680_v40, %v5668_v2  ;;  %v8282_v53 = vld [vmem:[%s15394_s1 + $0xfb8] sm:$0xf0]  ;;  %v9875_v55 = vld [vmem:[%s15394_s1 + $0xe8c] sm:$0xf] }
 0x2b7   :  { %5898 = vmatpush.bf16.msrb.mxu0 %v7453_v52  ;;  %v9911_v52 = vld [vmem:[%s15394_s1 + $0xfac] sm:$0xf]  ;;  %v8010_v21 = vld [vmem:[%s15394_s1 + $0xd98] sm:$0xf0] }
 0x2b8   :  { %5911 = vmatpush.bf16.msrb.mxu1 %v7581_v12  ;;  %v7834_v12 = vld [vmem:[%s15394_s1 + $0xc38] sm:$0xf0]  ;;  %v8285_v54 = vor.u32 %v9911_v52, %v8282_v53  ;;  %v9907_v58 = vld [vmem:[%s15394_s1 + $0xf8c] sm:$0xf] }
 0x2b9   :  { %5924 = vmatpush.bf16.msrb.mxu2 %v7709_v51  ;;  %v8157_v51 = vor.u32 %v9879_v34, %v8154_v50  ;;  %v8138_v57 = vld [vmem:[%s15394_s1 + $0xe98] sm:$0xf0]  ;;  %v9795_v32 = vld [vmem:[%s15394_s1 + $0xc0c] sm:$0xf] }
 0x2ba   :  { %5933 = vmatpush.bf16.msrb.mxu3 %v7901_v56  ;;  %v8266_v61 = vld [vmem:[%s15394_s1 + $0xf98] sm:$0xf0]  ;;  %v9839_v25 = vld [vmem:[%s15394_s1 + $0xd6c] sm:$0xf] }
 0x2bb   :  { %5899 = vmatpush.bf16.msrb.mxu0 %v7437_v20  ;;  %v5693_v56 = vpop.f32.mrf.mxu0  ;;  %v5669_v22 = vpop.f32.mrf.mxu2  ;;  %v7818_v10 = vld [vmem:[%s15394_s1 + $0xc18] sm:$0xf0]  ;;  %v9903_v44 = vld [vmem:[%s15394_s1 + $0xf6c] sm:$0xf] }
 0x2bc   :  { %5912 = vmatpush.bf16.msrb.mxu1 %v7565_v3  ;;  %v5694_v62 = vadd.f32 %v5693_v56, %v5681_v45  ;;  %v5706_v63 = vpop.f32.mrf.mxu1  ;;  %v5682_v3 = vpop.f32.mrf.mxu3  ;;  %v7994_v27 = vld [vmem:[%s15394_s1 + $0xd78] sm:$0xf0]  ;;  %v9951_v23 = vld [vmem:[%s15394_s1 + $0x10ec] sm:$0xf]  ;;  %v7821_v33 = vor.u32 %v9795_v32, %v7818_v10 }
 0x2bd   :  { %5925 = vmatpush.bf16.msrb.mxu2 %v7693_v35  ;;  %v8141_v35 = vor.u32 %v9875_v55, %v8138_v57  ;;  %v8250_v30 = vld [vmem:[%s15394_s1 + $0xf78] sm:$0xf0]  ;;  %v7997_v31 = vor.u32 %v9839_v25, %v7994_v27  ;;  %v9835_v2 = vld [vmem:[%s15394_s1 + $0xd4c] sm:$0xf] }
 0x2be   :  { %5934 = vmatpush.bf16.msrb.mxu3 %v7885_v11  ;;  %5900 = vmatmul.bf16.vlgmr.msrb.gmra.mxu0 %v10917_v16  ;;  %v7853_v16 = vor.u32 %v9803_v38, %v7850_v60  ;;  %v8269_v11 = vor.u32 %v9907_v58, %v8266_v61  ;;  %v8442_v0 = vld [vmem:[%s15394_s1 + $0x10f8] sm:$0xf0]  ;;  %v9867_v40 = vld [vmem:[%s15394_s1 + $0xe4c] sm:$0xf] }
 0x2bf   :  { %5944 = vmatpush.bf16.msra.mxu0 %v8061_v24  ;;  %5913 = vmatmul.bf16.vlgmr.msrb.gmra.mxu1 %v10915_v15  ;;  %v9843_v15 = vld [vmem:[%s15394_s1 + $0xd8c] sm:$0xf]  ;;  %v14691_v24 = vadd.f32 %v5706_v63, %v5694_v62  ;;  %v8445_v38 = vor.u32 %v9951_v23, %v8442_v0  ;;  %v8106_v60 = vld [vmem:[%s15394_s1 + $0xe58] sm:$0xf0] }
 0x2c0   :  { %5957 = vmatpush.bf16.msra.mxu1 %v8189_v28  ;;  %5926 = vmatmul.bf16.vlgmr.msrb.gmra.mxu2 %v10919_v17  ;;  %v9799_v17 = vld [vmem:[%s15394_s1 + $0xc2c] sm:$0xf]  ;;  %v8013_v26 = vor.u32 %v9843_v15, %v8010_v21  ;;  %v8426_v34 = vld [vmem:[%s15394_s1 + $0x10d8] sm:$0xf0]  ;;  %v8109_v52 = vor.u32 %v9867_v40, %v8106_v60 }
 0x2c1   :  { %5970 = vmatpush.bf16.msra.mxu2 %v8317_v29  ;;  %v7837_v20 = vor.u32 %v9799_v17, %v7834_v12  ;;  %v9871_v28 = vld [vmem:[%s15394_s1 + $0xe6c] sm:$0xf]  ;;  %v8122_v29 = vld [vmem:[%s15394_s1 + $0xe78] sm:$0xf0] }
 0x2c2   :  { %5935 = vmatpush.bf16.msrb.mxu3 %v7869_v37  ;;  %v8125_v1 = vor.u32 %v9871_v28, %v8122_v29  ;;  %v8253_v37 = vor.u32 %v9903_v44, %v8250_v30  ;;  %v9947_v59 = vld [vmem:[%s15394_s1 + $0x10cc] sm:$0xf]  ;;  %v8218_v15 = vld [vmem:[%s15394_s1 + $0xf38] sm:$0xf0] }
 0x2c3   :  { %5945 = vmatpush.bf16.msra.mxu0 %v8045_v39  ;;  %v7978_v39 = vld [vmem:[%s15394_s1 + $0xd58] sm:$0xf0]  ;;  %v5695_v42 = vpop.f32.mrf.mxu0  ;;  %v9863_v17 = vld [vmem:[%s15394_s1 + $0xe2c] sm:$0xf]  ;;  %v8429_v12 = vor.u32 %v9947_v59, %v8426_v34 }
 0x2c4   :  { %5958 = vmatpush.bf16.msra.mxu1 %v8173_v36  ;;  %v9899_v36 = vld [vmem:[%s15394_s1 + $0xf4c] sm:$0xf]  ;;  %v5708_v45 = vpop.f32.mrf.mxu1  ;;  %v7981_v50 = vor.u32 %v9835_v2, %v7978_v39  ;;  %v8410_v55 = vld [vmem:[%s15394_s1 + $0x10b8] sm:$0xf0] }
 0x2c5   :  { %5971 = vmatpush.bf16.msra.mxu2 %v8301_v41  ;;  %v8234_v41 = vld [vmem:[%s15394_s1 + $0xf58] sm:$0xf0]  ;;  %v9943_v21 = vld [vmem:[%s15394_s1 + $0x10ac] sm:$0xf] }
 0x2c6   :  { %5936 = vmatpush.bf16.msrb.mxu3 %v7853_v16  ;;  %v8237_v53 = vor.u32 %v9899_v36, %v8234_v41  ;;  %v9831_v16 = vld [vmem:[%s15394_s1 + $0xd2c] sm:$0xf]  ;;  %v7946_v58 = vld [vmem:[%s15394_s1 + $0xd18] sm:$0xf0] }
 0x2c7   :  { %5946 = vmatpush.bf16.msra.mxu0 %v8029_v43  ;;  %v7962_v43 = vld [vmem:[%s15394_s1 + $0xd38] sm:$0xf0]  ;;  %v9827_v57 = vld [vmem:[%s15394_s1 + $0xd0c] sm:$0xf] }
 0x2c8   :  { %5959 = vmatpush.bf16.msra.mxu1 %v8157_v51  ;;  %v8090_v51 = vld [vmem:[%s15394_s1 + $0xe38] sm:$0xf0]  ;;  %v7965_v56 = vor.u32 %v9831_v16, %v7962_v43  ;;  %v9859_v62 = vld [vmem:[%s15394_s1 + $0xe0c] sm:$0xf]  ;;  %v7949_v25 = vor.u32 %v9827_v57, %v7946_v58 }
 0x2c9   :  { %5972 = vmatpush.bf16.msra.mxu2 %v8285_v54  ;;  %v9895_v54 = vld [vmem:[%s15394_s1 + $0xf2c] sm:$0xf]  ;;  %v8074_v63 = vld [vmem:[%s15394_s1 + $0xe18] sm:$0xf0] }
 0x2ca   :  { %5937 = vmatpush.bf16.msrb.mxu3 %v7837_v20  ;;  %v8221_v61 = vor.u32 %v9895_v54, %v8218_v15  ;;  %v9891_v22 = vld [vmem:[%s15394_s1 + $0xf0c] sm:$0xf]  ;;  %v8413_v20 = vor.u32 %v9943_v21, %v8410_v55  ;;  %v8394_v10 = vld [vmem:[%s15394_s1 + $0x1098] sm:$0xf0]  ;;  %v8077_v44 = vor.u32 %v9859_v62, %v8074_v63 }
 0x2cb   :  { %5947 = vmatpush.bf16.msra.mxu0 %v8013_v26  ;;  %v8202_v26 = vld [vmem:[%s15394_s1 + $0xf18] sm:$0xf0]  ;;  %v9939_v32 = vld [vmem:[%s15394_s1 + $0x108c] sm:$0xf] }
 0x2cc   :  { %5960 = vmatpush.bf16.msra.mxu1 %v8141_v35  ;;  %v9983_v3 = vld [vmem:[%s15394_s1 + $0x11ec] sm:$0xf]  ;;  %v8570_v35 = vld [vmem:[%s15394_s1 + $0x11f8] sm:$0xf0]  ;;  %v8205_v30 = vor.u32 %v9891_v22, %v8202_v26  ;;  %v8397_v23 = vor.u32 %v9939_v32, %v8394_v10 }
 0x2cd   :  { %5973 = vmatpush.bf16.msra.mxu2 %v8269_v11  ;;  %v10015_v11 = vld [vmem:[%s15394_s1 + $0x12ec] sm:$0xf]  ;;  %v8698_v27 = vld [vmem:[%s15394_s1 + $0x12f8] sm:$0xf0]  ;;  %v8573_v0 = vor.u32 %v9983_v3, %v8570_v35 }
 0x2ce   :  { %5938 = vmatpush.bf16.msrb.mxu3 %v7821_v33  ;;  %v10047_v28 = vld [vmem:[%s15394_s1 + $0x13ec] sm:$0xf]  ;;  %v8826_v29 = vld [vmem:[%s15394_s1 + $0x13f8] sm:$0xf0] }
 0x2cf   :  { %5948 = vmatpush.bf16.msra.mxu0 %v7997_v31  ;;  %v9935_v33 = vld [vmem:[%s15394_s1 + $0x106c] sm:$0xf]  ;;  %v8378_v31 = vld [vmem:[%s15394_s1 + $0x1078] sm:$0xf0] }
 0x2d0   :  { %5961 = vmatpush.bf16.msra.mxu1 %v8125_v1  ;;  %v8701_v1 = vor.u32 %v10015_v11, %v8698_v27  ;;  %v9979_v2 = vld [vmem:[%s15394_s1 + $0x11cc] sm:$0xf]  ;;  %v8554_v39 = vld [vmem:[%s15394_s1 + $0x11d8] sm:$0xf0]  ;;  %v8381_v42 = vor.u32 %v9935_v33, %v8378_v31 }
 0x2d1   :  { %5974 = vmatpush.bf16.msra.mxu2 %v8253_v37  ;;  %5939 = vmatmul.bf16.vlgmr.msrb.gmra.mxu3 %v11081_v46  ;;  %v8093_v46 = vor.u32 %v9863_v17, %v8090_v51  ;;  %v8829_v37 = vor.u32 %v10047_v28, %v8826_v29  ;;  %v10011_v40 = vld [vmem:[%s15394_s1 + $0x12cc] sm:$0xf]  ;;  %v8810_v36 = vld [vmem:[%s15394_s1 + $0x13d8] sm:$0xf0]  ;;  %v8557_v34 = vor.u32 %v9979_v2, %v8554_v39 }
 0x2d2   :  { %5983 = vmatpush.bf16.msra.mxu3 %v8445_v38  ;;  %v8682_v38 = vld [vmem:[%s15394_s1 + $0x12d8] sm:$0xf0]  ;;  %v10043_v60 = vld [vmem:[%s15394_s1 + $0x13cc] sm:$0xf] }
 0x2d3   :  { %5949 = vmatpush.bf16.msra.mxu0 %v7981_v50  ;;  %v5719_v41 = vpop.f32.mrf.mxu2  ;;  %v9931_v50 = vld [vmem:[%s15394_s1 + $0x104c] sm:$0xf]  ;;  %v8813_v16 = vor.u32 %v10043_v60, %v8810_v36  ;;  %v8666_v51 = vld [vmem:[%s15394_s1 + $0x12b8] sm:$0xf0] }
 0x2d4   :  { %5962 = vmatpush.bf16.msra.mxu1 %v8109_v52  ;;  %v5720_v59 = vadd.f32 %v5719_v41, %v14691_v24  ;;  %v5732_v45 = vpop.f32.mrf.mxu3  ;;  %v8362_v52 = vld [vmem:[%s15394_s1 + $0x1058] sm:$0xf0]  ;;  %v9975_v43 = vld [vmem:[%s15394_s1 + $0x11ac] sm:$0xf] }
 0x2d5   :  { %5975 = vmatpush.bf16.msra.mxu2 %v8237_v53  ;;  %v8685_v53 = vor.u32 %v10011_v40, %v8682_v38  ;;  %v8538_v24 = vld [vmem:[%s15394_s1 + $0x11b8] sm:$0xf0]  ;;  %v10007_v17 = vld [vmem:[%s15394_s1 + $0x12ac] sm:$0xf] }
 0x2d6   :  { %5984 = vmatpush.bf16.msra.mxu3 %v8429_v12  ;;  %v5733_v12 = vadd.f32 %v5732_v45, %v5720_v59  ;;  %v10039_v54 = vld [vmem:[%s15394_s1 + $0x13ac] sm:$0xf]  ;;  %v8794_v15 = vld [vmem:[%s15394_s1 + $0x13b8] sm:$0xf0]  ;;  %v8541_v21 = vor.u32 %v9975_v43, %v8538_v24 }
 0x2d7   :  { %5950 = vmatpush.bf16.msra.mxu0 %v7965_v56  ;;  %v8346_v55 = vld [vmem:[%s15394_s1 + $0x1038] sm:$0xf0]  ;;  %v8669_v56 = vor.u32 %v10007_v17, %v8666_v51  ;;  %v8797_v57 = vor.u32 %v10039_v54, %v8794_v15  ;;  %v10035_v62 = vld [vmem:[%s15394_s1 + $0x138c] sm:$0xf] }
 0x2d8   :  { %5963 = vmatpush.bf16.msra.mxu1 %v8093_v46  ;;  %v8522_v58 = vld [vmem:[%s15394_s1 + $0x1198] sm:$0xf0]  ;;  %v10003_v46 = vld [vmem:[%s15394_s1 + $0x128c] sm:$0xf] }
 0x2d9   :  { %5976 = vmatpush.bf16.msra.mxu2 %v8221_v61  ;;  %v8650_v61 = vld [vmem:[%s15394_s1 + $0x1298] sm:$0xf0]  ;;  %v9923_v35 = vld [vmem:[%s15394_s1 + $0x100c] sm:$0xf] }
 0x2da   :  { %5985 = vmatpush.bf16.msra.mxu3 %v8413_v20  ;;  %v8778_v63 = vld [vmem:[%s15394_s1 + $0x1398] sm:$0xf0]  ;;  %v8653_v27 = vor.u32 %v10003_v46, %v8650_v61  ;;  %v9967_v29 = vld [vmem:[%s15394_s1 + $0x116c] sm:$0xf] }
 0x2db   :  { %5951 = vmatpush.bf16.msra.mxu0 %v7949_v25  ;;  %v5745_v22 = vpop.f32.mrf.mxu0  ;;  %v5721_v20 = vpop.f32.mrf.mxu2  ;;  %v8330_v11 = vld [vmem:[%s15394_s1 + $0x1018] sm:$0xf0]  ;;  %v8781_v28 = vor.u32 %v10035_v62, %v8778_v63  ;;  %v10031_v33 = vld [vmem:[%s15394_s1 + $0x136c] sm:$0xf] }
 0x2dc   :  { %5964 = vmatpush.bf16.msra.mxu1 %v8077_v44  ;;  %v5746_v26 = vadd.f32 %v5745_v22, %v5733_v12  ;;  %v5758_v3 = vpop.f32.mrf.mxu1  ;;  %v5734_v25 = vpop.f32.mrf.mxu3  ;;  %v8506_v44 = vld [vmem:[%s15394_s1 + $0x1178] sm:$0xf0]  ;;  %v8333_v2 = vor.u32 %v9923_v35, %v8330_v11  ;;  %v9963_v60 = vld [vmem:[%s15394_s1 + $0x114c] sm:$0xf] }
 0x2dd   :  { %5977 = vmatpush.bf16.msra.mxu2 %v8205_v30  ;;  %v9999_v30 = vld [vmem:[%s15394_s1 + $0x126c] sm:$0xf]  ;;  %v8762_v31 = vld [vmem:[%s15394_s1 + $0x1378] sm:$0xf0]  ;;  %v8509_v39 = vor.u32 %v9967_v29, %v8506_v44 }
 0x2de   :  { %5986 = vmatpush.bf16.msra.mxu3 %v8397_v23  ;;  %5952 = vmatmul.bf16.vlgmr.msra.gmra.mxu0 %v11085_v48  ;;  %v8365_v48 = vor.u32 %v9931_v50, %v8362_v52  ;;  %v5759_v23 = vadd.f32 %v5758_v3, %v5746_v26  ;;  %v8765_v38 = vor.u32 %v10031_v33, %v8762_v31  ;;  %v8490_v36 = vld [vmem:[%s15394_s1 + $0x1158] sm:$0xf0]  ;;  %v9995_v41 = vld [vmem:[%s15394_s1 + $0x124c] sm:$0xf] }
 0x2df   :  { %5996 = vmatpush.bf16.msrb.mxu0 %v8573_v0  ;;  %5965 = vmatmul.bf16.vlgmr.msra.gmra.mxu1 %v11083_v47  ;;  %v9971_v47 = vld [vmem:[%s15394_s1 + $0x118c] sm:$0xf]  ;;  %v8634_v0 = vld [vmem:[%s15394_s1 + $0x1278] sm:$0xf0] }
 0x2e0   :  { %6009 = vmatpush.bf16.msrb.mxu1 %v8701_v1  ;;  %5978 = vmatmul.bf16.vlgmr.msra.gmra.mxu2 %v11087_v49  ;;  %v9927_v49 = vld [vmem:[%s15394_s1 + $0x102c] sm:$0xf]  ;;  %v8525_v10 = vor.u32 %v9971_v47, %v8522_v58  ;;  %v8637_v40 = vor.u32 %v9999_v30, %v8634_v0  ;;  %v8618_v59 = vld [vmem:[%s15394_s1 + $0x1258] sm:$0xf0] }
 0x2e1   :  { %6022 = vmatpush.bf16.msrb.mxu2 %v8829_v37  ;;  %v8349_v32 = vor.u32 %v9927_v49, %v8346_v55  ;;  %v10079_v1 = vld [vmem:[%s15394_s1 + $0x14ec] sm:$0xf]  ;;  %v8954_v37 = vld [vmem:[%s15394_s1 + $0x14f8] sm:$0xf0]  ;;  %v8621_v17 = vor.u32 %v9995_v41, %v8618_v59 }
 0x2e2   :  { %5987 = vmatpush.bf16.msra.mxu3 %v8381_v42  ;;  %v8957_v42 = vor.u32 %v10079_v1, %v8954_v37  ;;  %v8746_v45 = vld [vmem:[%s15394_s1 + $0x1358] sm:$0xf0]  ;;  %v10075_v50 = vld [vmem:[%s15394_s1 + $0x14cc] sm:$0xf] }
 0x2e3   :  { %5997 = vmatpush.bf16.msrb.mxu0 %v8557_v34  ;;  %v10027_v34 = vld [vmem:[%s15394_s1 + $0x134c] sm:$0xf]  ;;  %v8938_v52 = vld [vmem:[%s15394_s1 + $0x14d8] sm:$0xf0]  ;;  %v5771_v24 = vpop.f32.mrf.mxu2 }
 0x2e4   :  { %6010 = vmatpush.bf16.msrb.mxu1 %v8685_v53  ;;  %v5747_v53 = vpop.f32.mrf.mxu0  ;;  %v5760_v43 = vpop.f32.mrf.mxu1  ;;  %v8749_v12 = vor.u32 %v10027_v34, %v8746_v45  ;;  %v9959_v51 = vld [vmem:[%s15394_s1 + $0x112c] sm:$0xf]  ;;  %v8474_v54 = vld [vmem:[%s15394_s1 + $0x1138] sm:$0xf0] }
 0x2e5   :  { %6023 = vmatpush.bf16.msrb.mxu2 %v8813_v16  ;;  %v8493_v16 = vor.u32 %v9963_v60, %v8490_v36  ;;  %v9991_v15 = vld [vmem:[%s15394_s1 + $0x122c] sm:$0xf]  ;;  %v8602_v49 = vld [vmem:[%s15394_s1 + $0x1238] sm:$0xf0]  ;;  %v8477_v58 = vor.u32 %v9959_v51, %v8474_v54 }
 0x2e6   :  { %5988 = vmatpush.bf16.msra.mxu3 %v8365_v48  ;;  %v14947_v48 = vadd.f32 %v5771_v24, %v5759_v23  ;;  %v10023_v55 = vld [vmem:[%s15394_s1 + $0x132c] sm:$0xf]  ;;  %v8922_v47 = vld [vmem:[%s15394_s1 + $0x14b8] sm:$0xf0] }
 0x2e7   :  { %5998 = vmatpush.bf16.msrb.mxu0 %v8541_v21  ;;  %v8941_v21 = vor.u32 %v10075_v50, %v8938_v52  ;;  %v9955_v46 = vld [vmem:[%s15394_s1 + $0x110c] sm:$0xf]  ;;  %v8458_v61 = vld [vmem:[%s15394_s1 + $0x1118] sm:$0xf0]  ;;  %v10200_v52 = vld [vmem:[%s15395_s2] sm:$0xf] }
 0x2e8   :  { %6011 = vmatpush.bf16.msrb.mxu1 %v8669_v56  ;;  %v8730_v56 = vld [vmem:[%s15394_s1 + $0x1338] sm:$0xf0]  ;;  %v9987_v63 = vld [vmem:[%s15394_s1 + $0x120c] sm:$0xf]  ;;  %v815_v53 = vperm.slane %v10200_v52, 3 }
 0x2e9   :  { %6024 = vmatpush.bf16.msrb.mxu2 %v8797_v57  ;;  %v10071_v57 = vld [vmem:[%s15394_s1 + $0x14ac] sm:$0xf]  ;;  %v8733_v62 = vor.u32 %v10023_v55, %v8730_v56  ;;  %v8586_v22 = vld [vmem:[%s15394_s1 + $0x1218] sm:$0xf0] }
 0x2ea   :  { %5989 = vmatpush.bf16.msra.mxu3 %v8349_v32  ;;  %v10019_v20 = vld [vmem:[%s15394_s1 + $0x130c] sm:$0xf]  ;;  %v8925_v26 = vor.u32 %v10071_v57, %v8922_v47  ;;  %v8714_v32 = vld [vmem:[%s15394_s1 + $0x1318] sm:$0xf0]  ;;  %v8589_v30 = vor.u32 %v9987_v63, %v8586_v22 }
 0x2eb   :  { %5999 = vmatpush.bf16.msrb.mxu0 %v8525_v10  ;;  %v10067_v10 = vld [vmem:[%s15394_s1 + $0x148c] sm:$0xf]  ;;  %v8906_v3 = vld [vmem:[%s15394_s1 + $0x1498] sm:$0xf0]  ;;  %v8717_v23 = vor.u32 %v10019_v20, %v8714_v32  ;;  %v5773_v0 = vpop.f32.mrf.mxu2 }
 0x2ec   :  { %6012 = vmatpush.bf16.msrb.mxu1 %v8653_v27  ;;  %v10111_v35 = vld [vmem:[%s15394_s1 + $0x15ec] sm:$0xf]  ;;  %v9082_v11 = vld [vmem:[%s15394_s1 + $0x15f8] sm:$0xf0]  ;;  %v8461_v27 = vor.u32 %v9955_v46, %v8458_v61  ;;  %v8909_v33 = vor.u32 %v10067_v10, %v8906_v3 }
 0x2ed   :  { %6025 = vmatpush.bf16.msrb.mxu2 %v8781_v28  ;;  %v10143_v25 = vld [vmem:[%s15394_s1 + $0x16ec] sm:$0xf]  ;;  %v9210_v28 = vld [vmem:[%s15394_s1 + $0x16f8] sm:$0xf0]  ;;  %v9085_v31 = vor.u32 %v10111_v35, %v9082_v11 }
 0x2ee   :  { %5990 = vmatpush.bf16.msra.mxu3 %v8333_v2  ;;  %v10175_v29 = vld [vmem:[%s15394_s1 + $0x17ec] sm:$0xf]  ;;  %v9338_v44 = vld [vmem:[%s15394_s1 + $0x17f8] sm:$0xf0]  ;;  %v9213_v2 = vor.u32 %v10143_v25, %v9210_v28 }
 0x2ef   :  { %6000 = vmatpush.bf16.msrb.mxu0 %v8509_v39  ;;  %v10063_v1 = vld [vmem:[%s15394_s1 + $0x146c] sm:$0xf]  ;;  %v8890_v37 = vld [vmem:[%s15394_s1 + $0x1478] sm:$0xf0]  ;;  %v9341_v39 = vor.u32 %v10175_v29, %v9338_v44 }
 0x2f0   :  { %6013 = vmatpush.bf16.msrb.mxu1 %v8637_v40  ;;  %v10107_v40 = vld [vmem:[%s15394_s1 + $0x15cc] sm:$0xf]  ;;  %v9194_v36 = vld [vmem:[%s15394_s1 + $0x16d8] sm:$0xf0]  ;;  %v8893_v59 = vor.u32 %v10063_v1, %v8890_v37 }
 0x2f1   :  { %6026 = vmatpush.bf16.msrb.mxu2 %v8765_v38  ;;  %5991 = vmatmul.bf16.vlgmr.msra.gmra.mxu3 %v11318_v9  ;;  %v8605_v9 = vor.u32 %v9991_v15, %v8602_v49  ;;  %v9066_v38 = vld [vmem:[%s15394_s1 + $0x15d8] sm:$0xf0]  ;;  %v10139_v60 = vld [vmem:[%s15394_s1 + $0x16cc] sm:$0xf] }
 0x2f2   :  { %6035 = vmatpush.bf16.msrb.mxu3 %v8957_v42  ;;  %v10171_v41 = vld [vmem:[%s15394_s1 + $0x17cc] sm:$0xf]  ;;  %v9322_v42 = vld [vmem:[%s15394_s1 + $0x17d8] sm:$0xf0]  ;;  %v9069_v34 = vor.u32 %v10107_v40, %v9066_v38  ;;  %v9197_v43 = vor.u32 %v10139_v60, %v9194_v36 }
 0x2f3   :  { %6001 = vmatpush.bf16.msrb.mxu0 %v8493_v16  ;;  %v10059_v45 = vld [vmem:[%s15394_s1 + $0x144c] sm:$0xf]  ;;  %v8874_v50 = vld [vmem:[%s15394_s1 + $0x1458] sm:$0xf0]  ;;  %v9325_v24 = vor.u32 %v10171_v41, %v9322_v42 }
 0x2f4   :  { %6014 = vmatpush.bf16.msrb.mxu1 %v8621_v17  ;;  %v5784_v16 = vpop.f32.mrf.mxu3  ;;  %v10103_v17 = vld [vmem:[%s15394_s1 + $0x15ac] sm:$0xf]  ;;  %v9178_v54 = vld [vmem:[%s15394_s1 + $0x16b8] sm:$0xf0]  ;;  %v8877_v49 = vor.u32 %v10059_v45, %v8874_v50 }
 0x2f5   :  { %6027 = vmatpush.bf16.msrb.mxu2 %v8749_v12  ;;  %v9050_v12 = vld [vmem:[%s15394_s1 + $0x15b8] sm:$0xf0]  ;;  %v10135_v51 = vld [vmem:[%s15394_s1 + $0x16ac] sm:$0xf]  ;;  %v5785_v56 = vadd.f32 %v5784_v16, %v815_v53 }
 0x2f6   :  { %6036 = vmatpush.bf16.msrb.mxu3 %v8941_v21  ;;  %v10167_v15 = vld [vmem:[%s15394_s1 + $0x17ac] sm:$0xf]  ;;  %v9306_v21 = vld [vmem:[%s15394_s1 + $0x17b8] sm:$0xf0]  ;;  %v9181_v57 = vor.u32 %v10135_v51, %v9178_v54 }
 0x2f7   :  { %6002 = vmatpush.bf16.msrb.mxu0 %v8477_v58  ;;  %v8858_v55 = vld [vmem:[%s15394_s1 + $0x1438] sm:$0xf0]  ;;  %v9309_v47 = vor.u32 %v10167_v15, %v9306_v21  ;;  %v10131_v46 = vld [vmem:[%s15394_s1 + $0x168c] sm:$0xf] }
 0x2f8   :  { %6015 = vmatpush.bf16.msrb.mxu1 %v8605_v9  ;;  %v9034_v58 = vld [vmem:[%s15394_s1 + $0x1598] sm:$0xf0]  ;;  %v10163_v9 = vld [vmem:[%s15394_s1 + $0x178c] sm:$0xf] }
 0x2f9   :  { %6028 = vmatpush.bf16.msrb.mxu2 %v8733_v62  ;;  %v9162_v61 = vld [vmem:[%s15394_s1 + $0x1698] sm:$0xf0]  ;;  %v10127_v29 = vld [vmem:[%s15394_s1 + $0x166c] sm:$0xf] }
 0x2fa   :  { %6037 = vmatpush.bf16.msrb.mxu3 %v8925_v26  ;;  %v9290_v62 = vld [vmem:[%s15394_s1 + $0x1798] sm:$0xf0]  ;;  %v10051_v26 = vld [vmem:[%s15394_s1 + $0x140c] sm:$0xf]  ;;  %v9165_v11 = vor.u32 %v10131_v46, %v9162_v61 }
 0x2fb   :  { %6003 = vmatpush.bf16.msrb.mxu0 %v8461_v27  ;;  %v5797_v63 = vpop.f32.mrf.mxu0  ;;  %v8842_v32 = vld [vmem:[%s15394_s1 + $0x1418] sm:$0xf0]  ;;  %v9293_v25 = vor.u32 %v10163_v9, %v9290_v62  ;;  %v10095_v27 = vld [vmem:[%s15394_s1 + $0x156c] sm:$0xf] }
 0x2fc   :  { %6016 = vmatpush.bf16.msrb.mxu1 %v8589_v30  ;;  %v5798_v10 = vadd.f32 %v5797_v63, %v5785_v56  ;;  %v5810_v3 = vpop.f32.mrf.mxu1  ;;  %v5786_v35 = vpop.f32.mrf.mxu3  ;;  %v9018_v28 = vld [vmem:[%s15394_s1 + $0x1578] sm:$0xf0]  ;;  %v10159_v30 = vld [vmem:[%s15394_s1 + $0x176c] sm:$0xf]  ;;  %v8845_v1 = vor.u32 %v10051_v26, %v8842_v32 }
 0x2fd   :  { %6029 = vmatpush.bf16.msrb.mxu2 %v8717_v23  ;;  %v9146_v44 = vld [vmem:[%s15394_s1 + $0x1678] sm:$0xf0]  ;;  %v9021_v37 = vor.u32 %v10095_v27, %v9018_v28  ;;  %v10091_v40 = vld [vmem:[%s15394_s1 + $0x154c] sm:$0xf]  ;;  %v6118_v27 = vld [vmem:[%s15396_s3 + $0x70] sm:$0xff] }
 0x2fe   :  { %6038 = vmatpush.bf16.msrb.mxu3 %v8909_v33  ;;  %6004 = vmatmul.bf16.vlgmr.msrb.gmra.mxu0 %v11328_v14  ;;  %v9053_v14 = vor.u32 %v10103_v17, %v9050_v12  ;;  %v9274_v23 = vld [vmem:[%s15394_s1 + $0x1778] sm:$0xf0]  ;;  %v5811_v0 = vadd.f32 %v5810_v3, %v5798_v10  ;;  %v10191_v33 = vld [vmem:[%s15394_s1 + $0x186c] sm:$0xf] }
 0x2ff   :  { %6048 = vmatpush.bf16.msra.mxu0 %v9085_v31  ;;  %6017 = vmatmul.bf16.vlgmr.msrb.gmra.mxu1 %v11326_v13  ;;  %v10099_v13 = vld [vmem:[%s15394_s1 + $0x158c] sm:$0xf]  ;;  %v9402_v31 = vld [vmem:[%s15394_s1 + $0x1878] sm:$0xf0] }
 0x300   :  { %6061 = vmatpush.bf16.msra.mxu1 %v9213_v2  ;;  %6030 = vmatmul.bf16.vlgmr.msrb.gmra.mxu2 %v11330_v18  ;;  %v10055_v18 = vld [vmem:[%s15394_s1 + $0x142c] sm:$0xf]  ;;  %v9037_v20 = vor.u32 %v10099_v13, %v9034_v58  ;;  %v9149_v2 = vor.u32 %v10127_v29, %v9146_v44  ;;  %v9002_v38 = vld [vmem:[%s15394_s1 + $0x1558] sm:$0xf0]  ;;  %v9405_v41 = vor.u32 %v10191_v33, %v9402_v31  ;;  %v6134_v29 = vld [vmem:[%s15396_s3 + $0xf0] sm:$0xff] }
 0x301   :  { %6074 = vmatpush.bf16.msra.mxu2 %v9341_v39  ;;  %v8861_v22 = vor.u32 %v10055_v18, %v8858_v55  ;;  %v9277_v39 = vor.u32 %v10159_v30, %v9274_v23  ;;  %v10123_v60 = vld [vmem:[%s15394_s1 + $0x164c] sm:$0xf]  ;;  %v9130_v42 = vld [vmem:[%s15394_s1 + $0x1658] sm:$0xf0]  ;;  %v9005_v16 = vor.u32 %v10091_v40, %v9002_v38  ;;  %v6150_v44 = vld [vmem:[%s15396_s3 + $0x170] sm:$0xff] }
 0x302   :  { %6039 = vmatpush.bf16.msrb.mxu3 %v8893_v59  ;;  %v10155_v59 = vld [vmem:[%s15394_s1 + $0x174c] sm:$0xf]  ;;  %v9386_v52 = vld [vmem:[%s15394_s1 + $0x1858] sm:$0xf0]  ;;  %v6148_v31 = vld [vmem:[%s15396_s3 + $0x160] sm:$0xff] }
 0x303   :  { %6049 = vmatpush.bf16.msra.mxu0 %v9069_v34  ;;  %v5823_v36 = vpop.f32.mrf.mxu2  ;;  %v9258_v34 = vld [vmem:[%s15394_s1 + $0x1758] sm:$0xf0]  ;;  %v10187_v50 = vld [vmem:[%s15394_s1 + $0x184c] sm:$0xf]  ;;  %v5799_v53 = vpop.f32.mrf.mxu0  ;;  %v6114_v40 = vld [vmem:[%s15396_s3 + $0x50] sm:$0xff] }
 0x304   :  { %6062 = vmatpush.bf16.msra.mxu1 %v9197_v43  ;;  %v5824_v45 = vadd.f32 %v5823_v36, %v5811_v0  ;;  %v5812_v43 = vpop.f32.mrf.mxu1  ;;  %v9261_v17 = vor.u32 %v10155_v59, %v9258_v34  ;;  %v10087_v12 = vld [vmem:[%s15394_s1 + $0x152c] sm:$0xf]  ;;  %v8986_v51 = vld [vmem:[%s15394_s1 + $0x1538] sm:$0xf0]  ;;  %v9389_v15 = vor.u32 %v10187_v50, %v9386_v52  ;;  %v6112_v52 = vld [vmem:[%s15396_s3 + $0x40] sm:$0xff] }
 0x305   :  { %6075 = vmatpush.bf16.msra.mxu2 %v9325_v24  ;;  %v9133_v24 = vor.u32 %v10123_v60, %v9130_v42  ;;  %v10119_v54 = vld [vmem:[%s15394_s1 + $0x162c] sm:$0xf]  ;;  %v9114_v21 = vld [vmem:[%s15394_s1 + $0x1638] sm:$0xf0]  ;;  %v8989_v56 = vor.u32 %v10087_v12, %v8986_v51  ;;  %v6146_v42 = vld [vmem:[%s15396_s3 + $0x150] sm:$0xff] }
 0x306   :  { %6040 = vmatpush.bf16.msrb.mxu3 %v8877_v49  ;;  %v10151_v49 = vld [vmem:[%s15394_s1 + $0x172c] sm:$0xf]  ;;  %v9370_v55 = vld [vmem:[%s15394_s1 + $0x1838] sm:$0xf0]  ;;  %v6128_v53 = vld [vmem:[%s15396_s3 + $0xc0] sm:$0xff] }
 0x307   :  { %6050 = vmatpush.bf16.msra.mxu0 %v9053_v14  ;;  %v9242_v14 = vld [vmem:[%s15394_s1 + $0x1738] sm:$0xf0]  ;;  %v10183_v18 = vld [vmem:[%s15394_s1 + $0x182c] sm:$0xf] }
 0x308   :  { %6063 = vmatpush.bf16.msra.mxu1 %v9181_v57  ;;  %v9117_v57 = vor.u32 %v10119_v54, %v9114_v21  ;;  %v10083_v13 = vld [vmem:[%s15394_s1 + $0x150c] sm:$0xf]  ;;  %v9373_v61 = vor.u32 %v10183_v18, %v9370_v55  ;;  %v9098_v9 = vld [vmem:[%s15394_s1 + $0x1618] sm:$0xf0] }
 0x309   :  { %6076 = vmatpush.bf16.msra.mxu2 %v9309_v47  ;;  %v9245_v47 = vor.u32 %v10151_v49, %v9242_v14  ;;  %v10115_v58 = vld [vmem:[%s15394_s1 + $0x160c] sm:$0xf]  ;;  %v9226_v63 = vld [vmem:[%s15394_s1 + $0x1718] sm:$0xf0]  ;;  %v6126_v49 = vld [vmem:[%s15396_s3 + $0xb0] sm:$0xff] }
 0x30a   :  { %6041 = vmatpush.bf16.msrb.mxu3 %v8861_v22  ;;  %v10147_v62 = vld [vmem:[%s15394_s1 + $0x170c] sm:$0xf]  ;;  %v9354_v26 = vld [vmem:[%s15394_s1 + $0x1818] sm:$0xf0]  ;;  %v9101_v32 = vor.u32 %v10115_v58, %v9098_v9  ;;  %v6142_v14 = vld [vmem:[%s15396_s3 + $0x130] sm:$0xff] }
 0x30b   :  { %6051 = vmatpush.bf16.msra.mxu0 %v9037_v20  ;;  %v5825_v46 = vpop.f32.mrf.mxu2  ;;  %v10179_v20 = vld [vmem:[%s15394_s1 + $0x180c] sm:$0xf]  ;;  %v9229_v10 = vor.u32 %v10147_v62, %v9226_v63  ;;  %v6119_v3 = vld [vmem:[%s15396_s3 + $0x78] sm:$0xff]  ;;  %v6106_v9 = vld [vmem:[%s15396_s3 + $0x10] sm:$0xff] }
 0x30c   :  { %6064 = vmatpush.bf16.msra.mxu1 %v9165_v11  ;;  %v6135_v35 = vld [vmem:[%s15396_s3 + $0xf8] sm:$0xff]  ;;  %v9357_v11 = vor.u32 %v10179_v20, %v9354_v26  ;;  %v6117_v23 = vld [vmem:[%s15396_s3 + $0x68] sm:$0xff]  ;;  %v6122_v62 = vld [vmem:[%s15396_s3 + $0x90] sm:$0xff] }
 0x30d   :  { %6077 = vmatpush.bf16.msra.mxu2 %v9293_v25  ;;  %v6151_v25 = vld [vmem:[%s15396_s3 + $0x178] sm:$0xff]  ;;  %v6133_v0 = vld [vmem:[%s15396_s3 + $0xe8] sm:$0xff]  ;;  %v6138_v63 = vld [vmem:[%s15396_s3 + $0x110] sm:$0xff] }
 0x30e   :  { %6042 = vmatpush.bf16.msrb.mxu3 %v8845_v1  ;;  %v6149_v33 = vld [vmem:[%s15396_s3 + $0x168] sm:$0xff]  ;;  %v6115_v1 = vld [vmem:[%s15396_s3 + $0x58] sm:$0xff] }
 0x30f   :  { %6052 = vmatpush.bf16.msra.mxu0 %v9021_v37  ;;  %v6131_v37 = vld [vmem:[%s15396_s3 + $0xd8] sm:$0xff]  ;;  %v6113_v59 = vld [vmem:[%s15396_s3 + $0x48] sm:$0xff] }
 0x310   :  { %6065 = vmatpush.bf16.msra.mxu1 %v9149_v2  ;;  %v6147_v2 = vld [vmem:[%s15396_s3 + $0x158] sm:$0xff]  ;;  %v6145_v50 = vld [vmem:[%s15396_s3 + $0x148] sm:$0xff] }
 0x311   :  { %6078 = vmatpush.bf16.msra.mxu2 %v9277_v39  ;;  %6043 = vmatmul.bf16.vlgmr.msrb.gmra.mxu3 %v11411_v4  ;;  %v8970_v4 = vld [vmem:[%s15394_s1 + $0x1518] sm:$0xf0]  ;;  %v6109_v18 = vld [vmem:[%s15396_s3 + $0x28] sm:$0xff] }
 0x312   :  { %6091 = vmatpush.bf16.msra.mxu3 %v9405_v41  ;;  %v8973_v22 = vor.u32 %v10083_v13, %v8970_v4  ;;  %v6130_v41 = vld [vmem:[%s15396_s3 + $0xd0] sm:$0xff]  ;;  %v6127_v12 = vld [vmem:[%s15396_s3 + $0xb8] sm:$0xff]  ;;  %v6125_v55 = vld [vmem:[%s15396_s3 + $0xa8] sm:$0xff] }
 0x313   :  { %6053 = vmatpush.bf16.msra.mxu0 %v9005_v16  ;;  %v6144_v16 = vld [vmem:[%s15396_s3 + $0x140] sm:$0xff]  ;;  %v6143_v51 = vld [vmem:[%s15396_s3 + $0x138] sm:$0xff]  ;;  %v6121_v20 = vld [vmem:[%s15396_s3 + $0x88] sm:$0xff] }
 0x314   :  { %6066 = vmatpush.bf16.msra.mxu1 %v9133_v24  ;;  %v5836_v28 = vpop.f32.mrf.mxu3  ;;  %v6111_v24 = vld [vmem:[%s15396_s3 + $0x38] sm:$0xff]  ;;  %v6140_v13 = vld [vmem:[%s15396_s3 + $0x120] sm:$0xff]  ;;  %v6137_v26 = vld [vmem:[%s15396_s3 + $0x108] sm:$0xff] }
 0x315   :  { %6079 = vmatpush.bf16.msra.mxu2 %v9261_v17  ;;  %v5837_v30 = vadd.f32 %v5836_v28, %v5824_v45  ;;  %v6129_v45 = vld [vmem:[%s15396_s3 + $0xc8] sm:$0xff]  ;;  %v6107_v58 = vld [vmem:[%s15396_s3 + $0x18] sm:$0xff]  ;;  %v6102_v28 = vmax.f32 %v14947_v48, 0.0 }
 0x316   :  { %6092 = vmatpush.bf16.msra.mxu3 %v9389_v15  ;;  %v6110_v15 = vld [vmem:[%s15396_s3 + $0x30] sm:$0xff]  ;;  %v6123_v46 = vld [vmem:[%s15396_s3 + $0x98] sm:$0xff] }
 0x317   :  { %6054 = vmatpush.bf16.msra.mxu0 %v8989_v56  ;;  %v6141_v56 = vld [vmem:[%s15396_s3 + $0x128] sm:$0xff]  ;;  %v6167_v48 = vld [vmem:[%s15396_s3 + $0x1f8] sm:$0xff] }
 0x318   :  { %6067 = vmatpush.bf16.msra.mxu1 %v9117_v57  ;;  %v6108_v57 = vld [vmem:[%s15396_s3 + $0x20] sm:$0xff] }
 0x319   :  { %6080 = vmatpush.bf16.msra.mxu2 %v9245_v47  ;;  %v6124_v47 = vld [vmem:[%s15396_s3 + $0xa0] sm:$0xff] }
 0x31a   :  { %6093 = vmatpush.bf16.msra.mxu3 %v9373_v61  ;;  %v6139_v61 = vld [vmem:[%s15396_s3 + $0x118] sm:$0xff] }
 0x31b   :  { %6055 = vmatpush.bf16.msra.mxu0 %v8973_v22  ;;  %v5849_v39 = vpop.f32.mrf.mxu0  ;;  %v6105_v22 = vld [vmem:[%s15396_s3 + $0x8] sm:$0xff] }
 0x31c   :  { %6068 = vmatpush.bf16.msra.mxu1 %v9101_v32  ;;  %v5850_v38 = vadd.f32 %v5849_v39, %v5837_v30  ;;  %v5862_v60 = vpop.f32.mrf.mxu1  ;;  %v5838_v36 = vpop.f32.mrf.mxu3  ;;  %v6104_v32 = vld [vmem:[%s15396_s3] sm:$0xff] }
 0x31d   :  { %6081 = vmatpush.bf16.msra.mxu2 %v9229_v10  ;;  %v6120_v10 = vld [vmem:[%s15396_s3 + $0x80] sm:$0xff] }
 0x31e   :  { %6094 = vmatpush.bf16.msra.mxu3 %v9357_v11  ;;  %6056 = vmatmul.bf16.vlgmr.msra.gmra.mxu0 %v11415_v6  ;;  %v10201_v6 = vld [vmem:[#allocation1] sm:$0xff]  ;;  %v5863_v34 = vadd.f32 %v5862_v60, %v5850_v38  ;;  %v6100_v11 = vmax.f32 %v12508_v19, 0.0 }
 0x31f   :  { %6172 = vmatpush.msrb.mxu0 %v6119_v3  ;;  %6069 = vmatmul.bf16.vlgmr.msra.gmra.mxu1 %v11413_v5  ;;  %v6116_v5 = vld [vmem:[%s15396_s3 + $0x60] sm:$0xff] }
 0x320   :  { %6192 = vmatpush.msrb.mxu1 %v6135_v35  ;;  %6082 = vmatmul.bf16.vlgmr.msra.gmra.mxu2 %v11417_v7  ;;  %v6132_v7 = vld [vmem:[%s15396_s3 + $0xe0] sm:$0xff] }
 0x321   :  { %6212 = vmatpush.msrb.mxu2 %v6151_v25  ;;  %6173 = vmatpush.msrb.mxu0 %v6118_v27  ;;  %v6136_v3 = vld [vmem:[%s15396_s3 + $0x100] sm:$0xff]  ;;  %v6101_v25 = vmax.f32 %v13711_v8, 0.0 }
 0x322   :  { %6193 = vmatpush.msrb.mxu1 %v6134_v29  ;;  %9409 = vmatmul.msk.bf16.vlgmr.msra.gmra.mxu3 %vm4797_vm0, %v10201_v6  ;;  %v6164_v36 = vld [vmem:[%s15396_s3 + $0x1e0] sm:$0xff] }
 0x323   :  { %6213 = vmatpush.msrb.mxu2 %v6150_v44  ;;  %6174 = vmatpush.msrb.mxu0 %v6117_v23  ;;  %v5875_v43 = vpop.f32.mrf.mxu2  ;;  %v5851_v54 = vpop.f32.mrf.mxu0 }
 0x324   :  { %6194 = vmatpush.msrb.mxu1 %v6133_v0  ;;  %v5876_v17 = vadd.f32 %v5875_v43, %v5863_v34  ;;  %v5864_v21 = vpop.f32.mrf.mxu1  ;;  %6232 = vmatpush.msrb.mxu3 %v6167_v48  ;;  %v6161_v34 = vld [vmem:[%s15396_s3 + $0x1c8] sm:$0xff]  ;;  %v6155_v54 = vld [vmem:[%s15396_s3 + $0x198] sm:$0xff] }
 0x325   :  { %6214 = vmatpush.msrb.mxu2 %v6149_v33  ;;  %6175 = vmatpush.msrb.mxu0 %v6116_v5 }
 0x326   :  { %6195 = vmatpush.msrb.mxu1 %v6132_v7 }
 0x327   :  { %6215 = vmatpush.msrb.mxu2 %v6148_v31  ;;  %6176 = vmatpush.msrb.mxu0 %v6115_v1 }
 0x328   :  { %6196 = vmatpush.msrb.mxu1 %v6131_v37 }
 0x329   :  { %6216 = vmatpush.msrb.mxu2 %v6147_v2  ;;  %6177 = vmatpush.msrb.mxu0 %v6114_v40  ;;  %v6166_v2 = vld [vmem:[%s15396_s3 + $0x1f0] sm:$0xff]  ;;  %v6165_v40 = vld [vmem:[%s15396_s3 + $0x1e8] sm:$0xff] }
 0x32a   :  { %6197 = vmatpush.msrb.mxu1 %v6130_v41  ;;  %6233 = vmatpush.msrb.mxu3 %v6166_v2  ;;  %v6163_v41 = vld [vmem:[%s15396_s3 + $0x1d8] sm:$0xff] }
 0x32b   :  { %6217 = vmatpush.msrb.mxu2 %v6146_v42  ;;  %6178 = vmatpush.msrb.mxu0 %v6113_v59  ;;  %v5877_v4 = vpop.f32.mrf.mxu2  ;;  %v6162_v59 = vld [vmem:[%s15396_s3 + $0x1d0] sm:$0xff] }
 0x32c   :  { %6198 = vmatpush.msrb.mxu1 %v6129_v45  ;;  %6234 = vmatpush.msrb.mxu3 %v6165_v40 }
 0x32d   :  { %6218 = vmatpush.msrb.mxu2 %v6145_v50  ;;  %6179 = vmatpush.msrb.mxu0 %v6112_v52  ;;  %v6160_v50 = vld [vmem:[%s15396_s3 + $0x1c0] sm:$0xff]  ;;  %v6159_v52 = vld [vmem:[%s15396_s3 + $0x1b8] sm:$0xff] }
 0x32e   :  { %6199 = vmatpush.msrb.mxu1 %v6128_v53  ;;  %6235 = vmatpush.msrb.mxu3 %v6164_v36 }
 0x32f   :  { %6219 = vmatpush.msrb.mxu2 %v6144_v16  ;;  %6180 = vmatpush.msrb.mxu0 %v6111_v24  ;;  %v6158_v24 = vld [vmem:[%s15396_s3 + $0x1b0] sm:$0xff] }
 0x330   :  { %6200 = vmatpush.msrb.mxu1 %v6127_v12  ;;  %6236 = vmatpush.msrb.mxu3 %v6163_v41  ;;  %v6156_v12 = vld [vmem:[%s15396_s3 + $0x1a0] sm:$0xff] }
 0x331   :  { %6220 = vmatpush.msrb.mxu2 %v6143_v51  ;;  %6181 = vmatpush.msrb.mxu0 %v6110_v15 }
 0x332   :  { %6201 = vmatpush.msrb.mxu1 %v6126_v49  ;;  %6237 = vmatpush.msrb.mxu3 %v6162_v59  ;;  %v6154_v49 = vld [vmem:[%s15396_s3 + $0x190] sm:$0xff] }
 0x333   :  { %6221 = vmatpush.msrb.mxu2 %v6142_v14  ;;  %6182 = vmatpush.msrb.mxu0 %v6109_v18  ;;  %v6153_v18 = vld [vmem:[%s15396_s3 + $0x188] sm:$0xff] }
 0x334   :  { %6202 = vmatpush.msrb.mxu1 %v6125_v55  ;;  %v5888_v35 = vpop.f32.mrf.mxu3  ;;  %6238 = vmatpush.msrb.mxu3 %v6161_v34  ;;  %v6152_v55 = vld [vmem:[%s15396_s3 + $0x180] sm:$0xff] }
 0x335   :  { %6222 = vmatpush.msrb.mxu2 %v6141_v56  ;;  %6183 = vmatpush.msrb.mxu0 %v6108_v57  ;;  %v5889_v27 = vadd.f32 %v5888_v35, %v5876_v17  ;;  %v6157_v17 = vld [vmem:[%s15396_s3 + $0x1a8] sm:$0xff] }
 0x336   :  { %6203 = vmatpush.msrb.mxu1 %v6124_v47  ;;  %6239 = vmatpush.msrb.mxu3 %v6160_v50 }
 0x337   :  { %6223 = vmatpush.msrb.mxu2 %v6140_v13  ;;  %6184 = vmatpush.msrb.mxu0 %v6107_v58 }
 0x338   :  { %6204 = vmatpush.msrb.mxu1 %v6123_v46  ;;  %6240 = vmatpush.msrb.mxu3 %v6159_v52 }
 0x339   :  { %6224 = vmatpush.msrb.mxu2 %v6139_v61  ;;  %6185 = vmatpush.msrb.mxu0 %v6106_v9 }
 0x33a   :  { %6205 = vmatpush.msrb.mxu1 %v6122_v62  ;;  %6241 = vmatpush.msrb.mxu3 %v6158_v24 }
 0x33b   :  { %6225 = vmatpush.msrb.mxu2 %v6138_v63  ;;  %6186 = vmatpush.msrb.mxu0 %v6105_v22  ;;  %v5901_v29 = vpop.f32.mrf.mxu0 }
 0x33c   :  { %6206 = vmatpush.msrb.mxu1 %v6121_v20  ;;  %v5902_v44 = vadd.f32 %v5901_v29, %v5889_v27  ;;  %v5914_v30 = vpop.f32.mrf.mxu1  ;;  %v5890_v23 = vpop.f32.mrf.mxu3  ;;  %6242 = vmatpush.msrb.mxu3 %v6157_v17 }
 0x33d   :  { %6226 = vmatpush.msrb.mxu2 %v6137_v26  ;;  %6187 = vmatpush.msrb.mxu0 %v6104_v32 }
 0x33e   :  { %6207 = vmatpush.msrb.mxu1 %v6120_v10  ;;  %6188 = vmatmul.f32.vlgmr.msrb.gmra.mxu0 %v6100_v11  ;;  %v5915_v0 = vadd.f32 %v5914_v30, %v5902_v44  ;;  %v10195_v30 = vld [vmem:[%s15397_s4] ss:$0 sm:$0xff] }
 0x33f   :  { %6227 = vmatpush.msrb.mxu2 %v6136_v3  ;;  %6208 = vmatmul.f32.vlgmr.msrb.gmra.mxu1 %v6101_v25 }
 0x340   :  { %6228 = vmatmul.f32.vlgmr.msrb.gmra.mxu2 %v6102_v28  ;;  %6243 = vmatpush.msrb.mxu3 %v6156_v12 }
 0x342   :  { %6244 = vmatpush.msrb.mxu3 %v6155_v54 }
 0x343   :  { %v5927_v33 = vpop.f32.mrf.mxu2  ;;  %v5903_v6 = vpop.f32.mrf.mxu0 }
 0x344   :  { %v5928_v5 = vadd.f32 %v5927_v33, %v5915_v0  ;;  %v5916_v19 = vpop.f32.mrf.mxu1  ;;  %6245 = vmatpush.msrb.mxu3 %v6154_v49 }
 0x346   :  { %6246 = vmatpush.msrb.mxu3 %v6153_v18 }
 0x348   :  { %6247 = vmatpush.msrb.mxu3 %v6152_v55 }
 0x34b   :  { %v5929_v7 = vpop.f32.mrf.mxu2 }
 0x354   :  { %v5940_v8 = vpop.f32.mrf.mxu3 }
 0x355   :  { %v5941_v14 = vadd.f32 %v5940_v8, %v5928_v5 }
 0x35b   :  { %v5953_v31 = vpop.f32.mrf.mxu0 }
 0x35c   :  { %v5966_v1 = vpop.f32.mrf.mxu1  ;;  %v5942_v37 = vpop.f32.mrf.mxu3  ;;  %v5954_v56 = vadd.f32 %v5953_v31, %v5941_v14 }
 0x35e   :  { %v5967_v47 = vadd.f32 %v5966_v1, %v5954_v56 }
 0x363   :  { %v5979_v39 = vpop.f32.mrf.mxu2  ;;  %v5955_v38 = vpop.f32.mrf.mxu0 }
 0x364   :  { %v5968_v60 = vpop.f32.mrf.mxu1  ;;  %v5980_v13 = vadd.f32 %v5979_v39, %v5967_v47 }
 0x36b   :  { %v5981_v42 = vpop.f32.mrf.mxu2 }
 0x374   :  { %v5992_v45 = vpop.f32.mrf.mxu3 }
 0x375   :  { %v5993_v4 = vadd.f32 %v5992_v45, %v5980_v13 }
 0x37b   :  { %v6005_v53 = vpop.f32.mrf.mxu0 }
 0x37c   :  { %v6018_v16 = vpop.f32.mrf.mxu1  ;;  %v5994_v43 = vpop.f32.mrf.mxu3  ;;  %v6006_v58 = vadd.f32 %v6005_v53, %v5993_v4 }
 0x37e   :  { %v6019_v61 = vadd.f32 %v6018_v16, %v6006_v58 }
 0x383   :  { %v6031_v51 = vpop.f32.mrf.mxu2  ;;  %v6007_v15 = vpop.f32.mrf.mxu0 }
 0x384   :  { %v6020_v21 = vpop.f32.mrf.mxu1  ;;  %v6032_v9 = vadd.f32 %v6031_v51, %v6019_v61 }
 0x38b   :  { %v6033_v57 = vpop.f32.mrf.mxu2 }
 0x394   :  { %v6044_v46 = vpop.f32.mrf.mxu3 }
 0x395   :  { %v6045_v62 = vadd.f32 %v6044_v46, %v6032_v9 }
 0x39b   :  { %v6057_v63 = vpop.f32.mrf.mxu0 }
 0x39c   :  { %v6070_v22 = vpop.f32.mrf.mxu1  ;;  %v6046_v20 = vpop.f32.mrf.mxu3  ;;  %v6058_v26 = vadd.f32 %v6057_v63, %v6045_v62 }
 0x39e   :  { %v6071_v32 = vadd.f32 %v6070_v22, %v6058_v26 }
 0x3a3   :  { %v6083_v10 = vpop.f32.mrf.mxu2  ;;  %v6059_v35 = vpop.f32.mrf.mxu0 }
 0x3a4   :  { %v6084_v3 = vadd.f32 %v6083_v10, %v6071_v32  ;;  %v6072_v11 = vpop.f32.mrf.mxu1 }
 0x3a5   :  { %v6096_v25 = vpop.f32.mrf.mxu3 }
 0x3a6   :  { %v6097_v27 = vadd.f32 %v6096_v25, %v6084_v3 }
 0x3a8   :  { %v6103_v28 = vmax.f32 %v6097_v27, 0.0 }
 0x3aa   :  { %6248 = vmatmul.f32.vlgmr.msrb.gmra.mxu3 %v6103_v28 }
 0x3ab   :  { %v6085_v29 = vpop.f32.mrf.mxu2 }
 0x3ad   :  { %v6098_v44 = vpop.f32.mrf.mxu3 }
 0x3bb   :  { %v6189_v23 = vpop.f32.mrf.mxu0 }
 0x3bc   :  { %v6190_v0 = vadd.f32 %v10195_v30, %v6189_v23  ;;  %v6209_v33 = vpop.f32.mrf.mxu1 }
 0x3be   :  { %v6210_v6 = vadd.f32 %v6209_v33, %v6190_v0 }
 0x3c3   :  { %v6229_v5 = vpop.f32.mrf.mxu2 }
 0x3c4   :  { %v6230_v19 = vadd.f32 %v6229_v5, %v6210_v6 }
 0x42d   :  { %v6249_v7 = vpop.f32.mrf.mxu3 }
 0x42e   :  { %v6250_v8 = vadd.f32 %v6249_v7, %v6230_v19 }
 0x430   :  { %6253 = vst.msk [vmem:[#allocation2] sm:$0x3] %vm6252_vm1, %v6250_v8 }
 0x431   :  { %6264 = dma.vmem_to_hbm [thread:$0]  %s6260_s14, 32, %s6262_s16, [#allocation3]  }
 0x432   :  { %10226 = dma.done.wait [#allocation3], 32  }
 0x433   :  { %10227 = vsyncadd [#allocation3], 4294967264 }
 0x434   :  { %6269 = vsyncpa [#allocation3], 1 }

</bundles_post_ra>
